<compile_context>
chip_gen: v7x
topology: tpu7x:2x2x1
jax: 0.10.0
libtpu: 0.0.40
codegen_flags: <defaults>
</compile_context>

<pallas_src>
import jax
import jax.numpy as jnp
from jax import lax
from jax.experimental import pallas as pl
from jax.experimental.pallas import tpu as pltpu
import numpy as np

CLIP_DIM = 512        # target_dim_selections['r2plus1d_w_knowledge-34']
REDUCE_RATIO = 16     # reduce_ratio_selections['r2plus1d_w_knowledge-34']
BN_EPS = 1e-5
LOGIT_SCALE = 100.0   # CLIP logit_scale.exp()
LANE = 128
BLOCK_B = 512         # batch tile (rows) per grid step


def _round_up(x, m):
    return (x + m - 1) // m * m


# ---------------------------------------------------------------------------
# Kernel: row normalization + 4 matmuls + ReLUs (everything else folded offline).
# Weights/biases are grid-invariant (constant index_map) -> VMEM-resident.
# ---------------------------------------------------------------------------
def r2plus1d_w_knowledge_kernel(
    clip_ref, base_ref,
    w1_ref, b1_ref,
    w2_ref, b2_ref,
    w3_ref, b3_ref,
    wfc_ref, bfc_ref,
    out_ref,
):
    # ---- scaled_cosine_sim: only the input-dependent row normalization remains
    # (proposal normalization, logit scale, Conv1d_1 and BN1 folded into w1/b1).
    # NOTE: like the PyTorch reference, no epsilon — an all-zero clip row yields NaN.
    aa = clip_ref[...]
    aa = aa * lax.rsqrt(jnp.sum(aa * aa, axis=-1, keepdims=True))

    # ---- knowledge_early_fuser (BN-folded, C1 padded to 128 lanes) ----
    h = jnp.dot(aa.astype(jnp.bfloat16), w1_ref[...],
                preferred_element_type=jnp.float32) + b1_ref[...]
    h = jnp.maximum(h, 0.0)
    knowledge = jnp.dot(h.astype(jnp.bfloat16), w2_ref[...],
                        preferred_element_type=jnp.float32) + b2_ref[...]

    # ---- origfea_fuser (BN-folded): ReLU(base @ W3f + b3f), base already bf16 ----
    o = jnp.dot(base_ref[...], w3_ref[...],
                preferred_element_type=jnp.float32) + b3_ref[...]
    original_fea = jnp.maximum(o, 0.0)

    # ---- fuse_relu + new_fc (output written as a full 128-lane slab) ----
    fused = jnp.maximum(original_fea + knowledge, 0.0)
    out_ref[...] = jnp.dot(fused.astype(jnp.bfloat16), wfc_ref[...],
                           preferred_element_type=jnp.float32) + bfc_ref[...]


# ---------------------------------------------------------------------------
# Offline constant folding (done once; "weights" of the fused kernel).
# ---------------------------------------------------------------------------
def fold_params(params):
    D = CLIP_DIM
    P = params["proposals_fea"].shape[0]
    C1 = P // REDUCE_RATIO
    NC = params["fc_w"].shape[0]
    C1P = max(LANE, _round_up(C1, LANE))
    NCP = max(LANE, _round_up(NC, LANE))

    def bn_scale_shift(bn):
        g, be, m, v = bn
        s = g / jnp.sqrt(v + BN_EPS)
        return s, be - m * s

    s1, t1 = bn_scale_shift(params["bn1"])
    s2, t2 = bn_scale_shift(params["bn2"])
    s3, t3 = bn_scale_shift(params["bn3"])

    bb = params["proposals_fea"]
    bb = bb / jnp.linalg.norm(bb, axis=-1, keepdims=True)

    # (D, C1): folds LOGIT_SCALE * bb_norm.T, Conv1d_1 weight and BN1 scale.
    w1f = (LOGIT_SCALE * (bb.T @ params["w1"].T)) * s1[None, :]
    b1f = params["b1"] * s1 + t1
    w2f = params["w2"].T * s2[None, :]            # (C1, D), BN2 folded
    b2f = params["b2"] * s2 + t2                  # (D,)
    w3f = params["w3"].T * s3[None, :]            # (D, D), BN3 folded
    b3f = params["b3"] * s3 + t3                  # (D,)
    wfc = params["fc_w"].T                        # (D, NC)
    bfc = params["fc_b"]                          # (NC,)

    # Zero-pad the C1 bottleneck and the class dim to full 128-lane slabs.
    # Padded h columns are ReLU(0)=0 and hit zero rows of w2f -> exact semantics.
    w1f = jnp.pad(w1f, ((0, 0), (0, C1P - C1)))
    b1f = jnp.pad(b1f, (0, C1P - C1))
    w2f = jnp.pad(w2f, ((0, C1P - C1), (0, 0)))
    wfc = jnp.pad(wfc, ((0, 0), (0, NCP - NC)))
    bfc = jnp.pad(bfc, (0, NCP - NC))

    return {
        "w1f": w1f.astype(jnp.bfloat16), "b1f": b1f.reshape(1, C1P).astype(jnp.float32),
        "w2f": w2f.astype(jnp.bfloat16), "b2f": b2f.reshape(1, D).astype(jnp.float32),
        "w3f": w3f.astype(jnp.bfloat16), "b3f": b3f.reshape(1, D).astype(jnp.float32),
        "wfc": wfc.astype(jnp.bfloat16), "bfc": bfc.reshape(1, NCP).astype(jnp.float32),
        "num_classes": NC,
    }


def r2plus1d_w_knowledge_forward(clip_vis_branch, base_fea, folded, *, block_b=BLOCK_B):
    """clip_vis_branch: (B, 1, 512); base_fea: (B, 512) = base_model(input) output."""
    B, T, D = clip_vis_branch.shape
    assert T == 1 and D == CLIP_DIM
    clip2d = clip_vis_branch.reshape(B, D).astype(jnp.float32)
    base2d = base_fea.astype(jnp.bfloat16)   # pre-cast: halves activation DMA bytes

    NC = folded["num_classes"]
    C1P = folded["w1f"].shape[1]
    NCP = folded["wfc"].shape[1]

    # Batch tiling: pad to a multiple of 16 (bf16 sublane pack); for multi-block
    # batches pad to a multiple of the block so every grid step is full.
    if B <= block_b:
        tb = max(16, _round_up(B, 16))
        Bp = tb
    else:
        tb = block_b
        Bp = _round_up(B, block_b)
    if Bp != B:
        # Padded rows are all-zero -> NaN logits for those rows only (row-wise
        # math, no cross-row mixing); they are sliced off below.
        clip2d = jnp.pad(clip2d, ((0, Bp - B), (0, 0)))
        base2d = jnp.pad(base2d, ((0, Bp - B), (0, 0)))
    num_blocks = Bp // tb

    args = (clip2d, base2d,
            folded["w1f"], folded["b1f"],
            folded["w2f"], folded["b2f"],
            folded["w3f"], folded["b3f"],
            folded["wfc"], folded["bfc"])

    weight_bytes = int(sum(a.size * a.dtype.itemsize for a in args[2:]))
    act_bytes = Bp * D * 4 + Bp * D * 2 + Bp * NCP * 4
    flops = 2 * Bp * (D * C1P + C1P * D + D * D + D * NCP)

    # Activations stream per grid step; weights/biases use a constant index_map
    # so they are DMA'd once and stay VMEM-resident across all steps.
    act_spec = lambda cols: pl.BlockSpec((tb, cols), lambda i: (i, 0))
    res_spec = lambda shape: pl.BlockSpec(shape, lambda i: (0, 0))

    in_specs = [
        act_spec(D),                       # clip (f32)
        act_spec(D),                       # base (bf16)
        res_spec((D, C1P)), res_spec((1, C1P)),
        res_spec((C1P, D)), res_spec((1, D)),
        res_spec((D, D)),   res_spec((1, D)),
        res_spec((D, NCP)), res_spec((1, NCP)),
    ]
    out_specs = act_spec(NCP)

    padded_logits = pl.pallas_call(
        r2plus1d_w_knowledge_kernel,
        out_shape=jax.ShapeDtypeStruct((Bp, NCP), jnp.float32),
        grid=(num_blocks,),
        in_specs=in_specs,
        out_specs=out_specs,
        compiler_params=pltpu.CompilerParams(
            dimension_semantics=("parallel",)),   # v7x: shard batch over both TCs
        cost_estimate=pl.CostEstimate(
            flops=flops, transcendentals=Bp,
            bytes_accessed=weight_bytes + act_bytes),
    )(*args)
    return padded_logits[:B, :NC]


# ---------------------------------------------------------------------------
# Synthetic parameters matching the module's __init__ shapes.
# ---------------------------------------------------------------------------
def init_params(key, num_proposals, n_finetune_classes):
    D, C1 = CLIP_DIM, num_proposals // REDUCE_RATIO
    ks = jax.random.split(key, 12)

    def bn_params(k, c):
        g = 1.0 + 0.1 * jax.random.normal(k, (c,), jnp.float32)
        b = 0.1 * jax.random.normal(jax.random.fold_in(k, 1), (c,), jnp.float32)
        m = 0.05 * jax.random.normal(jax.random.fold_in(k, 2), (c,), jnp.float32)
        v = jax.random.uniform(jax.random.fold_in(k, 3), (c,), jnp.float32, 0.5, 1.5)
        return jnp.stack([g, b, m, v], axis=0)  # (4, C): gamma, beta, mean, var

    return {
        # torch.load(proposals_fea_pth) stand-in
        "proposals_fea": jax.random.normal(ks[0], (num_proposals, D), jnp.float32),
        # knowledge_early_fuser: Conv1d(P, P//16, 1), BN, ReLU, Conv1d(P//16, 512, 1), BN
        "w1": 0.05 * jax.random.normal(ks[1], (C1, num_proposals), jnp.float32),
        "b1": 0.05 * jax.random.normal(ks[2], (C1,), jnp.float32),
        "bn1": bn_params(ks[3], C1),
        "w2": 0.05 * jax.random.normal(ks[4], (D, C1), jnp.float32),
        "b2": 0.05 * jax.random.normal(ks[5], (D,), jnp.float32),
        "bn2": bn_params(ks[6], D),
        # origfea_fuser: Conv1d(512, 512, 1), BN, ReLU
        "w3": 0.02 * jax.random.normal(ks[7], (D, D), jnp.float32),
        "b3": 0.05 * jax.random.normal(ks[8], (D,), jnp.float32),
        "bn3": bn_params(ks[9], D),
        # new_fc: Linear(512, n_finetune_classes)   (fuse_mode='no')
        "fc_w": 0.02 * jax.random.normal(ks[10], (n_finetune_classes, D), jnp.float32),
        "fc_b": 0.02 * jax.random.normal(ks[11], (n_finetune_classes,), jnp.float32),
    }


def reference_forward(clip_vis_branch, base_fea, params):
    """Pure-JAX reference mirroring the (unfolded) PyTorch forward, for validation."""
    B = clip_vis_branch.shape[0]
    aa = clip_vis_branch.reshape(B, CLIP_DIM)
    bb = params["proposals_fea"]
    aa = aa / jnp.linalg.norm(aa, axis=-1, keepdims=True)
    bb = bb / jnp.linalg.norm(bb, axis=-1, keepdims=True)
    sim = LOGIT_SCALE * aa @ bb.T                     # (B, P)

    def bn(x, p):
        g, b, m, v = p
        return (x - m) / jnp.sqrt(v + BN_EPS) * g + b

    h = jax.nn.relu(bn(sim @ params["w1"].T + params["b1"], params["bn1"]))
    knowledge = bn(h @ params["w2"].T + params["b2"], params["bn2"])
    orig = jax.nn.relu(bn(base_fea @ params["w3"].T + params["b3"], params["bn3"]))
    fused = jax.nn.relu(orig + knowledge)
    return fused @ params["fc_w"].T + params["fc_b"]


if __name__ == "__main__":
    P = 128                    # number of knowledge proposals (match_result_dim)
    NUM_CLASSES = 16           # n_finetune_classes

    key = jax.random.PRNGKey(0)
    k_in, k_base, k_par, k_in2, k_base2 = jax.random.split(key, 5)

    params = init_params(k_par, P, NUM_CLASSES)
    folded = fold_params(params)

    # --- large batch: exercises the 1-D batch grid with resident weights ---
    B_LARGE = 1024
    clip_vis_branch = jax.random.normal(k_in, (B_LARGE, 1, CLIP_DIM), jnp.float32)
    base_fea = jax.random.normal(k_base, (B_LARGE, CLIP_DIM), jnp.float32)

    logits = r2plus1d_w_knowledge_forward(clip_vis_branch, base_fea, folded)
    logits = jax.block_until_ready(logits)
    ref = jax.block_until_ready(reference_forward(clip_vis_branch, base_fea, params))
    np.testing.assert_allclose(np.asarray(logits), np.asarray(ref), rtol=3e-2, atol=3e-2)
    assert logits.shape == (B_LARGE, NUM_CLASSES)

    # --- small batch: exercises the pad-to-16 single-block path ---
    B_SMALL = 8
    clip_s = jax.random.normal(k_in2, (B_SMALL, 1, CLIP_DIM), jnp.float32)
    base_s = jax.random.normal(k_base2, (B_SMALL, CLIP_DIM), jnp.float32)
    logits_s = jax.block_until_ready(
        r2plus1d_w_knowledge_forward(clip_s, base_s, folded))
    ref_s = jax.block_until_ready(reference_forward(clip_s, base_s, params))
    np.testing.assert_allclose(np.asarray(logits_s), np.asarray(ref_s),
                               rtol=3e-2, atol=3e-2)
    assert logits_s.shape == (B_SMALL, NUM_CLASSES)

    print("KERNEL_OK")
</pallas_src>

<mosaic_0001>
module attributes {stable_mosaic.version = 11 : i64} {
  func.func @r2plus1d_w_knowledge_kernel(%arg0: i32, %arg1: memref<512x512xf32, #tpu.memory_space<vmem>>, %arg2: memref<512x512xbf16, #tpu.memory_space<vmem>>, %arg3: memref<512x128xbf16, #tpu.memory_space<vmem>>, %arg4: memref<1x128xf32, #tpu.memory_space<vmem>>, %arg5: memref<128x512xbf16, #tpu.memory_space<vmem>>, %arg6: memref<1x512xf32, #tpu.memory_space<vmem>>, %arg7: memref<512x512xbf16, #tpu.memory_space<vmem>>, %arg8: memref<1x512xf32, #tpu.memory_space<vmem>>, %arg9: memref<512x128xbf16, #tpu.memory_space<vmem>>, %arg10: memref<1x128xf32, #tpu.memory_space<vmem>>, %arg11: memref<512x128xf32, #tpu.memory_space<vmem>>) attributes {dimension_semantics = [#tpu.dimension_semantics<parallel>], iteration_bounds = array<i64: 2>, scalar_prefetch = 0 : i64, scratch_operands = 0 : i64, tpu.core_type = #tpu.core_type<tc>, window_params = [{transform_indices = @transform_0, window_bounds = array<i64: 512, 512>}, {transform_indices = @transform_1, window_bounds = array<i64: 512, 512>}, {pipeline_mode = #tpu.pipeline_mode<synchronous>, transform_indices = @transform_2, window_bounds = array<i64: 512, 128>}, {pipeline_mode = #tpu.pipeline_mode<synchronous>, transform_indices = @transform_3, window_bounds = array<i64: 1, 128>}, {pipeline_mode = #tpu.pipeline_mode<synchronous>, transform_indices = @transform_4, window_bounds = array<i64: 128, 512>}, {pipeline_mode = #tpu.pipeline_mode<synchronous>, transform_indices = @transform_5, window_bounds = array<i64: 1, 512>}, {pipeline_mode = #tpu.pipeline_mode<synchronous>, transform_indices = @transform_6, window_bounds = array<i64: 512, 512>}, {pipeline_mode = #tpu.pipeline_mode<synchronous>, transform_indices = @transform_7, window_bounds = array<i64: 1, 512>}, {pipeline_mode = #tpu.pipeline_mode<synchronous>, transform_indices = @transform_8, window_bounds = array<i64: 512, 128>}, {pipeline_mode = #tpu.pipeline_mode<synchronous>, transform_indices = @transform_9, window_bounds = array<i64: 1, 128>}, {transform_indices = @transform_10, window_bounds = array<i64: 512, 128>}]} {
    %c0 = arith.constant 0 : index
    %c0_0 = arith.constant 0 : index
    %0 = vector.load %arg1[%c0, %c0_0] : memref<512x512xf32, #tpu.memory_space<vmem>>, vector<512x512xf32>
    %1 = arith.mulf %0, %0 : vector<512x512xf32>
    %cst = arith.constant dense<0.000000e+00> : vector<512xf32>
    %2 = vector.multi_reduction <add>, %1, %cst [1] : vector<512x512xf32> to vector<512xf32>
    %3 = vector.shape_cast %2 : vector<512xf32> to vector<512x1xf32>
    %4 = math.rsqrt %3 : vector<512x1xf32>
    %5 = vector.broadcast %4 : vector<512x1xf32> to vector<512x512xf32>
    %6 = arith.mulf %0, %5 : vector<512x512xf32>
    %7 = arith.truncf %6 : vector<512x512xf32> to vector<512x512xbf16>
    %c0_1 = arith.constant 0 : index
    %c0_2 = arith.constant 0 : index
    %8 = vector.load %arg3[%c0_1, %c0_2] : memref<512x128xbf16, #tpu.memory_space<vmem>>, vector<512x128xbf16>
    %cst_3 = arith.constant dense<0.000000e+00> : vector<512x128xf32>
    %9 = tpu.matmul %7, %8, %cst_3 {dimension_numbers = #tpu.dot_dimension_numbers<[1], [0], [0], [1], [0, 0, 1, 1], [], []>} : vector<512x512xbf16>, vector<512x128xbf16>, vector<512x128xf32> -> vector<512x128xf32>
    %c0_4 = arith.constant 0 : index
    %c0_5 = arith.constant 0 : index
    %10 = vector.load %arg4[%c0_4, %c0_5] : memref<1x128xf32, #tpu.memory_space<vmem>>, vector<1x128xf32>
    %11 = vector.broadcast %10 : vector<1x128xf32> to vector<512x128xf32>
    %12 = arith.addf %9, %11 : vector<512x128xf32>
    %cst_6 = arith.constant 0.000000e+00 : f32
    %13 = vector.broadcast %cst_6 : f32 to vector<512x128xf32>
    %14 = arith.maximumf %12, %13 : vector<512x128xf32>
    %15 = arith.truncf %14 : vector<512x128xf32> to vector<512x128xbf16>
    %c0_7 = arith.constant 0 : index
    %c0_8 = arith.constant 0 : index
    %16 = vector.load %arg5[%c0_7, %c0_8] : memref<128x512xbf16, #tpu.memory_space<vmem>>, vector<128x512xbf16>
    %cst_9 = arith.constant dense<0.000000e+00> : vector<512x512xf32>
    %17 = tpu.matmul %15, %16, %cst_9 {dimension_numbers = #tpu.dot_dimension_numbers<[1], [0], [0], [1], [0, 0, 1, 1], [], []>} : vector<512x128xbf16>, vector<128x512xbf16>, vector<512x512xf32> -> vector<512x512xf32>
    %c0_10 = arith.constant 0 : index
    %c0_11 = arith.constant 0 : index
    %18 = vector.load %arg6[%c0_10, %c0_11] : memref<1x512xf32, #tpu.memory_space<vmem>>, vector<1x512xf32>
    %19 = vector.broadcast %18 : vector<1x512xf32> to vector<512x512xf32>
    %20 = arith.addf %17, %19 : vector<512x512xf32>
    %c0_12 = arith.constant 0 : index
    %c0_13 = arith.constant 0 : index
    %21 = vector.load %arg2[%c0_12, %c0_13] : memref<512x512xbf16, #tpu.memory_space<vmem>>, vector<512x512xbf16>
    %c0_14 = arith.constant 0 : index
    %c0_15 = arith.constant 0 : index
    %22 = vector.load %arg7[%c0_14, %c0_15] : memref<512x512xbf16, #tpu.memory_space<vmem>>, vector<512x512xbf16>
    %cst_16 = arith.constant dense<0.000000e+00> : vector<512x512xf32>
    %23 = tpu.matmul %21, %22, %cst_16 {dimension_numbers = #tpu.dot_dimension_numbers<[1], [0], [0], [1], [0, 0, 1, 1], [], []>} : vector<512x512xbf16>, vector<512x512xbf16>, vector<512x512xf32> -> vector<512x512xf32>
    %c0_17 = arith.constant 0 : index
    %c0_18 = arith.constant 0 : index
    %24 = vector.load %arg8[%c0_17, %c0_18] : memref<1x512xf32, #tpu.memory_space<vmem>>, vector<1x512xf32>
    %25 = vector.broadcast %24 : vector<1x512xf32> to vector<512x512xf32>
    %26 = arith.addf %23, %25 : vector<512x512xf32>
    %cst_19 = arith.constant 0.000000e+00 : f32
    %27 = vector.broadcast %cst_19 : f32 to vector<512x512xf32>
    %28 = arith.maximumf %26, %27 : vector<512x512xf32>
    %29 = arith.addf %28, %20 : vector<512x512xf32>
    %cst_20 = arith.constant 0.000000e+00 : f32
    %30 = vector.broadcast %cst_20 : f32 to vector<512x512xf32>
    %31 = arith.maximumf %29, %30 : vector<512x512xf32>
    %32 = arith.truncf %31 : vector<512x512xf32> to vector<512x512xbf16>
    %c0_21 = arith.constant 0 : index
    %c0_22 = arith.constant 0 : index
    %33 = vector.load %arg9[%c0_21, %c0_22] : memref<512x128xbf16, #tpu.memory_space<vmem>>, vector<512x128xbf16>
    %cst_23 = arith.constant dense<0.000000e+00> : vector<512x128xf32>
    %34 = tpu.matmul %32, %33, %cst_23 {dimension_numbers = #tpu.dot_dimension_numbers<[1], [0], [0], [1], [0, 0, 1, 1], [], []>} : vector<512x512xbf16>, vector<512x128xbf16>, vector<512x128xf32> -> vector<512x128xf32>
    %c0_24 = arith.constant 0 : index
    %c0_25 = arith.constant 0 : index
    %35 = vector.load %arg10[%c0_24, %c0_25] : memref<1x128xf32, #tpu.memory_space<vmem>>, vector<1x128xf32>
    %36 = vector.broadcast %35 : vector<1x128xf32> to vector<512x128xf32>
    %37 = arith.addf %34, %36 : vector<512x128xf32>
    %c0_26 = arith.constant 0 : index
    %c0_27 = arith.constant 0 : index
    %38 = vector.load %arg11[%c0_26, %c0_27] : memref<512x128xf32, #tpu.memory_space<vmem>>, vector<512x128xf32>
    tpu.vector_store %arg11[%c0_26, %c0_27], %37 {strides = array<i32>} : memref<512x128xf32, #tpu.memory_space<vmem>>, vector<512x128xf32>,
    return
  }
  func.func @transform_0(%arg0: i32) -> (i32, i32) {
    %c0_i32 = arith.constant 0 : i32
    %c0_i32_0 = arith.constant 0 : i32
    return %arg0, %c0_i32 : i32, i32
  }
  func.func @transform_1(%arg0: i32) -> (i32, i32) {
    %c0_i32 = arith.constant 0 : i32
    %c0_i32_0 = arith.constant 0 : i32
    return %arg0, %c0_i32 : i32, i32
  }
  func.func @transform_2(%arg0: i32) -> (i32, i32) {
    %c0_i32 = arith.constant 0 : i32
    %c0_i32_0 = arith.constant 0 : i32
    %c0_i32_1 = arith.constant 0 : i32
    return %c0_i32, %c0_i32_0 : i32, i32
  }
  func.func @transform_3(%arg0: i32) -> (i32, i32) {
    %c0_i32 = arith.constant 0 : i32
    %c0_i32_0 = arith.constant 0 : i32
    %c0_i32_1 = arith.constant 0 : i32
    return %c0_i32, %c0_i32_0 : i32, i32
  }
  func.func @transform_4(%arg0: i32) -> (i32, i32) {
    %c0_i32 = arith.constant 0 : i32
    %c0_i32_0 = arith.constant 0 : i32
    %c0_i32_1 = arith.constant 0 : i32
    return %c0_i32, %c0_i32_0 : i32, i32
  }
  func.func @transform_5(%arg0: i32) -> (i32, i32) {
    %c0_i32 = arith.constant 0 : i32
    %c0_i32_0 = arith.constant 0 : i32
    %c0_i32_1 = arith.constant 0 : i32
    return %c0_i32, %c0_i32_0 : i32, i32
  }
  func.func @transform_6(%arg0: i32) -> (i32, i32) {
    %c0_i32 = arith.constant 0 : i32
    %c0_i32_0 = arith.constant 0 : i32
    %c0_i32_1 = arith.constant 0 : i32
    return %c0_i32, %c0_i32_0 : i32, i32
  }
  func.func @transform_7(%arg0: i32) -> (i32, i32) {
    %c0_i32 = arith.constant 0 : i32
    %c0_i32_0 = arith.constant 0 : i32
    %c0_i32_1 = arith.constant 0 : i32
    return %c0_i32, %c0_i32_0 : i32, i32
  }
  func.func @transform_8(%arg0: i32) -> (i32, i32) {
    %c0_i32 = arith.constant 0 : i32
    %c0_i32_0 = arith.constant 0 : i32
    %c0_i32_1 = arith.constant 0 : i32
    return %c0_i32, %c0_i32_0 : i32, i32
  }
  func.func @transform_9(%arg0: i32) -> (i32, i32) {
    %c0_i32 = arith.constant 0 : i32
    %c0_i32_0 = arith.constant 0 : i32
    %c0_i32_1 = arith.constant 0 : i32
    return %c0_i32, %c0_i32_0 : i32, i32
  }
  func.func @transform_10(%arg0: i32) -> (i32, i32) {
    %c0_i32 = arith.constant 0 : i32
    %c0_i32_0 = arith.constant 0 : i32
    return %arg0, %c0_i32 : i32, i32
  }
}

</mosaic_0001>

<bundles_post_ra>
// kernel: tpu_custom_call.1
= control target key start
LH: loop header
LB: loop body
LE: loop exit
PB: predicated region body
PF: predicated region fallthrough
CT: control target
= control target key end

     0   :  { %s15979_s0 = inlined_call_operand.hbm [shape: f32[1024,512], index: 0, kind: input, shape index: {}]   ;;  %s15980_s1 = inlined_call_operand.hbm [shape: bf16[1024,512], index: 1, kind: input, shape index: {}]   ;;  %s15981_s2 = inlined_call_operand.hbm [shape: bf16[512,128], index: 2, kind: input, shape index: {}]   ;;  %s15982_s3 = inlined_call_operand.hbm [shape: f32[1,128], index: 3, kind: input, shape index: {}]   ;;  %s15983_s4 = inlined_call_operand.hbm [shape: bf16[128,512], index: 4, kind: input, shape index: {}]   ;;  %s15984_s5 = inlined_call_operand.hbm [shape: f32[1,512], index: 5, kind: input, shape index: {}]   ;;  %s15985_s6 = inlined_call_operand.hbm [shape: bf16[512,512], index: 6, kind: input, shape index: {}]   ;;  %s15986_s7 = inlined_call_operand.hbm [shape: f32[1,512], index: 7, kind: input, shape index: {}]   ;;  %s15987_s8 = inlined_call_operand.hbm [shape: bf16[512,128], index: 8, kind: input, shape index: {}]   ;;  %s15988_s9 = inlined_call_operand.hbm [shape: f32[1,128], index: 9, kind: input, shape index: {}]   ;;  %s15989_s10 = inlined_call_operand.hbm [shape: f32[1024,128], index: 10, kind: output, shape index: {}]  }
   0x1   :  { %16110 = sst [smem:[#allocation181_spill]] %s15979_s0 }
   0x2   :  { %16111 = sst [smem:[#allocation182_spill]] %s15981_s2 }
   0x3   :  { %16112 = sst [smem:[#allocation183_spill]] %s15982_s3 }
   0x4   :  { %16113 = sst [smem:[#allocation184_spill]] %s15983_s4 }
   0x5   :  { %16114 = sst [smem:[#allocation185_spill]] %s15984_s5 }
   0x6   :  { %16115 = sst [smem:[#allocation186_spill]] %s15985_s6 }
   0x7   :  { %16116 = sst [smem:[#allocation187_spill]] %s15989_s10 }
   0x8   :  { %15 = vsyncpa [#allocation3], 0 }
   0x9   :  { %17 = vsyncpa [#allocation3 + $0x1], 0 }
   0xa   :  { %18 = vsyncpa [#allocation6], 0 }
   0xb   :  { %20 = vsyncpa [#allocation6 + $0x1], 0 }
   0xc   :  { %21 = vsyncpa [#allocation9], 0 }
   0xd   :  { %22 = vsyncpa [#allocation12], 0 }
   0xe   :  { %23 = vsyncpa [#allocation15], 0 }
   0xf   :  { %24 = vsyncpa [#allocation18], 0 }
  0x10   :  { %25 = vsyncpa [#allocation4], 0 }
  0x11   :  { %27 = vsyncpa [#allocation4 + $0x1], 0  ;;  %s11508_s13 = smov 0   ;;  %s11510_s14 = smov 0  }
  0x12   :  { %s11512_s15 = smov 0   ;;  %s11514_s16 = smov 0  }
  0x13 LB: > { %s11433_s17 = smov [#allocation7]   ;;  %s11529_s19 = sadd.s32 4294967295, %s11431_s16   ;;  %s11431_s16 = sphi %s11514_s16, %s16743_s16   ;;  %s11427_s15 = sphi %s11512_s15, %s16742_s15   ;;  %s11423_s14 = sphi %s11510_s14, %s16741_s14   ;;  %s11419_s13 = sphi %s11508_s13, %s16740_s13  }
  0x14   : > { %s296_s18 = sshll.u32 %s11433_s17, 4  ;;  %p8627_p0 = scmp.ge.s32.totalorder %s11431_s16, 1  ;;  %s11534_s18 = int_to_ptr.vmem [resolvable:$true] %s296_s18 }
  0x15   : > { %p15993_p1 = scmp.eq.s32.totalorder %s11529_s19, 0  ;;  %p284_p2 = scmp.lt.s32.totalorder %s11431_s16, 3 }
  0x16   : > { %s11434_s21 = smov [#allocation8]   ;;  %s11435_s24 = smov [#allocation11]  }
  0x17   : > { %p11536_p3 = pnand %p8627_p0, %p284_p2  ;;  %s310_s22 = sshll.u32 %s11434_s21, 4  ;;  %s11549_s22 = int_to_ptr.vmem [resolvable:$true] %s310_s22 }
  0x18   : > { %s334_s25 = sshll.u32 %s11435_s24, 4  ;;  %s16120_s2 = sld [smem:[#allocation182_spill]]  ;;  %s11551_s25 = int_to_ptr.vmem [resolvable:$true] %s334_s25 }
  0x19   : > { %s16117_s20 = scalar_select %p11536_p3, 1, 0 }
  0x1a   : > { %p9927_p5 = pneg %p11536_p3 }
  0x1b   : > { %16118 = sst [smem:[#allocation28_spill]] %s16117_s20 }
  0x1c   : > { %p11545_p6 = pnand %p9927_p5, %p15993_p1 }
  0x1e   : > { %s11057_s28 = scalar_lea.hbm %s16120_s2, 4096  ;;  %p11561_p8 = pneg %p11545_p6 }
  0x1f   : > { %p11058_p7 = scmp.ne.s32.totalorder %s16120_s2, %s11057_s28  ;;  %p11064_p11 = scmp.lt.u32.totalorder %s11057_s28, %s16120_s2 }
  0x21   : > { %p11060_p9 = pnand %p11561_p8, %p11058_p7 }
  0x23   : > { %p11061_p10 = pneg %p11060_p9 }
  0x25   : > { %p11066_p12 = pnand %p11064_p11, %p11061_p10 }
  0x27   : > { %11069 = shalt.err (!%p11066_p12)
}
  0x28   : > { %s11070_s21 = scalar_lea.vmem %s11534_s18, 4096  ;;  %p11078_p5 = scmp.lt.s32.totalorder %s11534_s18, %s11534_s18 }
  0x29   : > { %p11071_p13 = scmp.ne.s32.totalorder %s11534_s18, %s11070_s21  ;;  %p11079_p4 = scmp.lt.s32.totalorder %s11070_s21, %s11070_s21 }
  0x2b   : > { %p11073_p0 = pnand %p11071_p13, %p11561_p8  ;;  %p11080_p7 = por %p11079_p4, %p11078_p5 }
  0x2d   : > { %p11074_p2 = pneg %p11073_p0 }
  0x2f   : > { %p11081_p9 = pnand %p11080_p7, %p11074_p2 }
  0x31   : > { %11084 = shalt.err (!%p11081_p9)
}
  0x32   : > { %s15992_s24 = smov 64   ;;  %s15995_s26 = smov 4  }
  0x33   : > { %9930 = dma.hbm_to_vmem [thread:$0]  (!%p11545_p6), %s16120_s2, 4096, %s11534_s18, [#allocation6], %s15992_s24, %s15992_s24, %s15995_s26  }
  0x34   : > { %s16122_s3 = sld [smem:[#allocation183_spill]] }
  0x3a   : > { %s11085_s12 = scalar_lea.hbm %s16122_s3, 16 }
  0x3b   : > { %p11086_p4 = scmp.ne.s32.totalorder %s16122_s3, %s11085_s12  ;;  %p11092_p12 = scmp.lt.u32.totalorder %s11085_s12, %s16122_s3 }
  0x3d   : > { %p11088_p10 = pnand %p11086_p4, %p11561_p8 }
  0x3f   : > { %p11089_p11 = pneg %p11088_p10 }
  0x41   : > { %p11094_p13 = pnand %p11092_p12, %p11089_p11 }
  0x43   : > { %11097 = shalt.err (!%p11094_p13)
}
  0x44   : > { %s11098_s18 = scalar_lea.vmem %s11549_s22, 16  ;;  %s11105_s27 = scalar_lea.vmem %s11549_s22, 32 }
  0x45   : > { %p11099_p0 = scmp.ne.s32.totalorder %s11549_s22, %s11098_s18  ;;  %p11106_p7 = scmp.lt.s32.totalorder %s11549_s22, %s11549_s22 }
  0x46   : > { %p11107_p9 = scmp.lt.s32.totalorder %s11105_s27, %s11098_s18 }
  0x47   : > { %p11101_p2 = pnand %p11099_p0, %p11561_p8 }
  0x48   : > { %p11108_p4 = por %p11107_p9, %p11106_p7 }
  0x49   : > { %p11102_p5 = pneg %p11101_p2 }
  0x4b   : > { %p11109_p10 = pnand %p11108_p4, %p11102_p5 }
  0x4d   : > { %11112 = shalt.err (!%p11109_p10)
}
  0x4e   : > { %9933 = dma.hbm_to_vmem [thread:$0]  (!%p11545_p6), %s16122_s3, 16, %s11549_s22, [#allocation9]  }
  0x4f   : > { %s16123_s5 = sld [smem:[#allocation185_spill]] }
  0x55   : > { %s11113_s30 = scalar_lea.hbm %s16123_s5, 64 }
  0x56   : > { %p11114_p11 = scmp.ne.s32.totalorder %s16123_s5, %s11113_s30  ;;  %p11120_p0 = scmp.lt.u32.totalorder %s11113_s30, %s16123_s5 }
  0x58   : > { %p11116_p12 = pnand %p11114_p11, %p11561_p8 }
  0x5a   : > { %p11117_p13 = pneg %p11116_p12 }
  0x5c   : > { %p11122_p2 = pnand %p11120_p0, %p11117_p13 }
  0x5e   : > { %11125 = shalt.err (!%p11122_p2)
}
  0x5f   : > { %s11126_s22 = scalar_lea.vmem %s11551_s25, 64  ;;  %p11134_p4 = scmp.lt.s32.totalorder %s11551_s25, %s11551_s25 }
  0x60   : > { %p11127_p5 = scmp.ne.s32.totalorder %s11551_s25, %s11126_s22  ;;  %p11135_p10 = scmp.lt.s32.totalorder %s11126_s22, %s11126_s22 }
  0x62   : > { %p11129_p7 = pnand %p11127_p5, %p11561_p8  ;;  %p11136_p11 = por %p11135_p10, %p11134_p4 }
  0x64   : > { %p11130_p9 = pneg %p11129_p7 }
  0x66   : > { %p11137_p12 = pnand %p11136_p11, %p11130_p9 }
  0x68   : > { %11140 = shalt.err (!%p11137_p12)
}
  0x69   : > { %9939 = dma.hbm_to_vmem [thread:$0]  (!%p11545_p6), %s16123_s5, 64, %s11551_s25, [#allocation12]  }
  0x6a   : > { %s11438_s20 = smov [#allocation14]   ;;  %s11439_s29 = smov [#allocation10]  }
  0x6b   : > { %s358_s28 = sshll.u32 %s11438_s20, 4  ;;  %s320_s30 = sshll.u32 %s11439_s29, 4  ;;  %s359_s28 = int_to_ptr.vmem [resolvable:$true] %s358_s28  ;;  %s321_s30 = int_to_ptr.vmem [resolvable:$true] %s320_s30 }
  0x6c   : > { %s11141_s21 = scalar_lea.hbm %s15986_s7, 64 }
  0x6d   : > { %p11142_p13 = scmp.ne.s32.totalorder %s15986_s7, %s11141_s21  ;;  %p11148_p5 = scmp.lt.u32.totalorder %s11141_s21, %s15986_s7 }
  0x6f   : > { %p11144_p0 = pnand %p11142_p13, %p11561_p8 }
  0x71   : > { %p11145_p2 = pneg %p11144_p0 }
  0x73   : > { %p11150_p7 = pnand %p11148_p5, %p11145_p2 }
  0x75   : > { %11153 = shalt.err (!%p11150_p7)
}
  0x76   : > { %s11154_s25 = scalar_lea.vmem %s359_s28, 64  ;;  %p11162_p11 = scmp.lt.s32.totalorder %s359_s28, %s359_s28 }
  0x77   : > { %p11155_p9 = scmp.ne.s32.totalorder %s359_s28, %s11154_s25  ;;  %p11163_p12 = scmp.lt.s32.totalorder %s11154_s25, %s11154_s25 }
  0x79   : > { %p11157_p4 = pnand %p11155_p9, %p11561_p8  ;;  %p11164_p1 = por %p11163_p12, %p11162_p11 }
  0x7b   : > { %p11158_p10 = pneg %p11157_p4 }
  0x7d   : > { %p11165_p3 = pnand %p11164_p1, %p11158_p10 }
  0x7f   : > { %11168 = shalt.err (!%p11165_p3)
}
  0x80   : > { %9945 = dma.hbm_to_vmem [thread:$0]  (!%p11545_p6), %s15986_s7, 64, %s359_s28, [#allocation15]  }
  0x81   : > { %s16124_s4 = sld [smem:[#allocation184_spill]] }
  0x87   : > { %s11169_s12 = scalar_lea.hbm %s16124_s4, 4096 }
  0x88   : > { %p11170_p13 = scmp.ne.s32.totalorder %s16124_s4, %s11169_s12  ;;  %p11176_p3 = scmp.lt.u32.totalorder %s11169_s12, %s16124_s4 }
  0x8a   : > { %p11172_p0 = pnand %p11170_p13, %p11561_p8 }
  0x8c   : > { %p11173_p1 = pneg %p11172_p0 }
  0x8e   : > { %p11178_p2 = pnand %p11176_p3, %p11173_p1 }
  0x90   : > { %11181 = shalt.err (!%p11178_p2)
}
  0x91   : > { %s11182_s27 = scalar_lea.vmem %s321_s30, 4096  ;;  %p11190_p4 = scmp.lt.s32.totalorder %s321_s30, %s321_s30 }
  0x92   : > { %p11183_p5 = scmp.ne.s32.totalorder %s321_s30, %s11182_s27  ;;  %p11191_p10 = scmp.lt.s32.totalorder %s11182_s27, %s11182_s27 }
  0x94   : > { %p11185_p7 = pnand %p11183_p5, %p11561_p8  ;;  %p11192_p11 = por %p11191_p10, %p11190_p4 }
  0x96   : > { %p11186_p9 = pneg %p11185_p7 }
  0x98   : > { %p11193_p12 = pnand %p11192_p11, %p11186_p9 }
  0x9a   : > { %11196 = shalt.err (!%p11193_p12)
}
  0x9b   : > { %s15996_s28 = smov 256   ;;  %s15997_s25 = smov 16  }
  0x9c   : > { %9936 = dma.hbm_to_vmem [thread:$0]  (!%p11545_p6), %s16124_s4, 4096, %s321_s30, [#allocation9], %s15996_s28, %s15996_s28, %s15997_s25  }
  0x9d   : > { %s11442_s24 = smov [#allocation13]   ;;  %s11443_s12 = smov [#allocation16]  }
  0x9e   : > { %s344_s29 = sshll.u32 %s11442_s24, 4  ;;  %s368_s17 = sshll.u32 %s11443_s12, 4  ;;  %s345_s29 = int_to_ptr.vmem [resolvable:$true] %s344_s29  ;;  %s369_s17 = int_to_ptr.vmem [resolvable:$true] %s368_s17 }
  0x9f   : > { %s16125_s6 = sld [smem:[#allocation186_spill]] }
  0xa5   : > { %s11197_s22 = scalar_lea.hbm %s16125_s6, 16384 }
  0xa6   : > { %p11198_p13 = scmp.ne.s32.totalorder %s16125_s6, %s11197_s22  ;;  %p11204_p3 = scmp.lt.u32.totalorder %s11197_s22, %s16125_s6 }
  0xa8   : > { %p11200_p0 = pnand %p11198_p13, %p11561_p8 }
  0xaa   : > { %p11201_p1 = pneg %p11200_p0 }
  0xac   : > { %p11206_p2 = pnand %p11204_p3, %p11201_p1 }
  0xae   : > { %11209 = shalt.err (!%p11206_p2)
}
  0xaf   : > { %s11210_s30 = scalar_lea.vmem %s345_s29, 16384  ;;  %p11218_p4 = scmp.lt.s32.totalorder %s345_s29, %s345_s29 }
  0xb0   : > { %p11211_p5 = scmp.ne.s32.totalorder %s345_s29, %s11210_s30  ;;  %p11219_p10 = scmp.lt.s32.totalorder %s11210_s30, %s11210_s30 }
  0xb2   : > { %p11213_p7 = pnand %p11211_p5, %p11561_p8  ;;  %p11220_p11 = por %p11219_p10, %p11218_p4 }
  0xb4   : > { %p11214_p9 = pneg %p11213_p7 }
  0xb6   : > { %p11221_p12 = pnand %p11220_p11, %p11214_p9 }
  0xb8   : > { %11224 = shalt.err (!%p11221_p12)
}
  0xb9   : > { %9942 = dma.hbm_to_vmem [thread:$0]  (!%p11545_p6), %s16125_s6, 16384, %s345_s29, [#allocation12], %s15996_s28, %s15996_s28, %s15997_s25  }
  0xba   : > { %s11225_s20 = scalar_lea.hbm %s15987_s8, 4096 }
  0xbb   : > { %p11226_p13 = scmp.ne.s32.totalorder %s15987_s8, %s11225_s20  ;;  %p11232_p3 = scmp.lt.u32.totalorder %s11225_s20, %s15987_s8 }
  0xbd   : > { %p11228_p0 = pnand %p11226_p13, %p11561_p8 }
  0xbf   : > { %p11229_p1 = pneg %p11228_p0 }
  0xc1   : > { %p11234_p2 = pnand %p11232_p3, %p11229_p1 }
  0xc3   : > { %11237 = shalt.err (!%p11234_p2)
}
  0xc4   : > { %s11238_s22 = scalar_lea.vmem %s369_s17, 4096  ;;  %p11246_p4 = scmp.lt.s32.totalorder %s369_s17, %s369_s17 }
  0xc5   : > { %p11239_p5 = scmp.ne.s32.totalorder %s369_s17, %s11238_s22  ;;  %p11247_p10 = scmp.lt.s32.totalorder %s11238_s22, %s11238_s22 }
  0xc7   : > { %p11241_p7 = pnand %p11239_p5, %p11561_p8  ;;  %p11248_p11 = por %p11247_p10, %p11246_p4 }
  0xc9   : > { %p11242_p9 = pneg %p11241_p7 }
  0xcb   : > { %p11249_p12 = pnand %p11248_p11, %p11242_p9 }
  0xcd   : > { %11252 = shalt.err (!%p11249_p12)
}
  0xce   : > { %s16126_s29 = smov 4   ;;  %s16127_s27 = smov 64  }
  0xcf   : > { %9948 = dma.hbm_to_vmem [thread:$0]  (!%p11545_p6), %s15987_s8, 4096, %s369_s17, [#allocation15], %s16127_s27, %s16127_s27, %s16126_s29  }
  0xd0   : > { %s11444_s3 = smov [#allocation17]   ;;  %s11253_s24 = scalar_lea.hbm %s15988_s9, 16 }
  0xd1   : > { %s382_s26 = sshll.u32 %s11444_s3, 4  ;;  %p11254_p13 = scmp.ne.s32.totalorder %s15988_s9, %s11253_s24  ;;  %s383_s26 = int_to_ptr.vmem [resolvable:$true] %s382_s26 }
  0xd2   : > { %p11260_p3 = scmp.lt.u32.totalorder %s11253_s24, %s15988_s9 }
  0xd3   : > { %p11256_p0 = pnand %p11254_p13, %p11561_p8 }
  0xd5   : > { %p11257_p1 = pneg %p11256_p0 }
  0xd7   : > { %p11262_p2 = pnand %p11260_p3, %p11257_p1 }
  0xd9   : > { %11265 = shalt.err (!%p11262_p2)
}
  0xda   : > { %s11266_s17 = scalar_lea.vmem %s383_s26, 16  ;;  %s11273_s29 = scalar_lea.vmem %s383_s26, 32 }
  0xdb   : > { %p11267_p5 = scmp.ne.s32.totalorder %s383_s26, %s11266_s17  ;;  %p11274_p4 = scmp.lt.s32.totalorder %s383_s26, %s383_s26 }
  0xdc   : > { %p11275_p10 = scmp.lt.s32.totalorder %s11273_s29, %s11266_s17 }
  0xdd   : > { %p11269_p7 = pnand %p11267_p5, %p11561_p8 }
  0xde   : > { %p11276_p11 = por %p11275_p10, %p11274_p4 }
  0xdf   : > { %p11270_p9 = pneg %p11269_p7 }
  0xe1   : > { %p11277_p12 = pnand %p11276_p11, %p11270_p9 }
  0xe3   : > { %11280 = shalt.err (!%p11277_p12)
}
  0xe4   : > { %9951 = dma.hbm_to_vmem [thread:$0]  (!%p11545_p6), %s15988_s9, 16, %s383_s26, [#allocation18]  }
  0xe5   : > { %s8626_s11 = sadd.s32 4294967294, %s11431_s16   ;;  %s11733_s23 = sadd.s32 1, %s11431_s16  }
  0xe6   : > { %s37_s2 = ssub.s32 %s11431_s16, %s11733_s23  ;;  %s40_s3 = sadd.s32 1, %s11427_s15 }
  0xe7   : > { %p38_p8 = scmp.eq.s32.totalorder %s37_s2, 0  ;;  %p47_p13 = scmp.ne.s32.totalorder %s11427_s15, %s11423_s14 }
  0xe8   : > { %p48_p0 = scmp.eq.s32.totalorder %s11431_s16, 0  ;;  %p53_p1 = scmp.ne.s32.totalorder %s11423_s14, %s11419_s13 }
  0xe9   : > { %s11744_s10 = scalar_select %p38_p8, %s11427_s15, %s40_s3  }
  0xea   : > { %p11746_p3 = por %p48_p0, %p47_p13  ;;  %p16129_p2 = scmp.eq.s32.totalorder %s11529_s19, 0 }
  0xeb   : > { %p271_p5 = scmp.eq.s32.totalorder %s11529_s19, 1  ;;  %p277_p7 = scmp.eq.s32.totalorder %s8626_s11, 1 }
  0xec   : > { %p11752_p6 = por %p16129_p2, %p53_p1  ;;  %p9971_p9 = scmp.lt.s32.totalorder %s11431_s16, 2 }
  0xed   : > { %s11759_s24 = sand.u32 1, %s11427_s15   ;;  %p11761_p4 = por %p271_p5, %p47_p13 }
  0xee   : > { %p11765_p10 = por %p277_p7, %p53_p1  ;;  %s8637_s18 = sshll.u32 %s11759_s24, 11 }
  0xef   : > { %s16131_s12 = scalar_select %p11761_p4, 1, 0 }
  0xf0   : > { %s16132_s21 = scalar_select %p11765_p10, 1, 0 }
  0xf1   : > { %s9017_s22 = sshll.u32 %s11431_s16, 15  ;;  %s16133_s0 = sld [smem:[#allocation181_spill]] }
  0xf2   : > { %s397_s30 = scalar_lea.vmem [#allocation2], %s8637_s18  ;;  %p11780_p11 = pnand %p9971_p9, %p11746_p3 }
  0xf3   : > { %s405_s11 = sshll.u32 %s397_s30, 4  ;;  %s394_s28 = scalar_lea.sflag [#allocation3], %s11759_s24  ;;  %s11776_s11 = int_to_ptr.vmem [resolvable:$true] %s405_s11 }
  0xf4   : > { %p11283_p8 = pneg %p11780_p11 }
  0xf7   : > { %s11774_s27 = scalar_lea.hbm %s16133_s0, %s9017_s22  ;;  %s11286_s20 = scalar_lea.hbm %s16133_s0, 65536 }
  0xf8   : > { %s11281_s17 = scalar_lea.hbm %s11774_s27, 32768  ;;  %p11287_p1 = scmp.lt.u32.totalorder %s11774_s27, %s16133_s0 }
  0xf9   : > { %p11282_p12 = scmp.ne.s32.totalorder %s11774_s27, %s11281_s17  ;;  %p11288_p3 = scmp.lt.u32.totalorder %s11286_s20, %s11281_s17 }
  0xfa   : > { %p11290_p5 = scmp.lt.u32.totalorder %s11281_s17, %s11774_s27 }
  0xfb   : > { %p11284_p13 = pnand %p11283_p8, %p11282_p12  ;;  %p11289_p2 = por %p11288_p3, %p11287_p1 }
  0xfd   : > { %p11285_p0 = pneg %p11284_p13  ;;  %p11291_p7 = por %p11290_p5, %p11289_p2 }
  0xff   : > { %p11292_p9 = pnand %p11291_p7, %p11285_p0 }
 0x101   : > { %11295 = shalt.err (!%p11292_p9)
}
 0x102   : > { %s11296_s25 = scalar_lea.vmem %s11776_s11, 32768  ;;  %s11445_s18 = smov [#allocation2]  }
 0x103   : > { %p11297_p12 = scmp.ne.s32.totalorder %s11776_s11, %s11296_s25  ;;  %s11301_s22 = sshll.u32 %s11445_s18, 4  ;;  %s11302_s22 = int_to_ptr.vmem [resolvable:$false] %s11301_s22 }
 0x104   : > { %s11303_s29 = scalar_lea.vmem %s11302_s22, 65536  ;;  %p11304_p4 = scmp.lt.s32.totalorder %s11776_s11, %s11302_s22 }
 0x105   : > { %p11299_p13 = pnand %p11297_p12, %p11283_p8  ;;  %p11305_p1 = scmp.lt.s32.totalorder %s11303_s29, %s11296_s25 }
 0x107   : > { %p11300_p10 = pneg %p11299_p13  ;;  %p11306_p3 = por %p11305_p1, %p11304_p4 }
 0x109   : > { %p11307_p2 = pnand %p11306_p3, %p11300_p10 }
 0x10b   : > { %11310 = shalt.err (!%p11307_p2)
}
 0x10c   : > { %s11446_s17 = smov 512   ;;  %s11447_s20 = smov 32  }
 0x10d   : > { %9955 = dma.hbm_to_vmem [thread:$0]  (!%p11780_p11), %s11774_s27, 32768, %s11776_s11, %s394_s28, %s11446_s17, %s11446_s17, %s11447_s20  }
 0x10e   : > { %s8641_s30 = sshll.u32 %s11759_s24, 10  ;;  %s9019_s18 = sshll.u32 %s11431_s16, 14 }
 0x10f   : > { %s11818_s29 = scalar_lea.hbm %s15980_s1, %s9019_s18  ;;  %s419_s3 = scalar_lea.vmem [#allocation5], %s8641_s30 }
 0x110   : > { %s427_s0 = sshll.u32 %s419_s3, 4  ;;  %s16135_s4 = sand.u32 1, %s11431_s16   ;;  %s11820_s0 = int_to_ptr.vmem [resolvable:$true] %s427_s0 }
 0x111   : > { %s11824_s5 = scalar_lea.sflag [#allocation6], %s16135_s4  ;;  %s11311_s6 = scalar_lea.hbm %s11818_s29, 16384 }
 0x112   : > { %p11312_p4 = scmp.ne.s32.totalorder %s11818_s29, %s11311_s6  ;;  %s11316_s27 = scalar_lea.hbm %s15980_s1, 32768 }
 0x113   : > { %p11317_p5 = scmp.lt.u32.totalorder %s11818_s29, %s15980_s1  ;;  %p11318_p7 = scmp.lt.u32.totalorder %s11316_s27, %s11311_s6 }
 0x114   : > { %p11314_p10 = pnand %p11312_p4, %p11283_p8  ;;  %p11320_p12 = scmp.lt.u32.totalorder %s11311_s6, %s11818_s29 }
 0x115   : > { %p11319_p9 = por %p11318_p7, %p11317_p5 }
 0x116   : > { %p11315_p0 = pneg %p11314_p10 }
 0x117   : > { %p11321_p13 = por %p11320_p12, %p11319_p9 }
 0x119   : > { %p11322_p1 = pnand %p11321_p13, %p11315_p0 }
 0x11b   : > { %11325 = shalt.err (!%p11322_p1)
}
 0x11c   : > { %s11326_s4 = scalar_lea.vmem %s11820_s0, 16384  ;;  %s11448_s3 = smov [#allocation5]  }
 0x11d   : > { %p11327_p3 = scmp.ne.s32.totalorder %s11820_s0, %s11326_s4  ;;  %s11331_s20 = sshll.u32 %s11448_s3, 4  ;;  %s11332_s20 = int_to_ptr.vmem [resolvable:$false] %s11331_s20 }
 0x11e   : > { %s11333_s30 = scalar_lea.vmem %s11332_s20, 32768  ;;  %p11334_p10 = scmp.lt.s32.totalorder %s11820_s0, %s11332_s20 }
 0x11f   : > { %p11329_p2 = pnand %p11327_p3, %p11283_p8  ;;  %p11335_p5 = scmp.lt.s32.totalorder %s11333_s30, %s11326_s4 }
 0x121   : > { %p11330_p4 = pneg %p11329_p2  ;;  %p11336_p7 = por %p11335_p5, %p11334_p10 }
 0x123   : > { %p11337_p9 = pnand %p11336_p7, %p11330_p4 }
 0x125   : > { %11340 = shalt.err (!%p11337_p9)
}
 0x126   : > { %s16136_s6 = smov 16   ;;  %s16137_s18 = smov 256  }
 0x127   : > { %9958 = dma.hbm_to_vmem [thread:$0]  (!%p11780_p11), %s11818_s29, 16384, %s11820_s0, %s11824_s5, %s16137_s18, %s16137_s18, %s16136_s6  }
 0x128   : > { %s16138_s22 = sld [smem:[#allocation28_spill]] }
 0x12e   : > { %p16139_p8 = scmp.ne.s32.totalorder %s16138_s22, 0 }
 0x130   : > { %439 = sbr.rel (%p16139_p8) target bundleno = 2500 (0x9c4), region = 60 }
 0x137   : > { %s11856_s25 = sand.u32 1, %s11423_s14  }
 0x138   : > { %s8646_s28 = sshll.u32 %s11856_s25, 11  ;;  %s442_s24 = scalar_lea.sflag [#allocation3], %s11856_s25 }
 0x139   : > { %s11860_s27 = scalar_lea.vmem [#allocation2], %s8646_s28 }
 0x13a   : > { %11386 = dma.done.wait (%p11752_p6), %s442_s24, 32768  }
 0x13b   : > { %11388 = vsyncadd (%p11752_p6), %s442_s24, 4294934528  ;;  %s450_s0 = sand.u32 1, %s11529_s19   ;;  %s8647_s5 = sshll.u32 %s11856_s25, 10 }
 0x13c   : > { %s451_s2 = scalar_lea.sflag [#allocation6], %s450_s0  ;;  %s11868_s29 = scalar_lea.vmem [#allocation5], %s8647_s5 }
 0x13d   : > { %11390 = dma.done.wait (%p11752_p6), %s451_s2, 16384  }
 0x13e   : > { %11392 = vsyncadd (%p11752_p6), %s451_s2, 4294950912  ;;  %p16140_p11 = scmp.eq.s32.totalorder %s11529_s19, 0 }
 0x140   : > { %11394 = dma.done.wait (%p16140_p11), [#allocation6], 4096   ;;  %p16141_p0 = pmov %p16140_p11 }
 0x142   : > { %11396 = vsyncadd (%p16141_p0), [#allocation6], 4294963200  ;;  %p16142_p12 = pmov %p16141_p0 }
 0x143   : > { %p16143_p13 = pmov %p16141_p0 }
 0x144   : > { %11398 = dma.done.wait (%p16142_p12), [#allocation9], 4112  }
 0x145   : > { %11400 = vsyncadd (%p16143_p13), [#allocation9], 4294963184  ;;  %p16144_p1 = pmov %p16141_p0 }
 0x146   : > { %p16145_p3 = pmov %p16141_p0 }
 0x147   : > { %11402 = dma.done.wait (%p16144_p1), [#allocation12], 16448  }
 0x148   : > { %11404 = vsyncadd (%p16145_p3), [#allocation12], 4294950848  ;;  %p16146_p6 = pmov %p16141_p0 }
 0x149   : > { %p16147_p2 = pmov %p16141_p0 }
 0x14a   : > { %11406 = dma.done.wait (%p16146_p6), [#allocation15], 4160  }
 0x14b   : > { %11408 = vsyncadd (%p16147_p2), [#allocation15], 4294963136  ;;  %p16148_p4 = pmov %p16141_p0 }
 0x14c   : > { %p16149_p10 = pmov %p16141_p0 }
 0x14d   : > { %11410 = dma.done.wait (%p16148_p4), [#allocation18], 16  }
 0x14e   : > { %11412 = vsyncadd (%p16149_p10), [#allocation18], 4294967280  ;;  %v15999_v0 = vmov 0   ;;  %v532_v1 = vld [vmem:[%s11860_s27] sm:$0xff]  ;;  %v533_v2 = vld [vmem:[%s11860_s27 + $0x8] sm:$0xff]  ;;  %s8656_s26 = sshll.u32 %s11856_s25, 9 }
 0x14f   : > { %2075 = vmatprep.subr.bf16.mxu0 %v15999_v0  ;;  %2995 = vmatprep.mubr.bf16.mxu1 %v15999_v0  ;;  %v534_v3 = vld [vmem:[%s11860_s27 + $0x10] sm:$0xff]  ;;  %v535_v4 = vld [vmem:[%s11860_s27 + $0x18] sm:$0xff]  ;;  %v788_v5 = vmul.f32 %v532_v1, %v532_v1  ;;  %v789_v6 = vmul.f32 %v533_v2, %v533_v2  ;;  %v540_v8 = vld [vmem:[%s11860_s27 + $0x40] sm:$0xff]  ;;  %s15731_s11 = scalar_lea.vmem [#allocation19], %s8656_s26  ;;  %s9020_s17 = sshll.u32 %s11529_s19, 13 }
 0x150   : > { %v790_v7 = vmul.f32 %v534_v3, %v534_v3  ;;  %v541_v9 = vld [vmem:[%s11860_s27 + $0x48] sm:$0xff]  ;;  %v791_v10 = vmul.f32 %v535_v4, %v535_v4  ;;  %v542_v11 = vld [vmem:[%s11860_s27 + $0x50] sm:$0xff]  ;;  %v543_v12 = vld [vmem:[%s11860_s27 + $0x58] sm:$0xff]  ;;  %v796_v13 = vmul.f32 %v540_v8, %v540_v8  ;;  %s8454_s4 = sshll.u32 %s15731_s11, 4  ;;  %s16736_s30 = sld [smem:[#allocation187_spill]]  ;;  %s15932_s4 = int_to_ptr.vmem [resolvable:$true] %s8454_s4 }
 0x151   : > { %v797_v14 = vmul.f32 %v541_v9, %v541_v9  ;;  %v536_v15 = vld [vmem:[%s11860_s27 + $0x20] sm:$0xff]  ;;  %v1044_v16 = vadd.f32 %v789_v6, %v788_v5  ;;  %v798_v17 = vmul.f32 %v542_v11, %v542_v11  ;;  %v799_v18 = vmul.f32 %v543_v12, %v543_v12  ;;  %v537_v19 = vld [vmem:[%s11860_s27 + $0x28] sm:$0xff]  ;;  %v538_v20 = vld [vmem:[%s11860_s27 + $0x30] sm:$0xff]  ;;  %s8441_s19 = scalar_lea.sflag [#allocation4], %s11856_s25  ;;  %s11341_s18 = scalar_lea.vmem %s15932_s4, 8192 }
 0x152   : > { %v539_v21 = vld [vmem:[%s11860_s27 + $0x38] sm:$0xff]  ;;  %v792_v22 = vmul.f32 %v536_v15, %v536_v15  ;;  %v793_v24 = vmul.f32 %v537_v19, %v537_v19  ;;  %v794_v25 = vmul.f32 %v538_v20, %v538_v20  ;;  %v544_v27 = vld [vmem:[%s11860_s27 + $0x60] sm:$0xff]  ;;  %v545_v28 = vld [vmem:[%s11860_s27 + $0x68] sm:$0xff]  ;;  %p11342_p5 = scmp.ne.s32.totalorder %s15932_s4, %s11341_s18  ;;  %p16737_p7 = scmp.ne.s32.totalorder %s16131_s12, 0 }
 0x153   : > { %v1054_v23 = vadd.f32 %v797_v14, %v796_v13  ;;  %v795_v26 = vmul.f32 %v539_v21, %v539_v21  ;;  %v546_v29 = vld [vmem:[%s11860_s27 + $0x70] sm:$0xff]  ;;  %v1045_v30 = vadd.f32 %v1044_v16, %v790_v7  ;;  %v547_v31 = vld [vmem:[%s11860_s27 + $0x78] sm:$0xff]  ;;  %v800_v32 = vmul.f32 %v544_v27, %v544_v27  ;;  %v552_v35 = vld [vmem:[%s11860_s27 + $0xa0] sm:$0xff]  ;;  %s11450_s22 = smov [#allocation19]  }
 0x154   : > { %v801_v33 = vmul.f32 %v545_v28, %v545_v28  ;;  %v802_v34 = vmul.f32 %v546_v29, %v546_v29  ;;  %v553_v36 = vld [vmem:[%s11860_s27 + $0xa8] sm:$0xff]  ;;  %v1049_v38 = vadd.f32 %v793_v24, %v792_v22  ;;  %v803_v39 = vmul.f32 %v547_v31, %v547_v31  ;;  %v554_v40 = vld [vmem:[%s11860_s27 + $0xb0] sm:$0xff]  ;;  %v555_v41 = vld [vmem:[%s11860_s27 + $0xb8] sm:$0xff]  ;;  %p11343_p9 = pnand %p11342_p5, %p16737_p7  ;;  %s11345_s28 = sshll.u32 %s11450_s22, 4  ;;  %s11346_s28 = int_to_ptr.vmem [resolvable:$false] %s11345_s28 }
 0x155   : > { %v1055_v37 = vadd.f32 %v1054_v23, %v798_v17  ;;  %v808_v42 = vmul.f32 %v552_v35, %v552_v35  ;;  %v548_v43 = vld [vmem:[%s11860_s27 + $0x80] sm:$0xff]  ;;  %v1046_v44 = vadd.f32 %v1045_v30, %v791_v10  ;;  %v809_v46 = vmul.f32 %v553_v36, %v553_v36  ;;  %v549_v48 = vld [vmem:[%s11860_s27 + $0x88] sm:$0xff]  ;;  %v550_v49 = vld [vmem:[%s11860_s27 + $0x90] sm:$0xff]  ;;  %s11347_s24 = scalar_lea.vmem %s11346_s28, 16384  ;;  %p11348_p11 = scmp.lt.s32.totalorder %s15932_s4, %s11346_s28 }
 0x156   : > { %v1059_v45 = vadd.f32 %v801_v33, %v800_v32  ;;  %v810_v47 = vmul.f32 %v554_v40, %v554_v40  ;;  %v551_v50 = vld [vmem:[%s11860_s27 + $0x98] sm:$0xff]  ;;  %v1050_v52 = vadd.f32 %v1049_v38, %v794_v25  ;;  %v811_v53 = vmul.f32 %v555_v41, %v555_v41  ;;  %v560_v55 = vld [vmem:[%s11860_s27 + $0xe0] sm:$0xff]  ;;  %v561_v56 = vld [vmem:[%s11860_s27 + $0xe8] sm:$0xff]  ;;  %s15930_s6 = scalar_lea.hbm %s16736_s30, %s9020_s17  ;;  %p11344_p8 = pneg %p11343_p9 }
 0x157   : > { %v1056_v51 = vadd.f32 %v1055_v37, %v799_v18  ;;  %v804_v54 = vmul.f32 %v548_v43, %v548_v43  ;;  %v562_v57 = vld [vmem:[%s11860_s27 + $0xf0] sm:$0xff]  ;;  %1047 = vadd.xlane.f32.xlu0 %v1046_v44  ;;  %v1069_v59 = vadd.f32 %v809_v46, %v808_v42  ;;  %v805_v60 = vmul.f32 %v549_v48, %v549_v48  ;;  %v563_v62 = vld [vmem:[%s11860_s27 + $0xf8] sm:$0xff]  ;;  %v556_v63 = vld [vmem:[%s11860_s27 + $0xc0] sm:$0xff]  ;;  %p11349_p0 = scmp.lt.s32.totalorder %s11347_s24, %s11341_s18 }
 0x158   : > { %v1060_v58 = vadd.f32 %v1059_v45, %v802_v34  ;;  %v806_v61 = vmul.f32 %v550_v49, %v550_v49  ;;  %v557_v1 = vld [vmem:[%s11860_s27 + $0xc8] sm:$0xff]  ;;  %v1051_v2 = vadd.f32 %v1050_v52, %v795_v26  ;;  %v807_v3 = vmul.f32 %v551_v50, %v551_v50  ;;  %v558_v6 = vld [vmem:[%s11860_s27 + $0xd0] sm:$0xff]  ;;  %v559_v7 = vld [vmem:[%s11860_s27 + $0xd8] sm:$0xff] }
 0x159   : > { %1057 = vadd.xlane.f32.xlu1 %v1056_v51  ;;  %v816_v4 = vmul.f32 %v560_v55, %v560_v55  ;;  %v817_v5 = vmul.f32 %v561_v56, %v561_v56  ;;  %v1070_v9 = vadd.f32 %v1069_v59, %v810_v47  ;;  %v1064_v10 = vadd.f32 %v805_v60, %v804_v54  ;;  %v568_v12 = vld [vmem:[%s11860_s27 + $0x120] sm:$0xff]  ;;  %v569_v13 = vld [vmem:[%s11860_s27 + $0x128] sm:$0xff]  ;;  %v570_v18 = vld [vmem:[%s11860_s27 + $0x130] sm:$0xff]  ;;  %p11350_p12 = por %p11349_p0, %p11348_p11 }
 0x15a   : > { %v1061_v8 = vadd.f32 %v1060_v58, %v803_v39  ;;  %v818_v11 = vmul.f32 %v562_v57, %v562_v57  ;;  %v819_v14 = vmul.f32 %v563_v62, %v563_v62  ;;  %v812_v16 = vmul.f32 %v556_v63, %v556_v63  ;;  %v571_v19 = vld [vmem:[%s11860_s27 + $0x138] sm:$0xff]  ;;  %v564_v20 = vld [vmem:[%s11860_s27 + $0x100] sm:$0xff]  ;;  %v565_v25 = vld [vmem:[%s11860_s27 + $0x108] sm:$0xff] }
 0x15b   : > { %v1079_v15 = vadd.f32 %v817_v5, %v816_v4  ;;  %v813_v17 = vmul.f32 %v557_v1, %v557_v1  ;;  %1052 = vadd.xlane.f32.xlu0 %v1051_v2  ;;  %v1071_v21 = vadd.f32 %v1070_v9, %v811_v53  ;;  %v1065_v22 = vadd.f32 %v1064_v10, %v806_v61  ;;  %v566_v26 = vld [vmem:[%s11860_s27 + $0x110] sm:$0xff]  ;;  %v567_v31 = vld [vmem:[%s11860_s27 + $0x118] sm:$0xff]  ;;  %v576_v32 = vld [vmem:[%s11860_s27 + $0x160] sm:$0xff]  ;;  %p11351_p13 = pnand %p11350_p12, %p11344_p8 }
 0x15c   : > { %v814_v23 = vmul.f32 %v558_v6, %v558_v6  ;;  %v815_v24 = vmul.f32 %v559_v7, %v559_v7  ;;  %v824_v29 = vmul.f32 %v568_v12, %v568_v12  ;;  %v825_v30 = vmul.f32 %v569_v13, %v569_v13  ;;  %v577_v33 = vld [vmem:[%s11860_s27 + $0x168] sm:$0xff]  ;;  %v578_v38 = vld [vmem:[%s11860_s27 + $0x170] sm:$0xff]  ;;  %v572_v43 = vld [vmem:[%s11860_s27 + $0x140] sm:$0xff] }
 0x15d   : > { %1062 = vadd.xlane.f32.xlu1 %v1061_v8  ;;  %v1080_v27 = vadd.f32 %v1079_v15, %v818_v11  ;;  %v1074_v28 = vadd.f32 %v813_v17, %v812_v16  ;;  %v1066_v34 = vadd.f32 %v1065_v22, %v807_v3  ;;  %v826_v35 = vmul.f32 %v570_v18, %v570_v18  ;;  %v573_v44 = vld [vmem:[%s11860_s27 + $0x148] sm:$0xff]  ;;  %v579_v47 = vld [vmem:[%s11860_s27 + $0x178] sm:$0xff]  ;;  %v574_v50 = vld [vmem:[%s11860_s27 + $0x150] sm:$0xff] }
 0x15e   : > { %v827_v36 = vmul.f32 %v571_v19, %v571_v19  ;;  %v820_v37 = vmul.f32 %v564_v20, %v564_v20  ;;  %v1089_v41 = vadd.f32 %v825_v30, %v824_v29  ;;  %v821_v42 = vmul.f32 %v565_v25, %v565_v25  ;;  %v575_v51 = vld [vmem:[%s11860_s27 + $0x158] sm:$0xff]  ;;  %v584_v56 = vld [vmem:[%s11860_s27 + $0x1a0] sm:$0xff]  ;;  %v585_v57 = vld [vmem:[%s11860_s27 + $0x1a8] sm:$0xff] }
 0x15f   : > { %v1081_v39 = vadd.f32 %v1080_v27, %v819_v14  ;;  %v1075_v40 = vadd.f32 %v1074_v28, %v814_v23  ;;  %1067 = vadd.xlane.f32.xlu0 %v1066_v34  ;;  %v822_v45 = vmul.f32 %v566_v26, %v566_v26  ;;  %v823_v46 = vmul.f32 %v567_v31, %v567_v31  ;;  %v586_v61 = vld [vmem:[%s11860_s27 + $0x1b0] sm:$0xff]  ;;  %v580_v62 = vld [vmem:[%s11860_s27 + $0x180] sm:$0xff]  ;;  %v587_v4 = vld [vmem:[%s11860_s27 + $0x1b8] sm:$0xff] }
 0x160   : > { %v832_v48 = vmul.f32 %v576_v32, %v576_v32  ;;  %v833_v49 = vmul.f32 %v577_v33, %v577_v33  ;;  %v1090_v53 = vadd.f32 %v1089_v41, %v826_v35  ;;  %v1084_v54 = vadd.f32 %v821_v42, %v820_v37  ;;  %v581_v5 = vld [vmem:[%s11860_s27 + $0x188] sm:$0xff]  ;;  %v582_v10 = vld [vmem:[%s11860_s27 + $0x190] sm:$0xff]  ;;  %v592_v11 = vld [vmem:[%s11860_s27 + $0x1e0] sm:$0xff] }
 0x161   : > { %1072 = vadd.xlane.f32.xlu1 %v1071_v21  ;;  %v1076_v52 = vadd.f32 %v1075_v40, %v815_v24  ;;  %v834_v55 = vmul.f32 %v578_v38, %v578_v38  ;;  %v828_v59 = vmul.f32 %v572_v43, %v572_v43  ;;  %v829_v60 = vmul.f32 %v573_v44, %v573_v44  ;;  %v593_v12 = vld [vmem:[%s11860_s27 + $0x1e8] sm:$0xff]  ;;  %v583_v16 = vld [vmem:[%s11860_s27 + $0x198] sm:$0xff]  ;;  %v594_v18 = vld [vmem:[%s11860_s27 + $0x1f0] sm:$0xff] }
 0x162   : > { %v1099_v58 = vadd.f32 %v833_v49, %v832_v48  ;;  %v1085_v63 = vadd.f32 %v1084_v54, %v822_v45  ;;  %v835_v1 = vmul.f32 %v579_v47, %v579_v47  ;;  %v830_v2 = vmul.f32 %v574_v50, %v574_v50  ;;  %v588_v23 = vld [vmem:[%s11860_s27 + $0x1c0] sm:$0xff]  ;;  %v589_v24 = vld [vmem:[%s11860_s27 + $0x1c8] sm:$0xff]  ;;  %v595_v27 = vld [vmem:[%s11860_s27 + $0x1f8] sm:$0xff] }
 0x163   : > { %v831_v3 = vmul.f32 %v575_v51, %v575_v51  ;;  %1077 = vadd.xlane.f32.xlu0 %v1076_v52  ;;  %v1094_v7 = vadd.f32 %v829_v60, %v828_v59  ;;  %v840_v8 = vmul.f32 %v584_v56, %v584_v56  ;;  %v841_v9 = vmul.f32 %v585_v57, %v585_v57  ;;  %v590_v30 = vld [vmem:[%s11860_s27 + $0x1d0] sm:$0xff]  ;;  %v591_v35 = vld [vmem:[%s11860_s27 + $0x1d8] sm:$0xff]  ;;  %v601_v37 = vld [vmem:[%s11860_s27 + $0x228] sm:$0xff] }
 0x164   : > { %v1100_v6 = vadd.f32 %v1099_v58, %v834_v55  ;;  %v1091_v13 = vadd.f32 %v1090_v53, %v827_v36  ;;  %v1086_v14 = vadd.f32 %v1085_v63, %v823_v46  ;;  %v842_v15 = vmul.f32 %v586_v61, %v586_v61  ;;  %v600_v36 = vld [vmem:[%s11860_s27 + $0x220] sm:$0xff]  ;;  %v602_v42 = vld [vmem:[%s11860_s27 + $0x230] sm:$0xff]  ;;  %v597_v47 = vld [vmem:[%s11860_s27 + $0x208] sm:$0xff] }
 0x165   : > { %1082 = vadd.xlane.f32.xlu1 %v1081_v39  ;;  %v836_v17 = vmul.f32 %v580_v62, %v580_v62  ;;  %v1095_v19 = vadd.f32 %v1094_v7, %v830_v2  ;;  %v843_v20 = vmul.f32 %v587_v4, %v587_v4  ;;  %v1109_v21 = vadd.f32 %v841_v9, %v840_v8  ;;  %v596_v43 = vld [vmem:[%s11860_s27 + $0x200] sm:$0xff]  ;;  %v598_v52 = vld [vmem:[%s11860_s27 + $0x210] sm:$0xff]  ;;  %v609_v54 = vld [vmem:[%s11860_s27 + $0x268] sm:$0xff] }
 0x166   : > { %v837_v22 = vmul.f32 %v581_v5, %v581_v5  ;;  %v1101_v25 = vadd.f32 %v1100_v6, %v835_v1  ;;  %v838_v26 = vmul.f32 %v582_v10, %v582_v10  ;;  %v848_v28 = vmul.f32 %v592_v11, %v592_v11  ;;  %v608_v53 = vld [vmem:[%s11860_s27 + $0x260] sm:$0xff]  ;;  %v603_v57 = vld [vmem:[%s11860_s27 + $0x238] sm:$0xff]  ;;  %v610_v61 = vld [vmem:[%s11860_s27 + $0x270] sm:$0xff] }
 0x167   : > { %v849_v29 = vmul.f32 %v593_v12, %v593_v12  ;;  %1087 = vadd.xlane.f32.xlu0 %v1086_v14  ;;  %v1096_v31 = vadd.f32 %v1095_v19, %v831_v3  ;;  %v839_v32 = vmul.f32 %v583_v16, %v583_v16  ;;  %v850_v34 = vmul.f32 %v594_v18, %v594_v18  ;;  %v599_v59 = vld [vmem:[%s11860_s27 + $0x218] sm:$0xff]  ;;  %v604_v4 = vld [vmem:[%s11860_s27 + $0x240] sm:$0xff]  ;;  %v605_v5 = vld [vmem:[%s11860_s27 + $0x248] sm:$0xff] }
 0x168   : > { %v1104_v33 = vadd.f32 %v837_v22, %v836_v17  ;;  %v1110_v38 = vadd.f32 %v1109_v21, %v842_v15  ;;  %v844_v40 = vmul.f32 %v588_v23, %v588_v23  ;;  %v845_v41 = vmul.f32 %v589_v24, %v589_v24  ;;  %v611_v3 = vld [vmem:[%s11860_s27 + $0x278] sm:$0xff]  ;;  %v606_v6 = vld [vmem:[%s11860_s27 + $0x250] sm:$0xff]  ;;  %v616_v11 = vld [vmem:[%s11860_s27 + $0x2a0] sm:$0xff] }
 0x169   : > { %1092 = vadd.xlane.f32.xlu1 %v1091_v13  ;;  %v1119_v39 = vadd.f32 %v849_v29, %v848_v28  ;;  %v851_v45 = vmul.f32 %v595_v27, %v595_v27  ;;  %v846_v46 = vmul.f32 %v590_v30, %v590_v30  ;;  %v847_v48 = vmul.f32 %v591_v35, %v591_v35  ;;  %v607_v10 = vld [vmem:[%s11860_s27 + $0x258] sm:$0xff]  ;;  %v617_v12 = vld [vmem:[%s11860_s27 + $0x2a8] sm:$0xff]  ;;  %v10030_v17 = vld [vmem:[#allocation7] sm:$0xff]  }
 0x16a   : > { %v1105_v44 = vadd.f32 %v1104_v33, %v838_v26  ;;  %v1114_v49 = vadd.f32 %v845_v41, %v844_v40  ;;  %v856_v50 = vmul.f32 %v600_v36, %v600_v36  ;;  %v857_v51 = vmul.f32 %v601_v37, %v601_v37  ;;  %v618_v22 = vld [vmem:[%s11860_s27 + $0x2b0] sm:$0xff]  ;;  %v612_v23 = vld [vmem:[%s11860_s27 + $0x280] sm:$0xff]  ;;  %v613_v24 = vld [vmem:[%s11860_s27 + $0x288] sm:$0xff]  ;;  %2076 = vmatpush1.bf16.msra.mxu0 %v10030_v17 }
 0x16b   : > { %1097 = vadd.xlane.f32.xlu0 %v1096_v31  ;;  %v1120_v56 = vadd.f32 %v1119_v39, %v850_v34  ;;  %v858_v58 = vmul.f32 %v602_v42, %v602_v42  ;;  %v852_v60 = vmul.f32 %v596_v43, %v596_v43  ;;  %v1111_v62 = vadd.f32 %v1110_v38, %v843_v20  ;;  %v619_v29 = vld [vmem:[%s11860_s27 + $0x2b8] sm:$0xff]  ;;  %v614_v30 = vld [vmem:[%s11860_s27 + $0x290] sm:$0xff]  ;;  %v625_v37 = vld [vmem:[%s11860_s27 + $0x2e8] sm:$0xff] }
 0x16c   : > { %v1106_v55 = vadd.f32 %v1105_v44, %v839_v32  ;;  %v1115_v63 = vadd.f32 %v1114_v49, %v846_v46  ;;  %v1129_v1 = vadd.f32 %v857_v51, %v856_v50  ;;  %v853_v2 = vmul.f32 %v597_v47, %v597_v47  ;;  %v615_v31 = vld [vmem:[%s11860_s27 + $0x298] sm:$0xff]  ;;  %v624_v32 = vld [vmem:[%s11860_s27 + $0x2e0] sm:$0xff]  ;;  %v626_v38 = vld [vmem:[%s11860_s27 + $0x2f0] sm:$0xff]  ;;  %2077 = vmatprep.subr.bf16.mxu0 %v15999_v0 }
 0x16d   : > { %1102 = vadd.xlane.f32.xlu1 %v1101_v25  ;;  %v854_v7 = vmul.f32 %v598_v52, %v598_v52  ;;  %v864_v8 = vmul.f32 %v608_v53, %v608_v53  ;;  %v865_v9 = vmul.f32 %v609_v54, %v609_v54  ;;  %v859_v13 = vmul.f32 %v603_v57, %v603_v57  ;;  %v10031_v43 = vld [vmem:[#allocation7 + $0x8] sm:$0xff]   ;;  %v627_v52 = vld [vmem:[%s11860_s27 + $0x2f8] sm:$0xff] }
 0x16e   : > { %v1130_v14 = vadd.f32 %v1129_v1, %v858_v58  ;;  %v855_v15 = vmul.f32 %v599_v59, %v599_v59  ;;  %v1124_v16 = vadd.f32 %v853_v2, %v852_v60  ;;  %v1121_v18 = vadd.f32 %v1120_v56, %v851_v45  ;;  %v621_v49 = vld [vmem:[%s11860_s27 + $0x2c8] sm:$0xff]  ;;  %v623_v59 = vld [vmem:[%s11860_s27 + $0x2d8] sm:$0xff]  ;;  %v632_v60 = vld [vmem:[%s11860_s27 + $0x320] sm:$0xff]  ;;  %2078 = vmatpush1.bf16.msra.mxu0 %v10031_v43 }
 0x16f   : > { %1107 = vadd.xlane.f32.xlu0 %v1106_v55  ;;  %v1116_v19 = vadd.f32 %v1115_v63, %v847_v48  ;;  %v860_v20 = vmul.f32 %v604_v4, %v604_v4  ;;  %v861_v21 = vmul.f32 %v605_v5, %v605_v5  ;;  %v866_v26 = vmul.f32 %v610_v61, %v610_v61  ;;  %v620_v48 = vld [vmem:[%s11860_s27 + $0x2c0] sm:$0xff]  ;;  %v622_v55 = vld [vmem:[%s11860_s27 + $0x2d0] sm:$0xff]  ;;  %v633_v61 = vld [vmem:[%s11860_s27 + $0x328] sm:$0xff] }
 0x170   : > { %v1125_v25 = vadd.f32 %v1124_v16, %v854_v7  ;;  %v1139_v27 = vadd.f32 %v865_v9, %v864_v8  ;;  %v862_v28 = vmul.f32 %v606_v6, %v606_v6  ;;  %v867_v33 = vmul.f32 %v611_v3, %v611_v3  ;;  %v628_v4 = vld [vmem:[%s11860_s27 + $0x300] sm:$0xff]  ;;  %2079 = vmatprep.subr.bf16.mxu0 %v15999_v0  ;;  %v629_v9 = vld [vmem:[%s11860_s27 + $0x308] sm:$0xff]  ;;  %v630_v16 = vld [vmem:[%s11860_s27 + $0x310] sm:$0xff] }
 0x171   : > { %1112 = vadd.xlane.f32.xlu1 %v1111_v62  ;;  %v1134_v34 = vadd.f32 %v861_v21, %v860_v20  ;;  %v872_v35 = vmul.f32 %v616_v11, %v616_v11  ;;  %v873_v36 = vmul.f32 %v617_v12, %v617_v12  ;;  %v1131_v39 = vadd.f32 %v1130_v14, %v859_v13  ;;  %v10032_v62 = vld [vmem:[#allocation7 + $0x10] sm:$0xff]   ;;  %v635_v13 = vld [vmem:[%s11860_s27 + $0x338] sm:$0xff]  ;;  %v640_v20 = vld [vmem:[%s11860_s27 + $0x360] sm:$0xff] }
 0x172   : > { %v1126_v40 = vadd.f32 %v1125_v25, %v855_v15  ;;  %v863_v41 = vmul.f32 %v607_v10, %v607_v10  ;;  %v868_v42 = vmul.f32 %v612_v23, %v612_v23  ;;  %v874_v45 = vmul.f32 %v618_v22, %v618_v22  ;;  %v634_v12 = vld [vmem:[%s11860_s27 + $0x330] sm:$0xff]  ;;  %2080 = vmatpush1.bf16.msra.mxu0 %v10032_v62  ;;  %v641_v21 = vld [vmem:[%s11860_s27 + $0x368] sm:$0xff]  ;;  %v10033_v22 = vld [vmem:[#allocation7 + $0x18] sm:$0xff]  }
 0x173   : > { %1117 = vadd.xlane.f32.xlu0 %v1116_v19  ;;  %v1135_v44 = vadd.f32 %v1134_v34, %v862_v28  ;;  %v1149_v46 = vadd.f32 %v873_v36, %v872_v35  ;;  %v869_v47 = vmul.f32 %v613_v24, %v613_v24  ;;  %v1140_v50 = vadd.f32 %v1139_v27, %v866_v26  ;;  %v636_v27 = vld [vmem:[%s11860_s27 + $0x340] sm:$0xff]  ;;  %v637_v28 = vld [vmem:[%s11860_s27 + $0x348] sm:$0xff]  ;;  %v642_v34 = vld [vmem:[%s11860_s27 + $0x370] sm:$0xff] }
 0x174   : > { %v870_v51 = vmul.f32 %v614_v30, %v614_v30  ;;  %v880_v53 = vmul.f32 %v624_v32, %v624_v32  ;;  %v881_v54 = vmul.f32 %v625_v37, %v625_v37  ;;  %v875_v56 = vmul.f32 %v619_v29, %v619_v29  ;;  %v638_v29 = vld [vmem:[%s11860_s27 + $0x350] sm:$0xff]  ;;  %2081 = vmatprep.subr.bf16.mxu0 %v15999_v0  ;;  %v648_v35 = vld [vmem:[%s11860_s27 + $0x3a0] sm:$0xff] }
 0x175   : > { %1122 = vadd.xlane.f32.xlu1 %v1121_v18  ;;  %v871_v57 = vmul.f32 %v615_v31, %v615_v31  ;;  %v1144_v58 = vadd.f32 %v869_v47, %v868_v42  ;;  %v882_v63 = vmul.f32 %v626_v38, %v626_v38  ;;  %v876_v2 = vmul.f32 %v620_v48, %v620_v48  ;;  %v631_v18 = vld [vmem:[%s11860_s27 + $0x318] sm:$0xff] }
 0x176   : > { %v1159_v1 = vadd.f32 %v881_v54, %v880_v53  ;;  %v877_v3 = vmul.f32 %v621_v49, %v621_v49  ;;  %v1136_v5 = vadd.f32 %v1135_v44, %v863_v41  ;;  %v1150_v6 = vadd.f32 %v1149_v46, %v874_v45  ;;  %v639_v42 = vld [vmem:[%s11860_s27 + $0x358] sm:$0xff]  ;;  %2082 = vmatpush1.bf16.msra.mxu0 %v10033_v22  ;;  %v10034_v45 = vld [vmem:[#allocation7 + $0x20] sm:$0xff]   ;;  %v645_v53 = vld [vmem:[%s11860_s27 + $0x388] sm:$0xff] }
 0x177   : > { %1127 = vadd.xlane.f32.xlu0 %v1126_v40  ;;  %v1145_v7 = vadd.f32 %v1144_v58, %v870_v51  ;;  %v878_v8 = vmul.f32 %v622_v55, %v622_v55  ;;  %v1141_v10 = vadd.f32 %v1140_v50, %v867_v33  ;;  %v888_v14 = vmul.f32 %v632_v60, %v632_v60  ;;  %v649_v40 = vld [vmem:[%s11860_s27 + $0x3a8] sm:$0xff]  ;;  %v644_v46 = vld [vmem:[%s11860_s27 + $0x380] sm:$0xff]  ;;  %v643_v50 = vld [vmem:[%s11860_s27 + $0x378] sm:$0xff] }
 0x178   : > { %v1154_v11 = vadd.f32 %v877_v3, %v876_v2  ;;  %v889_v15 = vmul.f32 %v633_v61, %v633_v61  ;;  %v883_v17 = vmul.f32 %v627_v52, %v627_v52  ;;  %v884_v19 = vmul.f32 %v628_v4, %v628_v4  ;;  %2083 = vmatprep.subr.bf16.mxu0 %v15999_v0  ;;  %v650_v52 = vld [vmem:[%s11860_s27 + $0x3b0] sm:$0xff]  ;;  %v657_v60 = vld [vmem:[%s11860_s27 + $0x3e8] sm:$0xff] }
 0x179   : > { %1132 = vadd.xlane.f32.xlu1 %v1131_v39  ;;  %v1160_v23 = vadd.f32 %v1159_v1, %v882_v63  ;;  %v879_v24 = vmul.f32 %v623_v59, %v623_v59  ;;  %v885_v26 = vmul.f32 %v629_v9, %v629_v9  ;;  %v1151_v30 = vadd.f32 %v1150_v6, %v875_v56  ;;  %v646_v54 = vld [vmem:[%s11860_s27 + $0x390] sm:$0xff]  ;;  %v656_v59 = vld [vmem:[%s11860_s27 + $0x3e0] sm:$0xff]  ;;  %v10035_v2 = vld [vmem:[#allocation7 + $0x28] sm:$0xff]  }
 0x17a   : > { %v1155_v25 = vadd.f32 %v1154_v11, %v878_v8  ;;  %v1146_v31 = vadd.f32 %v1145_v7, %v871_v57  ;;  %v890_v32 = vmul.f32 %v634_v12, %v634_v12  ;;  %v886_v33 = vmul.f32 %v630_v16, %v630_v16  ;;  %2084 = vmatpush1.bf16.msra.mxu0 %v10034_v45  ;;  %v652_v6 = vld [vmem:[%s11860_s27 + $0x3c0] sm:$0xff]  ;;  %v653_v7 = vld [vmem:[%s11860_s27 + $0x3c8] sm:$0xff]  ;;  %v651_v9 = vld [vmem:[%s11860_s27 + $0x3b8] sm:$0xff] }
 0x17b   : > { %1137 = vadd.xlane.f32.xlu0 %v1136_v5  ;;  %v1169_v36 = vadd.f32 %v889_v15, %v888_v14  ;;  %v1164_v37 = vadd.f32 %v885_v26, %v884_v19  ;;  %v896_v38 = vmul.f32 %v640_v20, %v640_v20  ;;  %v897_v39 = vmul.f32 %v641_v21, %v641_v21  ;;  %v647_v11 = vld [vmem:[%s11860_s27 + $0x398] sm:$0xff]  ;;  %v658_v12 = vld [vmem:[%s11860_s27 + $0x3f0] sm:$0xff]  ;;  %v664_v21 = vld [vmem:[%s11860_s27 + $0x420] sm:$0xff] }
 0x17c   : > { %v891_v41 = vmul.f32 %v635_v13, %v635_v13  ;;  %v892_v43 = vmul.f32 %v636_v27, %v636_v27  ;;  %v893_v44 = vmul.f32 %v637_v28, %v637_v28  ;;  %v1161_v47 = vadd.f32 %v1160_v23, %v883_v17  ;;  %2085 = vmatprep.subr.bf16.mxu0 %v15999_v0  ;;  %v10036_v19 = vld [vmem:[#allocation7 + $0x30] sm:$0xff]   ;;  %v665_v22 = vld [vmem:[%s11860_s27 + $0x428] sm:$0xff]  ;;  %v660_v27 = vld [vmem:[%s11860_s27 + $0x400] sm:$0xff] }
 0x17d   : > { %1142 = vadd.xlane.f32.xlu1 %v1141_v10  ;;  %v1156_v48 = vadd.f32 %v1155_v25, %v879_v24  ;;  %v887_v49 = vmul.f32 %v631_v18, %v631_v18  ;;  %v894_v51 = vmul.f32 %v638_v29, %v638_v29  ;;  %v1165_v55 = vadd.f32 %v1164_v37, %v886_v33  ;;  %v654_v20 = vld [vmem:[%s11860_s27 + $0x3d0] sm:$0xff]  ;;  %v659_v33 = vld [vmem:[%s11860_s27 + $0x3f8] sm:$0xff] }
 0x17e   : > { %v1174_v56 = vadd.f32 %v893_v44, %v892_v43  ;;  %v904_v57 = vmul.f32 %v648_v35, %v648_v35  ;;  %v905_v58 = vmul.f32 %v649_v40, %v649_v40  ;;  %v1170_v61 = vadd.f32 %v1169_v36, %v890_v32  ;;  %2086 = vmatpush1.bf16.msra.mxu0 %v10035_v2  ;;  %v662_v36 = vld [vmem:[%s11860_s27 + $0x410] sm:$0xff]  ;;  %v681_v2 = vld [vmem:[%s11860_s27 + $0x4a8] sm:$0xff] }
 0x17f   : > { %1147 = vadd.xlane.f32.xlu0 %v1146_v31  ;;  %v898_v62 = vmul.f32 %v642_v34, %v642_v34  ;;  %v1179_v63 = vadd.f32 %v897_v39, %v896_v38  ;;  %v900_v1 = vmul.f32 %v644_v46, %v644_v46  ;;  %v895_v3 = vmul.f32 %v639_v42, %v639_v42  ;;  %v655_v38 = vld [vmem:[%s11860_s27 + $0x3d8] sm:$0xff]  ;;  %v666_v42 = vld [vmem:[%s11860_s27 + $0x430] sm:$0xff] }
 0x180   : > { %v906_v4 = vmul.f32 %v650_v52, %v650_v52  ;;  %v901_v5 = vmul.f32 %v645_v53, %v645_v53  ;;  %v1175_v8 = vadd.f32 %v1174_v56, %v894_v51  ;;  %v1189_v10 = vadd.f32 %v905_v58, %v904_v57  ;;  %2087 = vmatprep.subr.bf16.mxu0 %v15999_v0  ;;  %v669_v51 = vld [vmem:[%s11860_s27 + $0x448] sm:$0xff] }
 0x181   : > { %1152 = vadd.xlane.f32.xlu1 %v1151_v30  ;;  %v912_v13 = vmul.f32 %v656_v59, %v656_v59  ;;  %v913_v14 = vmul.f32 %v657_v60, %v657_v60  ;;  %v1166_v15 = vadd.f32 %v1165_v55, %v887_v49  ;;  %v899_v16 = vmul.f32 %v643_v50, %v643_v50  ;;  %v661_v30 = vld [vmem:[%s11860_s27 + $0x408] sm:$0xff]  ;;  %v672_v49 = vld [vmem:[%s11860_s27 + $0x460] sm:$0xff]  ;;  %v670_v59 = vld [vmem:[%s11860_s27 + $0x450] sm:$0xff] }
 0x182   : > { %v902_v17 = vmul.f32 %v646_v54, %v646_v54  ;;  %v1184_v18 = vadd.f32 %v901_v5, %v900_v1  ;;  %v1171_v23 = vadd.f32 %v1170_v61, %v891_v41  ;;  %v1180_v24 = vadd.f32 %v1179_v63, %v898_v62  ;;  %v10037_v41 = vld [vmem:[#allocation7 + $0x38] sm:$0xff]   ;;  %v668_v50 = vld [vmem:[%s11860_s27 + $0x440] sm:$0xff]  ;;  %2088 = vmatpush1.bf16.msra.mxu0 %v10036_v19  ;;  %v673_v54 = vld [vmem:[%s11860_s27 + $0x468] sm:$0xff] }
 0x183   : > { %1157 = vadd.xlane.f32.xlu0 %v1156_v48  ;;  %v908_v25 = vmul.f32 %v652_v6, %v652_v6  ;;  %v909_v26 = vmul.f32 %v653_v7, %v653_v7  ;;  %v907_v28 = vmul.f32 %v651_v9, %v651_v9  ;;  %v903_v29 = vmul.f32 %v647_v11, %v647_v11  ;;  %v680_v1 = vld [vmem:[%s11860_s27 + $0x4a0] sm:$0xff]  ;;  %v677_v9 = vld [vmem:[%s11860_s27 + $0x488] sm:$0xff] }
 0x184   : > { %v1176_v31 = vadd.f32 %v1175_v8, %v895_v3  ;;  %v1190_v32 = vadd.f32 %v1189_v10, %v906_v4  ;;  %v914_v34 = vmul.f32 %v658_v12, %v658_v12  ;;  %v1199_v35 = vadd.f32 %v913_v14, %v912_v13  ;;  %2089 = vmatprep.subr.bf16.mxu0 %v15999_v0  ;;  %v667_v3 = vld [vmem:[%s11860_s27 + $0x438] sm:$0xff]  ;;  %v676_v8 = vld [vmem:[%s11860_s27 + $0x480] sm:$0xff]  ;;  %v674_v13 = vld [vmem:[%s11860_s27 + $0x470] sm:$0xff] }
 0x185   : > { %1162 = vadd.xlane.f32.xlu1 %v1161_v47  ;;  %v1185_v37 = vadd.f32 %v1184_v18, %v902_v17  ;;  %v910_v39 = vmul.f32 %v654_v20, %v654_v20  ;;  %v1194_v40 = vadd.f32 %v909_v26, %v908_v25  ;;  %v916_v43 = vmul.f32 %v660_v27, %v660_v27  ;;  %v663_v47 = vld [vmem:[%s11860_s27 + $0x418] sm:$0xff]  ;;  %v10038_v10 = vld [vmem:[#allocation7 + $0x40] sm:$0xff]  }
 0x186   : > { %v1181_v44 = vadd.f32 %v1180_v24, %v899_v16  ;;  %v920_v45 = vmul.f32 %v664_v21, %v664_v21  ;;  %v921_v46 = vmul.f32 %v665_v22, %v665_v22  ;;  %v917_v48 = vmul.f32 %v661_v30, %v661_v30  ;;  %2090 = vmatpush1.bf16.msra.mxu0 %v10037_v41  ;;  %v671_v16 = vld [vmem:[%s11860_s27 + $0x458] sm:$0xff]  ;;  %v10039_v22 = vld [vmem:[#allocation7 + $0x48] sm:$0xff]   ;;  %v678_v24 = vld [vmem:[%s11860_s27 + $0x490] sm:$0xff] }
 0x187   : > { %1167 = vadd.xlane.f32.xlu0 %v1166_v15  ;;  %v915_v52 = vmul.f32 %v659_v33, %v659_v33  ;;  %v918_v53 = vmul.f32 %v662_v36, %v662_v36  ;;  %v1191_v55 = vadd.f32 %v1190_v32, %v907_v28  ;;  %v1200_v56 = vadd.f32 %v1199_v35, %v914_v34  ;;  %v675_v28 = vld [vmem:[%s11860_s27 + $0x478] sm:$0xff]  ;;  %v689_v32 = vld [vmem:[%s11860_s27 + $0x4e8] sm:$0xff] }
 0x188   : > { %v911_v57 = vmul.f32 %v655_v38, %v655_v38  ;;  %v1204_v58 = vadd.f32 %v917_v48, %v916_v43  ;;  %v1186_v60 = vadd.f32 %v1185_v37, %v903_v29  ;;  %v1195_v61 = vadd.f32 %v1194_v40, %v910_v39  ;;  %2091 = vmatprep.subr.bf16.mxu0 %v15999_v0  ;;  %v683_v36 = vld [vmem:[%s11860_s27 + $0x4b8] sm:$0xff]  ;;  %v684_v37 = vld [vmem:[%s11860_s27 + $0x4c0] sm:$0xff]  ;;  %v685_v38 = vld [vmem:[%s11860_s27 + $0x4c8] sm:$0xff] }
 0x189   : > { %1172 = vadd.xlane.f32.xlu1 %v1171_v23  ;;  %v924_v62 = vmul.f32 %v668_v50, %v668_v50  ;;  %v925_v63 = vmul.f32 %v669_v51, %v669_v51  ;;  %v922_v4 = vmul.f32 %v666_v42, %v666_v42  ;;  %v1209_v5 = vadd.f32 %v921_v46, %v920_v45  ;;  %v682_v23 = vld [vmem:[%s11860_s27 + $0x4b0] sm:$0xff]  ;;  %v679_v41 = vld [vmem:[%s11860_s27 + $0x498] sm:$0xff] }
 0x18a   : > { %v928_v6 = vmul.f32 %v672_v49, %v672_v49  ;;  %v929_v7 = vmul.f32 %v673_v54, %v673_v54  ;;  %v919_v11 = vmul.f32 %v663_v47, %v663_v47  ;;  %v1205_v12 = vadd.f32 %v1204_v58, %v918_v53  ;;  %2092 = vmatpush1.bf16.msra.mxu0 %v10038_v10  ;;  %v10040_v50 = vld [vmem:[#allocation7 + $0x50] sm:$0xff]   ;;  %v697_v58 = vld [vmem:[%s11860_s27 + $0x528] sm:$0xff] }
 0x18b   : > { %1177 = vadd.xlane.f32.xlu0 %v1176_v31  ;;  %v926_v14 = vmul.f32 %v670_v59, %v670_v59  ;;  %v1214_v15 = vadd.f32 %v925_v63, %v924_v62  ;;  %v936_v17 = vmul.f32 %v680_v1, %v680_v1  ;;  %v937_v18 = vmul.f32 %v681_v2, %v681_v2  ;;  %v688_v31 = vld [vmem:[%s11860_s27 + $0x4e0] sm:$0xff]  ;;  %v686_v53 = vld [vmem:[%s11860_s27 + $0x4d0] sm:$0xff]  ;;  %v693_v63 = vld [vmem:[%s11860_s27 + $0x508] sm:$0xff] }
 0x18c   : > { %v932_v19 = vmul.f32 %v676_v8, %v676_v8  ;;  %v1196_v20 = vadd.f32 %v1195_v61, %v911_v57  ;;  %v923_v21 = vmul.f32 %v667_v3, %v667_v3  ;;  %v933_v25 = vmul.f32 %v677_v9, %v677_v9  ;;  %2093 = vmatprep.subr.bf16.mxu0 %v15999_v0  ;;  %v696_v57 = vld [vmem:[%s11860_s27 + $0x520] sm:$0xff]  ;;  %v694_v1 = vld [vmem:[%s11860_s27 + $0x510] sm:$0xff]  ;;  %v10041_v3 = vld [vmem:[#allocation7 + $0x58] sm:$0xff]  }
 0x18d   : > { %1182 = vadd.xlane.f32.xlu1 %v1181_v44  ;;  %v1201_v26 = vadd.f32 %v1200_v56, %v915_v52  ;;  %v1210_v27 = vadd.f32 %v1209_v5, %v922_v4  ;;  %v930_v29 = vmul.f32 %v674_v13, %v674_v13  ;;  %v1219_v30 = vadd.f32 %v929_v7, %v928_v6  ;;  %v690_v44 = vld [vmem:[%s11860_s27 + $0x4f0] sm:$0xff]  ;;  %v692_v59 = vld [vmem:[%s11860_s27 + $0x500] sm:$0xff]  ;;  %v691_v4 = vld [vmem:[%s11860_s27 + $0x4f8] sm:$0xff] }
 0x18e   : > { %v1206_v33 = vadd.f32 %v1205_v12, %v919_v11  ;;  %v927_v34 = vmul.f32 %v671_v16, %v671_v16  ;;  %v1215_v35 = vadd.f32 %v1214_v15, %v926_v14  ;;  %v938_v39 = vmul.f32 %v682_v23, %v682_v23  ;;  %2094 = vmatpush1.bf16.msra.mxu0 %v10039_v22  ;;  %v687_v6 = vld [vmem:[%s11860_s27 + $0x4d8] sm:$0xff]  ;;  %v698_v9 = vld [vmem:[%s11860_s27 + $0x530] sm:$0xff]  ;;  %v700_v15 = vld [vmem:[%s11860_s27 + $0x540] sm:$0xff] }
 0x18f   : > { %1187 = vadd.xlane.f32.xlu0 %v1186_v60  ;;  %v1229_v40 = vadd.f32 %v937_v18, %v936_v17  ;;  %v934_v42 = vmul.f32 %v678_v24, %v678_v24  ;;  %v1224_v43 = vadd.f32 %v933_v25, %v932_v19  ;;  %v944_v45 = vmul.f32 %v688_v31, %v688_v31  ;;  %v695_v14 = vld [vmem:[%s11860_s27 + $0x518] sm:$0xff]  ;;  %v701_v16 = vld [vmem:[%s11860_s27 + $0x548] sm:$0xff]  ;;  %v704_v19 = vld [vmem:[%s11860_s27 + $0x560] sm:$0xff] }
 0x190   : > { %v945_v46 = vmul.f32 %v689_v32, %v689_v32  ;;  %v940_v47 = vmul.f32 %v684_v37, %v684_v37  ;;  %v941_v48 = vmul.f32 %v685_v38, %v685_v38  ;;  %v1211_v49 = vadd.f32 %v1210_v27, %v923_v21  ;;  %2095 = vmatprep.subr.bf16.mxu0 %v15999_v0  ;;  %v702_v23 = vld [vmem:[%s11860_s27 + $0x550] sm:$0xff]  ;;  %v713_v31 = vld [vmem:[%s11860_s27 + $0x5a8] sm:$0xff]  ;;  %v699_v32 = vld [vmem:[%s11860_s27 + $0x538] sm:$0xff] }
 0x191   : > { %1192 = vadd.xlane.f32.xlu1 %v1191_v55  ;;  %v931_v51 = vmul.f32 %v675_v28, %v675_v28  ;;  %v1220_v52 = vadd.f32 %v1219_v30, %v930_v29  ;;  %v1216_v54 = vadd.f32 %v1215_v35, %v927_v34  ;;  %v939_v55 = vmul.f32 %v683_v36, %v683_v36  ;;  %v708_v37 = vld [vmem:[%s11860_s27 + $0x580] sm:$0xff]  ;;  %v709_v38 = vld [vmem:[%s11860_s27 + $0x588] sm:$0xff] }
 0x192   : > { %v935_v56 = vmul.f32 %v679_v41, %v679_v41  ;;  %v1230_v60 = vadd.f32 %v1229_v40, %v938_v39  ;;  %v1225_v61 = vadd.f32 %v1224_v43, %v934_v42  ;;  %v946_v62 = vmul.f32 %v690_v44, %v690_v44  ;;  %2096 = vmatpush1.bf16.msra.mxu0 %v10040_v50  ;;  %v10042_v39 = vld [vmem:[#allocation7 + $0x60] sm:$0xff]   ;;  %v706_v42 = vld [vmem:[%s11860_s27 + $0x570] sm:$0xff] }
 0x193   : > { %1197 = vadd.xlane.f32.xlu0 %v1196_v20  ;;  %v948_v2 = vmul.f32 %v692_v59, %v692_v59  ;;  %v1239_v5 = vadd.f32 %v945_v46, %v944_v45  ;;  %v942_v7 = vmul.f32 %v686_v53, %v686_v53  ;;  %v1234_v8 = vadd.f32 %v941_v48, %v940_v47  ;;  %v705_v20 = vld [vmem:[%s11860_s27 + $0x568] sm:$0xff]  ;;  %v703_v45 = vld [vmem:[%s11860_s27 + $0x558] sm:$0xff]  ;;  %v714_v47 = vld [vmem:[%s11860_s27 + $0x5b0] sm:$0xff] }
 0x194   : > { %v949_v10 = vmul.f32 %v693_v63, %v693_v63  ;;  %v1221_v11 = vadd.f32 %v1220_v52, %v931_v51  ;;  %v952_v12 = vmul.f32 %v696_v57, %v696_v57  ;;  %v953_v13 = vmul.f32 %v697_v58, %v697_v58  ;;  %2097 = vmatprep.subr.bf16.mxu0 %v15999_v0 }
 0x195   : > { %1202 = vadd.xlane.f32.xlu1 %v1201_v26  ;;  %v950_v17 = vmul.f32 %v694_v1, %v694_v1  ;;  %v1231_v21 = vadd.f32 %v1230_v60, %v939_v55  ;;  %v947_v22 = vmul.f32 %v691_v4, %v691_v4  ;;  %v956_v24 = vmul.f32 %v700_v15, %v700_v15  ;;  %v712_v26 = vld [vmem:[%s11860_s27 + $0x5a0] sm:$0xff]  ;;  %v721_v55 = vld [vmem:[%s11860_s27 + $0x5e8] sm:$0xff]  ;;  %v707_v1 = vld [vmem:[%s11860_s27 + $0x578] sm:$0xff] }
 0x196   : > { %v1244_v18 = vadd.f32 %v949_v10, %v948_v2  ;;  %v957_v25 = vmul.f32 %v701_v16, %v701_v16  ;;  %v1226_v27 = vadd.f32 %v1225_v61, %v935_v56  ;;  %v1240_v28 = vadd.f32 %v1239_v5, %v946_v62  ;;  %2098 = vmatpush1.bf16.msra.mxu0 %v10041_v3  ;;  %v716_v56 = vld [vmem:[%s11860_s27 + $0x5c0] sm:$0xff]  ;;  %v717_v61 = vld [vmem:[%s11860_s27 + $0x5c8] sm:$0xff]  ;;  %v715_v5 = vld [vmem:[%s11860_s27 + $0x5b8] sm:$0xff] }
 0x197   : > { %1207 = vadd.xlane.f32.xlu0 %v1206_v33  ;;  %v943_v29 = vmul.f32 %v687_v6, %v687_v6  ;;  %v1235_v30 = vadd.f32 %v1234_v8, %v942_v7  ;;  %v954_v33 = vmul.f32 %v698_v9, %v698_v9  ;;  %v1249_v34 = vadd.f32 %v953_v13, %v952_v12  ;;  %v10043_v62 = vld [vmem:[#allocation7 + $0x68] sm:$0xff]   ;;  %v724_v9 = vld [vmem:[%s11860_s27 + $0x600] sm:$0xff]  ;;  %v722_v12 = vld [vmem:[%s11860_s27 + $0x5f0] sm:$0xff] }
 0x198   : > { %v960_v35 = vmul.f32 %v704_v19, %v704_v19  ;;  %v961_v36 = vmul.f32 %v705_v20, %v705_v20  ;;  %v951_v40 = vmul.f32 %v695_v14, %v695_v14  ;;  %v1245_v41 = vadd.f32 %v1244_v18, %v950_v17  ;;  %2099 = vmatprep.subr.bf16.mxu0 %v15999_v0  ;;  %v725_v10 = vld [vmem:[%s11860_s27 + $0x608] sm:$0xff]  ;;  %v718_v20 = vld [vmem:[%s11860_s27 + $0x5d0] sm:$0xff] }
 0x199   : > { %1212 = vadd.xlane.f32.xlu1 %v1211_v49  ;;  %v958_v43 = vmul.f32 %v702_v23, %v702_v23  ;;  %v968_v44 = vmul.f32 %v712_v26, %v712_v26  ;;  %v1254_v46 = vadd.f32 %v957_v25, %v956_v24  ;;  %v969_v48 = vmul.f32 %v713_v31, %v713_v31  ;;  %v710_v49 = vld [vmem:[%s11860_s27 + $0x590] sm:$0xff]  ;;  %v728_v23 = vld [vmem:[%s11860_s27 + $0x620] sm:$0xff]  ;;  %v729_v24 = vld [vmem:[%s11860_s27 + $0x628] sm:$0xff] }
 0x19a   : > { %v964_v50 = vmul.f32 %v708_v37, %v708_v37  ;;  %v965_v51 = vmul.f32 %v709_v38, %v709_v38  ;;  %v1236_v52 = vadd.f32 %v1235_v30, %v943_v29  ;;  %v955_v53 = vmul.f32 %v699_v32, %v699_v32  ;;  %2100 = vmatpush1.bf16.msra.mxu0 %v10042_v39  ;;  %v726_v31 = vld [vmem:[%s11860_s27 + $0x610] sm:$0xff]  ;;  %v10045_v32 = vld [vmem:[#allocation7 + $0x78] sm:$0xff]   ;;  %v732_v38 = vld [vmem:[%s11860_s27 + $0x640] sm:$0xff] }
 0x19b   : > { %1217 = vadd.xlane.f32.xlu0 %v1216_v54  ;;  %v720_v54 = vld [vmem:[%s11860_s27 + $0x5e0] sm:$0xff]  ;;  %v1241_v57 = vadd.f32 %v1240_v28, %v947_v22  ;;  %v1250_v58 = vadd.f32 %v1249_v34, %v954_v33  ;;  %v962_v59 = vmul.f32 %v706_v42, %v706_v42  ;;  %v1259_v60 = vadd.f32 %v961_v36, %v960_v35  ;;  %v723_v34 = vld [vmem:[%s11860_s27 + $0x5f8] sm:$0xff]  ;;  %v733_v39 = vld [vmem:[%s11860_s27 + $0x648] sm:$0xff] }
 0x19c   : > { %v1246_v63 = vadd.f32 %v1245_v41, %v951_v40  ;;  %v959_v2 = vmul.f32 %v703_v45, %v703_v45  ;;  %v970_v3 = vmul.f32 %v714_v47, %v714_v47  ;;  %2101 = vmatprep.subr.bf16.mxu0 %v15999_v0  ;;  %v1255_v4 = vadd.f32 %v1254_v46, %v958_v43  ;;  %v719_v41 = vld [vmem:[%s11860_s27 + $0x5d8] sm:$0xff]  ;;  %v730_v42 = vld [vmem:[%s11860_s27 + $0x630] sm:$0xff] }
 0x19d   : > { %1222 = vadd.xlane.f32.xlu1 %v1221_v11  ;;  %v1269_v6 = vadd.f32 %v969_v48, %v968_v44  ;;  %v966_v7 = vmul.f32 %v710_v49, %v710_v49  ;;  %v1264_v8 = vadd.f32 %v965_v51, %v964_v50  ;;  %v711_v11 = vld [vmem:[%s11860_s27 + $0x598] sm:$0xff]  ;;  %v976_v13 = vmul.f32 %v720_v54, %v720_v54  ;;  %v736_v48 = vld [vmem:[%s11860_s27 + $0x660] sm:$0xff]  ;;  %v737_v49 = vld [vmem:[%s11860_s27 + $0x668] sm:$0xff] }
 0x19e   : > { %v977_v14 = vmul.f32 %v721_v55, %v721_v55  ;;  %v972_v15 = vmul.f32 %v716_v56, %v716_v56  ;;  %v973_v16 = vmul.f32 %v717_v61, %v717_v61  ;;  %v1251_v17 = vadd.f32 %v1250_v58, %v955_v53  ;;  %2102 = vmatpush1.bf16.msra.mxu0 %v10043_v62  ;;  %v727_v45 = vld [vmem:[%s11860_s27 + $0x618] sm:$0xff]  ;;  %v734_v50 = vld [vmem:[%s11860_s27 + $0x650] sm:$0xff]  ;;  %v744_v56 = vld [vmem:[%s11860_s27 + $0x6a0] sm:$0xff] }
 0x19f   : > { %1227 = vadd.xlane.f32.xlu0 %v1226_v27  ;;  %v963_v18 = vmul.f32 %v707_v1, %v707_v1  ;;  %v1260_v19 = vadd.f32 %v1259_v60, %v962_v59  ;;  %v971_v22 = vmul.f32 %v715_v5, %v715_v5  ;;  %v980_v25 = vmul.f32 %v724_v9, %v724_v9  ;;  %v731_v53 = vld [vmem:[%s11860_s27 + $0x638] sm:$0xff]  ;;  %v740_v58 = vld [vmem:[%s11860_s27 + $0x680] sm:$0xff]  ;;  %v741_v1 = vld [vmem:[%s11860_s27 + $0x688] sm:$0xff] }
 0x1a0   : > { %v981_v26 = vmul.f32 %v725_v10, %v725_v10  ;;  %2103 = vmatprep.subr.bf16.mxu0 %v15999_v0  ;;  %v1256_v27 = vadd.f32 %v1255_v4, %v959_v2  ;;  %v1270_v28 = vadd.f32 %v1269_v6, %v970_v3  ;;  %v967_v29 = vmul.f32 %v711_v11, %v711_v11  ;;  %v735_v6 = vld [vmem:[%s11860_s27 + $0x658] sm:$0xff] }
 0x1a1   : > { %1232 = vadd.xlane.f32.xlu1 %v1231_v21  ;;  %v10044_v21 = vld [vmem:[#allocation7 + $0x70] sm:$0xff]   ;;  %v978_v30 = vmul.f32 %v722_v12, %v722_v12  ;;  %v1265_v33 = vadd.f32 %v1264_v8, %v966_v7  ;;  %v1279_v35 = vadd.f32 %v977_v14, %v976_v13  ;;  %v974_v36 = vmul.f32 %v718_v20, %v718_v20  ;;  %v749_v20 = vld [vmem:[%s11860_s27 + $0x6c8] sm:$0xff] }
 0x1a2   : > { %v1274_v37 = vadd.f32 %v973_v16, %v972_v15  ;;  %v1261_v40 = vadd.f32 %v1260_v19, %v963_v18  ;;  %v984_v43 = vmul.f32 %v728_v23, %v728_v23  ;;  %v985_v44 = vmul.f32 %v729_v24, %v729_v24  ;;  %2104 = vmatpush1.bf16.msra.mxu0 %v10044_v21  ;;  %v746_v7 = vld [vmem:[%s11860_s27 + $0x6b0] sm:$0xff]  ;;  %v753_v18 = vld [vmem:[%s11860_s27 + $0x6e8] sm:$0xff]  ;;  %v748_v19 = vld [vmem:[%s11860_s27 + $0x6c0] sm:$0xff] }
 0x1a3   : > { %1237 = vadd.xlane.f32.xlu0 %v1236_v52  ;;  %v982_v46 = vmul.f32 %v726_v31, %v726_v31  ;;  %v1284_v47 = vadd.f32 %v981_v26, %v980_v25  ;;  %2105 = vmatprep.subr.bf16.mxu0 %v15999_v0  ;;  %v1271_v51 = vadd.f32 %v1270_v28, %v971_v22  ;;  %v742_v12 = vld [vmem:[%s11860_s27 + $0x690] sm:$0xff]  ;;  %v739_v23 = vld [vmem:[%s11860_s27 + $0x678] sm:$0xff] }
 0x1a4   : > { %v979_v52 = vmul.f32 %v723_v34, %v723_v34  ;;  %v988_v54 = vmul.f32 %v732_v38, %v732_v38  ;;  %v989_v55 = vmul.f32 %v733_v39, %v733_v39  ;;  %v1266_v59 = vadd.f32 %v1265_v33, %v967_v29  ;;  %v747_v28 = vld [vmem:[%s11860_s27 + $0x6b8] sm:$0xff]  ;;  %v750_v38 = vld [vmem:[%s11860_s27 + $0x6d0] sm:$0xff]  ;;  %v756_v39 = vld [vmem:[%s11860_s27 + $0x700] sm:$0xff] }
 0x1a5   : > { %1242 = vadd.xlane.f32.xlu1 %v1241_v57  ;;  %v745_v57 = vld [vmem:[%s11860_s27 + $0x6a8] sm:$0xff]  ;;  %v1280_v60 = vadd.f32 %v1279_v35, %v978_v30  ;;  %v975_v61 = vmul.f32 %v719_v41, %v719_v41  ;;  %v1275_v62 = vadd.f32 %v1274_v37, %v974_v36  ;;  %v986_v2 = vmul.f32 %v730_v42, %v730_v42  ;;  %v743_v29 = vld [vmem:[%s11860_s27 + $0x698] sm:$0xff]  ;;  %v754_v37 = vld [vmem:[%s11860_s27 + $0x6f0] sm:$0xff] }
 0x1a6   : > { %v1289_v3 = vadd.f32 %v985_v44, %v984_v43  ;;  %v992_v4 = vmul.f32 %v736_v48, %v736_v48  ;;  %v993_v5 = vmul.f32 %v737_v49, %v737_v49  ;;  %2106 = vmatpush1.bf16.msra.mxu0 %v10045_v32  ;;  %v983_v8 = vmul.f32 %v727_v45, %v727_v45  ;;  %v757_v44 = vld [vmem:[%s11860_s27 + $0x708] sm:$0xff]  ;;  %v755_v48 = vld [vmem:[%s11860_s27 + $0x6f8] sm:$0xff]  ;;  %v760_v49 = vld [vmem:[%s11860_s27 + $0x720] sm:$0xff] }
 0x1a7   : > { %1247 = vadd.xlane.f32.xlu0 %v1246_v63  ;;  %v738_v63 = vld [vmem:[%s11860_s27 + $0x670] sm:$0xff]  ;;  %v1285_v9 = vadd.f32 %v1284_v47, %v982_v46  ;;  %v1000_v10 = vmul.f32 %v744_v56, %v744_v56  ;;  %v1001_v11 = vmul.f32 %v745_v57, %v745_v57  ;;  %2364 = vmatprep.subr.bf16.mxu0 %v15999_v0 }
 0x1a8   : > { %v990_v13 = vmul.f32 %v734_v50, %v734_v50  ;;  %v1294_v14 = vadd.f32 %v989_v55, %v988_v54  ;;  %v996_v15 = vmul.f32 %v740_v58, %v740_v58  ;;  %v997_v16 = vmul.f32 %v741_v1, %v741_v1  ;;  %v761_v50 = vld [vmem:[%s11860_s27 + $0x728] sm:$0xff]  ;;  %v751_v54 = vld [vmem:[%s11860_s27 + $0x6d8] sm:$0xff]  ;;  %v762_v57 = vld [vmem:[%s11860_s27 + $0x730] sm:$0xff] }
 0x1a9   : > { %1252 = vadd.xlane.f32.xlu1 %v1251_v17  ;;  %v752_v17 = vld [vmem:[%s11860_s27 + $0x6e0] sm:$0xff]  ;;  %v1276_v21 = vadd.f32 %v1275_v62, %v975_v61  ;;  %v987_v22 = vmul.f32 %v731_v53, %v731_v53  ;;  %v1281_v24 = vadd.f32 %v1280_v60, %v979_v52  ;;  %v1290_v25 = vadd.f32 %v1289_v3, %v986_v2  ;;  %v758_v58 = vld [vmem:[%s11860_s27 + $0x710] sm:$0xff] }
 0x1aa   : > { %v994_v26 = vmul.f32 %v738_v63, %v738_v63  ;;  %v991_v30 = vmul.f32 %v735_v6, %v735_v6  ;;  %v1002_v31 = vmul.f32 %v746_v7, %v746_v7  ;;  %v1309_v32 = vadd.f32 %v1001_v11, %v1000_v10  ;;  %v759_v7 = vld [vmem:[%s11860_s27 + $0x718] sm:$0xff] }
 0x1ab   : > { %1257 = vadd.xlane.f32.xlu0 %v1256_v27  ;;  %v1299_v27 = vadd.f32 %v993_v5, %v992_v4  ;;  %v1286_v33 = vadd.f32 %v1285_v9, %v983_v8  ;;  %v1295_v34 = vadd.f32 %v1294_v14, %v990_v13  ;;  %v998_v35 = vmul.f32 %v742_v12, %v742_v12  ;;  %v768_v12 = vld [vmem:[%s11860_s27 + $0x760] sm:$0xff]  ;;  %v769_v13 = vld [vmem:[%s11860_s27 + $0x768] sm:$0xff] }
 0x1ac   : > { %v1304_v36 = vadd.f32 %v997_v16, %v996_v15  ;;  %v1009_v41 = vmul.f32 %v753_v18, %v753_v18  ;;  %v1004_v42 = vmul.f32 %v748_v19, %v748_v19  ;;  %v1005_v43 = vmul.f32 %v749_v20, %v749_v20  ;;  %v764_v14 = vld [vmem:[%s11860_s27 + $0x740] sm:$0xff]  ;;  %v765_v19 = vld [vmem:[%s11860_s27 + $0x748] sm:$0xff] }
 0x1ad   : > { %1262 = vadd.xlane.f32.xlu1 %v1261_v40  ;;  %v1008_v40 = vmul.f32 %v752_v17, %v752_v17  ;;  %v1291_v45 = vadd.f32 %v1290_v25, %v987_v22  ;;  %v995_v46 = vmul.f32 %v739_v23, %v739_v23  ;;  %v1300_v47 = vadd.f32 %v1299_v27, %v994_v26  ;;  %v763_v17 = vld [vmem:[%s11860_s27 + $0x738] sm:$0xff]  ;;  %v770_v22 = vld [vmem:[%s11860_s27 + $0x770] sm:$0xff] }
 0x1ae   : > { %v1310_v52 = vadd.f32 %v1309_v32, %v1002_v31  ;;  %v999_v53 = vmul.f32 %v743_v29, %v743_v29  ;;  %v1296_v55 = vadd.f32 %v1295_v34, %v991_v30  ;;  %v1305_v56 = vadd.f32 %v1304_v36, %v998_v35  ;;  %v766_v25 = vld [vmem:[%s11860_s27 + $0x750] sm:$0xff]  ;;  %v767_v29 = vld [vmem:[%s11860_s27 + $0x758] sm:$0xff] }
 0x1af   : > { %1267 = vadd.xlane.f32.xlu0 %v1266_v59  ;;  %v1012_v59 = vmul.f32 %v756_v39, %v756_v39  ;;  %v1013_v60 = vmul.f32 %v757_v44, %v757_v44  ;;  %v1010_v61 = vmul.f32 %v754_v37, %v754_v37  ;;  %v1319_v62 = vadd.f32 %v1009_v41, %v1008_v40  ;;  %v771_v32 = vld [vmem:[%s11860_s27 + $0x778] sm:$0xff]  ;;  %v776_v41 = vld [vmem:[%s11860_s27 + $0x7a0] sm:$0xff] }
 0x1b0   : > { %v1006_v63 = vmul.f32 %v750_v38, %v750_v38  ;;  %v1314_v1 = vadd.f32 %v1005_v43, %v1004_v42  ;;  %v1301_v2 = vadd.f32 %v1300_v47, %v995_v46  ;;  %v1016_v3 = vmul.f32 %v760_v49, %v760_v49  ;;  %v777_v42 = vld [vmem:[%s11860_s27 + $0x7a8] sm:$0xff]  ;;  %v772_v43 = vld [vmem:[%s11860_s27 + $0x780] sm:$0xff] }
 0x1b1   : > { %1272 = vadd.xlane.f32.xlu1 %v1271_v51  ;;  %v1003_v51 = vmul.f32 %v747_v28, %v747_v28  ;;  %v1017_v4 = vmul.f32 %v761_v50, %v761_v50  ;;  %v1011_v6 = vmul.f32 %v755_v48, %v755_v48  ;;  %v1306_v8 = vadd.f32 %v1305_v56, %v999_v53  ;;  %v773_v47 = vld [vmem:[%s11860_s27 + $0x788] sm:$0xff]  ;;  %v774_v53 = vld [vmem:[%s11860_s27 + $0x790] sm:$0xff] }
 0x1b2   : > { %v1007_v9 = vmul.f32 %v751_v54, %v751_v54  ;;  %v1014_v10 = vmul.f32 %v758_v58, %v758_v58  ;;  %v1324_v11 = vadd.f32 %v1013_v60, %v1012_v59  ;;  %v1320_v15 = vadd.f32 %v1319_v62, %v1010_v61  ;;  %v779_v58 = vld [vmem:[%s11860_s27 + $0x7b8] sm:$0xff] }
 0x1b3   : > { %1277 = vadd.xlane.f32.xlu0 %v1276_v21  ;;  %v1311_v5 = vadd.f32 %v1310_v52, %v1003_v51  ;;  %v1315_v16 = vadd.f32 %v1314_v1, %v1006_v63  ;;  %v1018_v18 = vmul.f32 %v762_v57, %v762_v57  ;;  %v1020_v20 = vmul.f32 %v764_v14, %v764_v14  ;;  %v778_v52 = vld [vmem:[%s11860_s27 + $0x7b0] sm:$0xff]  ;;  %v775_v59 = vld [vmem:[%s11860_s27 + $0x798] sm:$0xff] }
 0x1b4   : > { %v1329_v21 = vadd.f32 %v1017_v4, %v1016_v3  ;;  %v1024_v23 = vmul.f32 %v768_v12, %v768_v12  ;;  %v1021_v26 = vmul.f32 %v765_v19, %v765_v19  ;;  %v1015_v27 = vmul.f32 %v759_v7, %v759_v7  ;;  %v784_v4 = vld [vmem:[%s11860_s27 + $0x7e0] sm:$0xff]  ;;  %v782_v14 = vld [vmem:[%s11860_s27 + $0x7d0] sm:$0xff]  ;;  %v787_v19 = vld [vmem:[%s11860_s27 + $0x7f8] sm:$0xff] }
 0x1b5   : > { %1282 = vadd.xlane.f32.xlu1 %v1281_v24  ;;  %v1025_v24 = vmul.f32 %v769_v13, %v769_v13  ;;  %v1325_v28 = vadd.f32 %v1324_v11, %v1014_v10  ;;  %v1321_v30 = vadd.f32 %v1320_v15, %v1011_v6  ;;  %v1316_v31 = vadd.f32 %v1315_v16, %v1007_v9  ;;  %v780_v6 = vld [vmem:[%s11860_s27 + $0x7c0] sm:$0xff]  ;;  %v781_v10 = vld [vmem:[%s11860_s27 + $0x7c8] sm:$0xff]  ;;  %v786_v13 = vld [vmem:[%s11860_s27 + $0x7f0] sm:$0xff] }
 0x1b6   : > { %v1334_v34 = vadd.f32 %v1021_v26, %v1020_v20  ;;  %v1019_v35 = vmul.f32 %v763_v17, %v763_v17  ;;  %v1330_v36 = vadd.f32 %v1329_v21, %v1018_v18  ;;  %v1026_v37 = vmul.f32 %v770_v22, %v770_v22  ;;  %v783_v20 = vld [vmem:[%s11860_s27 + $0x7d8] sm:$0xff] }
 0x1b7   : > { %1287 = vadd.xlane.f32.xlu0 %v1286_v33  ;;  %v1022_v33 = vmul.f32 %v766_v25, %v766_v25  ;;  %v1339_v38 = vadd.f32 %v1025_v24, %v1024_v23  ;;  %v1326_v39 = vadd.f32 %v1325_v28, %v1015_v27  ;;  %v1023_v40 = vmul.f32 %v767_v29, %v767_v29 }
 0x1b8   : > { %v1033_v46 = vmul.f32 %v777_v42, %v777_v42  ;;  %v1028_v48 = vmul.f32 %v772_v43, %v772_v43  ;;  %v1331_v49 = vadd.f32 %v1330_v36, %v1019_v35  ;;  %v1027_v50 = vmul.f32 %v771_v32, %v771_v32  ;;  %v10656_v43 = vld [vmem:[%s11860_s27 + $0x48] sm:$0xff] }
 0x1b9   : > { %1292 = vadd.xlane.f32.xlu1 %v1291_v45  ;;  %v1335_v44 = vadd.f32 %v1334_v34, %v1022_v33  ;;  %v1032_v45 = vmul.f32 %v776_v41, %v776_v41  ;;  %v1340_v51 = vadd.f32 %v1339_v38, %v1026_v37  ;;  %v1029_v54 = vmul.f32 %v773_v47, %v773_v47  ;;  %v10654_v38 = vld [vmem:[%s11860_s27 + $0x8] sm:$0xff]  ;;  %v10658_v47 = vld [vmem:[%s11860_s27 + $0x10] sm:$0xff] }
 0x1ba   : > { %v1030_v57 = vmul.f32 %v774_v53, %v774_v53  ;;  %v1031_v62 = vmul.f32 %v775_v59, %v775_v59  ;;  %v1035_v1 = vmul.f32 %v779_v58, %v779_v58  ;;  %v1036_v11 = vmul.f32 %v780_v6, %v780_v6  ;;  %v10662_v58 = vld [vmem:[%s11860_s27 + $0x38] sm:$0xff] }
 0x1bb   : > { %1297 = vadd.xlane.f32.xlu0 %v1296_v55  ;;  %v1034_v55 = vmul.f32 %v778_v52, %v778_v52  ;;  %v1349_v56 = vadd.f32 %v1033_v46, %v1032_v45  ;;  %v1344_v60 = vadd.f32 %v1029_v54, %v1028_v48  ;;  %v1336_v61 = vadd.f32 %v1335_v44, %v1023_v40  ;;  %v10655_v40 = vld [vmem:[%s11860_s27] sm:$0xff]  ;;  %v10657_v45 = vld [vmem:[%s11860_s27 + $0x18] sm:$0xff]  ;;  %v10660_v52 = vld [vmem:[%s11860_s27 + $0x28] sm:$0xff] }
 0x1bc   : > { %v1341_v63 = vadd.f32 %v1340_v51, %v1027_v50  ;;  %v1037_v15 = vmul.f32 %v781_v10, %v781_v10  ;;  %v1042_v16 = vmul.f32 %v786_v13, %v786_v13  ;;  %v1038_v18 = vmul.f32 %v782_v14, %v782_v14  ;;  %v10661_v54 = vld [vmem:[%s11860_s27 + $0x20] sm:$0xff] }
 0x1bd   : > { %1302 = vadd.xlane.f32.xlu1 %v1301_v2  ;;  %v1350_v2 = vadd.f32 %v1349_v56, %v1034_v55  ;;  %v1345_v3 = vadd.f32 %v1344_v60, %v1030_v57  ;;  %v1043_v22 = vmul.f32 %v787_v19, %v787_v19  ;;  %v1039_v24 = vmul.f32 %v783_v20, %v783_v20  ;;  %v10046_v56 = vld [vmem:[#allocation7 + $0x80] sm:$0xff]   ;;  %v10663_v60 = vld [vmem:[%s11860_s27 + $0x30] sm:$0xff]  ;;  %v10669_v19 = vld [vmem:[%s11860_s27 + $0x88] sm:$0xff] }
 0x1be   : > { %v1354_v21 = vadd.f32 %v1037_v15, %v1036_v11  ;;  %v10667_v15 = vld [vmem:[%s11860_s27 + $0x70] sm:$0xff] }
 0x1bf   : > { %1307 = vadd.xlane.f32.xlu0 %v1306_v8  ;;  %v1346_v7 = vadd.f32 %v1345_v3, %v1031_v62  ;;  %v1040_v8 = vmul.f32 %v784_v4, %v784_v4  ;;  %v1351_v12 = vadd.f32 %v1350_v2, %v1035_v1  ;;  %v10664_v62 = vld [vmem:[%s11860_s27 + $0x68] sm:$0xff]  ;;  %v10665_v2 = vld [vmem:[%s11860_s27 + $0x78] sm:$0xff]  ;;  %v10666_v4 = vld [vmem:[%s11860_s27 + $0x50] sm:$0xff] }
 0x1c0   : > { %v1355_v25 = vadd.f32 %v1354_v21, %v1038_v18  ;;  %v10670_v21 = vld [vmem:[%s11860_s27 + $0xa8] sm:$0xff]  ;;  %v10714_v11 = vld [vmem:[%s11860_s27 + $0x250] sm:$0xff] }
 0x1c1   : > { %1312 = vadd.xlane.f32.xlu1 %v1311_v5  ;;  %v785_v5 = vld [vmem:[%s11860_s27 + $0x7e8] sm:$0xff] }
 0x1c2   : > { %v1041_v9 = vmul.f32 %v785_v5, %v785_v5  ;;  %v1356_v27 = vadd.f32 %v1355_v25, %v1039_v24  ;;  %v10671_v25 = vld [vmem:[%s11860_s27 + $0xb8] sm:$0xff] }
 0x1c3   : > { %1317 = vadd.xlane.f32.xlu0 %v1316_v31 }
 0x1c4   : > { %v1359_v17 = vadd.f32 %v1041_v9, %v1040_v8  ;;  %v10718_v8 = vld [vmem:[%s11860_s27 + $0x160] sm:$0xff] }
 0x1c5   : > { %1322 = vadd.xlane.f32.xlu1 %v1321_v30 }
 0x1c6   : > { %v1360_v23 = vadd.f32 %v1359_v17, %v1042_v16  ;;  %v10668_v17 = vld [vmem:[%s11860_s27 + $0x98] sm:$0xff] }
 0x1c7   : > { %1327 = vadd.xlane.f32.xlu0 %v1326_v39 }
 0x1c8   : > { %v1361_v26 = vadd.f32 %v1360_v23, %v1043_v22  ;;  %v10047_v23 = vld [vmem:[#allocation7 + $0x88] sm:$0xff]  }
 0x1c9   : > { %1332 = vadd.xlane.f32.xlu1 %v1331_v49  ;;  %v10659_v49 = vld [vmem:[%s11860_s27 + $0x58] sm:$0xff] }
 0x1cb   : > { %1337 = vadd.xlane.f32.xlu0 %v1336_v61 }
 0x1cd   : > { %1342 = vadd.xlane.f32.xlu1 %v1341_v63 }
 0x1cf   : > { %1347 = vadd.xlane.f32.xlu0 %v1346_v7 }
 0x1d1   : > { %1352 = vadd.xlane.f32.xlu1 %v1351_v12 }
 0x1d3   : > { %1357 = vadd.xlane.f32.xlu0 %v1356_v27  ;;  %v10713_v27 = vld [vmem:[%s11860_s27 + $0x278] sm:$0xff] }
 0x1d5   : > { %1362 = vadd.xlane.f32.xlu1 %v1361_v26 }
 0x1e4   : > { %v1048_v28 = vpop.xlane.xlu0 %1047 }
 0x1e5   : > { %10526 = vrsqrt.f32 %v1048_v28  ;;  %v10672_v28 = vld [vmem:[%s11860_s27 + $0x90] sm:$0xff] }
 0x1e6   : > { %v1058_v29 = vpop.xlane.xlu1 %1057 }
 0x1e7   : > { %10528 = vrsqrt.f32 %v1058_v29 }
 0x1e8   : > { %v1053_v30 = vpop.xlane.xlu0 %1052 }
 0x1e9   : > { %10530 = vrsqrt.f32 %v1053_v30  ;;  %v10673_v30 = vld [vmem:[%s11860_s27 + $0xb0] sm:$0xff] }
 0x1ea   : > { %v1063_v31 = vpop.xlane.xlu1 %1062 }
 0x1eb   : > { %10532 = vrsqrt.f32 %v1063_v31 }
 0x1ec   : > { %v1068_v32 = vpop.xlane.xlu0 %1067 }
 0x1ed   : > { %10534 = vrsqrt.f32 %v1068_v32 }
 0x1ee   : > { %v1073_v33 = vpop.xlane.xlu1 %1072 }
 0x1ef   : > { %10536 = vrsqrt.f32 %v1073_v33  ;;  %v10527_v34 = vpop.eup %10526  ;;  %v10674_v33 = vld [vmem:[%s11860_s27 + $0x40] sm:$0xff] }
 0x1f0   : > { %v1078_v36 = vpop.xlane.xlu0 %1077  ;;  %v1429_v39 = vmul.f32 %v10654_v38, %v10527_v34  ;;  %v1428_v41 = vmul.f32 %v10655_v40, %v10527_v34  ;;  %v12175_v46 = vmul.f32 %v10657_v45, %v10527_v34  ;;  %v12178_v48 = vmul.f32 %v10658_v47, %v10527_v34  ;;  %v10677_v45 = vld [vmem:[%s11860_s27 + $0xf8] sm:$0xff] }
 0x1f1   : > { %v12168_v35 = vpop.eup %10528  ;;  %10538 = vrsqrt.f32 %v1078_v36  ;;  %v10675_v36 = vld [vmem:[%s11860_s27 + $0x60] sm:$0xff] }
 0x1f2   : > { %v1083_v37 = vpop.xlane.xlu1 %1082  ;;  %v1437_v44 = vmul.f32 %v10656_v43, %v12168_v35  ;;  %v12182_v50 = vmul.f32 %v10659_v49, %v12168_v35  ;;  %v12198_v5 = vmul.f32 %v10666_v4, %v12168_v35  ;;  %v1436_v34 = vmul.f32 %v10674_v33, %v12168_v35  ;;  %v10676_v43 = vld [vmem:[%s11860_s27 + $0xd8] sm:$0xff] }
 0x1f3   : > { %10540 = vrsqrt.f32 %v1083_v37  ;;  %v10531_v42 = vpop.eup %10530  ;;  %v10681_v4 = vld [vmem:[%s11860_s27 + $0x118] sm:$0xff] }
 0x1f4   : > { %v1433_v53 = vmul.f32 %v10660_v52, %v10531_v42  ;;  %v1432_v55 = vmul.f32 %v10661_v54, %v10531_v42  ;;  %v1088_v57 = vpop.xlane.xlu0 %1087  ;;  %v12187_v59 = vmul.f32 %v10662_v58, %v10531_v42  ;;  %v12190_v61 = vmul.f32 %v10663_v60, %v10531_v42  ;;  %v10680_v60 = vld [vmem:[%s11860_s27 + $0x80] sm:$0xff] }
 0x1f5   : > { %v10533_v51 = vpop.eup %10532  ;;  %10542 = vrsqrt.f32 %v1088_v57 }
 0x1f6   : > { %v1441_v63 = vmul.f32 %v10664_v62, %v10533_v51  ;;  %v1093_v1 = vpop.xlane.xlu1 %1092  ;;  %v12194_v3 = vmul.f32 %v10665_v2, %v10533_v51  ;;  %v1685_v6 = vpack.c.bf16 %v1433_v53, %v1429_v39  ;;  %v1684_v7 = vpack.c.bf16 %v1432_v55, %v1428_v41  ;;  %v10048_v41 = vld [vmem:[#allocation7 + $0x90] sm:$0xff]  }
 0x1f7   : > { %10544 = vrsqrt.f32 %v1093_v1  ;;  %v10535_v9 = vpop.eup %10534  ;;  %v12209_v16 = vmul.f32 %v10667_v15, %v10533_v51  ;;  %v1440_v37 = vmul.f32 %v10675_v36, %v10533_v51  ;;  %v10678_v51 = vld [vmem:[%s11860_s27 + $0xd0] sm:$0xff]  ;;  %v10049_v1 = vld [vmem:[#allocation7 + $0x98] sm:$0xff]  }
 0x1f8   : > { %v1689_v10 = vpack.c.bf16 %v1441_v63, %v1437_v44  ;;  %2107 = vmatprep.mubr.bf16.mxu0 %v1685_v6  ;;  %v1098_v14 = vpop.xlane.xlu0 %1097  ;;  %v12212_v18 = vmul.f32 %v10668_v17, %v10535_v9  ;;  %v1445_v20 = vmul.f32 %v10669_v19, %v10535_v9  ;;  %v12224_v29 = vmul.f32 %v10672_v28, %v10535_v9  ;;  %v10679_v53 = vld [vmem:[%s11860_s27 + $0xf0] sm:$0xff]  ;;  %v10684_v17 = vld [vmem:[%s11860_s27 + $0x138] sm:$0xff]  ;;  %v10707_v28 = vld [vmem:[%s11860_s27 + $0x148] sm:$0xff] }
 0x1f9   : > { %v12206_v13 = vpop.eup %10536  ;;  %2108 = vmatmul.mubr.bf16.vlgmr.msra.gmra.mrb[0].mxu0 %v1684_v7  ;;  %10546 = vrsqrt.f32 %v1098_v14  ;;  %v1444_v62 = vmul.f32 %v10680_v60, %v10535_v9  ;;  %v10682_v7 = vld [vmem:[%s11860_s27 + $0xa0] sm:$0xff]  ;;  %v10683_v14 = vld [vmem:[%s11860_s27 + $0xc8] sm:$0xff] }
 0x1fa   : > { %v1449_v22 = vmul.f32 %v10670_v21, %v12206_v13  ;;  %v1103_v24 = vpop.xlane.xlu1 %1102  ;;  %v12219_v26 = vmul.f32 %v10671_v25, %v12206_v13  ;;  %2365 = vmatpush1.bf16.msra.mxu0 %v10046_v56  ;;  %2115 = vmatprep.mubr.bf16.mxu0 %v1689_v10  ;;  %v12228_v31 = vmul.f32 %v10673_v30, %v12206_v13 }
 0x1fb   : > { %10548 = vrsqrt.f32 %v1103_v24  ;;  %v12230_v32 = vpop.eup %10538  ;;  %2366 = vmatprep.subr.bf16.mxu0 %v15999_v0  ;;  %v1688_v56 = vpack.c.bf16 %v1440_v37, %v1436_v34  ;;  %v1448_v10 = vmul.f32 %v10682_v7, %v12206_v13  ;;  %v10050_v34 = vld [vmem:[#allocation7 + $0xa0] sm:$0xff]   ;;  %v10688_v37 = vld [vmem:[%s11860_s27 + $0x158] sm:$0xff] }
 0x1fc   : > { %v1108_v40 = vpop.xlane.xlu0 %1107  ;;  %v12244_v44 = vmul.f32 %v10676_v43, %v12230_v32  ;;  %v1693_v49 = vpack.c.bf16 %v1449_v22, %v1445_v20  ;;  %v12252_v52 = vmul.f32 %v10678_v51, %v12230_v32  ;;  %v1453_v15 = vmul.f32 %v10683_v14, %v12230_v32  ;;  %v10685_v20 = vld [vmem:[%s11860_s27 + $0xe8] sm:$0xff]  ;;  %v10686_v22 = vld [vmem:[%s11860_s27 + $0x110] sm:$0xff] }
 0x1fd   : > { %v12238_v39 = vpop.eup %10540  ;;  %10550 = vrsqrt.f32 %v1108_v40  ;;  %v10690_v51 = vld [vmem:[%s11860_s27 + $0x150] sm:$0xff] }
 0x1fe   : > { %v1113_v35 = vpop.xlane.xlu1 %1112  ;;  %v12248_v47 = vmul.f32 %v10677_v45, %v12238_v39  ;;  %2367 = vmatpush1.bf16.msra.mxu0 %v10047_v23  ;;  %v12256_v54 = vmul.f32 %v10679_v53, %v12238_v39  ;;  %v1457_v21 = vmul.f32 %v10685_v20, %v12238_v39  ;;  %v10687_v23 = vld [vmem:[%s11860_s27 + $0x130] sm:$0xff] }
 0x1ff   : > { %10552 = vrsqrt.f32 %v1113_v35  ;;  %v12258_v55 = vpop.eup %10542  ;;  %2368 = vmatprep.subr.bf16.mxu0 %v15999_v0  ;;  %v10689_v35 = vld [vmem:[%s11860_s27 + $0x178] sm:$0xff]  ;;  %v10702_v14 = vld [vmem:[%s11860_s27 + $0x1d0] sm:$0xff] }
 0x200   : > { %v1118_v63 = vpop.xlane.xlu0 %1117  ;;  %v12270_v6 = vmul.f32 %v10681_v4, %v12258_v55  ;;  %v12284_v13 = vmul.f32 %v10686_v22, %v12258_v55 }
 0x201   : > { %v12263_v58 = vpop.eup %10544  ;;  %2116 = vmatmul.mubr.bf16.gmra.mrb[4].mxu0 %v1688_v56  ;;  %10554 = vrsqrt.f32 %v1118_v63  ;;  %v10691_v56 = vld [vmem:[%s11860_s27 + $0x170] sm:$0xff] }
 0x202   : > { %16150 = vst [vmem:[#allocation29_spill] sm:$0xff] %v12270_v6  ;;  %v1123_v9 = vpop.xlane.xlu1 %1122  ;;  %v12278_v19 = vmul.f32 %v10684_v17, %v12263_v58  ;;  %2123 = vmatprep.mubr.bf16.mxu0 %v1693_v49  ;;  %2369 = vmatpush1.bf16.msra.mxu0 %v10048_v41  ;;  %16151 = vst [vmem:[#allocation30_spill] sm:$0xff] %v12284_v13  ;;  %v12288_v24 = vmul.f32 %v10687_v23, %v12263_v58  ;;  %v10694_v17 = vld [vmem:[%s11860_s27 + $0xe0] sm:$0xff]  ;;  %v10703_v63 = vld [vmem:[%s11860_s27 + $0x1f0] sm:$0xff] }
 0x203   : > { %10556 = vrsqrt.f32 %v1123_v9  ;;  %v12290_v25 = vpop.eup %10546  ;;  %2370 = vmatprep.subr.bf16.mxu0 %v15999_v0  ;;  %v1692_v41 = vpack.c.bf16 %v1448_v10, %v1444_v62  ;;  %v1697_v49 = vpack.c.bf16 %v1457_v21, %v1453_v15  ;;  %v10693_v15 = vld [vmem:[%s11860_s27 + $0x198] sm:$0xff]  ;;  %v1456_v20 = vmul.f32 %v10694_v17, %v12238_v39  ;;  %v10695_v21 = vld [vmem:[%s11860_s27 + $0x108] sm:$0xff] }
 0x204   : > { %16152 = vst [vmem:[#allocation31_spill] sm:$0xff] %v12288_v24  ;;  %v1128_v33 = vpop.xlane.xlu0 %1127  ;;  %v12301_v40 = vmul.f32 %v10688_v37, %v12290_v25  ;;  %v12309_v53 = vmul.f32 %v10690_v51, %v12290_v25  ;;  %v1461_v22 = vmul.f32 %v10695_v21, %v12258_v55  ;;  %v10699_v51 = vld [vmem:[%s11860_s27 + $0x1b0] sm:$0xff]  ;;  %v10700_v21 = vld [vmem:[%s11860_s27 + $0x1d8] sm:$0xff]  ;;  %v1469_v2 = vmul.f32 %v10707_v28, %v12290_v25 }
 0x205   : > { %v12295_v30 = vpop.eup %10548  ;;  %10558 = vrsqrt.f32 %v1128_v33  ;;  %v10696_v33 = vld [vmem:[%s11860_s27 + $0x1b8] sm:$0xff] }
 0x206   : > { %16153 = vst [vmem:[#allocation32_spill] sm:$0xff] %v12301_v40  ;;  %v1133_v43 = vpop.xlane.xlu1 %1132  ;;  %v12305_v45 = vmul.f32 %v10689_v35, %v12295_v30  ;;  %2371 = vmatpush1.bf16.msra.mxu0 %v10049_v1  ;;  %16155 = vst [vmem:[#allocation34_spill] sm:$0xff] %v12309_v53  ;;  %v12313_v60 = vmul.f32 %v10691_v56, %v12295_v30  ;;  %v10692_v1 = vld [vmem:[%s11860_s27 + $0xc0] sm:$0xff]  ;;  %v10809_v40 = vld [vmem:[%s11860_s27 + $0x678] sm:$0xff] }
 0x207   : > { %10560 = vrsqrt.f32 %v1133_v43  ;;  %v12315_v62 = vpop.eup %10550  ;;  %2372 = vmatprep.subr.bf16.mxu0 %v15999_v0  ;;  %v1452_v7 = vmul.f32 %v10692_v1, %v12230_v32  ;;  %v10051_v32 = vld [vmem:[#allocation7 + $0xa8] sm:$0xff]  }
 0x208   : > { %16154 = vst [vmem:[#allocation33_spill] sm:$0xff] %v12305_v45  ;;  %16156 = vst [vmem:[#allocation35_spill] sm:$0xff] %v12313_v60  ;;  %v1138_v10 = vpop.xlane.xlu0 %1137  ;;  %v12328_v9 = vmul.f32 %v10693_v15, %v12315_v62  ;;  %v10697_v43 = vld [vmem:[%s11860_s27 + $0x128] sm:$0xff]  ;;  %v10052_v15 = vld [vmem:[#allocation7 + $0xb0] sm:$0xff]  }
 0x209   : > { %v12320_v4 = vpop.eup %10552  ;;  %2124 = vmatmul.mubr.bf16.gmra.mrb[8].mxu0 %v1692_v41  ;;  %10562 = vrsqrt.f32 %v1138_v10  ;;  %v1465_v35 = vmul.f32 %v10697_v43, %v12263_v58  ;;  %v10698_v41 = vld [vmem:[%s11860_s27 + $0x190] sm:$0xff] }
 0x20a   : > { %16157 = vst [vmem:[#allocation36_spill] sm:$0xff] %v12328_v9  ;;  %v1143_v23 = vpop.xlane.xlu1 %1142  ;;  %v12336_v37 = vmul.f32 %v10696_v33, %v12320_v4  ;;  %2131 = vmatprep.mubr.bf16.mxu0 %v1697_v49  ;;  %2373 = vmatpush1.bf16.msra.mxu0 %v10050_v34  ;;  %v12342_v39 = vmul.f32 %v10698_v41, %v12315_v62  ;;  %v10701_v41 = vld [vmem:[%s11860_s27 + $0x1f8] sm:$0xff] }
 0x20b   : > { %10564 = vrsqrt.f32 %v1143_v23  ;;  %v12346_v56 = vmul.f32 %v10699_v51, %v12320_v4  ;;  %v12348_v1 = vpop.eup %10554  ;;  %2374 = vmatprep.subr.bf16.mxu0 %v15999_v0  ;;  %v1696_v33 = vpack.c.bf16 %v1456_v20, %v1452_v7  ;;  %v1701_v49 = vpack.c.bf16 %v1465_v35, %v1461_v22  ;;  %v10706_v22 = vld [vmem:[%s11860_s27 + $0x120] sm:$0xff]  ;;  %v10785_v9 = vld [vmem:[%s11860_s27 + $0x578] sm:$0xff] }
 0x20c   : > { %16158 = vst [vmem:[#allocation37_spill] sm:$0xff] %v12336_v37  ;;  %16159 = vst [vmem:[#allocation38_spill] sm:$0xff] %v12342_v39  ;;  %v1148_v34 = vpop.xlane.xlu0 %1147  ;;  %v12359_v23 = vmul.f32 %v10700_v21, %v12348_v1  ;;  %v12367_v17 = vmul.f32 %v10702_v14, %v12348_v1  ;;  %v10053_v21 = vld [vmem:[#allocation7 + $0xb8] sm:$0xff]   ;;  %v1464_v36 = vmul.f32 %v10706_v22, %v12263_v58  ;;  %v10711_v22 = vld [vmem:[%s11860_s27 + $0x230] sm:$0xff] }
 0x20d   : > { %16160 = vst [vmem:[#allocation39_spill] sm:$0xff] %v12346_v56  ;;  %v12353_v10 = vpop.eup %10556  ;;  %10566 = vrsqrt.f32 %v1148_v34 }
 0x20e   : > { %16161 = vst [vmem:[#allocation40_spill] sm:$0xff] %v12359_v23  ;;  %v1153_v43 = vpop.xlane.xlu1 %1152  ;;  %v12363_v51 = vmul.f32 %v10701_v41, %v12353_v10  ;;  %2375 = vmatpush1.bf16.msra.mxu0 %v10051_v32  ;;  %16163 = vst [vmem:[#allocation42_spill] sm:$0xff] %v12367_v17  ;;  %v12371_v7 = vmul.f32 %v10703_v63, %v12353_v10  ;;  %v10704_v32 = vld [vmem:[%s11860_s27 + $0x100] sm:$0xff]  ;;  %v10709_v63 = vld [vmem:[%s11860_s27 + $0x168] sm:$0xff] }
 0x20f   : > { %10568 = vrsqrt.f32 %v1153_v43  ;;  %v12373_v20 = vpop.eup %10558  ;;  %2376 = vmatprep.subr.bf16.mxu0 %v15999_v0  ;;  %v1460_v34 = vmul.f32 %v10704_v32, %v12258_v55  ;;  %v10705_v43 = vld [vmem:[%s11860_s27 + $0x218] sm:$0xff] }
 0x210   : > { %16162 = vst [vmem:[#allocation41_spill] sm:$0xff] %v12363_v51  ;;  %16164 = vst [vmem:[#allocation43_spill] sm:$0xff] %v12371_v7  ;;  %v1158_v14 = vpop.xlane.xlu0 %1157  ;;  %v12386_v41 = vmul.f32 %v10705_v43, %v12373_v20  ;;  %v10708_v32 = vld [vmem:[%s11860_s27 + $0x238] sm:$0xff]  ;;  %v1473_v43 = vmul.f32 %v10709_v63, %v12295_v30 }
 0x211   : > { %v12378_v35 = vpop.eup %10560  ;;  %2132 = vmatmul.mubr.bf16.gmra.mrb[12].mxu0 %v1696_v33  ;;  %10570 = vrsqrt.f32 %v1158_v14  ;;  %v10710_v33 = vld [vmem:[%s11860_s27 + $0x210] sm:$0xff]  ;;  %v1700_v42 = vpack.c.bf16 %v1464_v36, %v1460_v34  ;;  %v10761_v23 = vld [vmem:[%s11860_s27 + $0x478] sm:$0xff] }
 0x212   : > { %16165 = vst [vmem:[#allocation44_spill] sm:$0xff] %v12386_v41  ;;  %v1163_v55 = vpop.xlane.xlu1 %1162  ;;  %v12394_v57 = vmul.f32 %v10708_v32, %v12378_v35  ;;  %2139 = vmatprep.mubr.bf16.mxu0 %v1701_v49  ;;  %2377 = vmatpush1.bf16.msra.mxu0 %v10052_v15  ;;  %v12400_v58 = vmul.f32 %v10710_v33, %v12373_v20  ;;  %v10712_v33 = vld [vmem:[%s11860_s27 + $0x258] sm:$0xff] }
 0x213   : > { %10572 = vrsqrt.f32 %v1163_v55  ;;  %v12404_v28 = vmul.f32 %v10711_v22, %v12378_v35  ;;  %v12406_v14 = vpop.eup %10562  ;;  %2378 = vmatprep.subr.bf16.mxu0 %v15999_v0  ;;  %v10054_v55 = vld [vmem:[#allocation7 + $0xc0] sm:$0xff]   ;;  %v1705_v49 = vpack.c.bf16 %v1473_v43, %v1469_v2  ;;  %v10725_v41 = vld [vmem:[%s11860_s27 + $0x2f8] sm:$0xff] }
 0x214   : > { %16166 = vst [vmem:[#allocation45_spill] sm:$0xff] %v12394_v57  ;;  %16167 = vst [vmem:[#allocation46_spill] sm:$0xff] %v12400_v58  ;;  %v1168_v15 = vpop.xlane.xlu0 %1167  ;;  %v12417_v22 = vmul.f32 %v10712_v33, %v12406_v14  ;;  %v12425_v32 = vmul.f32 %v10714_v11, %v12406_v14  ;;  %v10715_v33 = vld [vmem:[%s11860_s27 + $0x270] sm:$0xff]  ;;  %v10716_v2 = vld [vmem:[%s11860_s27 + $0x140] sm:$0xff] }
 0x215   : > { %16168 = vst [vmem:[#allocation47_spill] sm:$0xff] %v12404_v28  ;;  %v12411_v63 = vpop.eup %10564  ;;  %10574 = vrsqrt.f32 %v1168_v15  ;;  %v10717_v15 = vld [vmem:[%s11860_s27 + $0x298] sm:$0xff] }
 0x216   : > { %16169 = vst [vmem:[#allocation48_spill] sm:$0xff] %v12417_v22  ;;  %v1173_v38 = vpop.xlane.xlu1 %1172  ;;  %v12421_v12 = vmul.f32 %v10713_v27, %v12411_v63  ;;  %2379 = vmatpush1.bf16.msra.mxu0 %v10053_v21  ;;  %16171 = vst [vmem:[#allocation50_spill] sm:$0xff] %v12425_v32  ;;  %v12429_v36 = vmul.f32 %v10715_v33, %v12411_v63  ;;  %v1468_v21 = vmul.f32 %v10716_v2, %v12290_v25  ;;  %v10055_v25 = vld [vmem:[#allocation7 + $0xc8] sm:$0xff]   ;;  %v10720_v2 = vld [vmem:[%s11860_s27 + $0x2b8] sm:$0xff] }
 0x217   : > { %10576 = vrsqrt.f32 %v1173_v38  ;;  %v12431_v34 = vpop.eup %10566  ;;  %2380 = vmatprep.subr.bf16.mxu0 %v15999_v0  ;;  %v1472_v27 = vmul.f32 %v10718_v8, %v12295_v30  ;;  %v10719_v0 = vld [vmem:[%s11860_s27 + $0x188] sm:$0xff]  ;;  %v10724_v32 = vld [vmem:[%s11860_s27 + $0x2d8] sm:$0xff] }
 0x218   : > { %16170 = vst [vmem:[#allocation49_spill] sm:$0xff] %v12421_v12  ;;  %16172 = vst [vmem:[#allocation51_spill] sm:$0xff] %v12429_v36  ;;  %v1178_v11 = vpop.xlane.xlu0 %1177  ;;  %v12444_v33 = vmul.f32 %v10717_v15, %v12431_v34  ;;  %v1477_v22 = vmul.f32 %v10719_v0, %v12315_v62  ;;  %v10721_v15 = vld [vmem:[%s11860_s27 + $0x1a8] sm:$0xff]  ;;  %v10723_v0 = vld [vmem:[%s11860_s27 + $0x2b0] sm:$0xff] }
 0x219   : > { %v12436_v38 = vpop.eup %10568  ;;  %2140 = vmatmul.mubr.bf16.gmra.mrb[16].mxu0 %v1700_v42  ;;  %10578 = vrsqrt.f32 %v1178_v11  ;;  %v1481_v43 = vmul.f32 %v10721_v15, %v12320_v4  ;;  %v10722_v42 = vld [vmem:[%s11860_s27 + $0x290] sm:$0xff]  ;;  %v1704_v36 = vpack.c.bf16 %v1472_v27, %v1468_v21 }
 0x21a   : > { %16173 = vst [vmem:[#allocation52_spill] sm:$0xff] %v12444_v33  ;;  %v1183_v12 = vpop.xlane.xlu1 %1182  ;;  %v12452_v58 = vmul.f32 %v10720_v2, %v12436_v38  ;;  %2147 = vmatprep.mubr.bf16.mxu0 %v1705_v49  ;;  %2381 = vmatpush1.bf16.msra.mxu0 %v10054_v55  ;;  %v12458_v8 = vmul.f32 %v10722_v42, %v12431_v34  ;;  %v16177_v2 = vmov 0   ;;  %v10056_v55 = vld [vmem:[#allocation7 + $0xd0] sm:$0xff]  }
 0x21b   : > { %10580 = vrsqrt.f32 %v1183_v12  ;;  %v12462_v30 = vmul.f32 %v10723_v0, %v12436_v38  ;;  %v12464_v11 = vpop.eup %10570  ;;  %2382 = vmatprep.subr.bf16.mxu0 %v16177_v2  ;;  %v1709_v49 = vpack.c.bf16 %v1481_v43, %v1477_v22  ;;  %v10726_v33 = vld [vmem:[%s11860_s27 + $0x2d0] sm:$0xff]  ;;  %v10728_v22 = vld [vmem:[%s11860_s27 + $0x180] sm:$0xff] }
 0x21c   : > { %16174 = vst [vmem:[#allocation53_spill] sm:$0xff] %v12452_v58  ;;  %16175 = vst [vmem:[#allocation54_spill] sm:$0xff] %v12458_v8  ;;  %v1188_v12 = vpop.xlane.xlu0 %1187  ;;  %v12475_v0 = vmul.f32 %v10724_v32, %v12464_v11  ;;  %v12483_v42 = vmul.f32 %v10726_v33, %v12464_v11  ;;  %v10727_v32 = vld [vmem:[%s11860_s27 + $0x2f0] sm:$0xff]  ;;  %v1476_v43 = vmul.f32 %v10728_v22, %v12315_v62  ;;  %v10730_v8 = vld [vmem:[%s11860_s27 + $0x1a0] sm:$0xff] }
 0x21d   : > { %16176 = vst [vmem:[#allocation55_spill] sm:$0xff] %v12462_v30  ;;  %v12469_v15 = vpop.eup %10572  ;;  %10582 = vrsqrt.f32 %v1188_v12  ;;  %v10729_v12 = vld [vmem:[%s11860_s27 + $0x318] sm:$0xff] }
 0x21e   : > { %16178 = vst [vmem:[#allocation56_spill] sm:$0xff] %v12475_v0  ;;  %v1193_v28 = vpop.xlane.xlu1 %1192  ;;  %v12479_v57 = vmul.f32 %v10725_v41, %v12469_v15  ;;  %2383 = vmatpush1.bf16.msra.mxu0 %v10055_v25  ;;  %16180 = vst [vmem:[#allocation58_spill] sm:$0xff] %v12483_v42  ;;  %v12487_v27 = vmul.f32 %v10727_v32, %v12469_v15  ;;  %v1480_v41 = vmul.f32 %v10730_v8, %v12320_v4  ;;  %v10731_v0 = vld [vmem:[%s11860_s27 + $0x1c8] sm:$0xff]  ;;  %v10732_v62 = vld [vmem:[%s11860_s27 + $0x338] sm:$0xff] }
 0x21f   : > { %10584 = vrsqrt.f32 %v1193_v28  ;;  %v12489_v21 = vpop.eup %10574  ;;  %2384 = vmatprep.subr.bf16.mxu0 %v16177_v2  ;;  %v10733_v25 = vld [vmem:[%s11860_s27 + $0x1e8] sm:$0xff]  ;;  %v10735_v8 = vld [vmem:[%s11860_s27 + $0x330] sm:$0xff] }
 0x220   : > { %16179 = vst [vmem:[#allocation57_spill] sm:$0xff] %v12479_v57  ;;  %16181 = vst [vmem:[#allocation59_spill] sm:$0xff] %v12487_v27  ;;  %v1198_v33 = vpop.xlane.xlu0 %1197  ;;  %v12502_v32 = vmul.f32 %v10729_v12, %v12489_v21  ;;  %v1485_v57 = vmul.f32 %v10731_v0, %v12348_v1  ;;  %v1489_v12 = vmul.f32 %v10733_v25, %v12353_v10  ;;  %v10737_v27 = vld [vmem:[%s11860_s27 + $0x378] sm:$0xff] }
 0x221   : > { %v12494_v28 = vpop.eup %10576  ;;  %2148 = vmatmul.mubr.bf16.gmra.mrb[20].mxu0 %v1704_v36  ;;  %10586 = vrsqrt.f32 %v1198_v33  ;;  %v10734_v36 = vld [vmem:[%s11860_s27 + $0x310] sm:$0xff] }
 0x222   : > { %16182 = vst [vmem:[#allocation60_spill] sm:$0xff] %v12502_v32  ;;  %v1203_v30 = vpop.xlane.xlu1 %1202  ;;  %v12510_v22 = vmul.f32 %v10732_v62, %v12494_v28  ;;  %2155 = vmatprep.mubr.bf16.mxu0 %v1709_v49  ;;  %2385 = vmatpush1.bf16.msra.mxu0 %v10056_v55  ;;  %v12516_v4 = vmul.f32 %v10734_v36, %v12489_v21  ;;  %v10736_v62 = vld [vmem:[%s11860_s27 + $0x358] sm:$0xff]  ;;  %v10738_v32 = vld [vmem:[%s11860_s27 + $0x350] sm:$0xff] }
 0x223   : > { %10588 = vrsqrt.f32 %v1203_v30  ;;  %v12520_v0 = vmul.f32 %v10735_v8, %v12494_v28  ;;  %v12522_v33 = vpop.eup %10578  ;;  %2386 = vmatprep.subr.bf16.mxu0 %v16177_v2  ;;  %v1708_v8 = vpack.c.bf16 %v1480_v41, %v1476_v43  ;;  %v1713_v49 = vpack.c.bf16 %v1489_v12, %v1485_v57  ;;  %v10740_v57 = vld [vmem:[%s11860_s27 + $0x1c0] sm:$0xff] }
 0x224   : > { %16183 = vst [vmem:[#allocation61_spill] sm:$0xff] %v12510_v22  ;;  %16184 = vst [vmem:[#allocation62_spill] sm:$0xff] %v12516_v4  ;;  %v1208_v55 = vpop.xlane.xlu0 %1207  ;;  %v12533_v36 = vmul.f32 %v10736_v62, %v12522_v33  ;;  %v12541_v25 = vmul.f32 %v10738_v32, %v12522_v33  ;;  %v10739_v4 = vld [vmem:[%s11860_s27 + $0x370] sm:$0xff]  ;;  %v10745_v32 = vld [vmem:[%s11860_s27 + $0x228] sm:$0xff] }
 0x225   : > { %16185 = vst [vmem:[#allocation63_spill] sm:$0xff] %v12520_v0  ;;  %v12527_v30 = vpop.eup %10580  ;;  %10590 = vrsqrt.f32 %v1208_v55  ;;  %v10741_v55 = vld [vmem:[%s11860_s27 + $0x398] sm:$0xff]  ;;  %v10742_v0 = vld [vmem:[%s11860_s27 + $0x1e0] sm:$0xff] }
 0x226   : > { %16186 = vst [vmem:[#allocation64_spill] sm:$0xff] %v12533_v36  ;;  %v1213_v42 = vpop.xlane.xlu1 %1212  ;;  %v12537_v58 = vmul.f32 %v10737_v27, %v12527_v30  ;;  %16188 = vst [vmem:[#allocation66_spill] sm:$0xff] %v12541_v25  ;;  %v12545_v62 = vmul.f32 %v10739_v4, %v12527_v30  ;;  %v1488_v43 = vmul.f32 %v10742_v0, %v12353_v10  ;;  %v10743_v36 = vld [vmem:[%s11860_s27 + $0x208] sm:$0xff]  ;;  %v10747_v0 = vld [vmem:[%s11860_s27 + $0x3b0] sm:$0xff] }
 0x227   : > { %10592 = vrsqrt.f32 %v1213_v42  ;;  %v12547_v41 = vpop.eup %10582  ;;  %v1484_v42 = vmul.f32 %v10740_v57, %v12348_v1  ;;  %v10057_v1 = vld [vmem:[#allocation7 + $0xd8] sm:$0xff]  }
 0x228   : > { %16187 = vst [vmem:[#allocation65_spill] sm:$0xff] %v12537_v58  ;;  %16189 = vst [vmem:[#allocation67_spill] sm:$0xff] %v12545_v62  ;;  %v1218_v12 = vpop.xlane.xlu0 %1217  ;;  %v12559_v4 = vmul.f32 %v10741_v55, %v12547_v41  ;;  %v1493_v58 = vmul.f32 %v10743_v36, %v12373_v20  ;;  %v10744_v57 = vld [vmem:[%s11860_s27 + $0x3b8] sm:$0xff]  ;;  %v1497_v55 = vmul.f32 %v10745_v32, %v12378_v35  ;;  %2387 = vmatpush1.bf16.msra.mxu0 %v10057_v1 }
 0x229   : > { %v12551_v27 = vpop.eup %10584  ;;  %2156 = vmatmul.mubr.bf16.gmra.mrb[24].mxu0 %v1708_v8  ;;  %10594 = vrsqrt.f32 %v1218_v12  ;;  %v10746_v8 = vld [vmem:[%s11860_s27 + $0x390] sm:$0xff]  ;;  %2388 = vmatprep.subr.bf16.mxu0 %v16177_v2  ;;  %v1712_v25 = vpack.c.bf16 %v1488_v43, %v1484_v42  ;;  %v10749_v1 = vld [vmem:[%s11860_s27 + $0x3f8] sm:$0xff] }
 0x22a   : > { %16190 = vst [vmem:[#allocation68_spill] sm:$0xff] %v12559_v4  ;;  %v1223_v22 = vpop.xlane.xlu1 %1222  ;;  %v12567_v17 = vmul.f32 %v10744_v57, %v12551_v27  ;;  %2163 = vmatprep.mubr.bf16.mxu0 %v1713_v49  ;;  %v12573_v10 = vmul.f32 %v10746_v8, %v12547_v41  ;;  %v12577_v36 = vmul.f32 %v10747_v0, %v12551_v27  ;;  %v10748_v8 = vld [vmem:[%s11860_s27 + $0x3d8] sm:$0xff] }
 0x22b   : > { %10596 = vrsqrt.f32 %v1223_v22  ;;  %v12579_v12 = vpop.eup %10586  ;;  %v1717_v4 = vpack.c.bf16 %v1497_v55, %v1493_v58  ;;  %v10752_v58 = vld [vmem:[%s11860_s27 + $0x200] sm:$0xff] }
 0x22c   : > { %16191 = vst [vmem:[#allocation69_spill] sm:$0xff] %v12567_v17  ;;  %16192 = vst [vmem:[#allocation70_spill] sm:$0xff] %v12573_v10  ;;  %v1228_v22 = vpop.xlane.xlu0 %1227  ;;  %v12590_v0 = vmul.f32 %v10748_v8, %v12579_v12  ;;  %v10750_v17 = vld [vmem:[%s11860_s27 + $0x3d0] sm:$0xff] }
 0x22d   : > { %16193 = vst [vmem:[#allocation71_spill] sm:$0xff] %v12577_v36  ;;  %v12583_v57 = vpop.eup %10588  ;;  %10598 = vrsqrt.f32 %v1228_v22  ;;  %v12598_v32 = vmul.f32 %v10750_v17, %v12579_v12  ;;  %v10751_v10 = vld [vmem:[%s11860_s27 + $0x3f0] sm:$0xff]  ;;  %v10754_v36 = vld [vmem:[%s11860_s27 + $0x220] sm:$0xff]  ;;  %v10757_v17 = vld [vmem:[%s11860_s27 + $0x268] sm:$0xff] }
 0x22e   : > { %16194 = vst [vmem:[#allocation72_spill] sm:$0xff] %v12590_v0  ;;  %v1233_v62 = vpop.xlane.xlu1 %1232  ;;  %v12594_v49 = vmul.f32 %v10749_v1, %v12583_v57  ;;  %v12602_v8 = vmul.f32 %v10751_v10, %v12583_v57  ;;  %v10753_v1 = vld [vmem:[%s11860_s27 + $0x418] sm:$0xff]  ;;  %v1496_v42 = vmul.f32 %v10754_v36, %v12378_v35  ;;  %v10755_v0 = vld [vmem:[%s11860_s27 + $0x248] sm:$0xff]  ;;  %v10759_v35 = vld [vmem:[%s11860_s27 + $0x430] sm:$0xff] }
 0x22f   : > { %10600 = vrsqrt.f32 %v1233_v62  ;;  %16196 = vst [vmem:[#allocation74_spill] sm:$0xff] %v12598_v32  ;;  %v12604_v43 = vpop.eup %10590  ;;  %v1492_v62 = vmul.f32 %v10752_v58, %v12373_v20  ;;  %v10756_v20 = vld [vmem:[%s11860_s27 + $0x438] sm:$0xff] }
 0x230   : > { %16195 = vst [vmem:[#allocation73_spill] sm:$0xff] %v12594_v49  ;;  %16197 = vst [vmem:[#allocation75_spill] sm:$0xff] %v12602_v8  ;;  %v1238_v55 = vpop.xlane.xlu0 %1237  ;;  %v12616_v10 = vmul.f32 %v10753_v1, %v12604_v43  ;;  %v1501_v49 = vmul.f32 %v10755_v0, %v12406_v14  ;;  %v1505_v1 = vmul.f32 %v10757_v17, %v12411_v63 }
 0x231   : > { %v12608_v22 = vpop.eup %10592  ;;  %2164 = vmatmul.mubr.bf16.gmra.mrb[28].mxu0 %v1712_v25  ;;  %10602 = vrsqrt.f32 %v1238_v55  ;;  %v10758_v25 = vld [vmem:[%s11860_s27 + $0x410] sm:$0xff]  ;;  %v1716_v8 = vpack.c.bf16 %v1496_v42, %v1492_v62 }
 0x232   : > { %16198 = vst [vmem:[#allocation76_spill] sm:$0xff] %v12616_v10  ;;  %v1243_v7 = vpop.xlane.xlu1 %1242  ;;  %v12624_v58 = vmul.f32 %v10756_v20, %v12608_v22  ;;  %2171 = vmatprep.mubr.bf16.mxu0 %v1717_v4  ;;  %v12630_v32 = vmul.f32 %v10758_v25, %v12604_v43  ;;  %v12634_v36 = vmul.f32 %v10759_v35, %v12608_v22  ;;  %v10760_v20 = vld [vmem:[%s11860_s27 + $0x458] sm:$0xff]  ;;  %v10762_v10 = vld [vmem:[%s11860_s27 + $0x450] sm:$0xff] }
 0x233   : > { %10604 = vrsqrt.f32 %v1243_v7  ;;  %v12636_v0 = vpop.eup %10594  ;;  %v1721_v4 = vpack.c.bf16 %v1505_v1, %v1501_v49  ;;  %v10764_v49 = vld [vmem:[%s11860_s27 + $0x240] sm:$0xff] }
 0x234   : > { %16199 = vst [vmem:[#allocation77_spill] sm:$0xff] %v12624_v58  ;;  %16200 = vst [vmem:[#allocation78_spill] sm:$0xff] %v12630_v32  ;;  %v1248_v17 = vpop.xlane.xlu0 %1247  ;;  %v12646_v25 = vmul.f32 %v10760_v20, %v12636_v0  ;;  %v12654_v7 = vmul.f32 %v10762_v10, %v12636_v0  ;;  %v10763_v32 = vld [vmem:[%s11860_s27 + $0x470] sm:$0xff]  ;;  %v1500_v1 = vmul.f32 %v10764_v49, %v12406_v14  ;;  %v10058_v14 = vld [vmem:[#allocation7 + $0xe0] sm:$0xff]  }
 0x235   : > { %16201 = vst [vmem:[#allocation79_spill] sm:$0xff] %v12634_v36  ;;  %v12640_v55 = vpop.eup %10596  ;;  %10606 = vrsqrt.f32 %v1248_v17  ;;  %v10766_v36 = vld [vmem:[%s11860_s27 + $0x260] sm:$0xff]  ;;  %v10768_v49 = vld [vmem:[%s11860_s27 + $0x4b8] sm:$0xff]  ;;  %v10769_v10 = vld [vmem:[%s11860_s27 + $0x2a8] sm:$0xff]  ;;  %2389 = vmatpush1.bf16.msra.mxu0 %v10058_v14 }
 0x236   : > { %16202 = vst [vmem:[#allocation80_spill] sm:$0xff] %v12646_v25  ;;  %v1253_v35 = vpop.xlane.xlu1 %1252  ;;  %v12650_v51 = vmul.f32 %v10761_v23, %v12640_v55  ;;  %16204 = vst [vmem:[#allocation82_spill] sm:$0xff] %v12654_v7  ;;  %v12658_v20 = vmul.f32 %v10763_v32, %v12640_v55  ;;  %v1504_v62 = vmul.f32 %v10766_v36, %v12411_v63  ;;  %v10767_v25 = vld [vmem:[%s11860_s27 + $0x288] sm:$0xff]  ;;  %v10771_v36 = vld [vmem:[%s11860_s27 + $0x4b0] sm:$0xff]  ;;  %2390 = vmatprep.subr.bf16.mxu0 %v16177_v2 }
 0x237   : > { %10608 = vrsqrt.f32 %v1253_v35  ;;  %v12660_v42 = vpop.eup %10598  ;;  %v10765_v35 = vld [vmem:[%s11860_s27 + $0x498] sm:$0xff] }
 0x238   : > { %16203 = vst [vmem:[#allocation81_spill] sm:$0xff] %v12650_v51  ;;  %16205 = vst [vmem:[#allocation83_spill] sm:$0xff] %v12658_v20  ;;  %v1258_v17 = vpop.xlane.xlu0 %1257  ;;  %v12672_v32 = vmul.f32 %v10765_v35, %v12660_v42  ;;  %v1509_v51 = vmul.f32 %v10767_v25, %v12431_v34  ;;  %v1513_v35 = vmul.f32 %v10769_v10, %v12436_v38  ;;  %v10773_v14 = vld [vmem:[%s11860_s27 + $0x4f8] sm:$0xff] }
 0x239   : > { %v12664_v23 = vpop.eup %10600  ;;  %2172 = vmatmul.mubr.bf16.gmra.mrb[32].mxu0 %v1716_v8  ;;  %10610 = vrsqrt.f32 %v1258_v17  ;;  %v10770_v8 = vld [vmem:[%s11860_s27 + $0x490] sm:$0xff]  ;;  %v1720_v7 = vpack.c.bf16 %v1504_v62, %v1500_v1 }
 0x23a   : > { %16206 = vst [vmem:[#allocation84_spill] sm:$0xff] %v12672_v32  ;;  %v1263_v58 = vpop.xlane.xlu1 %1262  ;;  %v12680_v39 = vmul.f32 %v10768_v49, %v12664_v23  ;;  %2179 = vmatprep.mubr.bf16.mxu0 %v1721_v4  ;;  %v12686_v63 = vmul.f32 %v10770_v8, %v12660_v42  ;;  %v12690_v25 = vmul.f32 %v10771_v36, %v12664_v23  ;;  %v10772_v8 = vld [vmem:[%s11860_s27 + $0x4d8] sm:$0xff] }
 0x23b   : > { %10612 = vrsqrt.f32 %v1263_v58  ;;  %v12692_v17 = vpop.eup %10602  ;;  %v1725_v32 = vpack.c.bf16 %v1513_v35, %v1509_v51  ;;  %v10776_v51 = vld [vmem:[%s11860_s27 + $0x280] sm:$0xff] }
 0x23c   : > { %16207 = vst [vmem:[#allocation85_spill] sm:$0xff] %v12680_v39  ;;  %16208 = vst [vmem:[#allocation86_spill] sm:$0xff] %v12686_v63  ;;  %v1268_v58 = vpop.xlane.xlu0 %1267  ;;  %v12703_v36 = vmul.f32 %v10772_v8, %v12692_v17  ;;  %v10774_v39 = vld [vmem:[%s11860_s27 + $0x4d0] sm:$0xff] }
 0x23d   : > { %16209 = vst [vmem:[#allocation87_spill] sm:$0xff] %v12690_v25  ;;  %v12696_v49 = vpop.eup %10604  ;;  %10614 = vrsqrt.f32 %v1268_v58  ;;  %v12711_v10 = vmul.f32 %v10774_v39, %v12692_v17  ;;  %v10775_v63 = vld [vmem:[%s11860_s27 + $0x4f0] sm:$0xff]  ;;  %v10778_v25 = vld [vmem:[%s11860_s27 + $0x2a0] sm:$0xff]  ;;  %v10781_v39 = vld [vmem:[%s11860_s27 + $0x2e8] sm:$0xff] }
 0x23e   : > { %16210 = vst [vmem:[#allocation88_spill] sm:$0xff] %v12703_v36  ;;  %v1273_v20 = vpop.xlane.xlu1 %1272  ;;  %v12707_v4 = vmul.f32 %v10773_v14, %v12696_v49  ;;  %v12715_v8 = vmul.f32 %v10775_v63, %v12696_v49  ;;  %v10777_v14 = vld [vmem:[%s11860_s27 + $0x518] sm:$0xff]  ;;  %v1512_v1 = vmul.f32 %v10778_v25, %v12436_v38  ;;  %v10779_v36 = vld [vmem:[%s11860_s27 + $0x2c8] sm:$0xff]  ;;  %v10783_v38 = vld [vmem:[%s11860_s27 + $0x530] sm:$0xff] }
 0x23f   : > { %10616 = vrsqrt.f32 %v1273_v20  ;;  %16212 = vst [vmem:[#allocation90_spill] sm:$0xff] %v12711_v10  ;;  %v12717_v62 = vpop.eup %10606  ;;  %v1508_v20 = vmul.f32 %v10776_v51, %v12431_v34  ;;  %v10780_v34 = vld [vmem:[%s11860_s27 + $0x538] sm:$0xff] }
 0x240   : > { %16211 = vst [vmem:[#allocation89_spill] sm:$0xff] %v12707_v4  ;;  %16213 = vst [vmem:[#allocation91_spill] sm:$0xff] %v12715_v8  ;;  %v1278_v35 = vpop.xlane.xlu0 %1277  ;;  %v12729_v63 = vmul.f32 %v10777_v14, %v12717_v62  ;;  %v1517_v4 = vmul.f32 %v10779_v36, %v12464_v11  ;;  %v1521_v14 = vmul.f32 %v10781_v39, %v12469_v15 }
 0x241   : > { %v12721_v58 = vpop.eup %10608  ;;  %2180 = vmatmul.mubr.bf16.gmra.mrb[36].mxu0 %v1720_v7  ;;  %10618 = vrsqrt.f32 %v1278_v35  ;;  %v10782_v7 = vld [vmem:[%s11860_s27 + $0x510] sm:$0xff]  ;;  %v1724_v8 = vpack.c.bf16 %v1512_v1, %v1508_v20 }
 0x242   : > { %16214 = vst [vmem:[#allocation92_spill] sm:$0xff] %v12729_v63  ;;  %v1283_v56 = vpop.xlane.xlu1 %1282  ;;  %v12737_v51 = vmul.f32 %v10780_v34, %v12721_v58  ;;  %2187 = vmatprep.mubr.bf16.mxu0 %v1725_v32  ;;  %v12743_v10 = vmul.f32 %v10782_v7, %v12717_v62  ;;  %v12747_v25 = vmul.f32 %v10783_v38, %v12721_v58  ;;  %v10784_v34 = vld [vmem:[%s11860_s27 + $0x558] sm:$0xff]  ;;  %v10786_v63 = vld [vmem:[%s11860_s27 + $0x550] sm:$0xff] }
 0x243   : > { %10620 = vrsqrt.f32 %v1283_v56  ;;  %v12749_v36 = vpop.eup %10610  ;;  %v1729_v32 = vpack.c.bf16 %v1521_v14, %v1517_v4  ;;  %v10788_v4 = vld [vmem:[%s11860_s27 + $0x2c0] sm:$0xff] }
 0x244   : > { %16215 = vst [vmem:[#allocation93_spill] sm:$0xff] %v12737_v51  ;;  %16216 = vst [vmem:[#allocation94_spill] sm:$0xff] %v12743_v10  ;;  %v1288_v39 = vpop.xlane.xlu0 %1287  ;;  %v12759_v7 = vmul.f32 %v10784_v34, %v12749_v36  ;;  %v12767_v56 = vmul.f32 %v10786_v63, %v12749_v36  ;;  %v10787_v10 = vld [vmem:[%s11860_s27 + $0x570] sm:$0xff]  ;;  %v1516_v14 = vmul.f32 %v10788_v4, %v12464_v11  ;;  %v10059_v11 = vld [vmem:[#allocation7 + $0xe8] sm:$0xff]  }
 0x245   : > { %16217 = vst [vmem:[#allocation95_spill] sm:$0xff] %v12747_v25  ;;  %v12753_v35 = vpop.eup %10612  ;;  %10622 = vrsqrt.f32 %v1288_v39  ;;  %v10790_v25 = vld [vmem:[%s11860_s27 + $0x2e0] sm:$0xff]  ;;  %v10792_v4 = vld [vmem:[%s11860_s27 + $0x5b8] sm:$0xff]  ;;  %v10793_v63 = vld [vmem:[%s11860_s27 + $0x328] sm:$0xff]  ;;  %2391 = vmatpush1.bf16.msra.mxu0 %v10059_v11 }
 0x246   : > { %16218 = vst [vmem:[#allocation96_spill] sm:$0xff] %v12759_v7  ;;  %v1293_v38 = vpop.xlane.xlu1 %1292  ;;  %v12763_v37 = vmul.f32 %v10785_v9, %v12753_v35  ;;  %16220 = vst [vmem:[#allocation98_spill] sm:$0xff] %v12767_v56  ;;  %v12771_v34 = vmul.f32 %v10787_v10, %v12753_v35  ;;  %v1520_v20 = vmul.f32 %v10790_v25, %v12469_v15  ;;  %v10791_v7 = vld [vmem:[%s11860_s27 + $0x308] sm:$0xff]  ;;  %v10795_v25 = vld [vmem:[%s11860_s27 + $0x5b0] sm:$0xff]  ;;  %2392 = vmatprep.subr.bf16.mxu0 %v16177_v2 }
 0x247   : > { %10624 = vrsqrt.f32 %v1293_v38  ;;  %v12773_v1 = vpop.eup %10614  ;;  %v10789_v38 = vld [vmem:[%s11860_s27 + $0x598] sm:$0xff] }
 0x248   : > { %16219 = vst [vmem:[#allocation97_spill] sm:$0xff] %v12763_v37  ;;  %16221 = vst [vmem:[#allocation99_spill] sm:$0xff] %v12771_v34  ;;  %v1298_v39 = vpop.xlane.xlu0 %1297  ;;  %v12785_v10 = vmul.f32 %v10789_v38, %v12773_v1  ;;  %v1525_v37 = vmul.f32 %v10791_v7, %v12489_v21  ;;  %v1529_v38 = vmul.f32 %v10793_v63, %v12494_v28  ;;  %v10797_v11 = vld [vmem:[%s11860_s27 + $0x5f8] sm:$0xff] }
 0x249   : > { %v12777_v9 = vpop.eup %10616  ;;  %2188 = vmatmul.mubr.bf16.gmra.mrb[40].mxu0 %v1724_v8  ;;  %10626 = vrsqrt.f32 %v1298_v39  ;;  %v10794_v8 = vld [vmem:[%s11860_s27 + $0x590] sm:$0xff]  ;;  %v1728_v56 = vpack.c.bf16 %v1520_v20, %v1516_v14 }
 0x24a   : > { %16222 = vst [vmem:[#allocation100_spill] sm:$0xff] %v12785_v10  ;;  %v1303_v51 = vpop.xlane.xlu1 %1302  ;;  %v12793_v53 = vmul.f32 %v10792_v4, %v12777_v9  ;;  %2195 = vmatprep.mubr.bf16.mxu0 %v1729_v32  ;;  %v12799_v15 = vmul.f32 %v10794_v8, %v12773_v1  ;;  %v12803_v7 = vmul.f32 %v10795_v25, %v12777_v9  ;;  %v10796_v8 = vld [vmem:[%s11860_s27 + $0x5d8] sm:$0xff] }
 0x24b   : > { %10628 = vrsqrt.f32 %v1303_v51  ;;  %v12805_v39 = vpop.eup %10618  ;;  %v1733_v10 = vpack.c.bf16 %v1529_v38, %v1525_v37  ;;  %v10800_v37 = vld [vmem:[%s11860_s27 + $0x300] sm:$0xff] }
 0x24c   : > { %16223 = vst [vmem:[#allocation101_spill] sm:$0xff] %v12793_v53  ;;  %16224 = vst [vmem:[#allocation102_spill] sm:$0xff] %v12799_v15  ;;  %v1308_v51 = vpop.xlane.xlu0 %1307  ;;  %v12816_v25 = vmul.f32 %v10796_v8, %v12805_v39  ;;  %v10798_v53 = vld [vmem:[%s11860_s27 + $0x5d0] sm:$0xff] }
 0x24d   : > { %16225 = vst [vmem:[#allocation103_spill] sm:$0xff] %v12803_v7  ;;  %v12809_v4 = vpop.eup %10620  ;;  %10630 = vrsqrt.f32 %v1308_v51  ;;  %v12824_v63 = vmul.f32 %v10798_v53, %v12805_v39  ;;  %v10799_v15 = vld [vmem:[%s11860_s27 + $0x5f0] sm:$0xff]  ;;  %v10802_v7 = vld [vmem:[%s11860_s27 + $0x320] sm:$0xff]  ;;  %v10805_v53 = vld [vmem:[%s11860_s27 + $0x368] sm:$0xff] }
 0x24e   : > { %16226 = vst [vmem:[#allocation104_spill] sm:$0xff] %v12816_v25  ;;  %v1313_v34 = vpop.xlane.xlu1 %1312  ;;  %v12820_v32 = vmul.f32 %v10797_v11, %v12809_v4  ;;  %v12828_v8 = vmul.f32 %v10799_v15, %v12809_v4  ;;  %v10801_v11 = vld [vmem:[%s11860_s27 + $0x618] sm:$0xff]  ;;  %v1528_v14 = vmul.f32 %v10802_v7, %v12494_v28  ;;  %v10803_v25 = vld [vmem:[%s11860_s27 + $0x348] sm:$0xff]  ;;  %v10807_v28 = vld [vmem:[%s11860_s27 + $0x630] sm:$0xff] }
 0x24f   : > { %10632 = vrsqrt.f32 %v1313_v34  ;;  %16228 = vst [vmem:[#allocation106_spill] sm:$0xff] %v12824_v63  ;;  %v12830_v20 = vpop.eup %10622  ;;  %v1524_v34 = vmul.f32 %v10800_v37, %v12489_v21  ;;  %v10804_v21 = vld [vmem:[%s11860_s27 + $0x638] sm:$0xff] }
 0x250   : > { %16227 = vst [vmem:[#allocation105_spill] sm:$0xff] %v12820_v32  ;;  %16229 = vst [vmem:[#allocation107_spill] sm:$0xff] %v12828_v8  ;;  %v1318_v38 = vpop.xlane.xlu0 %1317  ;;  %v12842_v15 = vmul.f32 %v10801_v11, %v12830_v20  ;;  %v1533_v32 = vmul.f32 %v10803_v25, %v12522_v33  ;;  %v1537_v11 = vmul.f32 %v10805_v53, %v12527_v30 }
 0x251   : > { %v12834_v51 = vpop.eup %10624  ;;  %2196 = vmatmul.mubr.bf16.gmra.mrb[44].mxu0 %v1728_v56  ;;  %10634 = vrsqrt.f32 %v1318_v38  ;;  %v10806_v56 = vld [vmem:[%s11860_s27 + $0x610] sm:$0xff]  ;;  %v1732_v8 = vpack.c.bf16 %v1528_v14, %v1524_v34 }
 0x252   : > { %16230 = vst [vmem:[#allocation108_spill] sm:$0xff] %v12842_v15  ;;  %v1323_v60 = vpop.xlane.xlu1 %1322  ;;  %v12850_v37 = vmul.f32 %v10804_v21, %v12834_v51  ;;  %2203 = vmatprep.mubr.bf16.mxu0 %v1733_v10  ;;  %v12856_v63 = vmul.f32 %v10806_v56, %v12830_v20  ;;  %v12860_v7 = vmul.f32 %v10807_v28, %v12834_v51  ;;  %v10808_v21 = vld [vmem:[%s11860_s27 + $0x658] sm:$0xff]  ;;  %v10810_v15 = vld [vmem:[%s11860_s27 + $0x650] sm:$0xff] }
 0x253   : > { %10636 = vrsqrt.f32 %v1323_v60  ;;  %v12862_v25 = vpop.eup %10626  ;;  %v1737_v10 = vpack.c.bf16 %v1537_v11, %v1533_v32  ;;  %v10812_v32 = vld [vmem:[%s11860_s27 + $0x340] sm:$0xff] }
 0x254   : > { %16231 = vst [vmem:[#allocation109_spill] sm:$0xff] %v12850_v37  ;;  %16232 = vst [vmem:[#allocation110_spill] sm:$0xff] %v12856_v63  ;;  %v1328_v53 = vpop.xlane.xlu0 %1327  ;;  %v12872_v56 = vmul.f32 %v10808_v21, %v12862_v25  ;;  %v12880_v60 = vmul.f32 %v10810_v15, %v12862_v25  ;;  %v10811_v63 = vld [vmem:[%s11860_s27 + $0x670] sm:$0xff]  ;;  %v1532_v11 = vmul.f32 %v10812_v32, %v12522_v33  ;;  %v10816_v32 = vld [vmem:[%s11860_s27 + $0x6b8] sm:$0xff] }
 0x255   : > { %16233 = vst [vmem:[#allocation111_spill] sm:$0xff] %v12860_v7  ;;  %v12866_v38 = vpop.eup %10628  ;;  %10638 = vrsqrt.f32 %v1328_v53  ;;  %v10814_v7 = vld [vmem:[%s11860_s27 + $0x360] sm:$0xff]  ;;  %v10060_v33 = vld [vmem:[#allocation7 + $0xf0] sm:$0xff]   ;;  %v10817_v15 = vld [vmem:[%s11860_s27 + $0x3a8] sm:$0xff] }
 0x256   : > { %16234 = vst [vmem:[#allocation112_spill] sm:$0xff] %v12872_v56  ;;  %v1333_v28 = vpop.xlane.xlu1 %1332  ;;  %v12876_v45 = vmul.f32 %v10809_v40, %v12866_v38  ;;  %16236 = vst [vmem:[#allocation114_spill] sm:$0xff] %v12880_v60  ;;  %v12884_v21 = vmul.f32 %v10811_v63, %v12866_v38  ;;  %v1536_v34 = vmul.f32 %v10814_v7, %v12527_v30  ;;  %v10815_v56 = vld [vmem:[%s11860_s27 + $0x388] sm:$0xff]  ;;  %v10819_v7 = vld [vmem:[%s11860_s27 + $0x6b0] sm:$0xff]  ;;  %2393 = vmatpush1.bf16.msra.mxu0 %v10060_v33 }
 0x257   : > { %10640 = vrsqrt.f32 %v1333_v28  ;;  %v12886_v14 = vpop.eup %10630  ;;  %v10813_v28 = vld [vmem:[%s11860_s27 + $0x698] sm:$0xff]  ;;  %2394 = vmatprep.subr.bf16.mxu0 %v16177_v2  ;;  %v10822_v2 = vld [vmem:[%s11860_s27 + $0x6d0] sm:$0xff] }
 0x258   : > { %16235 = vst [vmem:[#allocation113_spill] sm:$0xff] %v12876_v45  ;;  %16237 = vst [vmem:[#allocation115_spill] sm:$0xff] %v12884_v21  ;;  %v1338_v53 = vpop.xlane.xlu0 %1337  ;;  %v12898_v63 = vmul.f32 %v10813_v28, %v12886_v14  ;;  %v1541_v45 = vmul.f32 %v10815_v56, %v12547_v41  ;;  %v1545_v28 = vmul.f32 %v10817_v15, %v12551_v27  ;;  %v10821_v33 = vld [vmem:[%s11860_s27 + $0x6f8] sm:$0xff]  ;;  %v10823_v15 = vld [vmem:[%s11860_s27 + $0x6f0] sm:$0xff] }
 0x259   : > { %v12890_v40 = vpop.eup %10632  ;;  %2204 = vmatmul.mubr.bf16.gmra.mrb[48].mxu0 %v1732_v8  ;;  %10642 = vrsqrt.f32 %v1338_v53  ;;  %v10818_v8 = vld [vmem:[%s11860_s27 + $0x690] sm:$0xff]  ;;  %v1736_v60 = vpack.c.bf16 %v1536_v34, %v1532_v11 }
 0x25a   : > { %16238 = vst [vmem:[#allocation116_spill] sm:$0xff] %v12898_v63  ;;  %v1343_v37 = vpop.xlane.xlu1 %1342  ;;  %v12906_v13 = vmul.f32 %v10816_v32, %v12890_v40  ;;  %2211 = vmatprep.mubr.bf16.mxu0 %v1737_v10  ;;  %v12912_v30 = vmul.f32 %v10818_v8, %v12886_v14  ;;  %v12916_v56 = vmul.f32 %v10819_v7, %v12890_v40  ;;  %v10820_v8 = vld [vmem:[%s11860_s27 + $0x6d8] sm:$0xff] }
 0x25b   : > { %10644 = vrsqrt.f32 %v1343_v37  ;;  %v12918_v53 = vpop.eup %10634  ;;  %v1741_v63 = vpack.c.bf16 %v1545_v28, %v1541_v45  ;;  %v10825_v28 = vld [vmem:[%s11860_s27 + $0x380] sm:$0xff]  ;;  %v10828_v45 = vld [vmem:[%s11860_s27 + $0x710] sm:$0xff] }
 0x25c   : > { %16239 = vst [vmem:[#allocation117_spill] sm:$0xff] %v12906_v13  ;;  %16240 = vst [vmem:[#allocation118_spill] sm:$0xff] %v12912_v30  ;;  %v1348_v37 = vpop.xlane.xlu0 %1347  ;;  %v12929_v7 = vmul.f32 %v10820_v8, %v12918_v53  ;;  %v12937_v13 = vmul.f32 %v10822_v2, %v12918_v53 }
 0x25d   : > { %16241 = vst [vmem:[#allocation119_spill] sm:$0xff] %v12916_v56  ;;  %v12922_v32 = vpop.eup %10636  ;;  %10646 = vrsqrt.f32 %v1348_v37 }
 0x25e   : > { %16242 = vst [vmem:[#allocation120_spill] sm:$0xff] %v12929_v7  ;;  %v1353_v21 = vpop.xlane.xlu1 %1352  ;;  %v12933_v10 = vmul.f32 %v10821_v33, %v12922_v32  ;;  %16244 = vst [vmem:[#allocation122_spill] sm:$0xff] %v12937_v13  ;;  %v12941_v8 = vmul.f32 %v10823_v15, %v12922_v32  ;;  %v1540_v15 = vmul.f32 %v10825_v28, %v12547_v41  ;;  %v10826_v33 = vld [vmem:[%s11860_s27 + $0x3a0] sm:$0xff]  ;;  %v10830_v41 = vld [vmem:[%s11860_s27 + $0x3e8] sm:$0xff] }
 0x25f   : > { %10648 = vrsqrt.f32 %v1353_v21  ;;  %v12943_v34 = vpop.eup %10638  ;;  %v10824_v21 = vld [vmem:[%s11860_s27 + $0x718] sm:$0xff]  ;;  %v1544_v30 = vmul.f32 %v10826_v33, %v12551_v27  ;;  %v1553_v27 = vmul.f32 %v10830_v41, %v12583_v57  ;;  %v10831_v28 = vld [vmem:[%s11860_s27 + $0x730] sm:$0xff] }
 0x260   : > { %16243 = vst [vmem:[#allocation121_spill] sm:$0xff] %v12933_v10  ;;  %16245 = vst [vmem:[#allocation123_spill] sm:$0xff] %v12941_v8  ;;  %v12953_v2 = vmul.f32 %v10824_v21, %v12943_v34  ;;  %v1358_v7 = vpop.xlane.xlu0 %1357  ;;  %v10827_v10 = vld [vmem:[%s11860_s27 + $0x738] sm:$0xff]  ;;  %v12965_v13 = vmul.f32 %v10828_v45, %v12943_v34 }
 0x261   : > { %v12947_v37 = vpop.eup %10640  ;;  %2212 = vmatmul.mubr.bf16.gmra.mrb[52].mxu0 %v1736_v60  ;;  %v10829_v60 = vld [vmem:[%s11860_s27 + $0x3c8] sm:$0xff]  ;;  %v10832_v8 = vld [vmem:[%s11860_s27 + $0x758] sm:$0xff]  ;;  %v1740_v41 = vpack.c.bf16 %v1544_v30, %v1540_v15 }
 0x262   : > { %16246 = vst [vmem:[#allocation124_spill] sm:$0xff] %v12953_v2  ;;  %v1363_v11 = vpop.xlane.xlu1 %1362  ;;  %v12961_v56 = vmul.f32 %v10827_v10, %v12947_v37  ;;  %16248 = vst [vmem:[#allocation126_spill] sm:$0xff] %v12965_v13  ;;  %2219 = vmatprep.mubr.bf16.mxu0 %v1741_v63  ;;  %v1549_v21 = vmul.f32 %v10829_v60, %v12579_v12  ;;  %v12973_v10 = vmul.f32 %v10831_v28, %v12947_v37  ;;  %v10833_v28 = vld [vmem:[%s11860_s27 + $0x778] sm:$0xff]  ;;  %v10838_v13 = vld [vmem:[%s11860_s27 + $0x3e0] sm:$0xff] }
 0x263   : > { %10650 = vrsqrt.f32 %v1363_v11  ;;  %v12975_v33 = vpop.eup %10642  ;;  %v10061_v30 = vld [vmem:[#allocation7 + $0xf8] sm:$0xff]  }
 0x264   : > { %16247 = vst [vmem:[#allocation125_spill] sm:$0xff] %v12961_v56  ;;  %16249 = vst [vmem:[#allocation127_spill] sm:$0xff] %v12973_v10  ;;  %10652 = vrsqrt.f32 %v1358_v7  ;;  %v12985_v11 = vmul.f32 %v10832_v8, %v12975_v33  ;;  %v10834_v7 = vld [vmem:[%s11860_s27 + $0x750] sm:$0xff]  ;;  %v1745_v2 = vpack.c.bf16 %v1553_v27, %v1549_v21  ;;  %v1552_v10 = vmul.f32 %v10838_v13, %v12583_v57 }
 0x265   : > { %v12979_v45 = vpop.eup %10644  ;;  %v12993_v63 = vmul.f32 %v10834_v7, %v12975_v33  ;;  %v10835_v56 = vld [vmem:[%s11860_s27 + $0x770] sm:$0xff]  ;;  %v10836_v7 = vld [vmem:[%s11860_s27 + $0x798] sm:$0xff]  ;;  %2395 = vmatpush1.bf16.msra.mxu0 %v10061_v30 }
 0x266   : > { %16250 = vst [vmem:[#allocation128_spill] sm:$0xff] %v12985_v11  ;;  %v12989_v24 = vmul.f32 %v10833_v28, %v12979_v45  ;;  %v12997_v60 = vmul.f32 %v10835_v56, %v12979_v45  ;;  %v10837_v56 = vld [vmem:[%s11860_s27 + $0x3c0] sm:$0xff]  ;;  %v10839_v11 = vld [vmem:[%s11860_s27 + $0x7b8] sm:$0xff]  ;;  %v10840_v28 = vld [vmem:[%s11860_s27 + $0x790] sm:$0xff] }
 0x267   : > { %16252 = vst [vmem:[#allocation130_spill] sm:$0xff] %v12993_v63  ;;  %v12999_v8 = vpop.eup %10646  ;;  %v1548_v27 = vmul.f32 %v10837_v56, %v12579_v12  ;;  %v10842_v12 = vld [vmem:[%s11860_s27 + $0x428] sm:$0xff]  ;;  %v10843_v13 = vld [vmem:[%s11860_s27 + $0x7b0] sm:$0xff] }
 0x268   : > { %16251 = vst [vmem:[#allocation129_spill] sm:$0xff] %v12989_v24  ;;  %16253 = vst [vmem:[#allocation131_spill] sm:$0xff] %v12997_v60  ;;  %v13009_v21 = vmul.f32 %v10836_v7, %v12999_v8  ;;  %v13021_v63 = vmul.f32 %v10840_v28, %v12999_v8  ;;  %v10841_v7 = vld [vmem:[%s11860_s27 + $0x408] sm:$0xff]  ;;  %v1561_v56 = vmul.f32 %v10842_v12, %v12608_v22  ;;  %v10844_v12 = vld [vmem:[%s11860_s27 + $0x7f8] sm:$0xff] }
 0x269   : > { %v13003_v15 = vpop.eup %10648  ;;  %2220 = vmatmul.mubr.bf16.gmra.mrb[56].mxu0 %v1740_v41  ;;  %v1557_v41 = vmul.f32 %v10841_v7, %v12604_v43  ;;  %v1744_v60 = vpack.c.bf16 %v1552_v10, %v1548_v27 }
 0x26a   : > { %16254 = vst [vmem:[#allocation132_spill] sm:$0xff] %v13009_v21  ;;  %v13017_v24 = vmul.f32 %v10839_v11, %v13003_v15  ;;  %16256 = vst [vmem:[#allocation134_spill] sm:$0xff] %v13021_v63  ;;  %2227 = vmatprep.mubr.bf16.mxu0 %v1745_v2  ;;  %v13029_v57 = vmul.f32 %v10843_v13, %v13003_v15  ;;  %v10845_v13 = vld [vmem:[%s11860_s27 + $0x7f0] sm:$0xff]  ;;  %v10846_v21 = vld [vmem:[%s11860_s27 + $0x7d8] sm:$0xff] }
 0x26b   : > { %v1749_v11 = vpack.c.bf16 %v1561_v56, %v1557_v41  ;;  %v10847_v2 = vld [vmem:[%s11860_s27 + $0x7d0] sm:$0xff]  ;;  %v10849_v56 = vld [vmem:[%s11860_s27 + $0x420] sm:$0xff] }
 0x26c   : > { %16255 = vst [vmem:[#allocation133_spill] sm:$0xff] %v13017_v24  ;;  %16257 = vst [vmem:[#allocation135_spill] sm:$0xff] %v13029_v57  ;;  %v10851_v57 = vld [vmem:[%s11860_s27 + $0x468] sm:$0xff] }
 0x26d   : > { %v13033_v28 = vpop.eup %10650  ;;  %v1569_v10 = vmul.f32 %v10851_v57, %v12640_v55 }
 0x26e   : > { %v13037_v7 = vpop.eup %10652  ;;  %v13041_v6 = vmul.f32 %v10844_v12, %v13033_v28  ;;  %v13045_v30 = vmul.f32 %v10845_v13, %v13033_v28  ;;  %v10848_v12 = vld [vmem:[%s11860_s27 + $0x400] sm:$0xff] }
 0x26f   : > { %v13049_v24 = vmul.f32 %v10846_v21, %v13037_v7  ;;  %v13053_v63 = vmul.f32 %v10847_v2, %v13037_v7  ;;  %v1556_v41 = vmul.f32 %v10848_v12, %v12604_v43  ;;  %v1560_v21 = vmul.f32 %v10849_v56, %v12608_v22  ;;  %v10850_v2 = vld [vmem:[%s11860_s27 + $0x448] sm:$0xff]  ;;  %v10853_v12 = vld [vmem:[%s11860_s27 + $0x460] sm:$0xff] }
 0x270   : > { %v1565_v13 = vmul.f32 %v10850_v2, %v12636_v0  ;;  %v1568_v22 = vmul.f32 %v10853_v12, %v12640_v55  ;;  %v10855_v2 = vld [vmem:[%s11860_s27 + $0x4a8] sm:$0xff] }
 0x271   : > { %16258 = vst [vmem:[#allocation136_spill] sm:$0xff] %v13049_v24  ;;  %2228 = vmatmul.mubr.bf16.gmra.mrb[60].mxu0 %v1744_v60  ;;  %v1748_v24 = vpack.c.bf16 %v1560_v21, %v1556_v41  ;;  %v10852_v60 = vld [vmem:[%s11860_s27 + $0x440] sm:$0xff]  ;;  %v1577_v57 = vmul.f32 %v10855_v2, %v12664_v23  ;;  %v10862_v2 = vld [vmem:[%s11860_s27 + $0x508] sm:$0xff] }
 0x272   : > { %2235 = vmatprep.mubr.bf16.mxu0 %v1749_v11  ;;  %v1753_v27 = vpack.c.bf16 %v1569_v10, %v1565_v13  ;;  %v1564_v43 = vmul.f32 %v10852_v60, %v12636_v0  ;;  %v10854_v11 = vld [vmem:[%s11860_s27 + $0x488] sm:$0xff]  ;;  %v10857_v21 = vld [vmem:[%s11860_s27 + $0x4a0] sm:$0xff] }
 0x273   : > { %v1573_v56 = vmul.f32 %v10854_v11, %v12660_v42  ;;  %v1576_v55 = vmul.f32 %v10857_v21, %v12664_v23  ;;  %v10859_v60 = vld [vmem:[%s11860_s27 + $0x4e8] sm:$0xff]  ;;  %v10860_v11 = vld [vmem:[%s11860_s27 + $0x4c0] sm:$0xff] }
 0x274   : > { %v1752_v41 = vpack.c.bf16 %v1568_v22, %v1564_v43  ;;  %v1585_v12 = vmul.f32 %v10859_v60, %v12696_v49  ;;  %v10864_v21 = vld [vmem:[%s11860_s27 + $0x500] sm:$0xff]  ;;  %v10867_v60 = vld [vmem:[%s11860_s27 + $0x568] sm:$0xff] }
 0x275   : > { %v1757_v10 = vpack.c.bf16 %v1577_v57, %v1573_v56  ;;  %v10861_v56 = vld [vmem:[%s11860_s27 + $0x4e0] sm:$0xff]  ;;  %v1589_v57 = vmul.f32 %v10862_v2, %v12717_v62  ;;  %v10871_v2 = vld [vmem:[%s11860_s27 + $0x5a8] sm:$0xff] }
 0x276   : > { %v1584_v23 = vmul.f32 %v10861_v56, %v12696_v49  ;;  %v10870_v56 = vld [vmem:[%s11860_s27 + $0x588] sm:$0xff] }
 0x279   : > { %2236 = vmatmul.mubr.bf16.gmra.mrb[64].mxu0 %v1748_v24  ;;  %v10856_v24 = vld [vmem:[%s11860_s27 + $0x480] sm:$0xff] }
 0x27a   : > { %2243 = vmatprep.mubr.bf16.mxu0 %v1753_v27  ;;  %v1572_v0 = vmul.f32 %v10856_v24, %v12660_v42  ;;  %v10858_v27 = vld [vmem:[%s11860_s27 + $0x4c8] sm:$0xff]  ;;  %v1580_v42 = vmul.f32 %v10860_v11, %v12692_v17  ;;  %v10868_v11 = vld [vmem:[%s11860_s27 + $0x540] sm:$0xff] }
 0x27b   : > { %v1581_v13 = vmul.f32 %v10858_v27, %v12692_v17  ;;  %v1588_v17 = vmul.f32 %v10864_v21, %v12717_v62  ;;  %v10866_v27 = vld [vmem:[%s11860_s27 + $0x548] sm:$0xff]  ;;  %v1596_v62 = vmul.f32 %v10868_v11, %v12749_v36 }
 0x27c   : > { %v1756_v43 = vpack.c.bf16 %v1576_v55, %v1572_v0  ;;  %v1760_v24 = vpack.c.bf16 %v1584_v23, %v1580_v42  ;;  %v10865_v55 = vld [vmem:[%s11860_s27 + $0x520] sm:$0xff]  ;;  %v1605_v23 = vmul.f32 %v10870_v56, %v12773_v1  ;;  %v10874_v21 = vld [vmem:[%s11860_s27 + $0x5c8] sm:$0xff] }
 0x27d   : > { %v1761_v22 = vpack.c.bf16 %v1585_v12, %v1581_v13  ;;  %v1592_v49 = vmul.f32 %v10865_v55, %v12721_v58  ;;  %v1597_v13 = vmul.f32 %v10866_v27, %v12749_v36  ;;  %v1601_v12 = vmul.f32 %v10867_v60, %v12753_v35  ;;  %v10869_v42 = vld [vmem:[%s11860_s27 + $0x560] sm:$0xff]  ;;  %v10875_v55 = vld [vmem:[%s11860_s27 + $0x5e8] sm:$0xff] }
 0x27e   : > { %v10876_v60 = vld [vmem:[%s11860_s27 + $0x5c0] sm:$0xff]  ;;  %v10879_v11 = vld [vmem:[%s11860_s27 + $0x628] sm:$0xff] }
 0x27f   : > { %v10880_v56 = vld [vmem:[%s11860_s27 + $0x600] sm:$0xff] }
 0x281   : > { %2244 = vmatmul.mubr.bf16.gmra.mrb[68].mxu0 %v1752_v41  ;;  %v10863_v41 = vld [vmem:[%s11860_s27 + $0x528] sm:$0xff] }
 0x282   : > { %2251 = vmatprep.mubr.bf16.mxu0 %v1757_v10  ;;  %v1593_v10 = vmul.f32 %v10863_v41, %v12721_v58  ;;  %v1600_v58 = vmul.f32 %v10869_v42, %v12753_v35 }
 0x284   : > { %v1765_v0 = vpack.c.bf16 %v1593_v10, %v1589_v57  ;;  %v1609_v57 = vmul.f32 %v10871_v2, %v12777_v9  ;;  %v1768_v41 = vpack.c.bf16 %v1600_v58, %v1596_v62  ;;  %v1625_v62 = vmul.f32 %v10879_v11, %v12834_v51  ;;  %v10882_v2 = vld [vmem:[%s11860_s27 + $0x648] sm:$0xff] }
 0x286   : > { %v1773_v10 = vpack.c.bf16 %v1609_v57, %v1605_v23  ;;  %v10881_v23 = vld [vmem:[%s11860_s27 + $0x620] sm:$0xff]  ;;  %v1629_v57 = vmul.f32 %v10882_v2, %v12862_v25 }
 0x289   : > { %2252 = vmatmul.mubr.bf16.gmra.mrb[72].mxu0 %v1756_v43  ;;  %v1764_v43 = vpack.c.bf16 %v1592_v49, %v1588_v17  ;;  %v1613_v17 = vmul.f32 %v10874_v21, %v12805_v39  ;;  %v1617_v49 = vmul.f32 %v10875_v55, %v12809_v4  ;;  %v10886_v21 = vld [vmem:[%s11860_s27 + $0x688] sm:$0xff] }
 0x28a   : > { %2259 = vmatprep.mubr.bf16.mxu0 %v1761_v22  ;;  %v1769_v22 = vpack.c.bf16 %v1601_v12, %v1597_v13  ;;  %v10877_v12 = vld [vmem:[%s11860_s27 + $0x5e0] sm:$0xff]  ;;  %v10887_v55 = vld [vmem:[%s11860_s27 + $0x6a8] sm:$0xff] }
 0x28b   : > { %v1777_v13 = vpack.c.bf16 %v1617_v49, %v1613_v17  ;;  %v1637_v17 = vmul.f32 %v10886_v21, %v12886_v14  ;;  %v1641_v49 = vmul.f32 %v10887_v55, %v12890_v40  ;;  %v10900_v21 = vld [vmem:[%s11860_s27 + $0x740] sm:$0xff]  ;;  %v10902_v55 = vld [vmem:[%s11860_s27 + $0x788] sm:$0xff] }
 0x291   : > { %2260 = vmatmul.mubr.bf16.gmra.mrb[76].mxu0 %v1760_v24  ;;  %v10872_v24 = vld [vmem:[%s11860_s27 + $0x580] sm:$0xff] }
 0x292   : > { %2267 = vmatprep.mubr.bf16.mxu0 %v1765_v0  ;;  %v1604_v36 = vmul.f32 %v10872_v24, %v12773_v1  ;;  %v10873_v0 = vld [vmem:[%s11860_s27 + $0x5a0] sm:$0xff]  ;;  %v1612_v1 = vmul.f32 %v10876_v60, %v12805_v39  ;;  %v1620_v39 = vmul.f32 %v10880_v56, %v12830_v20  ;;  %v10894_v56 = vld [vmem:[%s11860_s27 + $0x708] sm:$0xff] }
 0x293   : > { %v1608_v35 = vmul.f32 %v10873_v0, %v12777_v9  ;;  %v1616_v9 = vmul.f32 %v10877_v12, %v12809_v4  ;;  %v1624_v4 = vmul.f32 %v10881_v23, %v12834_v51  ;;  %v10884_v0 = vld [vmem:[%s11860_s27 + $0x640] sm:$0xff]  ;;  %v10890_v12 = vld [vmem:[%s11860_s27 + $0x6c8] sm:$0xff] }
 0x294   : > { %v10888_v60 = vld [vmem:[%s11860_s27 + $0x680] sm:$0xff]  ;;  %v10895_v23 = vld [vmem:[%s11860_s27 + $0x728] sm:$0xff] }
 0x295   : > { %v1772_v27 = vpack.c.bf16 %v1608_v35, %v1604_v36  ;;  %v1776_v42 = vpack.c.bf16 %v1616_v9, %v1612_v1  ;;  %v1780_v24 = vpack.c.bf16 %v1624_v4, %v1620_v39  ;;  %v10885_v35 = vld [vmem:[%s11860_s27 + $0x660] sm:$0xff]  ;;  %v1645_v9 = vmul.f32 %v10890_v12, %v12918_v53 }
 0x296   : > { %v1632_v51 = vmul.f32 %v10885_v35, %v12866_v38  ;;  %v10889_v1 = vld [vmem:[%s11860_s27 + $0x6a0] sm:$0xff]  ;;  %v1653_v39 = vmul.f32 %v10894_v56, %v12943_v34  ;;  %v1657_v4 = vmul.f32 %v10895_v23, %v12947_v37  ;;  %v16260_v56 = vpack.c.bf16 %v12190_v61, %v12178_v48  ;;  %v16276_v23 = vld [vmem:[#allocation34_spill] sm:$0xff] }
 0x297   : > { %v16265_v48 = vpack.c.bf16 %v12248_v47, %v12244_v44  ;;  %v16278_v47 = vld [vmem:[#allocation37_spill] sm:$0xff] }
 0x299   : > { %2268 = vmatmul.mubr.bf16.gmra.mrb[80].mxu0 %v1764_v43  ;;  %v10878_v43 = vld [vmem:[%s11860_s27 + $0x608] sm:$0xff] }
 0x29a   : > { %2275 = vmatprep.mubr.bf16.mxu0 %v1769_v22  ;;  %v1621_v22 = vmul.f32 %v10878_v43, %v12830_v20  ;;  %v1628_v20 = vmul.f32 %v10884_v0, %v12862_v25  ;;  %v1636_v25 = vmul.f32 %v10888_v60, %v12886_v14  ;;  %v10891_v43 = vld [vmem:[%s11860_s27 + $0x6e8] sm:$0xff] }
 0x29b   : > { %v10899_v0 = vld [vmem:[%s11860_s27 + $0x768] sm:$0xff] }
 0x29c   : > { %v1781_v58 = vpack.c.bf16 %v1625_v62, %v1621_v22  ;;  %v1649_v22 = vmul.f32 %v10891_v43, %v12922_v32  ;;  %v10907_v43 = vld [vmem:[%s11860_s27 + $0x7e8] sm:$0xff] }
 0x29e   : > { %v1793_v62 = vpack.c.bf16 %v1649_v22, %v1645_v9  ;;  %v1681_v22 = vmul.f32 %v10907_v43, %v13033_v28  ;;  %v16299_v43 = vld [vmem:[#allocation51_spill] sm:$0xff] }
 0x2a1   : > { %2276 = vmatmul.mubr.bf16.gmra.mrb[84].mxu0 %v1768_v41  ;;  %v10883_v41 = vld [vmem:[%s11860_s27 + $0x668] sm:$0xff] }
 0x2a2   : > { %2283 = vmatprep.mubr.bf16.mxu0 %v1773_v10  ;;  %v1633_v10 = vmul.f32 %v10883_v41, %v12866_v38  ;;  %v1640_v38 = vmul.f32 %v10889_v1, %v12890_v40  ;;  %v10896_v41 = vld [vmem:[%s11860_s27 + $0x700] sm:$0xff] }
 0x2a3   : > { %v10904_v1 = vld [vmem:[%s11860_s27 + $0x780] sm:$0xff] }
 0x2a4   : > { %v1785_v36 = vpack.c.bf16 %v1633_v10, %v1629_v57  ;;  %v1788_v11 = vpack.c.bf16 %v1640_v38, %v1636_v25  ;;  %v1797_v57 = vpack.c.bf16 %v1657_v4, %v1653_v39  ;;  %v10897_v10 = vld [vmem:[%s11860_s27 + $0x720] sm:$0xff]  ;;  %v16261_v39 = vpack.c.bf16 %v12194_v3, %v12182_v50 }
 0x2a5   : > { %v10905_v38 = vld [vmem:[%s11860_s27 + $0x7a0] sm:$0xff]  ;;  %v16266_v50 = vpack.c.bf16 %v12256_v54, %v12252_v52 }
 0x2a6   : > { %v1672_v12 = vmul.f32 %v10905_v38, %v13003_v15  ;;  %v16269_v3 = vld [vmem:[#allocation31_spill] sm:$0xff]  ;;  %v16279_v4 = vld [vmem:[#allocation36_spill] sm:$0xff] }
 0x2a7   : > { %v16280_v52 = vpack.c.bf16 %v16278_v47, %v16279_v4  ;;  %v16281_v54 = vld [vmem:[#allocation39_spill] sm:$0xff]  ;;  %v16312_v4 = vld [vmem:[#allocation58_spill] sm:$0xff] }
 0x2a8   : > { %v10074_v38 = vld [vmem:[#allocation13 + $0x28] ss:$16 sps:$4 sm:$0xff]  }
 0x2a9   : > { %2284 = vmatmul.mubr.bf16.gmra.mrb[88].mxu0 %v1772_v27  ;;  %v1784_v27 = vpack.c.bf16 %v1632_v51, %v1628_v20  ;;  %v1665_v20 = vmul.f32 %v10899_v0, %v12979_v45  ;;  %v16291_v0 = vld [vmem:[#allocation44_spill] sm:$0xff]  ;;  %v16311_v47 = vld [vmem:[#allocation59_spill] sm:$0xff] }
 0x2aa   : > { %2291 = vmatprep.mubr.bf16.mxu0 %v1777_v13  ;;  %v1789_v13 = vpack.c.bf16 %v1641_v49, %v1637_v17  ;;  %v10901_v17 = vld [vmem:[%s11860_s27 + $0x760] sm:$0xff]  ;;  %v1669_v49 = vmul.f32 %v10902_v55, %v12999_v8 }
 0x2b1   : > { %2292 = vmatmul.mubr.bf16.gmra.mrb[92].mxu0 %v1776_v42  ;;  %v10892_v42 = vld [vmem:[%s11860_s27 + $0x6c0] sm:$0xff] }
 0x2b2   : > { %2299 = vmatprep.mubr.bf16.mxu0 %v1781_v58  ;;  %v1644_v14 = vmul.f32 %v10892_v42, %v12918_v53  ;;  %v10893_v58 = vld [vmem:[%s11860_s27 + $0x6e0] sm:$0xff]  ;;  %v1652_v53 = vmul.f32 %v10896_v41, %v12943_v34  ;;  %v1660_v34 = vmul.f32 %v10900_v21, %v12975_v33 }
 0x2b3   : > { %v1648_v40 = vmul.f32 %v10893_v58, %v12922_v32  ;;  %v1656_v32 = vmul.f32 %v10897_v10, %v12947_v37  ;;  %v1664_v37 = vmul.f32 %v10901_v17, %v12979_v45  ;;  %v10906_v45 = vld [vmem:[%s11860_s27 + $0x7c8] sm:$0xff]  ;;  %v10908_v42 = vld [vmem:[%s11860_s27 + $0x7c0] sm:$0xff] }
 0x2b4   : > { %v1677_v9 = vmul.f32 %v10906_v45, %v13037_v7  ;;  %v10909_v58 = vld [vmem:[%s11860_s27 + $0x7e0] sm:$0xff] }
 0x2b5   : > { %v1792_v2 = vpack.c.bf16 %v1648_v40, %v1644_v14  ;;  %v1796_v35 = vpack.c.bf16 %v1656_v32, %v1652_v53  ;;  %v1800_v60 = vpack.c.bf16 %v1664_v37, %v1660_v34  ;;  %v1676_v14 = vmul.f32 %v10908_v42, %v13037_v7  ;;  %v16285_v41 = vld [vmem:[#allocation40_spill] sm:$0xff]  ;;  %v16287_v10 = vld [vmem:[#allocation43_spill] sm:$0xff]  ;;  %v16288_v32 = vld [vmem:[#allocation42_spill] sm:$0xff] }
 0x2b6   : > { %v1680_v40 = vmul.f32 %v10909_v58, %v13033_v28  ;;  %v16262_v7 = vpack.c.bf16 %v12209_v16, %v12198_v5  ;;  %v16263_v28 = vpack.c.bf16 %v12219_v26, %v12212_v18  ;;  %v16270_v5 = vld [vmem:[#allocation30_spill] sm:$0xff]  ;;  %v16272_v18 = vld [vmem:[#allocation33_spill] sm:$0xff]  ;;  %v16273_v26 = vld [vmem:[#allocation32_spill] sm:$0xff] }
 0x2b7   : > { %v16271_v16 = vpack.c.bf16 %v16269_v3, %v16270_v5  ;;  %v10065_v21 = vld [vmem:[#allocation10 + $0x24] ss:$16 sps:$4 sm:$0xff]   ;;  %v10070_v34 = vld [vmem:[#allocation13 + $0xc] ss:$16 sps:$4 sm:$0xff]   ;;  %v10080_v42 = vld [vmem:[#allocation13 + $0x48] ss:$16 sps:$4 sm:$0xff]  }
 0x2b8   : > { %v16293_v17 = vld [vmem:[#allocation47_spill] sm:$0xff]  ;;  %v16294_v37 = vld [vmem:[#allocation46_spill] sm:$0xff]  ;;  %5933 = vmatprep.subr.bf16.mxu0 %v10070_v34  ;;  %v16303_v58 = vld [vmem:[#allocation52_spill] sm:$0xff] }
 0x2b9   : > { %2300 = vmatmul.mubr.bf16.gmra.mrb[96].mxu0 %v1780_v24  ;;  %v10898_v24 = vld [vmem:[%s11860_s27 + $0x748] sm:$0xff]  ;;  %v16295_v55 = vpack.c.bf16 %v16293_v17, %v16294_v37  ;;  %v10118_v17 = vld [vmem:[#allocation13 + $0x12c] ss:$16 sps:$4 sm:$0xff]  }
 0x2ba   : > { %2307 = vmatprep.mubr.bf16.mxu0 %v1785_v36  ;;  %v1661_v36 = vmul.f32 %v10898_v24, %v12975_v33  ;;  %v1668_v33 = vmul.f32 %v10904_v1, %v12999_v8  ;;  %v1808_v8 = vpack.c.bf16 %v1680_v40, %v1676_v14  ;;  %v16289_v24 = vpack.c.bf16 %v16287_v10, %v16288_v32  ;;  %v10071_v1 = vld [vmem:[#allocation10 + $0x44] ss:$16 sps:$4 sm:$0xff]   ;;  %v16302_v14 = vld [vmem:[#allocation53_spill] sm:$0xff] }
 0x2bb   : > { %v10077_v45 = vld [vmem:[#allocation10 + $0x64] ss:$16 sps:$4 sm:$0xff]   ;;  %v16304_v40 = vpack.c.bf16 %v16302_v14, %v16303_v58  ;;  %v16308_v3 = vld [vmem:[#allocation57_spill] sm:$0xff] }
 0x2bc   : > { %v1801_v51 = vpack.c.bf16 %v1665_v20, %v1661_v36  ;;  %v16290_v36 = vld [vmem:[#allocation45_spill] sm:$0xff]  ;;  %v16309_v5 = vld [vmem:[#allocation56_spill] sm:$0xff] }
 0x2bd   : > { %v16292_v20 = vpack.c.bf16 %v16290_v36, %v16291_v0  ;;  %v10110_v10 = vld [vmem:[#allocation13 + $0xe8] ss:$16 sps:$4 sm:$0xff]   ;;  %v16318_v0 = vld [vmem:[#allocation62_spill] sm:$0xff] }
 0x2be   : > { %v10109_v32 = vld [vmem:[#allocation10 + $0xc] ss:$16 sps:$4 sm:$0xff]   ;;  %v10130_v58 = vld [vmem:[#allocation13 + $0x1ac] ss:$16 sps:$4 sm:$0xff]  }
 0x2bf   : > { %v16317_v36 = vld [vmem:[#allocation63_spill] sm:$0xff] }
 0x2c0   : > { %v10116_v37 = vld [vmem:[#allocation13 + $0x128] ss:$16 sps:$4 sm:$0xff]  }
 0x2c1   : > { %2308 = vmatmul.mubr.bf16.gmra.mrb[100].mxu0 %v1784_v27  ;;  %v10903_v27 = vld [vmem:[%s11860_s27 + $0x7a8] sm:$0xff] }
 0x2c2   : > { %2315 = vmatprep.mubr.bf16.mxu0 %v1789_v13  ;;  %v1673_v13 = vmul.f32 %v10903_v27, %v13003_v15  ;;  %v16259_v15 = vpack.c.bf16 %v12187_v59, %v12175_v46  ;;  %v16264_v46 = vpack.c.bf16 %v12228_v31, %v12224_v29  ;;  %v16267_v59 = vld [vmem:[#allocation29_spill] sm:$0xff]  ;;  %v16274_v29 = vpack.c.bf16 %v16272_v18, %v16273_v26  ;;  %v16275_v31 = vld [vmem:[#allocation35_spill] sm:$0xff]  ;;  %v10095_v18 = vld [vmem:[#allocation10 + $0xc4] ss:$16 sps:$4 sm:$0xff]  }
 0x2c3   : > { %v16268_v61 = vpack.c.bf16 %v12278_v19, %v16267_v59  ;;  %v16277_v44 = vpack.c.bf16 %v16275_v31, %v16276_v23  ;;  %v10068_v27 = vld [vmem:[#allocation13 + $0x8] ss:$16 sps:$4 sm:$0xff]   ;;  %v10091_v59 = vld [vmem:[#allocation10 + $0xa0] ss:$16 sps:$4 sm:$0xff]   ;;  %v10101_v23 = vld [vmem:[#allocation10 + $0xe4] ss:$16 sps:$4 sm:$0xff]  }
 0x2c4   : > { %v1805_v25 = vpack.c.bf16 %v1673_v13, %v1669_v49  ;;  %v10067_v49 = vld [vmem:[#allocation10 + $0x20] ss:$16 sps:$4 sm:$0xff]   ;;  %v10098_v31 = vld [vmem:[#allocation13 + $0xa8] ss:$16 sps:$4 sm:$0xff]  }
 0x2c5   : > { %v16296_v13 = vld [vmem:[#allocation49_spill] sm:$0xff] }
 0x2c6   : > { %v10100_v26 = vld [vmem:[#allocation13 + $0xac] ss:$16 sps:$4 sm:$0xff]  }
 0x2c9   : > { %2316 = vmatmul.mubr.bf16.gmra.mrb[104].mxu0 %v1788_v11  ;;  %v1804_v11 = vpack.c.bf16 %v1672_v12, %v1668_v33  ;;  %v10073_v33 = vld [vmem:[#allocation10 + $0x40] ss:$16 sps:$4 sm:$0xff]  }
 0x2ca   : > { %2323 = vmatprep.mubr.bf16.mxu0 %v1793_v62  ;;  %v1809_v62 = vpack.c.bf16 %v1681_v22, %v1677_v9  ;;  %v10076_v12 = vld [vmem:[#allocation13 + $0x2c] ss:$16 sps:$4 sm:$0xff]  }
 0x2cb   : > { %v10082_v9 = vld [vmem:[#allocation13 + $0x4c] ss:$16 sps:$4 sm:$0xff]  }
 0x2cc   : > { %v16300_v22 = vld [vmem:[#allocation50_spill] sm:$0xff] }
 0x2d1   : > { %2324 = vmatmul.mubr.bf16.gmra.mrb[108].mxu0 %v1792_v2  ;;  %v16282_v2 = vld [vmem:[#allocation38_spill] sm:$0xff] }
 0x2d2   : > { %2331 = vmatprep.mubr.bf16.mxu0 %v1797_v57  ;;  %v16283_v19 = vpack.c.bf16 %v16281_v54, %v16282_v2  ;;  %v16284_v57 = vld [vmem:[#allocation41_spill] sm:$0xff] }
 0x2d3   : > { %v16286_v53 = vpack.c.bf16 %v16284_v57, %v16285_v41  ;;  %v10103_v54 = vld [vmem:[#allocation10 + $0xe0] ss:$16 sps:$4 sm:$0xff]   ;;  %v10104_v2 = vld [vmem:[#allocation13 + $0xc8] ss:$16 sps:$4 sm:$0xff]  }
 0x2d4   : > { %v16315_v57 = vld [vmem:[#allocation60_spill] sm:$0xff] }
 0x2d9   : > { %2332 = vmatmul.mubr.bf16.gmra.mrb[112].mxu0 %v1796_v35  ;;  %v10062_v35 = vld [vmem:[#allocation10 + $0x4] ss:$16 sps:$4 sm:$0xff]  }
 0x2da   : > { %2339 = vmatprep.mubr.bf16.mxu0 %v1801_v51  ;;  %v10064_v51 = vld [vmem:[#allocation10] ss:$16 sps:$4 sm:$0xff]   ;;  %2963 = vmatprep.subr.bf16.mxu1 %v10062_v35  ;;  %v10113_v35 = vld [vmem:[#allocation13 + $0x108] ss:$16 sps:$4 sm:$0xff]  }
 0x2db   : > { %2964 = vmatpush1.bf16.msra.mxu1 %v10064_v51  ;;  %v16320_v51 = vld [vmem:[#allocation65_spill] sm:$0xff] }
 0x2dc   : > { %2965 = vmatprep.subr.bf16.mxu1 %v10065_v21  ;;  %v16321_v21 = vld [vmem:[#allocation64_spill] sm:$0xff] }
 0x2dd   : > { %v16322_v34 = vpack.c.bf16 %v16320_v51, %v16321_v21  ;;  %v16368_v21 = vld [vmem:[#allocation97_spill] sm:$0xff] }
 0x2df   : > { %2966 = vmatpush1.bf16.msra.mxu1 %v10067_v49  ;;  %v16323_v49 = vld [vmem:[#allocation67_spill] sm:$0xff] }
 0x2e0   : > { %2967 = vmatprep.subr.bf16.mxu1 %v10071_v1  ;;  %v16327_v1 = vld [vmem:[#allocation68_spill] sm:$0xff] }
 0x2e1   : > { %2340 = vmatmul.mubr.bf16.gmra.mrb[116].mxu0 %v1800_v60  ;;  %v16297_v60 = vld [vmem:[#allocation48_spill] sm:$0xff] }
 0x2e2   : > { %2347 = vmatprep.mubr.bf16.mxu0 %v1805_v25  ;;  %v16298_v25 = vpack.c.bf16 %v16296_v13, %v16297_v60  ;;  %v10119_v60 = vld [vmem:[#allocation13 + $0x148] ss:$16 sps:$4 sm:$0xff]  }
 0x2e3   : > { %2968 = vmatpush1.bf16.msra.mxu1 %v10073_v33 }
 0x2e4   : > { %2969 = vmatprep.subr.bf16.mxu1 %v10077_v45  ;;  %v10127_v45 = vld [vmem:[#allocation13 + $0x18c] ss:$16 sps:$4 sm:$0xff]  }
 0x2e9   : > { %2348 = vmatmul.mubr.bf16.gmra.mrb[120].mxu0 %v1804_v11  ;;  %v16301_v11 = vpack.c.bf16 %v16299_v43, %v16300_v22  ;;  %v16330_v43 = vld [vmem:[#allocation70_spill] sm:$0xff] }
 0x2ea   : > { %2355 = vmatprep.mubr.bf16.mxu0 %v1809_v62  ;;  %v10079_v62 = vld [vmem:[#allocation10 + $0x60] ss:$16 sps:$4 sm:$0xff]  }
 0x2eb   : > { %2970 = vmatpush1.bf16.msra.mxu1 %v10079_v62  ;;  %v16332_v62 = vld [vmem:[#allocation73_spill] sm:$0xff] }
 0x2f1   : > { %2356 = vmatmul.mubr.bf16.gmra.mrb[124].mxu0 %v1808_v8  ;;  %v10083_v8 = vld [vmem:[#allocation10 + $0x84] ss:$16 sps:$4 sm:$0xff]  }
 0x2f2   : > { %2396 = vmatprep.mubr.bf16.mxu0 %v16259_v15  ;;  %v10085_v15 = vld [vmem:[#allocation10 + $0x80] ss:$16 sps:$4 sm:$0xff]   ;;  %2971 = vmatprep.subr.bf16.mxu1 %v10083_v8 }
 0x2f3   : > { %2972 = vmatpush1.bf16.msra.mxu1 %v10085_v15  ;;  %v10133_v8 = vld [vmem:[#allocation13 + $0x1cc] ss:$16 sps:$4 sm:$0xff]  }
 0x2f4   : > { %v16335_v15 = vld [vmem:[#allocation75_spill] sm:$0xff] }
 0x2f9   : > { %2397 = vmatmul.mubr.bf16.vlgmr.msra.gmra.mrb[0].mxu0 %v16260_v56  ;;  %v10086_v56 = vld [vmem:[#allocation13 + $0x68] ss:$16 sps:$4 sm:$0xff]  }
 0x2fa   : > { %2404 = vmatprep.mubr.bf16.mxu0 %v16261_v39  ;;  %5934 = vmatpush1.bf16.msra.mxu0 %v10068_v27  ;;  %v10088_v39 = vld [vmem:[#allocation13 + $0x6c] ss:$16 sps:$4 sm:$0xff]  }
 0x2fb   : > { %5935 = vmatprep.subr.bf16.mxu0 %v10076_v12  ;;  %v16324_v27 = vld [vmem:[#allocation66_spill] sm:$0xff]  ;;  %v10122_v12 = vld [vmem:[#allocation13 + $0x168] ss:$16 sps:$4 sm:$0xff]  }
 0x2fc   : > { %v16325_v13 = vpack.c.bf16 %v16323_v49, %v16324_v27  ;;  %v16374_v27 = vld [vmem:[#allocation101_spill] sm:$0xff] }
 0x2fe   : > { %5936 = vmatpush1.bf16.msra.mxu0 %v10074_v38  ;;  %v10124_v38 = vld [vmem:[#allocation13 + $0x16c] ss:$16 sps:$4 sm:$0xff]  }
 0x2ff   : > { %5937 = vmatprep.subr.bf16.mxu0 %v10082_v9  ;;  %v16329_v9 = vld [vmem:[#allocation71_spill] sm:$0xff] }
 0x300   : > { %v16331_v22 = vpack.c.bf16 %v16329_v9, %v16330_v43  ;;  %v16383_v9 = vld [vmem:[#allocation107_spill] sm:$0xff]  ;;  %v16384_v43 = vld [vmem:[#allocation106_spill] sm:$0xff] }
 0x301   : > { %2405 = vmatmul.mubr.bf16.gmra.mrb[4].mxu0 %v16262_v7  ;;  %v10089_v7 = vld [vmem:[#allocation10 + $0xa4] ss:$16 sps:$4 sm:$0xff]  }
 0x302   : > { %2412 = vmatprep.mubr.bf16.mxu0 %v16263_v28  ;;  %5938 = vmatpush1.bf16.msra.mxu0 %v10080_v42  ;;  %v10094_v28 = vld [vmem:[#allocation13 + $0x8c] ss:$16 sps:$4 sm:$0xff]  }
 0x303   : > { %5939 = vmatprep.subr.bf16.mxu0 %v10088_v39  ;;  %2973 = vmatprep.subr.bf16.mxu1 %v10089_v7  ;;  %v16333_v42 = vld [vmem:[#allocation72_spill] sm:$0xff]  ;;  %v10131_v7 = vld [vmem:[#allocation13 + $0x1c8] ss:$16 sps:$4 sm:$0xff]  }
 0x304   : > { %2974 = vmatpush1.bf16.msra.mxu1 %v10091_v59  ;;  %v16334_v14 = vpack.c.bf16 %v16332_v62, %v16333_v42  ;;  %v10137_v59 = vld [vmem:[#allocation13 + $0x1e8] ss:$16 sps:$4 sm:$0xff]   ;;  %v16387_v62 = vld [vmem:[#allocation108_spill] sm:$0xff] }
 0x305   : > { %2975 = vmatprep.subr.bf16.mxu1 %v10095_v18  ;;  %v16345_v18 = vld [vmem:[#allocation80_spill] sm:$0xff] }
 0x306   : > { %5940 = vmatpush1.bf16.msra.mxu0 %v10086_v56  ;;  %v16336_v56 = vld [vmem:[#allocation74_spill] sm:$0xff] }
 0x307   : > { %5941 = vmatprep.subr.bf16.mxu0 %v10094_v28  ;;  %v16337_v39 = vpack.c.bf16 %v16335_v15, %v16336_v56  ;;  %v16338_v28 = vld [vmem:[#allocation77_spill] sm:$0xff]  ;;  %v16393_v15 = vld [vmem:[#allocation112_spill] sm:$0xff] }
 0x309   : > { %2413 = vmatmul.mubr.bf16.gmra.mrb[8].mxu0 %v16264_v46  ;;  %v16305_v46 = vld [vmem:[#allocation55_spill] sm:$0xff] }
 0x30a   : > { %2420 = vmatprep.mubr.bf16.mxu0 %v16265_v48  ;;  %v16306_v48 = vld [vmem:[#allocation54_spill] sm:$0xff] }
 0x311   : > { %2421 = vmatmul.mubr.bf16.gmra.mrb[12].mxu0 %v16266_v50  ;;  %v16307_v50 = vpack.c.bf16 %v16305_v46, %v16306_v48  ;;  %v16339_v46 = vld [vmem:[#allocation76_spill] sm:$0xff] }
 0x312   : > { %2428 = vmatprep.mubr.bf16.mxu0 %v16268_v61  ;;  %v10092_v61 = vld [vmem:[#allocation13 + $0x88] ss:$16 sps:$4 sm:$0xff]   ;;  %v16340_v48 = vpack.c.bf16 %v16338_v28, %v16339_v46 }
 0x313   : > { %5942 = vmatpush1.bf16.msra.mxu0 %v10092_v61  ;;  %v16341_v61 = vld [vmem:[#allocation79_spill] sm:$0xff]  ;;  %v16398_v46 = vld [vmem:[#allocation117_spill] sm:$0xff] }
 0x314   : > { %5943 = vmatprep.subr.bf16.mxu0 %v10100_v26 }
 0x317   : > { %5944 = vmatpush1.bf16.msra.mxu0 %v10098_v31  ;;  %v16348_v31 = vld [vmem:[#allocation82_spill] sm:$0xff] }
 0x319   : > { %2429 = vmatmul.mubr.bf16.gmra.mrb[16].mxu0 %v16271_v16  ;;  %v16310_v16 = vpack.c.bf16 %v16308_v3, %v16309_v5  ;;  %v16342_v3 = vld [vmem:[#allocation78_spill] sm:$0xff] }
 0x31a   : > { %2436 = vmatprep.mubr.bf16.mxu0 %v16274_v29  ;;  %v10097_v29 = vld [vmem:[#allocation10 + $0xc0] ss:$16 sps:$4 sm:$0xff]   ;;  %v16343_v5 = vpack.c.bf16 %v16341_v61, %v16342_v3 }
 0x31b   : > { %2976 = vmatpush1.bf16.msra.mxu1 %v10097_v29  ;;  %v16347_v29 = vld [vmem:[#allocation83_spill] sm:$0xff]  ;;  %v16402_v61 = vld [vmem:[#allocation118_spill] sm:$0xff] }
 0x31c   : > { %2977 = vmatprep.subr.bf16.mxu1 %v10101_v23  ;;  %v16349_v23 = vpack.c.bf16 %v16347_v29, %v16348_v31 }
 0x31f   : > { %2978 = vmatpush1.bf16.msra.mxu1 %v10103_v54  ;;  %v16354_v54 = vld [vmem:[#allocation86_spill] sm:$0xff] }
 0x320   : > { %3316 = vmatprep.subr.bf16.mxu1 %v10109_v32 }
 0x321   : > { %2437 = vmatmul.mubr.bf16.gmra.mrb[20].mxu0 %v16277_v44  ;;  %v10106_v44 = vld [vmem:[#allocation13 + $0xcc] ss:$16 sps:$4 sm:$0xff]  }
 0x322   : > { %2444 = vmatprep.mubr.bf16.mxu0 %v16280_v52  ;;  %v16313_v52 = vpack.c.bf16 %v16311_v47, %v16312_v4  ;;  %5945 = vmatprep.subr.bf16.mxu0 %v10106_v44  ;;  %v16350_v44 = vld [vmem:[#allocation85_spill] sm:$0xff]  ;;  %v16351_v47 = vld [vmem:[#allocation84_spill] sm:$0xff] }
 0x323   : > { %5946 = vmatpush1.bf16.msra.mxu0 %v10104_v2  ;;  %v16352_v4 = vpack.c.bf16 %v16350_v44, %v16351_v47 }
 0x329   : > { %2445 = vmatmul.mubr.bf16.gmra.mrb[24].mxu0 %v16283_v19  ;;  %v16314_v19 = vld [vmem:[#allocation61_spill] sm:$0xff] }
 0x32a   : > { %2452 = vmatprep.mubr.bf16.mxu0 %v16286_v53  ;;  %v16316_v41 = vpack.c.bf16 %v16314_v19, %v16315_v57  ;;  %v10112_v53 = vld [vmem:[#allocation13 + $0xec] ss:$16 sps:$4 sm:$0xff]  }
 0x32b   : > { %5947 = vmatprep.subr.bf16.mxu0 %v10112_v53  ;;  %v16356_v19 = vld [vmem:[#allocation89_spill] sm:$0xff]  ;;  %v16357_v57 = vld [vmem:[#allocation88_spill] sm:$0xff]  ;;  %v16359_v53 = vld [vmem:[#allocation91_spill] sm:$0xff] }
 0x32c   : > { %5948 = vmatpush1.bf16.msra.mxu0 %v10110_v10  ;;  %v16360_v10 = vld [vmem:[#allocation90_spill] sm:$0xff] }
 0x32d   : > { %v16361_v32 = vpack.c.bf16 %v16359_v53, %v16360_v10  ;;  %v16411_v53 = vld [vmem:[#allocation124_spill] sm:$0xff] }
 0x331   : > { %2453 = vmatmul.mubr.bf16.gmra.mrb[28].mxu0 %v16289_v24  ;;  %v10115_v24 = vld [vmem:[#allocation13 + $0x10c] ss:$16 sps:$4 sm:$0xff]  }
 0x332   : > { %2460 = vmatprep.mubr.bf16.mxu0 %v16292_v20  ;;  %v16319_v20 = vpack.c.bf16 %v16317_v36, %v16318_v0  ;;  %5949 = vmatprep.subr.bf16.mxu0 %v10115_v24  ;;  %v16362_v24 = vld [vmem:[#allocation93_spill] sm:$0xff]  ;;  %v16363_v36 = vld [vmem:[#allocation92_spill] sm:$0xff] }
 0x333   : > { %5950 = vmatpush1.bf16.msra.mxu0 %v10113_v35  ;;  %v16364_v0 = vpack.c.bf16 %v16362_v24, %v16363_v36  ;;  %v16366_v35 = vld [vmem:[#allocation94_spill] sm:$0xff]  ;;  %v10136_v36 = vld [vmem:[#allocation10 + $0x2c] ss:$16 sps:$4 sm:$0xff]  }
 0x334   : > { %5951 = vmatprep.subr.bf16.mxu0 %v10118_v17 }
 0x337   : > { %5952 = vmatpush1.bf16.msra.mxu0 %v10116_v37  ;;  %v16371_v37 = vld [vmem:[#allocation99_spill] sm:$0xff] }
 0x339   : > { %2461 = vmatmul.mubr.bf16.gmra.mrb[32].mxu0 %v16295_v55  ;;  %v10121_v55 = vld [vmem:[#allocation13 + $0x14c] ss:$16 sps:$4 sm:$0xff]  }
 0x33a   : > { %2468 = vmatprep.mubr.bf16.mxu0 %v16298_v25  ;;  %v16326_v25 = vld [vmem:[#allocation69_spill] sm:$0xff]  ;;  %5953 = vmatprep.subr.bf16.mxu0 %v10121_v55  ;;  %v16372_v55 = vld [vmem:[#allocation98_spill] sm:$0xff] }
 0x33b   : > { %v16328_v33 = vpack.c.bf16 %v16326_v25, %v16327_v1  ;;  %5954 = vmatpush1.bf16.msra.mxu0 %v10119_v60  ;;  %v16373_v49 = vpack.c.bf16 %v16371_v37, %v16372_v55  ;;  %v16377_v25 = vld [vmem:[#allocation103_spill] sm:$0xff]  ;;  %v16378_v1 = vld [vmem:[#allocation102_spill] sm:$0xff] }
 0x33c   : > { %5955 = vmatprep.subr.bf16.mxu0 %v10124_v38  ;;  %v16380_v38 = vld [vmem:[#allocation105_spill] sm:$0xff] }
 0x33d   : > { %v10154_v55 = vld [vmem:[#allocation10 + $0x4c] ss:$16 sps:$4 sm:$0xff]  }
 0x33f   : > { %5956 = vmatpush1.bf16.msra.mxu0 %v10122_v12  ;;  %v16381_v12 = vld [vmem:[#allocation104_spill] sm:$0xff] }
 0x340   : > { %5957 = vmatprep.subr.bf16.mxu0 %v10127_v45  ;;  %v16382_v45 = vpack.c.bf16 %v16380_v38, %v16381_v12  ;;  %v10152_v12 = vld [vmem:[#allocation10 + $0x48] ss:$16 sps:$4 sm:$0xff]  }
 0x341   : > { %2469 = vmatmul.mubr.bf16.gmra.mrb[36].mxu0 %v16301_v11  ;;  %v10125_v11 = vld [vmem:[#allocation13 + $0x188] ss:$16 sps:$4 sm:$0xff]  }
 0x342   : > { %2476 = vmatprep.mubr.bf16.mxu0 %v16304_v40  ;;  %v10128_v40 = vld [vmem:[#allocation13 + $0x1a8] ss:$16 sps:$4 sm:$0xff]  }
 0x343   : > { %5958 = vmatpush1.bf16.msra.mxu0 %v10125_v11  ;;  %v16386_v11 = vld [vmem:[#allocation109_spill] sm:$0xff] }
 0x344   : > { %5959 = vmatprep.subr.bf16.mxu0 %v10130_v58  ;;  %v16388_v42 = vpack.c.bf16 %v16386_v11, %v16387_v62  ;;  %v16390_v58 = vld [vmem:[#allocation110_spill] sm:$0xff] }
 0x347   : > { %5960 = vmatpush1.bf16.msra.mxu0 %v10128_v40 }
 0x348   : > { %5961 = vmatprep.subr.bf16.mxu0 %v10133_v8  ;;  %v16392_v8 = vld [vmem:[#allocation113_spill] sm:$0xff] }
 0x349   : > { %2477 = vmatmul.mubr.bf16.gmra.mrb[40].mxu0 %v16307_v50  ;;  %v10139_v50 = vld [vmem:[#allocation13 + $0x1ec] ss:$16 sps:$4 sm:$0xff]   ;;  %v16394_v56 = vpack.c.bf16 %v16392_v8, %v16393_v15 }
 0x34a   : > { %2484 = vmatprep.mubr.bf16.mxu0 %v16310_v16  ;;  %v16344_v16 = vld [vmem:[#allocation81_spill] sm:$0xff] }
 0x34b   : > { %5962 = vmatpush1.bf16.msra.mxu0 %v10131_v7  ;;  %v16346_v26 = vpack.c.bf16 %v16344_v16, %v16345_v18  ;;  %v16396_v7 = vld [vmem:[#allocation114_spill] sm:$0xff]  ;;  %v16405_v16 = vld [vmem:[#allocation120_spill] sm:$0xff] }
 0x34c   : > { %5963 = vmatprep.subr.bf16.mxu0 %v10139_v50 }
 0x34f   : > { %5964 = vmatpush1.bf16.msra.mxu0 %v10137_v59  ;;  %v16401_v59 = vld [vmem:[#allocation119_spill] sm:$0xff] }
 0x350   : > { %v16403_v3 = vpack.c.bf16 %v16401_v59, %v16402_v61 }
 0x351   : > { %2485 = vmatmul.mubr.bf16.gmra.mrb[44].mxu0 %v16313_v52  ;;  %v16353_v52 = vld [vmem:[#allocation87_spill] sm:$0xff] }
 0x352   : > { %2492 = vmatprep.mubr.bf16.mxu0 %v16316_v41  ;;  %v16355_v2 = vpack.c.bf16 %v16353_v52, %v16354_v54  ;;  %v16358_v41 = vpack.c.bf16 %v16356_v19, %v16357_v57  ;;  %v16408_v19 = vld [vmem:[#allocation122_spill] sm:$0xff] }
 0x359   : > { %2493 = vmatmul.mubr.bf16.gmra.mrb[48].mxu0 %v16319_v20  ;;  %v16365_v20 = vld [vmem:[#allocation95_spill] sm:$0xff] }
 0x35a   : > { %2500 = vmatprep.mubr.bf16.mxu0 %v16322_v34  ;;  %v16367_v51 = vpack.c.bf16 %v16365_v20, %v16366_v35  ;;  %v16369_v34 = vld [vmem:[#allocation96_spill] sm:$0xff] }
 0x35b   : > { %v16370_v17 = vpack.c.bf16 %v16368_v21, %v16369_v34  ;;  %v16413_v21 = vmov 0   ;;  %v10134_v34 = vld [vmem:[#allocation10 + $0x28] ss:$16 sps:$4 sm:$0xff]  }
 0x361   : > { %2501 = vmatmul.mubr.bf16.gmra.mrb[52].mxu0 %v16325_v13  ;;  %v16375_v13 = vld [vmem:[#allocation100_spill] sm:$0xff] }
 0x362   : > { %2508 = vmatprep.mubr.bf16.mxu0 %v16328_v33  ;;  %v16376_v60 = vpack.c.bf16 %v16374_v27, %v16375_v13  ;;  %v16379_v33 = vpack.c.bf16 %v16377_v25, %v16378_v1  ;;  %v16414_v13 = vld [vmem:[#allocation127_spill] sm:$0xff]  ;;  %v16417_v1 = vld [vmem:[#allocation129_spill] sm:$0xff] }
 0x369   : > { %2509 = vmatmul.mubr.bf16.gmra.mrb[56].mxu0 %v16331_v22  ;;  %v16385_v22 = vpack.c.bf16 %v16383_v9, %v16384_v43  ;;  %v10169_v9 = vld [vmem:[#allocation10 + $0x6c] ss:$16 sps:$4 sm:$0xff]  }
 0x36a   : > { %2516 = vmatprep.mubr.bf16.mxu0 %v16334_v14  ;;  %v16389_v14 = vld [vmem:[#allocation111_spill] sm:$0xff] }
 0x36b   : > { %v16391_v40 = vpack.c.bf16 %v16389_v14, %v16390_v58 }
 0x371   : > { %2517 = vmatmul.mubr.bf16.gmra.mrb[60].mxu0 %v16337_v39  ;;  %v16395_v39 = vld [vmem:[#allocation115_spill] sm:$0xff] }
 0x372   : > { %2524 = vmatprep.mubr.bf16.mxu0 %v16340_v48  ;;  %v16397_v28 = vpack.c.bf16 %v16395_v39, %v16396_v7  ;;  %v16399_v48 = vld [vmem:[#allocation116_spill] sm:$0xff]  ;;  %v16421_v39 = vld [vmem:[#allocation130_spill] sm:$0xff] }
 0x373   : > { %v16400_v50 = vpack.c.bf16 %v16398_v46, %v16399_v48  ;;  %v16424_v46 = vld [vmem:[#allocation132_spill] sm:$0xff] }
 0x379   : > { %2525 = vmatmul.mubr.bf16.gmra.mrb[64].mxu0 %v16343_v5  ;;  %v16404_v5 = vld [vmem:[#allocation121_spill] sm:$0xff] }
 0x37a   : > { %2532 = vmatprep.mubr.bf16.mxu0 %v16346_v26  ;;  %v16406_v18 = vpack.c.bf16 %v16404_v5, %v16405_v16  ;;  %v13348_v26 = vld [vmem:[#allocation8] ss:$0 sm:$0xff] }
 0x381   : > { %2533 = vmatmul.mubr.bf16.gmra.mrb[68].mxu0 %v16349_v23 }
 0x382   : > { %2540 = vmatprep.mubr.bf16.mxu0 %v16352_v4 }
 0x389   : > { %2541 = vmatmul.mubr.bf16.gmra.mrb[72].mxu0 %v16355_v2  ;;  %v16407_v2 = vld [vmem:[#allocation123_spill] sm:$0xff] }
 0x38a   : > { %2548 = vmatprep.mubr.bf16.mxu0 %v16358_v41  ;;  %v16409_v57 = vpack.c.bf16 %v16407_v2, %v16408_v19  ;;  %v16410_v41 = vld [vmem:[#allocation125_spill] sm:$0xff] }
 0x38b   : > { %v16412_v10 = vpack.c.bf16 %v16410_v41, %v16411_v53 }
 0x391   : > { %2549 = vmatmul.mubr.bf16.gmra.mrb[76].mxu0 %v16361_v32  ;;  %v10107_v32 = vld [vmem:[#allocation10 + $0x8] ss:$16 sps:$4 sm:$0xff]  }
 0x392   : > { %2556 = vmatprep.mubr.bf16.mxu0 %v16364_v0 }
 0x399   : > { %2557 = vmatmul.mubr.bf16.gmra.mrb[80].mxu0 %v16367_v51 }
 0x39a   : > { %2564 = vmatprep.mubr.bf16.mxu0 %v16370_v17 }
 0x3a1   : > { %2565 = vmatmul.mubr.bf16.gmra.mrb[84].mxu0 %v16373_v49 }
 0x3a2   : > { %2572 = vmatprep.mubr.bf16.mxu0 %v16376_v60  ;;  %v16415_v60 = vld [vmem:[#allocation126_spill] sm:$0xff] }
 0x3a3   : > { %v16416_v25 = vpack.c.bf16 %v16414_v13, %v16415_v60 }
 0x3a9   : > { %2573 = vmatmul.mubr.bf16.gmra.mrb[88].mxu0 %v16379_v33  ;;  %v16418_v33 = vld [vmem:[#allocation128_spill] sm:$0xff] }
 0x3aa   : > { %2580 = vmatprep.mubr.bf16.mxu0 %v16382_v45  ;;  %v16419_v38 = vpack.c.bf16 %v16417_v1, %v16418_v33 }
 0x3b1   : > { %2581 = vmatmul.mubr.bf16.gmra.mrb[92].mxu0 %v16385_v22 }
 0x3b2   : > { %2588 = vmatprep.mubr.bf16.mxu0 %v16388_v42  ;;  %v10167_v42 = vld [vmem:[#allocation10 + $0x68] ss:$16 sps:$4 sm:$0xff]  }
 0x3b9   : > { %2589 = vmatmul.mubr.bf16.gmra.mrb[96].mxu0 %v16391_v40  ;;  %v10184_v40 = vld [vmem:[#allocation10 + $0x8c] ss:$16 sps:$4 sm:$0xff]  }
 0x3ba   : > { %2596 = vmatprep.mubr.bf16.mxu0 %v16394_v56  ;;  %v16420_v56 = vld [vmem:[#allocation131_spill] sm:$0xff] }
 0x3bb   : > { %v16422_v7 = vpack.c.bf16 %v16420_v56, %v16421_v39  ;;  %v10148_v56 = vld [vmem:[%s11868_s29 + $0x40] ss:$16 sps:$4 sm:$0xff]  }
 0x3c1   : > { %2597 = vmatmul.mubr.bf16.gmra.mrb[100].mxu0 %v16397_v28  ;;  %v16423_v28 = vld [vmem:[#allocation133_spill] sm:$0xff] }
 0x3c2   : > { %2604 = vmatprep.mubr.bf16.mxu0 %v16400_v50  ;;  %v16425_v48 = vpack.c.bf16 %v16423_v28, %v16424_v46  ;;  %v10182_v50 = vld [vmem:[#allocation10 + $0x88] ss:$16 sps:$4 sm:$0xff]  }
 0x3c9   : > { %2605 = vmatmul.mubr.bf16.gmra.mrb[104].mxu0 %v16403_v3 }
 0x3ca   : > { %2612 = vmatprep.mubr.bf16.mxu0 %v16406_v18 }
 0x3cc   : > { %v2398_v29 = vpop.f32.mrb[0].mxu0 }
 0x3cd   : > { %v9053_v31 = vadd.f32 %v13348_v26, %v2398_v29  ;;  %v2400_v23 = vpop.f32.mrb[1].mxu0 }
 0x3ce   : > { %v2401_v44 = vpop.f32.mrb[2].mxu0 }
 0x3cf   : > { %v9054_v47 = vadd.f32 %v13348_v26, %v2401_v44  ;;  %v2403_v4 = vpop.f32.mrb[3].mxu0  ;;  %v2653_v52 = vmax.f32 %v9053_v31, 0.0  ;;  %v16426_v44 = vld [vmem:[#allocation135_spill] sm:$0xff] }
 0x3d1   : > { %v2654_v54 = vmax.f32 %v9054_v47, 0.0  ;;  %2613 = vmatmul.mubr.bf16.gmra.mrb[108].mxu0 %v16409_v57  ;;  %v16427_v47 = vld [vmem:[#allocation134_spill] sm:$0xff] }
 0x3d2   : > { %2620 = vmatprep.mubr.bf16.mxu0 %v16412_v10  ;;  %v16428_v4 = vpack.c.bf16 %v16426_v44, %v16427_v47  ;;  %v10142_v10 = vld [vmem:[%s11868_s29 + $0x4] ss:$16 sps:$4 sm:$0xff]  }
 0x3d3   : > { %v13358_v24 = vpack.c.bf16 %v2654_v54, %v2653_v52  ;;  %v16429_v52 = vld [vmem:[#allocation136_spill] sm:$0xff] }
 0x3d4   : > { %v2406_v0 = vpop.f32.mrb[4].mxu0  ;;  %v16430_v54 = vpack.c.bf16 %v13041_v6, %v16429_v52 }
 0x3d5   : > { %v9055_v20 = vadd.f32 %v13348_v26, %v2406_v0  ;;  %v2408_v35 = vpop.f32.mrb[5].mxu0  ;;  %2996 = vmatmul.mubr.bf16.vlgmr.msra.gmra.mrb[0].mxu1 %v13358_v24 }
 0x3d6   : > { %3317 = vmatpush1.bf16.msra.mxu1 %v10107_v32  ;;  %v2409_v51 = vpop.f32.mrb[6].mxu0  ;;  %3005 = vmatprep.mubr.bf16.mxu1 %v16413_v21 }
 0x3d7   : > { %v9056_v17 = vadd.f32 %v13348_v26, %v2409_v51  ;;  %v2411_v37 = vpop.f32.mrb[7].mxu0  ;;  %3318 = vmatprep.subr.bf16.mxu1 %v10136_v36  ;;  %v2655_v49 = vmax.f32 %v9055_v20, 0.0  ;;  %v16431_v20 = vpack.c.bf16 %v13045_v30, %v13053_v63  ;;  %v10197_v63 = vld [vmem:[#allocation10 + $0xa8] ss:$16 sps:$4 sm:$0xff]   ;;  %v10199_v30 = vld [vmem:[#allocation10 + $0xac] ss:$16 sps:$4 sm:$0xff]  }
 0x3d8   : > { %v10140_v37 = vld [vmem:[%s11868_s29] ss:$16 sps:$4 sm:$0xff]  }
 0x3d9   : > { %v2656_v27 = vmax.f32 %v9056_v17, 0.0  ;;  %2621 = vmatmul.mubr.bf16.gmra.mrb[112].mxu0 %v16416_v25 }
 0x3da   : > { %2628 = vmatprep.mubr.bf16.mxu0 %v16419_v38  ;;  %3319 = vmatpush1.bf16.msra.mxu1 %v10134_v34 }
 0x3db   : > { %v13370_v45 = vpack.c.bf16 %v2656_v27, %v2655_v49  ;;  %3320 = vmatprep.subr.bf16.mxu1 %v10154_v55  ;;  %v10143_v49 = vld [vmem:[%s11868_s29 + $0x24] ss:$16 sps:$4 sm:$0xff]  }
 0x3dc   : > { %v2414_v43 = vpop.f32.mrb[8].mxu0 }
 0x3dd   : > { %v9057_v22 = vadd.f32 %v13348_v26, %v2414_v43  ;;  %v2416_v11 = vpop.f32.mrb[9].mxu0  ;;  %3006 = vmatmul.mubr.bf16.gmra.mrb[4].mxu1 %v13370_v45 }
 0x3de   : > { %v2417_v62 = vpop.f32.mrb[10].mxu0  ;;  %3015 = vmatprep.mubr.bf16.mxu1 %v16413_v21  ;;  %3321 = vmatpush1.bf16.msra.mxu1 %v10152_v12 }
 0x3df   : > { %v9058_v14 = vadd.f32 %v13348_v26, %v2417_v62  ;;  %v2419_v58 = vpop.f32.mrb[11].mxu0  ;;  %3322 = vmatprep.subr.bf16.mxu1 %v10169_v9  ;;  %v2657_v8 = vmax.f32 %v9057_v22, 0.0  ;;  %v10145_v9 = vld [vmem:[%s11868_s29 + $0x20] ss:$16 sps:$4 sm:$0xff]   ;;  %v10146_v22 = vld [vmem:[%s11868_s29 + $0x44] ss:$16 sps:$4 sm:$0xff]  }
 0x3e1   : > { %v2658_v15 = vmax.f32 %v9058_v14, 0.0  ;;  %2629 = vmatmul.mubr.bf16.gmra.mrb[116].mxu0 %v16422_v7  ;;  %v10149_v7 = vld [vmem:[%s11868_s29 + $0x64] ss:$16 sps:$4 sm:$0xff]  }
 0x3e2   : > { %2636 = vmatprep.mubr.bf16.mxu0 %v16425_v48  ;;  %3323 = vmatpush1.bf16.msra.mxu1 %v10167_v42 }
 0x3e3   : > { %v13382_v59 = vpack.c.bf16 %v2658_v15, %v2657_v8  ;;  %3324 = vmatprep.subr.bf16.mxu1 %v10184_v40 }
 0x3e4   : > { %v2422_v61 = vpop.f32.mrb[12].mxu0 }
 0x3e5   : > { %v9059_v3 = vadd.f32 %v13348_v26, %v2422_v61  ;;  %v2424_v5 = vpop.f32.mrb[13].mxu0  ;;  %3016 = vmatmul.mubr.bf16.gmra.mrb[8].mxu1 %v13382_v59 }
 0x3e6   : > { %v2425_v16 = vpop.f32.mrb[14].mxu0  ;;  %3025 = vmatprep.mubr.bf16.mxu1 %v16413_v21  ;;  %3325 = vmatpush1.bf16.msra.mxu1 %v10182_v50 }
 0x3e7   : > { %v9060_v18 = vadd.f32 %v13348_v26, %v2425_v16  ;;  %v2427_v29 = vpop.f32.mrb[15].mxu0  ;;  %v2659_v31 = vmax.f32 %v9059_v3, 0.0  ;;  %3326 = vmatprep.subr.bf16.mxu1 %v10199_v30 }
 0x3e9   : > { %v2660_v23 = vmax.f32 %v9060_v18, 0.0  ;;  %2637 = vmatmul.mubr.bf16.gmra.mrb[120].mxu0 %v16428_v4  ;;  %v10151_v18 = vld [vmem:[%s11868_s29 + $0x60] ss:$16 sps:$4 sm:$0xff]  }
 0x3ea   : > { %2644 = vmatprep.mubr.bf16.mxu0 %v16430_v54  ;;  %3327 = vmatpush1.bf16.msra.mxu1 %v10197_v63 }
 0x3eb   : > { %v13394_v2 = vpack.c.bf16 %v2660_v23, %v2659_v31  ;;  %v10155_v31 = vld [vmem:[%s11868_s29 + $0x84] ss:$16 sps:$4 sm:$0xff]  }
 0x3ec   : > { %v2430_v19 = vpop.f32.mrb[16].mxu0 }
 0x3ed   : > { %v9061_v57 = vadd.f32 %v13348_v26, %v2430_v19  ;;  %v2432_v41 = vpop.f32.mrb[17].mxu0  ;;  %3026 = vmatmul.mubr.bf16.gmra.mrb[12].mxu1 %v13394_v2 }
 0x3ee   : > { %v2433_v53 = vpop.f32.mrb[18].mxu0  ;;  %3035 = vmatprep.mubr.bf16.mxu1 %v16413_v21  ;;  %v10157_v41 = vld [vmem:[%s11868_s29 + $0x80] ss:$16 sps:$4 sm:$0xff]  }
 0x3ef   : > { %v9062_v32 = vadd.f32 %v13348_v26, %v2433_v53  ;;  %v2435_v36 = vpop.f32.mrb[19].mxu0  ;;  %v2661_v0 = vmax.f32 %v9061_v57, 0.0 }
 0x3f1   : > { %v2662_v6 = vmax.f32 %v9062_v32, 0.0  ;;  %2645 = vmatmul.mubr.bf16.gmra.mrb[124].mxu0 %v16431_v20 }
 0x3f2   : > { %5965 = vmatprep.mubr.bf16.mxu0 %v10142_v10  ;;  %v10158_v10 = vld [vmem:[%s11868_s29 + $0xa4] ss:$16 sps:$4 sm:$0xff]  }
 0x3f3   : > { %v13404_v35 = vpack.c.bf16 %v2662_v6, %v2661_v0  ;;  %v10212_v0 = vld [vmem:[#allocation10 + $0xc8] ss:$16 sps:$4 sm:$0xff]   ;;  %v10214_v6 = vld [vmem:[#allocation10 + $0xcc] ss:$16 sps:$4 sm:$0xff]  }
 0x3f4   : > { %v2438_v51 = vpop.f32.mrb[20].mxu0  ;;  %3328 = vmatprep.subr.bf16.mxu1 %v10214_v6  ;;  %v10238_v6 = vld [vmem:[#allocation13 + $0x22c] ss:$16 sps:$4 sm:$0xff]  }
 0x3f5   : > { %v9063_v34 = vadd.f32 %v13348_v26, %v2438_v51  ;;  %v2440_v17 = vpop.f32.mrb[21].mxu0  ;;  %3036 = vmatmul.mubr.bf16.gmra.mrb[16].mxu1 %v13404_v35 }
 0x3f6   : > { %v2441_v55 = vpop.f32.mrb[22].mxu0  ;;  %3045 = vmatprep.mubr.bf16.mxu1 %v16413_v21  ;;  %3329 = vmatpush1.bf16.msra.mxu1 %v10212_v0 }
 0x3f7   : > { %v9064_v27 = vadd.f32 %v13348_v26, %v2441_v55  ;;  %v2443_v13 = vpop.f32.mrb[23].mxu0  ;;  %v2663_v60 = vmax.f32 %v9063_v34, 0.0 }
 0x3f8   : > { %v10161_v13 = vld [vmem:[%s11868_s29 + $0xc4] ss:$16 sps:$4 sm:$0xff]  }
 0x3f9   : > { %v2664_v25 = vmax.f32 %v9064_v27, 0.0  ;;  %5966 = vmatmul.mubr.bf16.vlgmr.msra.gmra.mrb[128].mxu0 %v10140_v37 }
 0x3fa   : > { %5975 = vmatprep.mubr.bf16.mxu0 %v10143_v49  ;;  %v10160_v49 = vld [vmem:[%s11868_s29 + $0xa0] ss:$16 sps:$4 sm:$0xff]  }
 0x3fb   : > { %v13412_v1 = vpack.c.bf16 %v2664_v25, %v2663_v60 }
 0x3fc   : > { %v2446_v33 = vpop.f32.mrb[24].mxu0 }
 0x3fd   : > { %v9065_v38 = vadd.f32 %v13348_v26, %v2446_v33  ;;  %v2448_v12 = vpop.f32.mrb[25].mxu0  ;;  %3046 = vmatmul.mubr.bf16.gmra.mrb[20].mxu1 %v13412_v1 }
 0x3fe   : > { %v2449_v43 = vpop.f32.mrb[26].mxu0  ;;  %3055 = vmatprep.mubr.bf16.mxu1 %v16413_v21 }
 0x3ff   : > { %v9066_v11 = vadd.f32 %v13348_v26, %v2449_v43  ;;  %v2451_v62 = vpop.f32.mrb[27].mxu0  ;;  %v2665_v42 = vmax.f32 %v9065_v38, 0.0  ;;  %v10163_v43 = vld [vmem:[%s11868_s29 + $0xc0] ss:$16 sps:$4 sm:$0xff]  }
 0x401   : > { %v2666_v14 = vmax.f32 %v9066_v11, 0.0  ;;  %5976 = vmatmul.mubr.bf16.gmra.mrb[132].mxu0 %v10145_v9  ;;  %v10164_v11 = vld [vmem:[%s11868_s29 + $0xe4] ss:$16 sps:$4 sm:$0xff]  }
 0x402   : > { %5985 = vmatprep.mubr.bf16.mxu0 %v10146_v22 }
 0x403   : > { %v13420_v58 = vpack.c.bf16 %v2666_v14, %v2665_v42 }
 0x404   : > { %v2454_v40 = vpop.f32.mrb[28].mxu0 }
 0x405   : > { %v9067_v8 = vadd.f32 %v13348_v26, %v2454_v40  ;;  %v2456_v15 = vpop.f32.mrb[29].mxu0  ;;  %3056 = vmatmul.mubr.bf16.gmra.mrb[24].mxu1 %v13420_v58 }
 0x406   : > { %v2457_v39 = vpop.f32.mrb[30].mxu0  ;;  %3065 = vmatprep.mubr.bf16.mxu1 %v16413_v21 }
 0x407   : > { %v9068_v28 = vadd.f32 %v13348_v26, %v2457_v39  ;;  %v2459_v46 = vpop.f32.mrb[31].mxu0  ;;  %v2667_v48 = vmax.f32 %v9067_v8, 0.0 }
 0x408   : > { %v10170_v46 = vld [vmem:[%s11868_s29 + $0x104] ss:$16 sps:$4 sm:$0xff]  }
 0x409   : > { %v2668_v50 = vmax.f32 %v9068_v28, 0.0  ;;  %5986 = vmatmul.mubr.bf16.gmra.mrb[136].mxu0 %v10148_v56 }
 0x40a   : > { %5995 = vmatprep.mubr.bf16.mxu0 %v10149_v7  ;;  %v10166_v7 = vld [vmem:[%s11868_s29 + $0xe0] ss:$16 sps:$4 sm:$0xff]  }
 0x40b   : > { %v13428_v61 = vpack.c.bf16 %v2668_v50, %v2667_v48 }
 0x40c   : > { %v2462_v3 = vpop.f32.mrb[32].mxu0 }
 0x40d   : > { %v9069_v5 = vadd.f32 %v13348_v26, %v2462_v3  ;;  %v2464_v16 = vpop.f32.mrb[33].mxu0  ;;  %3066 = vmatmul.mubr.bf16.gmra.mrb[28].mxu1 %v13428_v61 }
 0x40e   : > { %v2465_v29 = vpop.f32.mrb[34].mxu0  ;;  %3075 = vmatprep.mubr.bf16.mxu1 %v16413_v21 }
 0x40f   : > { %v9070_v23 = vadd.f32 %v13348_v26, %v2465_v29  ;;  %v2467_v44 = vpop.f32.mrb[35].mxu0  ;;  %v2669_v47 = vmax.f32 %v9069_v5, 0.0 }
 0x411   : > { %v2670_v4 = vmax.f32 %v9070_v23, 0.0  ;;  %5996 = vmatmul.mubr.bf16.gmra.mrb[140].mxu0 %v10151_v18  ;;  %v10172_v23 = vld [vmem:[%s11868_s29 + $0x100] ss:$16 sps:$4 sm:$0xff]  }
 0x412   : > { %6005 = vmatprep.mubr.bf16.mxu0 %v10155_v31 }
 0x413   : > { %v13436_v52 = vpack.c.bf16 %v2670_v4, %v2669_v47  ;;  %v10173_v47 = vld [vmem:[%s11868_s29 + $0x124] ss:$16 sps:$4 sm:$0xff]  }
 0x414   : > { %v2470_v54 = vpop.f32.mrb[36].mxu0 }
 0x415   : > { %v9071_v19 = vadd.f32 %v13348_v26, %v2470_v54  ;;  %v2472_v57 = vpop.f32.mrb[37].mxu0  ;;  %3076 = vmatmul.mubr.bf16.gmra.mrb[32].mxu1 %v13436_v52 }
 0x416   : > { %v2473_v53 = vpop.f32.mrb[38].mxu0  ;;  %3085 = vmatprep.mubr.bf16.mxu1 %v16413_v21  ;;  %v10229_v57 = vld [vmem:[#allocation10 + $0xec] ss:$16 sps:$4 sm:$0xff]  }
 0x417   : > { %v9072_v32 = vadd.f32 %v13348_v26, %v2473_v53  ;;  %v2475_v36 = vpop.f32.mrb[39].mxu0  ;;  %v2671_v20 = vmax.f32 %v9071_v19, 0.0  ;;  %v10227_v19 = vld [vmem:[#allocation10 + $0xe8] ss:$16 sps:$4 sm:$0xff]   ;;  %3330 = vmatprep.subr.bf16.mxu1 %v10229_v57  ;;  %v10260_v57 = vld [vmem:[#allocation13 + $0x2c8] ss:$16 sps:$4 sm:$0xff]  }
 0x418   : > { %3331 = vmatpush1.bf16.msra.mxu1 %v10227_v19 }
 0x419   : > { %v2672_v51 = vmax.f32 %v9072_v32, 0.0  ;;  %6006 = vmatmul.mubr.bf16.gmra.mrb[144].mxu0 %v10157_v41  ;;  %v10235_v41 = vld [vmem:[#allocation13 + $0x20c] ss:$16 sps:$4 sm:$0xff]   ;;  %v10233_v32 = vld [vmem:[#allocation13 + $0x208] ss:$16 sps:$4 sm:$0xff]  }
 0x41a   : > { %6015 = vmatprep.mubr.bf16.mxu0 %v10158_v10  ;;  %6286 = vmatprep.subr.bf16.mxu0 %v10235_v41 }
 0x41b   : > { %v13444_v34 = vpack.c.bf16 %v2672_v51, %v2671_v20  ;;  %6287 = vmatpush1.bf16.msra.mxu0 %v10233_v32  ;;  %v10268_v32 = vld [vmem:[#allocation13 + $0x2ec] ss:$16 sps:$4 sm:$0xff]  }
 0x41c   : > { %v2478_v17 = vpop.f32.mrb[40].mxu0  ;;  %6288 = vmatprep.subr.bf16.mxu0 %v10238_v6 }
 0x41d   : > { %v9073_v37 = vadd.f32 %v13348_v26, %v2478_v17  ;;  %v2480_v55 = vpop.f32.mrb[41].mxu0  ;;  %3086 = vmatmul.mubr.bf16.gmra.mrb[36].mxu1 %v13444_v34  ;;  %v10175_v17 = vld [vmem:[%s11868_s29 + $0x120] ss:$16 sps:$4 sm:$0xff]  }
 0x41e   : > { %v2481_v27 = vpop.f32.mrb[42].mxu0  ;;  %3095 = vmatprep.mubr.bf16.mxu1 %v16413_v21 }
 0x41f   : > { %v9074_v63 = vadd.f32 %v13348_v26, %v2481_v27  ;;  %v2483_v30 = vpop.f32.mrb[43].mxu0  ;;  %v2673_v60 = vmax.f32 %v9073_v37, 0.0  ;;  %v10236_v37 = vld [vmem:[#allocation13 + $0x228] ss:$16 sps:$4 sm:$0xff]  }
 0x420   : > { %6289 = vmatpush1.bf16.msra.mxu0 %v10236_v37  ;;  %v10188_v37 = vld [vmem:[%s11868_s29 + $0x1a4] ss:$16 sps:$4 sm:$0xff]  }
 0x421   : > { %v2674_v25 = vmax.f32 %v9074_v63, 0.0  ;;  %6016 = vmatmul.mubr.bf16.gmra.mrb[148].mxu0 %v10160_v49  ;;  %v10176_v49 = vld [vmem:[%s11868_s29 + $0x144] ss:$16 sps:$4 sm:$0xff]  }
 0x422   : > { %6025 = vmatprep.mubr.bf16.mxu0 %v10161_v13  ;;  %v10244_v63 = vld [vmem:[#allocation13 + $0x24c] ss:$16 sps:$4 sm:$0xff]  }
 0x423   : > { %v13452_v33 = vpack.c.bf16 %v2674_v25, %v2673_v60  ;;  %v10242_v25 = vld [vmem:[#allocation13 + $0x248] ss:$16 sps:$4 sm:$0xff]   ;;  %6290 = vmatprep.subr.bf16.mxu0 %v10244_v63 }
 0x424   : > { %v2486_v38 = vpop.f32.mrb[44].mxu0  ;;  %6291 = vmatpush1.bf16.msra.mxu0 %v10242_v25 }
 0x425   : > { %v9075_v12 = vadd.f32 %v13348_v26, %v2486_v38  ;;  %v2488_v9 = vpop.f32.mrb[45].mxu0  ;;  %3096 = vmatmul.mubr.bf16.gmra.mrb[40].mxu1 %v13452_v33 }
 0x426   : > { %v2489_v22 = vpop.f32.mrb[46].mxu0  ;;  %3105 = vmatprep.mubr.bf16.mxu1 %v16413_v21  ;;  %v10247_v9 = vld [vmem:[#allocation13 + $0x26c] ss:$16 sps:$4 sm:$0xff]  }
 0x427   : > { %v9076_v62 = vadd.f32 %v13348_v26, %v2489_v22  ;;  %v2491_v42 = vpop.f32.mrb[47].mxu0  ;;  %v2675_v14 = vmax.f32 %v9075_v12, 0.0  ;;  %6292 = vmatprep.subr.bf16.mxu0 %v10247_v9 }
 0x429   : > { %v2676_v40 = vmax.f32 %v9076_v62, 0.0  ;;  %6026 = vmatmul.mubr.bf16.gmra.mrb[152].mxu0 %v10163_v43  ;;  %v10245_v62 = vld [vmem:[#allocation13 + $0x268] ss:$16 sps:$4 sm:$0xff]  }
 0x42a   : > { %6035 = vmatprep.mubr.bf16.mxu0 %v10164_v11  ;;  %v10178_v11 = vld [vmem:[%s11868_s29 + $0x140] ss:$16 sps:$4 sm:$0xff]   ;;  %6293 = vmatpush1.bf16.msra.mxu0 %v10245_v62 }
 0x42b   : > { %v13460_v8 = vpack.c.bf16 %v2676_v40, %v2675_v14  ;;  %v10179_v14 = vld [vmem:[%s11868_s29 + $0x164] ss:$16 sps:$4 sm:$0xff]  }
 0x42c   : > { %v2494_v15 = vpop.f32.mrb[48].mxu0 }
 0x42d   : > { %v9077_v56 = vadd.f32 %v13348_v26, %v2494_v15  ;;  %v2496_v39 = vpop.f32.mrb[49].mxu0  ;;  %3106 = vmatmul.mubr.bf16.gmra.mrb[44].mxu1 %v13460_v8 }
 0x42e   : > { %v2497_v28 = vpop.f32.mrb[50].mxu0  ;;  %3115 = vmatprep.mubr.bf16.mxu1 %v16413_v21 }
 0x42f   : > { %v9078_v48 = vadd.f32 %v13348_v26, %v2497_v28  ;;  %v2499_v50 = vpop.f32.mrb[51].mxu0  ;;  %v2677_v3 = vmax.f32 %v9077_v56, 0.0  ;;  %v10253_v56 = vld [vmem:[#allocation13 + $0x28c] ss:$16 sps:$4 sm:$0xff]   ;;  %v10251_v28 = vld [vmem:[#allocation13 + $0x288] ss:$16 sps:$4 sm:$0xff]  }
 0x430   : > { %6294 = vmatprep.subr.bf16.mxu0 %v10253_v56  ;;  %v10256_v50 = vld [vmem:[#allocation13 + $0x2ac] ss:$16 sps:$4 sm:$0xff]  }
 0x431   : > { %v2678_v5 = vmax.f32 %v9078_v48, 0.0  ;;  %6036 = vmatmul.mubr.bf16.gmra.mrb[156].mxu0 %v10166_v7 }
 0x432   : > { %6045 = vmatprep.mubr.bf16.mxu0 %v10170_v46  ;;  %6295 = vmatpush1.bf16.msra.mxu0 %v10251_v28 }
 0x433   : > { %v13468_v16 = vpack.c.bf16 %v2678_v5, %v2677_v3  ;;  %6296 = vmatprep.subr.bf16.mxu0 %v10256_v50  ;;  %v10289_v50 = vld [vmem:[#allocation13 + $0x36c] ss:$16 sps:$4 sm:$0xff]  }
 0x434   : > { %v2502_v18 = vpop.f32.mrb[52].mxu0 }
 0x435   : > { %v9079_v29 = vadd.f32 %v13348_v26, %v2502_v18  ;;  %v2504_v31 = vpop.f32.mrb[53].mxu0  ;;  %3116 = vmatmul.mubr.bf16.gmra.mrb[48].mxu1 %v13468_v16  ;;  %v10181_v18 = vld [vmem:[%s11868_s29 + $0x160] ss:$16 sps:$4 sm:$0xff]  }
 0x436   : > { %v2505_v44 = vpop.f32.mrb[54].mxu0  ;;  %3125 = vmatprep.mubr.bf16.mxu1 %v16413_v21 }
 0x437   : > { %v9080_v4 = vadd.f32 %v13348_v26, %v2505_v44  ;;  %v2507_v54 = vpop.f32.mrb[55].mxu0  ;;  %v2679_v53 = vmax.f32 %v9079_v29, 0.0  ;;  %v10254_v29 = vld [vmem:[#allocation13 + $0x2a8] ss:$16 sps:$4 sm:$0xff]  }
 0x438   : > { %6297 = vmatpush1.bf16.msra.mxu0 %v10254_v29  ;;  %v10287_v29 = vld [vmem:[#allocation13 + $0x368] ss:$16 sps:$4 sm:$0xff]  }
 0x439   : > { %v2680_v10 = vmax.f32 %v9080_v4, 0.0  ;;  %6046 = vmatmul.mubr.bf16.gmra.mrb[160].mxu0 %v10172_v23  ;;  %v10185_v23 = vld [vmem:[%s11868_s29 + $0x184] ss:$16 sps:$4 sm:$0xff]  }
 0x43a   : > { %6055 = vmatprep.mubr.bf16.mxu0 %v10173_v47  ;;  %v10262_v4 = vld [vmem:[#allocation13 + $0x2cc] ss:$16 sps:$4 sm:$0xff]  }
 0x43b   : > { %v13476_v36 = vpack.c.bf16 %v2680_v10, %v2679_v53  ;;  %6298 = vmatprep.subr.bf16.mxu0 %v10262_v4  ;;  %v10265_v53 = vld [vmem:[#allocation13 + $0x4] ss:$16 sps:$4 sm:$0xff]   ;;  %v10295_v4 = vld [vmem:[#allocation13 + $0x38c] ss:$16 sps:$4 sm:$0xff]  }
 0x43c   : > { %v2510_v0 = vpop.f32.mrb[56].mxu0  ;;  %6299 = vmatpush1.bf16.msra.mxu0 %v10260_v57  ;;  %5227 = vmatprep.subr.bf16.mxu1 %v10265_v53  ;;  %v10293_v57 = vld [vmem:[#allocation13 + $0x388] ss:$16 sps:$4 sm:$0xff]  }
 0x43d   : > { %v9081_v20 = vadd.f32 %v13348_v26, %v2510_v0  ;;  %v2512_v51 = vpop.f32.mrb[57].mxu0  ;;  %3126 = vmatmul.mubr.bf16.gmra.mrb[52].mxu1 %v13476_v36  ;;  %6300 = vmatprep.subr.bf16.mxu0 %v10268_v32  ;;  %v10298_v32 = vld [vmem:[#allocation13 + $0x3ac] ss:$16 sps:$4 sm:$0xff]  }
 0x43e   : > { %v2513_v55 = vpop.f32.mrb[58].mxu0  ;;  %3135 = vmatprep.mubr.bf16.mxu1 %v16413_v21  ;;  %v10266_v51 = vld [vmem:[#allocation13 + $0x2e8] ss:$16 sps:$4 sm:$0xff]  }
 0x43f   : > { %v9082_v27 = vadd.f32 %v13348_v26, %v2513_v55  ;;  %v2515_v13 = vpop.f32.mrb[59].mxu0  ;;  %v2681_v30 = vmax.f32 %v9081_v20, 0.0  ;;  %v10187_v20 = vld [vmem:[%s11868_s29 + $0x180] ss:$16 sps:$4 sm:$0xff]  }
 0x440   : > { %6301 = vmatpush1.bf16.msra.mxu0 %v10266_v51  ;;  %v10296_v51 = vld [vmem:[#allocation13 + $0x3a8] ss:$16 sps:$4 sm:$0xff]  }
 0x441   : > { %v2682_v60 = vmax.f32 %v9082_v27, 0.0  ;;  %6056 = vmatmul.mubr.bf16.gmra.mrb[164].mxu0 %v10175_v17  ;;  %v10274_v27 = vld [vmem:[#allocation13 + $0x30c] ss:$16 sps:$4 sm:$0xff]  }
 0x442   : > { %6065 = vmatprep.mubr.bf16.mxu0 %v10176_v49  ;;  %6302 = vmatprep.subr.bf16.mxu0 %v10274_v27  ;;  %v10304_v27 = vld [vmem:[#allocation13 + $0x3cc] ss:$16 sps:$4 sm:$0xff]  }
 0x443   : > { %v13484_v38 = vpack.c.bf16 %v2682_v60, %v2681_v30  ;;  %v10272_v30 = vld [vmem:[#allocation13 + $0x308] ss:$16 sps:$4 sm:$0xff]  }
 0x444   : > { %v2518_v12 = vpop.f32.mrb[60].mxu0  ;;  %6303 = vmatpush1.bf16.msra.mxu0 %v10272_v30  ;;  %v10302_v30 = vld [vmem:[#allocation13 + $0x3c8] ss:$16 sps:$4 sm:$0xff]  }
 0x445   : > { %v9083_v43 = vadd.f32 %v13348_v26, %v2518_v12  ;;  %v2520_v22 = vpop.f32.mrb[61].mxu0  ;;  %3136 = vmatmul.mubr.bf16.gmra.mrb[56].mxu1 %v13484_v38  ;;  %v10277_v12 = vld [vmem:[#allocation13 + $0x32c] ss:$16 sps:$4 sm:$0xff]  }
 0x446   : > { %v2521_v42 = vpop.f32.mrb[62].mxu0  ;;  %3145 = vmatprep.mubr.bf16.mxu1 %v16413_v21  ;;  %v10190_v22 = vld [vmem:[%s11868_s29 + $0x1a0] ss:$16 sps:$4 sm:$0xff]   ;;  %6304 = vmatprep.subr.bf16.mxu0 %v10277_v12 }
 0x447   : > { %v9084_v40 = vadd.f32 %v13348_v26, %v2521_v42  ;;  %v2523_v15 = vpop.f32.mrb[63].mxu0  ;;  %v2683_v39 = vmax.f32 %v9083_v43, 0.0  ;;  %v10191_v42 = vld [vmem:[%s11868_s29 + $0x1c4] ss:$16 sps:$4 sm:$0xff]  }
 0x448   : > { %v10283_v15 = vld [vmem:[#allocation13 + $0x34c] ss:$16 sps:$4 sm:$0xff]  }
 0x449   : > { %v2684_v7 = vmax.f32 %v9084_v40, 0.0  ;;  %6066 = vmatmul.mubr.bf16.gmra.mrb[168].mxu0 %v10178_v11  ;;  %v10275_v11 = vld [vmem:[#allocation13 + $0x328] ss:$16 sps:$4 sm:$0xff]  }
 0x44a   : > { %6075 = vmatprep.mubr.bf16.mxu0 %v10179_v14  ;;  %6305 = vmatpush1.bf16.msra.mxu0 %v10275_v11  ;;  %v10202_v11 = vld [vmem:[%s11868_s29 + $0x200] ss:$16 sps:$4 sm:$0xff]  }
 0x44b   : > { %v13492_v46 = vpack.c.bf16 %v2684_v7, %v2683_v39  ;;  %v10281_v7 = vld [vmem:[#allocation13 + $0x348] ss:$16 sps:$4 sm:$0xff]   ;;  %6306 = vmatprep.subr.bf16.mxu0 %v10283_v15 }
 0x44c   : > { %v2526_v48 = vpop.f32.mrb[64].mxu0 }
 0x44d   : > { %v9085_v3 = vadd.f32 %v13348_v26, %v2526_v48  ;;  %v2528_v5 = vpop.f32.mrb[65].mxu0  ;;  %3146 = vmatmul.mubr.bf16.gmra.mrb[60].mxu1 %v13492_v46 }
 0x44e   : > { %v2529_v31 = vpop.f32.mrb[66].mxu0  ;;  %3155 = vmatprep.mubr.bf16.mxu1 %v16413_v21  ;;  %6307 = vmatpush1.bf16.msra.mxu0 %v10281_v7 }
 0x44f   : > { %v9086_v44 = vadd.f32 %v13348_v26, %v2529_v31  ;;  %v2531_v47 = vpop.f32.mrb[67].mxu0  ;;  %v2685_v54 = vmax.f32 %v9085_v3, 0.0  ;;  %6308 = vmatprep.subr.bf16.mxu0 %v10289_v50 }
 0x451   : > { %v2686_v19 = vmax.f32 %v9086_v44, 0.0  ;;  %6076 = vmatmul.mubr.bf16.gmra.mrb[172].mxu0 %v10181_v18  ;;  %v10193_v18 = vld [vmem:[%s11868_s29 + $0x1c0] ss:$16 sps:$4 sm:$0xff]  }
 0x452   : > { %6085 = vmatprep.mubr.bf16.mxu0 %v10185_v23  ;;  %v10194_v23 = vld [vmem:[%s11868_s29 + $0x1e4] ss:$16 sps:$4 sm:$0xff]   ;;  %6309 = vmatpush1.bf16.msra.mxu0 %v10287_v29 }
 0x453   : > { %v13500_v41 = vpack.c.bf16 %v2686_v19, %v2685_v54  ;;  %6310 = vmatprep.subr.bf16.mxu0 %v10295_v4  ;;  %v10206_v29 = vld [vmem:[%s11868_s29 + $0x244] ss:$16 sps:$4 sm:$0xff]  }
 0x454   : > { %v2534_v10 = vpop.f32.mrb[68].mxu0 }
 0x455   : > { %v9087_v0 = vadd.f32 %v13348_v26, %v2534_v10  ;;  %v2536_v6 = vpop.f32.mrb[69].mxu0  ;;  %3156 = vmatmul.mubr.bf16.gmra.mrb[64].mxu1 %v13500_v41 }
 0x456   : > { %v2537_v17 = vpop.f32.mrb[70].mxu0  ;;  %3165 = vmatprep.mubr.bf16.mxu1 %v16413_v21  ;;  %6311 = vmatpush1.bf16.msra.mxu0 %v10293_v57 }
 0x457   : > { %v9088_v55 = vadd.f32 %v13348_v26, %v2537_v17  ;;  %v2539_v49 = vpop.f32.mrb[71].mxu0  ;;  %v2687_v13 = vmax.f32 %v9087_v0, 0.0  ;;  %6312 = vmatprep.subr.bf16.mxu0 %v10298_v32 }
 0x459   : > { %v2688_v63 = vmax.f32 %v9088_v55, 0.0  ;;  %6086 = vmatmul.mubr.bf16.gmra.mrb[176].mxu0 %v10187_v20  ;;  %v10196_v20 = vld [vmem:[%s11868_s29 + $0x1e0] ss:$16 sps:$4 sm:$0xff]  }
 0x45a   : > { %6095 = vmatprep.mubr.bf16.mxu0 %v10188_v37  ;;  %v10200_v37 = vld [vmem:[%s11868_s29 + $0x204] ss:$16 sps:$4 sm:$0xff]   ;;  %6313 = vmatpush1.bf16.msra.mxu0 %v10296_v51 }
 0x45b   : > { %v13508_v60 = vpack.c.bf16 %v2688_v63, %v2687_v13  ;;  %6314 = vmatprep.subr.bf16.mxu0 %v10304_v27 }
 0x45c   : > { %v2542_v25 = vpop.f32.mrb[72].mxu0 }
 0x45d   : > { %v9089_v9 = vadd.f32 %v13348_v26, %v2542_v25  ;;  %v2544_v43 = vpop.f32.mrb[73].mxu0  ;;  %3166 = vmatmul.mubr.bf16.gmra.mrb[68].mxu1 %v13508_v60 }
 0x45e   : > { %v2545_v62 = vpop.f32.mrb[74].mxu0  ;;  %3175 = vmatprep.mubr.bf16.mxu1 %v16413_v21  ;;  %6315 = vmatpush1.bf16.msra.mxu0 %v10302_v30  ;;  %v10215_v30 = vld [vmem:[%s11868_s29 + $0x284] ss:$16 sps:$4 sm:$0xff]  }
 0x45f   : > { %v9090_v14 = vadd.f32 %v13348_v26, %v2545_v62  ;;  %v2547_v40 = vpop.f32.mrb[75].mxu0  ;;  %v2689_v56 = vmax.f32 %v9089_v9, 0.0  ;;  %v10310_v9 = vld [vmem:[#allocation13 + $0x3ec] ss:$16 sps:$4 sm:$0xff]   ;;  %v10308_v62 = vld [vmem:[#allocation13 + $0x3e8] ss:$16 sps:$4 sm:$0xff]  }
 0x460   : > { %6316 = vmatprep.subr.bf16.mxu0 %v10310_v9 }
 0x461   : > { %v2690_v39 = vmax.f32 %v9090_v14, 0.0  ;;  %6096 = vmatmul.mubr.bf16.gmra.mrb[180].mxu0 %v10190_v22  ;;  %v10203_v14 = vld [vmem:[%s11868_s29 + $0x224] ss:$16 sps:$4 sm:$0xff]  }
 0x462   : > { %6105 = vmatprep.mubr.bf16.mxu0 %v10191_v42  ;;  %6317 = vmatpush1.bf16.msra.mxu0 %v10308_v62 }
 0x463   : > { %v13516_v28 = vpack.c.bf16 %v2690_v39, %v2689_v56  ;;  %8087 = vmatprep.subr.bf16.mxu0 %v16413_v21 }
 0x464   : > { %v2550_v48 = vpop.f32.mrb[76].mxu0 }
 0x465   : > { %v9091_v3 = vadd.f32 %v13348_v26, %v2550_v48  ;;  %v2552_v5 = vpop.f32.mrb[77].mxu0  ;;  %3176 = vmatmul.mubr.bf16.gmra.mrb[72].mxu1 %v13516_v28 }
 0x466   : > { %v2553_v31 = vpop.f32.mrb[78].mxu0  ;;  %3185 = vmatprep.mubr.bf16.mxu1 %v16413_v21  ;;  %v10205_v5 = vld [vmem:[%s11868_s29 + $0x220] ss:$16 sps:$4 sm:$0xff]  }
 0x467   : > { %v9092_v44 = vadd.f32 %v13348_v26, %v2553_v31  ;;  %v2555_v47 = vpop.f32.mrb[79].mxu0  ;;  %v2691_v54 = vmax.f32 %v9091_v3, 0.0 }
 0x469   : > { %v2692_v19 = vmax.f32 %v9092_v44, 0.0  ;;  %6106 = vmatmul.mubr.bf16.gmra.mrb[184].mxu0 %v10193_v18 }
 0x46a   : > { %6115 = vmatprep.mubr.bf16.mxu0 %v10194_v23 }
 0x46b   : > { %v13524_v53 = vpack.c.bf16 %v2692_v19, %v2691_v54 }
 0x46c   : > { %v2558_v10 = vpop.f32.mrb[80].mxu0 }
 0x46d   : > { %v9093_v0 = vadd.f32 %v13348_v26, %v2558_v10  ;;  %v2560_v6 = vpop.f32.mrb[81].mxu0  ;;  %3186 = vmatmul.mubr.bf16.gmra.mrb[76].mxu1 %v13524_v53  ;;  %v10208_v10 = vld [vmem:[%s11868_s29 + $0x240] ss:$16 sps:$4 sm:$0xff]  }
 0x46e   : > { %v2561_v17 = vpop.f32.mrb[82].mxu0  ;;  %3195 = vmatprep.mubr.bf16.mxu1 %v16413_v21 }
 0x46f   : > { %v9094_v55 = vadd.f32 %v13348_v26, %v2561_v17  ;;  %v2563_v49 = vpop.f32.mrb[83].mxu0  ;;  %v2693_v13 = vmax.f32 %v9093_v0, 0.0  ;;  %v10209_v0 = vld [vmem:[%s11868_s29 + $0x264] ss:$16 sps:$4 sm:$0xff]  }
 0x471   : > { %v2694_v63 = vmax.f32 %v9094_v55, 0.0  ;;  %6116 = vmatmul.mubr.bf16.gmra.mrb[188].mxu0 %v10196_v20 }
 0x472   : > { %6125 = vmatprep.mubr.bf16.mxu0 %v10200_v37 }
 0x473   : > { %v13532_v25 = vpack.c.bf16 %v2694_v63, %v2693_v13  ;;  %v10211_v13 = vld [vmem:[%s11868_s29 + $0x260] ss:$16 sps:$4 sm:$0xff]  }
 0x474   : > { %v2566_v12 = vpop.f32.mrb[84].mxu0 }
 0x475   : > { %v9095_v43 = vadd.f32 %v13348_v26, %v2566_v12  ;;  %v2568_v22 = vpop.f32.mrb[85].mxu0  ;;  %3196 = vmatmul.mubr.bf16.gmra.mrb[80].mxu1 %v13532_v25 }
 0x476   : > { %v2569_v42 = vpop.f32.mrb[86].mxu0  ;;  %3205 = vmatprep.mubr.bf16.mxu1 %v16413_v21 }
 0x477   : > { %v9096_v40 = vadd.f32 %v13348_v26, %v2569_v42  ;;  %v2571_v15 = vpop.f32.mrb[87].mxu0  ;;  %v2695_v56 = vmax.f32 %v9095_v43, 0.0 }
 0x479   : > { %v2696_v39 = vmax.f32 %v9096_v40, 0.0  ;;  %6126 = vmatmul.mubr.bf16.gmra.mrb[192].mxu0 %v10202_v11  ;;  %v10217_v40 = vld [vmem:[%s11868_s29 + $0x280] ss:$16 sps:$4 sm:$0xff]  }
 0x47a   : > { %6135 = vmatprep.mubr.bf16.mxu0 %v10203_v14 }
 0x47b   : > { %v13541_v7 = vpack.c.bf16 %v2696_v39, %v2695_v56  ;;  %v10218_v56 = vld [vmem:[%s11868_s29 + $0x2a4] ss:$16 sps:$4 sm:$0xff]  }
 0x47c   : > { %v2574_v48 = vpop.f32.mrb[88].mxu0 }
 0x47d   : > { %v9097_v50 = vadd.f32 %v13348_v26, %v2574_v48  ;;  %v2576_v3 = vpop.f32.mrb[89].mxu0  ;;  %3206 = vmatmul.mubr.bf16.gmra.mrb[84].mxu1 %v13541_v7 }
 0x47e   : > { %v2577_v18 = vpop.f32.mrb[90].mxu0  ;;  %3215 = vmatprep.mubr.bf16.mxu1 %v16413_v21 }
 0x47f   : > { %v9098_v31 = vadd.f32 %v13348_v26, %v2577_v18  ;;  %v2579_v23 = vpop.f32.mrb[91].mxu0  ;;  %v2697_v44 = vmax.f32 %v9097_v50, 0.0 }
 0x480   : > { %v10220_v23 = vld [vmem:[%s11868_s29 + $0x2a0] ss:$16 sps:$4 sm:$0xff]  }
 0x481   : > { %v2698_v47 = vmax.f32 %v9098_v31, 0.0  ;;  %6136 = vmatmul.mubr.bf16.gmra.mrb[196].mxu0 %v10205_v5 }
 0x482   : > { %6145 = vmatprep.mubr.bf16.mxu0 %v10206_v29 }
 0x483   : > { %v13549_v4 = vpack.c.bf16 %v2698_v47, %v2697_v44  ;;  %v10221_v47 = vld [vmem:[%s11868_s29 + $0x2c4] ss:$16 sps:$4 sm:$0xff]  }
 0x484   : > { %v2582_v54 = vpop.f32.mrb[92].mxu0 }
 0x485   : > { %v9099_v19 = vadd.f32 %v13348_v26, %v2582_v54  ;;  %v2584_v57 = vpop.f32.mrb[93].mxu0  ;;  %3216 = vmatmul.mubr.bf16.gmra.mrb[88].mxu1 %v13549_v4 }
 0x486   : > { %v2585_v32 = vpop.f32.mrb[94].mxu0  ;;  %3225 = vmatprep.mubr.bf16.mxu1 %v16413_v21 }
 0x487   : > { %v9100_v6 = vadd.f32 %v13348_v26, %v2585_v32  ;;  %v2587_v20 = vpop.f32.mrb[95].mxu0  ;;  %v2699_v51 = vmax.f32 %v9099_v19, 0.0 }
 0x489   : > { %v2700_v17 = vmax.f32 %v9100_v6, 0.0  ;;  %6146 = vmatmul.mubr.bf16.gmra.mrb[200].mxu0 %v10208_v10 }
 0x48a   : > { %6155 = vmatprep.mubr.bf16.mxu0 %v10209_v0 }
 0x48b   : > { %v13557_v37 = vpack.c.bf16 %v2700_v17, %v2699_v51  ;;  %v10223_v51 = vld [vmem:[%s11868_s29 + $0x2c0] ss:$16 sps:$4 sm:$0xff]  }
 0x48c   : > { %v2590_v55 = vpop.f32.mrb[96].mxu0 }
 0x48d   : > { %v9101_v49 = vadd.f32 %v13348_v26, %v2590_v55  ;;  %v2592_v27 = vpop.f32.mrb[97].mxu0  ;;  %3226 = vmatmul.mubr.bf16.gmra.mrb[92].mxu1 %v13557_v37  ;;  %v10224_v55 = vld [vmem:[%s11868_s29 + $0x2e4] ss:$16 sps:$4 sm:$0xff]  }
 0x48e   : > { %v2593_v63 = vpop.f32.mrb[98].mxu0  ;;  %3235 = vmatprep.mubr.bf16.mxu1 %v16413_v21 }
 0x48f   : > { %v9102_v12 = vadd.f32 %v13348_v26, %v2593_v63  ;;  %v2595_v9 = vpop.f32.mrb[99].mxu0  ;;  %v2701_v43 = vmax.f32 %v9101_v49, 0.0 }
 0x491   : > { %v2702_v22 = vmax.f32 %v9102_v12, 0.0  ;;  %6156 = vmatmul.mubr.bf16.gmra.mrb[204].mxu0 %v10211_v13 }
 0x492   : > { %6165 = vmatprep.mubr.bf16.mxu0 %v10215_v30 }
 0x493   : > { %v13565_v11 = vpack.c.bf16 %v2702_v22, %v2701_v43 }
 0x494   : > { %v2598_v62 = vpop.f32.mrb[100].mxu0 }
 0x495   : > { %v9103_v42 = vadd.f32 %v13348_v26, %v2598_v62  ;;  %v2600_v14 = vpop.f32.mrb[101].mxu0  ;;  %3236 = vmatmul.mubr.bf16.gmra.mrb[96].mxu1 %v13565_v11 }
 0x496   : > { %v2601_v15 = vpop.f32.mrb[102].mxu0  ;;  %3245 = vmatprep.mubr.bf16.mxu1 %v16413_v21 }
 0x497   : > { %v9104_v39 = vadd.f32 %v13348_v26, %v2601_v15  ;;  %v2603_v48 = vpop.f32.mrb[103].mxu0  ;;  %v2703_v50 = vmax.f32 %v9103_v42, 0.0  ;;  %v13599_v42 = vld [vmem:[#allocation8] ss:$0 sm:$0xff] }
 0x499   : > { %v2704_v3 = vmax.f32 %v9104_v39, 0.0  ;;  %6166 = vmatmul.mubr.bf16.gmra.mrb[208].mxu0 %v10217_v40  ;;  %v10226_v40 = vld [vmem:[%s11868_s29 + $0x2e0] ss:$16 sps:$4 sm:$0xff]  }
 0x49a   : > { %6175 = vmatprep.mubr.bf16.mxu0 %v10218_v56  ;;  %v10230_v56 = vld [vmem:[%s11868_s29 + $0x304] ss:$16 sps:$4 sm:$0xff]  }
 0x49b   : > { %v13573_v5 = vpack.c.bf16 %v2704_v3, %v2703_v50 }
 0x49c   : > { %v2606_v18 = vpop.f32.mrb[104].mxu0 }
 0x49d   : > { %v9105_v29 = vadd.f32 %v13348_v26, %v2606_v18  ;;  %v2608_v31 = vpop.f32.mrb[105].mxu0  ;;  %3246 = vmatmul.mubr.bf16.gmra.mrb[100].mxu1 %v13573_v5 }
 0x49e   : > { %v2609_v44 = vpop.f32.mrb[106].mxu0  ;;  %3255 = vmatprep.mubr.bf16.mxu1 %v16413_v21 }
 0x49f   : > { %v9106_v54 = vadd.f32 %v13348_v26, %v2609_v44  ;;  %v2611_v19 = vpop.f32.mrb[107].mxu0  ;;  %v2705_v57 = vmax.f32 %v9105_v29, 0.0 }
 0x4a1   : > { %v2706_v10 = vmax.f32 %v9106_v54, 0.0  ;;  %6176 = vmatmul.mubr.bf16.gmra.mrb[212].mxu0 %v10220_v23 }
 0x4a2   : > { %6185 = vmatprep.mubr.bf16.mxu0 %v10221_v47 }
 0x4a3   : > { %v13581_v32 = vpack.c.bf16 %v2706_v10, %v2705_v57  ;;  %v10232_v57 = vld [vmem:[%s11868_s29 + $0x300] ss:$16 sps:$4 sm:$0xff]  }
 0x4a4   : > { %v2614_v0 = vpop.f32.mrb[108].mxu0 }
 0x4a5   : > { %v9107_v6 = vadd.f32 %v13348_v26, %v2614_v0  ;;  %v2616_v20 = vpop.f32.mrb[109].mxu0  ;;  %3256 = vmatmul.mubr.bf16.gmra.mrb[104].mxu1 %v13581_v32  ;;  %v10239_v0 = vld [vmem:[%s11868_s29 + $0x324] ss:$16 sps:$4 sm:$0xff]  }
 0x4a6   : > { %v2617_v17 = vpop.f32.mrb[110].mxu0  ;;  %3265 = vmatprep.mubr.bf16.mxu1 %v16413_v21 }
 0x4a7   : > { %v9108_v49 = vadd.f32 %v13348_v26, %v2617_v17  ;;  %v2619_v27 = vpop.f32.mrb[111].mxu0  ;;  %v2707_v63 = vmax.f32 %v9107_v6, 0.0 }
 0x4a8   : > { %v13589_v13 = vpop.f32.mrb[0].mxu1 }
 0x4a9   : > { %v2708_v30 = vmax.f32 %v9108_v49, 0.0  ;;  %v13591_v12 = vpop.f32.mrb[1].mxu1  ;;  %6186 = vmatmul.mubr.bf16.gmra.mrb[216].mxu0 %v10223_v51 }
 0x4aa   : > { %v13593_v9 = vpop.f32.mrb[2].mxu1  ;;  %6195 = vmatprep.mubr.bf16.mxu0 %v10224_v55 }
 0x4ab   : > { %v13595_v43 = vpop.f32.mrb[3].mxu1  ;;  %v13597_v22 = vpack.c.bf16 %v2708_v30, %v2707_v63 }
 0x4ac   : > { %v2622_v62 = vpop.f32.mrb[112].mxu0 }
 0x4ad   : > { %v9109_v26 = vadd.f32 %v13599_v42, %v2622_v62  ;;  %v2624_v14 = vpop.f32.mrb[113].mxu0  ;;  %3266 = vmatmul.mubr.bf16.gmra.mrb[108].mxu1 %v13597_v22 }
 0x4ae   : > { %v2625_v15 = vpop.f32.mrb[114].mxu0  ;;  %3275 = vmatprep.mubr.bf16.mxu1 %v16413_v21 }
 0x4af   : > { %v9110_v39 = vadd.f32 %v13599_v42, %v2625_v15  ;;  %v2627_v48 = vpop.f32.mrb[115].mxu0  ;;  %v2709_v3 = vmax.f32 %v9109_v26, 0.0 }
 0x4b0   : > { %v13607_v50 = vpop.f32.mrb[4].mxu1 }
 0x4b1   : > { %v2710_v18 = vmax.f32 %v9110_v39, 0.0  ;;  %v13609_v29 = vpop.f32.mrb[5].mxu1  ;;  %6196 = vmatmul.mubr.bf16.gmra.mrb[220].mxu0 %v10226_v40  ;;  %v10241_v40 = vld [vmem:[%s11868_s29 + $0x320] ss:$16 sps:$4 sm:$0xff]  }
 0x4b2   : > { %v13611_v31 = vpop.f32.mrb[6].mxu1  ;;  %6205 = vmatprep.mubr.bf16.mxu0 %v10230_v56  ;;  %v10248_v56 = vld [vmem:[%s11868_s29 + $0x344] ss:$16 sps:$4 sm:$0xff]  }
 0x4b3   : > { %v13613_v23 = vpop.f32.mrb[7].mxu1  ;;  %v13615_v44 = vpack.c.bf16 %v2710_v18, %v2709_v3 }
 0x4b4   : > { %v2630_v47 = vpop.f32.mrb[116].mxu0 }
 0x4b5   : > { %v9111_v54 = vadd.f32 %v13599_v42, %v2630_v47  ;;  %v2632_v19 = vpop.f32.mrb[117].mxu0  ;;  %3276 = vmatmul.mubr.bf16.gmra.mrb[112].mxu1 %v13615_v44 }
 0x4b6   : > { %v2633_v10 = vpop.f32.mrb[118].mxu0  ;;  %3285 = vmatprep.mubr.bf16.mxu1 %v16413_v21 }
 0x4b7   : > { %v9112_v6 = vadd.f32 %v13599_v42, %v2633_v10  ;;  %v2635_v20 = vpop.f32.mrb[119].mxu0  ;;  %v2711_v17 = vmax.f32 %v9111_v54, 0.0 }
 0x4b8   : > { %v13623_v51 = vpop.f32.mrb[8].mxu1 }
 0x4b9   : > { %v2712_v55 = vmax.f32 %v9112_v6, 0.0  ;;  %v13625_v49 = vpop.f32.mrb[9].mxu1  ;;  %6206 = vmatmul.mubr.bf16.gmra.mrb[224].mxu0 %v10232_v57 }
 0x4ba   : > { %v13627_v27 = vpop.f32.mrb[10].mxu1  ;;  %6215 = vmatprep.mubr.bf16.mxu0 %v10239_v0 }
 0x4bb   : > { %16432 = vst [vmem:[#allocation29_spill] sm:$0xff] %v13627_v27  ;;  %v13629_v63 = vpop.f32.mrb[11].mxu1  ;;  %v13631_v30 = vpack.c.bf16 %v2712_v55, %v2711_v17  ;;  %v10250_v17 = vld [vmem:[%s11868_s29 + $0x340] ss:$16 sps:$4 sm:$0xff]  }
 0x4bc   : > { %16433 = vst [vmem:[#allocation31_spill] sm:$0xff] %v13629_v63  ;;  %v2638_v62 = vpop.f32.mrb[120].mxu0 }
 0x4bd   : > { %v9113_v26 = vadd.f32 %v13599_v42, %v2638_v62  ;;  %v2640_v14 = vpop.f32.mrb[121].mxu0  ;;  %3286 = vmatmul.mubr.bf16.gmra.mrb[116].mxu1 %v13631_v30  ;;  %v10257_v62 = vld [vmem:[%s11868_s29 + $0x364] ss:$16 sps:$4 sm:$0xff]  }
 0x4be   : > { %v2641_v15 = vpop.f32.mrb[122].mxu0  ;;  %3295 = vmatprep.mubr.bf16.mxu1 %v16413_v21 }
 0x4bf   : > { %v9114_v39 = vadd.f32 %v13599_v42, %v2641_v15  ;;  %v2643_v48 = vpop.f32.mrb[123].mxu0  ;;  %v2713_v18 = vmax.f32 %v9113_v26, 0.0 }
 0x4c0   : > { %v13639_v3 = vpop.f32.mrb[12].mxu1 }
 0x4c1   : > { %16434 = vst [vmem:[#allocation30_spill] sm:$0xff] %v13639_v3  ;;  %v2714_v47 = vmax.f32 %v9114_v39, 0.0  ;;  %v13641_v54 = vpop.f32.mrb[13].mxu1  ;;  %6216 = vmatmul.mubr.bf16.gmra.mrb[228].mxu0 %v10241_v40  ;;  %v10917_v3 = vld [vmem:[%s11868_s29 + $0x64] ss:$16 sps:$4 sm:$0xff]  }
 0x4c2   : > { %16435 = vst [vmem:[#allocation33_spill] sm:$0xff] %v13641_v54  ;;  %v13643_v19 = vpop.f32.mrb[14].mxu1  ;;  %6225 = vmatprep.mubr.bf16.mxu0 %v10248_v56 }
 0x4c3   : > { %16436 = vst [vmem:[#allocation32_spill] sm:$0xff] %v13643_v19  ;;  %v13645_v57 = vpack.c.bf16 %v2714_v47, %v2713_v18  ;;  %v13647_v10 = vpop.f32.mrb[15].mxu1  ;;  %v10915_v19 = vld [vmem:[%s11868_s29 + $0x44] ss:$16 sps:$4 sm:$0xff]  }
 0x4c4   : > { %16437 = vst [vmem:[#allocation35_spill] sm:$0xff] %v13647_v10  ;;  %v2646_v0 = vpop.f32.mrb[124].mxu0 }
 0x4c5   : > { %v9115_v6 = vadd.f32 %v13599_v42, %v2646_v0  ;;  %v2648_v20 = vpop.f32.mrb[125].mxu0  ;;  %3296 = vmatmul.mubr.bf16.gmra.mrb[120].mxu1 %v13645_v57  ;;  %v10269_v0 = vld [vmem:[%s11868_s29 + $0x384] ss:$16 sps:$4 sm:$0xff]  }
 0x4c6   : > { %v2649_v55 = vpop.f32.mrb[126].mxu0  ;;  %3305 = vmatprep.mubr.bf16.mxu1 %v16413_v21 }
 0x4c7   : > { %v9116_v26 = vadd.f32 %v13599_v42, %v2649_v55  ;;  %v2651_v14 = vpop.f32.mrb[127].mxu0  ;;  %v2715_v15 = vmax.f32 %v9115_v6, 0.0  ;;  %v10259_v42 = vld [vmem:[%s11868_s29 + $0x360] ss:$16 sps:$4 sm:$0xff]   ;;  %v10263_v55 = vld [vmem:[#allocation13] ss:$16 sps:$4 sm:$0xff]  }
 0x4c8   : > { %v13655_v40 = vpop.f32.mrb[16].mxu1  ;;  %v10271_v14 = vld [vmem:[%s11868_s29 + $0x380] ss:$16 sps:$4 sm:$0xff]  }
 0x4c9   : > { %16438 = vst [vmem:[#allocation34_spill] sm:$0xff] %v13655_v40  ;;  %v2716_v56 = vmax.f32 %v9116_v26, 0.0  ;;  %v13657_v39 = vpop.f32.mrb[17].mxu1  ;;  %6226 = vmatmul.mubr.bf16.gmra.mrb[232].mxu0 %v10250_v17  ;;  %v10286_v26 = vld [vmem:[#allocation13 + $0x24] ss:$16 sps:$4 sm:$0xff]  }
 0x4ca   : > { %16439 = vst [vmem:[#allocation37_spill] sm:$0xff] %v13657_v39  ;;  %v13659_v48 = vpop.f32.mrb[18].mxu1  ;;  %6235 = vmatprep.mubr.bf16.mxu0 %v10257_v62  ;;  %v10454_v40 = vld [vmem:[#allocation13 + $0x220] ss:$16 sps:$4 sm:$0xff]  }
 0x4cb   : > { %16440 = vst [vmem:[#allocation36_spill] sm:$0xff] %v13659_v48  ;;  %v13661_v18 = vpack.c.bf16 %v2716_v56, %v2715_v15  ;;  %v13663_v47 = vpop.f32.mrb[19].mxu1  ;;  %v10278_v15 = vld [vmem:[%s11868_s29 + $0x3a4] ss:$16 sps:$4 sm:$0xff]  }
 0x4cc   : > { %16441 = vst [vmem:[#allocation39_spill] sm:$0xff] %v13663_v47  ;;  %v10284_v56 = vld [vmem:[#allocation13 + $0x20] ss:$16 sps:$4 sm:$0xff]  }
 0x4cd   : > { %3306 = vmatmul.mubr.bf16.gmra.mrb[124].mxu1 %v13661_v18 }
 0x4ce   : > { %3348 = vmatprep.mubr.bf16.mxu1 %v16413_v21 }
 0x4d0   : > { %v13669_v6 = vpop.f32.mrb[20].mxu1 }
 0x4d1   : > { %16442 = vst [vmem:[#allocation38_spill] sm:$0xff] %v13669_v6  ;;  %v13671_v20 = vpop.f32.mrb[21].mxu1  ;;  %6236 = vmatmul.mubr.bf16.gmra.mrb[236].mxu0 %v10259_v42  ;;  %v10280_v6 = vld [vmem:[%s11868_s29 + $0x3a0] ss:$16 sps:$4 sm:$0xff]  }
 0x4d2   : > { %16443 = vst [vmem:[#allocation41_spill] sm:$0xff] %v13671_v20  ;;  %v13673_v17 = vpop.f32.mrb[22].mxu1  ;;  %6245 = vmatprep.mubr.bf16.mxu0 %v10269_v0  ;;  %v10307_v20 = vld [vmem:[#allocation13 + $0x44] ss:$16 sps:$4 sm:$0xff]  }
 0x4d3   : > { %16444 = vst [vmem:[#allocation40_spill] sm:$0xff] %v13673_v17  ;;  %v13675_v62 = vpop.f32.mrb[23].mxu1 }
 0x4d4   : > { %16445 = vst [vmem:[#allocation43_spill] sm:$0xff] %v13675_v62 }
 0x4d5   : > { %3349 = vmatmul.mubr.bf16.vlgmr.msra.gmra.mrb[128].mxu1 %v13358_v24  ;;  %v10305_v24 = vld [vmem:[#allocation13 + $0x40] ss:$16 sps:$4 sm:$0xff]  }
 0x4d6   : > { %5228 = vmatpush1.bf16.msra.mxu1 %v10263_v55  ;;  %3358 = vmatprep.mubr.bf16.mxu1 %v16413_v21  ;;  %v10319_v55 = vld [vmem:[#allocation13 + $0x64] ss:$16 sps:$4 sm:$0xff]  }
 0x4d7   : > { %5229 = vmatprep.subr.bf16.mxu1 %v10286_v26  ;;  %v10290_v26 = vld [vmem:[%s11868_s29 + $0x3c4] ss:$16 sps:$4 sm:$0xff]  }
 0x4d8   : > { %v13681_v42 = vpop.f32.mrb[24].mxu1 }
 0x4d9   : > { %16446 = vst [vmem:[#allocation42_spill] sm:$0xff] %v13681_v42  ;;  %v13683_v17 = vpop.f32.mrb[25].mxu1  ;;  %6246 = vmatmul.mubr.bf16.gmra.mrb[240].mxu0 %v10271_v14  ;;  %v10317_v42 = vld [vmem:[#allocation13 + $0x60] ss:$16 sps:$4 sm:$0xff]   ;;  %v10328_v14 = vld [vmem:[#allocation13 + $0x84] ss:$16 sps:$4 sm:$0xff]  }
 0x4da   : > { %16447 = vst [vmem:[#allocation45_spill] sm:$0xff] %v13683_v17  ;;  %v13685_v0 = vpop.f32.mrb[26].mxu1  ;;  %6255 = vmatprep.mubr.bf16.mxu0 %v10278_v15  ;;  %5230 = vmatpush1.bf16.msra.mxu1 %v10284_v56 }
 0x4db   : > { %16448 = vst [vmem:[#allocation44_spill] sm:$0xff] %v13685_v0  ;;  %v13687_v62 = vpop.f32.mrb[27].mxu1  ;;  %5231 = vmatprep.subr.bf16.mxu1 %v10307_v20 }
 0x4dc   : > { %16449 = vst [vmem:[#allocation47_spill] sm:$0xff] %v13687_v62  ;;  %v10337_v62 = vld [vmem:[#allocation13 + $0xa4] ss:$16 sps:$4 sm:$0xff]  }
 0x4dd   : > { %3359 = vmatmul.mubr.bf16.gmra.mrb[132].mxu1 %v13370_v45  ;;  %v10326_v45 = vld [vmem:[#allocation13 + $0x80] ss:$16 sps:$4 sm:$0xff]  }
 0x4de   : > { %3368 = vmatprep.mubr.bf16.mxu1 %v16413_v21  ;;  %5232 = vmatpush1.bf16.msra.mxu1 %v10305_v24  ;;  %v10292_v24 = vld [vmem:[%s11868_s29 + $0x3c0] ss:$16 sps:$4 sm:$0xff]  }
 0x4df   : > { %5233 = vmatprep.subr.bf16.mxu1 %v10319_v55  ;;  %v10299_v55 = vld [vmem:[%s11868_s29 + $0x3e4] ss:$16 sps:$4 sm:$0xff]  }
 0x4e0   : > { %v13693_v0 = vpop.f32.mrb[28].mxu1 }
 0x4e1   : > { %16450 = vst [vmem:[#allocation46_spill] sm:$0xff] %v13693_v0  ;;  %v13695_v15 = vpop.f32.mrb[29].mxu1  ;;  %6256 = vmatmul.mubr.bf16.gmra.mrb[244].mxu0 %v10280_v6  ;;  %v10335_v0 = vld [vmem:[#allocation13 + $0xa0] ss:$16 sps:$4 sm:$0xff]   ;;  %v10346_v6 = vld [vmem:[#allocation13 + $0xc4] ss:$16 sps:$4 sm:$0xff]  }
 0x4e2   : > { %16451 = vst [vmem:[#allocation49_spill] sm:$0xff] %v13695_v15  ;;  %v13697_v56 = vpop.f32.mrb[30].mxu1  ;;  %6265 = vmatprep.mubr.bf16.mxu0 %v10290_v26  ;;  %5234 = vmatpush1.bf16.msra.mxu1 %v10317_v42 }
 0x4e3   : > { %16452 = vst [vmem:[#allocation48_spill] sm:$0xff] %v13697_v56  ;;  %v13699_v20 = vpop.f32.mrb[31].mxu1  ;;  %5235 = vmatprep.subr.bf16.mxu1 %v10328_v14 }
 0x4e4   : > { %16453 = vst [vmem:[#allocation51_spill] sm:$0xff] %v13699_v20  ;;  %v10355_v20 = vld [vmem:[#allocation13 + $0xe4] ss:$16 sps:$4 sm:$0xff]  }
 0x4e5   : > { %3369 = vmatmul.mubr.bf16.gmra.mrb[136].mxu1 %v13382_v59  ;;  %v10344_v59 = vld [vmem:[#allocation13 + $0xc0] ss:$16 sps:$4 sm:$0xff]  }
 0x4e6   : > { %3378 = vmatprep.mubr.bf16.mxu1 %v16413_v21  ;;  %5236 = vmatpush1.bf16.msra.mxu1 %v10326_v45  ;;  %v10301_v45 = vld [vmem:[%s11868_s29 + $0x3e0] ss:$16 sps:$4 sm:$0xff]  }
 0x4e7   : > { %5237 = vmatprep.subr.bf16.mxu1 %v10337_v62  ;;  %v10313_v62 = vld [vmem:[%s11868_s29 + $0xc] ss:$16 sps:$4 sm:$0xff]  }
 0x4e8   : > { %v13705_v56 = vpop.f32.mrb[32].mxu1 }
 0x4e9   : > { %16454 = vst [vmem:[#allocation50_spill] sm:$0xff] %v13705_v56  ;;  %v13707_v42 = vpop.f32.mrb[33].mxu1  ;;  %6266 = vmatmul.mubr.bf16.gmra.mrb[248].mxu0 %v10292_v24  ;;  %v10353_v56 = vld [vmem:[#allocation13 + $0xe0] ss:$16 sps:$4 sm:$0xff]   ;;  %v10364_v24 = vld [vmem:[#allocation13 + $0x104] ss:$16 sps:$4 sm:$0xff]  }
 0x4ea   : > { %16455 = vst [vmem:[#allocation53_spill] sm:$0xff] %v13707_v42  ;;  %v13709_v26 = vpop.f32.mrb[34].mxu1  ;;  %6275 = vmatprep.mubr.bf16.mxu0 %v10299_v55  ;;  %5238 = vmatpush1.bf16.msra.mxu1 %v10335_v0 }
 0x4eb   : > { %16456 = vst [vmem:[#allocation52_spill] sm:$0xff] %v13709_v26  ;;  %v13711_v14 = vpop.f32.mrb[35].mxu1  ;;  %5239 = vmatprep.subr.bf16.mxu1 %v10346_v6 }
 0x4ec   : > { %16457 = vst [vmem:[#allocation55_spill] sm:$0xff] %v13711_v14  ;;  %v10373_v14 = vld [vmem:[#allocation13 + $0x124] ss:$16 sps:$4 sm:$0xff]  }
 0x4ed   : > { %3379 = vmatmul.mubr.bf16.gmra.mrb[140].mxu1 %v13394_v2  ;;  %v10362_v2 = vld [vmem:[#allocation13 + $0x100] ss:$16 sps:$4 sm:$0xff]  }
 0x4ee   : > { %3388 = vmatprep.mubr.bf16.mxu1 %v16413_v21  ;;  %5240 = vmatpush1.bf16.msra.mxu1 %v10344_v59  ;;  %v10311_v59 = vld [vmem:[%s11868_s29 + $0x8] ss:$16 sps:$4 sm:$0xff]  }
 0x4ef   : > { %5241 = vmatprep.subr.bf16.mxu1 %v10355_v20  ;;  %v10314_v20 = vld [vmem:[%s11868_s29 + $0x2c] ss:$16 sps:$4 sm:$0xff]  }
 0x4f0   : > { %v13717_v26 = vpop.f32.mrb[36].mxu1 }
 0x4f1   : > { %16458 = vst [vmem:[#allocation54_spill] sm:$0xff] %v13717_v26  ;;  %v13719_v0 = vpop.f32.mrb[37].mxu1  ;;  %6276 = vmatmul.mubr.bf16.gmra.mrb[252].mxu0 %v10301_v45  ;;  %v10382_v45 = vld [vmem:[#allocation13 + $0x144] ss:$16 sps:$4 sm:$0xff]  }
 0x4f2   : > { %16459 = vst [vmem:[#allocation57_spill] sm:$0xff] %v13719_v0  ;;  %v13721_v55 = vpop.f32.mrb[38].mxu1  ;;  %6318 = vmatprep.mubr.bf16.mxu0 %v10313_v62  ;;  %5242 = vmatpush1.bf16.msra.mxu1 %v10353_v56  ;;  %v10371_v0 = vld [vmem:[#allocation13 + $0x120] ss:$16 sps:$4 sm:$0xff]  }
 0x4f3   : > { %16460 = vst [vmem:[#allocation56_spill] sm:$0xff] %v13721_v55  ;;  %v13723_v6 = vpop.f32.mrb[39].mxu1  ;;  %5243 = vmatprep.subr.bf16.mxu1 %v10364_v24 }
 0x4f4   : > { %16461 = vst [vmem:[#allocation59_spill] sm:$0xff] %v13723_v6 }
 0x4f5   : > { %3389 = vmatmul.mubr.bf16.gmra.mrb[144].mxu1 %v13404_v35  ;;  %v10380_v35 = vld [vmem:[#allocation13 + $0x140] ss:$16 sps:$4 sm:$0xff]  }
 0x4f6   : > { %3398 = vmatprep.mubr.bf16.mxu1 %v16413_v21  ;;  %5244 = vmatpush1.bf16.msra.mxu1 %v10362_v2  ;;  %v10316_v2 = vld [vmem:[%s11868_s29 + $0x28] ss:$16 sps:$4 sm:$0xff]  }
 0x4f7   : > { %5245 = vmatprep.subr.bf16.mxu1 %v10373_v14  ;;  %v10320_v14 = vld [vmem:[%s11868_s29 + $0x4c] ss:$16 sps:$4 sm:$0xff]  }
 0x4f8   : > { %v13729_v55 = vpop.f32.mrb[40].mxu1 }
 0x4f9   : > { %16462 = vst [vmem:[#allocation58_spill] sm:$0xff] %v13729_v55  ;;  %v13731_v56 = vpop.f32.mrb[41].mxu1  ;;  %6319 = vmatmul.mubr.bf16.vlgmr.msra.gmra.mrb[128].mxu0 %v10311_v59 }
 0x4fa   : > { %16463 = vst [vmem:[#allocation61_spill] sm:$0xff] %v13731_v56  ;;  %v13733_v62 = vpop.f32.mrb[42].mxu1  ;;  %6328 = vmatprep.mubr.bf16.mxu0 %v10314_v20  ;;  %5246 = vmatpush1.bf16.msra.mxu1 %v10371_v0  ;;  %v10911_v56 = vld [vmem:[%s11868_s29 + $0x4] ss:$16 sps:$4 sm:$0xff]  }
 0x4fb   : > { %16464 = vst [vmem:[#allocation60_spill] sm:$0xff] %v13733_v62  ;;  %v13735_v24 = vpop.f32.mrb[43].mxu1  ;;  %5247 = vmatprep.subr.bf16.mxu1 %v10382_v45  ;;  %v10389_v45 = vld [vmem:[#allocation13 + $0x160] ss:$16 sps:$4 sm:$0xff]  }
 0x4fc   : > { %16465 = vst [vmem:[#allocation63_spill] sm:$0xff] %v13735_v24  ;;  %v10391_v24 = vld [vmem:[#allocation13 + $0x164] ss:$16 sps:$4 sm:$0xff]  }
 0x4fd   : > { %3399 = vmatmul.mubr.bf16.gmra.mrb[148].mxu1 %v13412_v1  ;;  %v10322_v1 = vld [vmem:[%s11868_s29 + $0x48] ss:$16 sps:$4 sm:$0xff]  }
 0x4fe   : > { %3408 = vmatprep.mubr.bf16.mxu1 %v16413_v21  ;;  %5248 = vmatpush1.bf16.msra.mxu1 %v10380_v35  ;;  %v10323_v35 = vld [vmem:[%s11868_s29 + $0x6c] ss:$16 sps:$4 sm:$0xff]  }
 0x4ff   : > { %5249 = vmatprep.subr.bf16.mxu1 %v10391_v24  ;;  %v10329_v24 = vld [vmem:[%s11868_s29 + $0x8c] ss:$16 sps:$4 sm:$0xff]  }
 0x500   : > { %v13741_v55 = vpop.f32.mrb[44].mxu1 }
 0x501   : > { %16466 = vst [vmem:[#allocation62_spill] sm:$0xff] %v13741_v55  ;;  %v13743_v59 = vpop.f32.mrb[45].mxu1  ;;  %6329 = vmatmul.mubr.bf16.gmra.mrb[132].mxu0 %v10316_v2 }
 0x502   : > { %16467 = vst [vmem:[#allocation65_spill] sm:$0xff] %v13743_v59  ;;  %v13745_v20 = vpop.f32.mrb[46].mxu1  ;;  %6338 = vmatprep.mubr.bf16.mxu0 %v10320_v14  ;;  %5250 = vmatpush1.bf16.msra.mxu1 %v10389_v45 }
 0x503   : > { %16468 = vst [vmem:[#allocation64_spill] sm:$0xff] %v13745_v20  ;;  %v13747_v0 = vpop.f32.mrb[47].mxu1 }
 0x504   : > { %16469 = vst [vmem:[#allocation67_spill] sm:$0xff] %v13747_v0 }
 0x505   : > { %3409 = vmatmul.mubr.bf16.gmra.mrb[152].mxu1 %v13420_v58  ;;  %v10325_v58 = vld [vmem:[%s11868_s29 + $0x68] ss:$16 sps:$4 sm:$0xff]  }
 0x506   : > { %3418 = vmatprep.mubr.bf16.mxu1 %v16413_v21 }
 0x508   : > { %v13753_v55 = vpop.f32.mrb[48].mxu1 }
 0x509   : > { %16470 = vst [vmem:[#allocation66_spill] sm:$0xff] %v13753_v55  ;;  %v13755_v2 = vpop.f32.mrb[49].mxu1  ;;  %6339 = vmatmul.mubr.bf16.gmra.mrb[136].mxu0 %v10322_v1  ;;  %v10439_v55 = vld [vmem:[%s11868_s29 + $0x368] ss:$16 sps:$4 sm:$0xff]  }
 0x50a   : > { %16471 = vst [vmem:[#allocation69_spill] sm:$0xff] %v13755_v2  ;;  %v13757_v14 = vpop.f32.mrb[50].mxu1  ;;  %6348 = vmatprep.mubr.bf16.mxu0 %v10323_v35  ;;  %v10398_v35 = vld [vmem:[#allocation13 + $0x180] ss:$16 sps:$4 sm:$0xff]  }
 0x50b   : > { %16472 = vst [vmem:[#allocation68_spill] sm:$0xff] %v13757_v14  ;;  %v13759_v0 = vpop.f32.mrb[51].mxu1  ;;  %v10332_v14 = vld [vmem:[%s11868_s29 + $0xac] ss:$16 sps:$4 sm:$0xff]  }
 0x50c   : > { %16473 = vst [vmem:[#allocation71_spill] sm:$0xff] %v13759_v0  ;;  %v10400_v0 = vld [vmem:[#allocation13 + $0x184] ss:$16 sps:$4 sm:$0xff]  }
 0x50d   : > { %3419 = vmatmul.mubr.bf16.gmra.mrb[156].mxu1 %v13428_v61  ;;  %v10331_v61 = vld [vmem:[%s11868_s29 + $0x88] ss:$16 sps:$4 sm:$0xff]   ;;  %5251 = vmatprep.subr.bf16.mxu1 %v10400_v0  ;;  %v10338_v0 = vld [vmem:[%s11868_s29 + $0xcc] ss:$16 sps:$4 sm:$0xff]  }
 0x50e   : > { %3428 = vmatprep.mubr.bf16.mxu1 %v16413_v21  ;;  %5252 = vmatpush1.bf16.msra.mxu1 %v10398_v35 }
 0x510   : > { %v13765_v20 = vpop.f32.mrb[52].mxu1 }
 0x511   : > { %16474 = vst [vmem:[#allocation70_spill] sm:$0xff] %v13765_v20  ;;  %v13767_v45 = vpop.f32.mrb[53].mxu1  ;;  %6349 = vmatmul.mubr.bf16.gmra.mrb[140].mxu0 %v10325_v58 }
 0x512   : > { %16475 = vst [vmem:[#allocation73_spill] sm:$0xff] %v13767_v45  ;;  %v13769_v2 = vpop.f32.mrb[54].mxu1  ;;  %6358 = vmatprep.mubr.bf16.mxu0 %v10329_v24 }
 0x513   : > { %16476 = vst [vmem:[#allocation72_spill] sm:$0xff] %v13769_v2  ;;  %v13771_v1 = vpop.f32.mrb[55].mxu1 }
 0x514   : > { %16477 = vst [vmem:[#allocation75_spill] sm:$0xff] %v13771_v1 }
 0x515   : > { %3429 = vmatmul.mubr.bf16.gmra.mrb[160].mxu1 %v13436_v52  ;;  %v10334_v52 = vld [vmem:[%s11868_s29 + $0xa8] ss:$16 sps:$4 sm:$0xff]  }
 0x516   : > { %3438 = vmatprep.mubr.bf16.mxu1 %v16413_v21 }
 0x518   : > { %v13777_v20 = vpop.f32.mrb[56].mxu1 }
 0x519   : > { %16478 = vst [vmem:[#allocation74_spill] sm:$0xff] %v13777_v20  ;;  %v13779_v58 = vpop.f32.mrb[57].mxu1  ;;  %6359 = vmatmul.mubr.bf16.gmra.mrb[144].mxu0 %v10331_v61 }
 0x51a   : > { %16479 = vst [vmem:[#allocation77_spill] sm:$0xff] %v13779_v58  ;;  %v13781_v24 = vpop.f32.mrb[58].mxu1  ;;  %6368 = vmatprep.mubr.bf16.mxu0 %v10332_v14  ;;  %v10407_v14 = vld [vmem:[#allocation13 + $0x1a0] ss:$16 sps:$4 sm:$0xff]  }
 0x51b   : > { %16480 = vst [vmem:[#allocation76_spill] sm:$0xff] %v13781_v24  ;;  %v13783_v1 = vpop.f32.mrb[59].mxu1  ;;  %v10341_v24 = vld [vmem:[%s11868_s29 + $0xec] ss:$16 sps:$4 sm:$0xff]  }
 0x51c   : > { %16481 = vst [vmem:[#allocation79_spill] sm:$0xff] %v13783_v1  ;;  %v10409_v1 = vld [vmem:[#allocation13 + $0x1a4] ss:$16 sps:$4 sm:$0xff]  }
 0x51d   : > { %3439 = vmatmul.mubr.bf16.gmra.mrb[164].mxu1 %v13444_v34  ;;  %v10340_v34 = vld [vmem:[%s11868_s29 + $0xc8] ss:$16 sps:$4 sm:$0xff]   ;;  %5253 = vmatprep.subr.bf16.mxu1 %v10409_v1  ;;  %v10347_v1 = vld [vmem:[%s11868_s29 + $0x10c] ss:$16 sps:$4 sm:$0xff]  }
 0x51e   : > { %3448 = vmatprep.mubr.bf16.mxu1 %v16413_v21  ;;  %5254 = vmatpush1.bf16.msra.mxu1 %v10407_v14 }
 0x520   : > { %v13789_v2 = vpop.f32.mrb[60].mxu1 }
 0x521   : > { %16482 = vst [vmem:[#allocation78_spill] sm:$0xff] %v13789_v2  ;;  %v13791_v35 = vpop.f32.mrb[61].mxu1  ;;  %6369 = vmatmul.mubr.bf16.gmra.mrb[148].mxu0 %v10334_v52 }
 0x522   : > { %16483 = vst [vmem:[#allocation81_spill] sm:$0xff] %v13791_v35  ;;  %v13793_v58 = vpop.f32.mrb[62].mxu1  ;;  %6378 = vmatprep.mubr.bf16.mxu0 %v10338_v0 }
 0x523   : > { %16484 = vst [vmem:[#allocation80_spill] sm:$0xff] %v13793_v58  ;;  %v13795_v61 = vpop.f32.mrb[63].mxu1 }
 0x524   : > { %16485 = vst [vmem:[#allocation83_spill] sm:$0xff] %v13795_v61 }
 0x525   : > { %3449 = vmatmul.mubr.bf16.gmra.mrb[168].mxu1 %v13452_v33  ;;  %v10343_v33 = vld [vmem:[%s11868_s29 + $0xe8] ss:$16 sps:$4 sm:$0xff]  }
 0x526   : > { %3458 = vmatprep.mubr.bf16.mxu1 %v16413_v21 }
 0x528   : > { %v13801_v2 = vpop.f32.mrb[64].mxu1 }
 0x529   : > { %16486 = vst [vmem:[#allocation82_spill] sm:$0xff] %v13801_v2  ;;  %v13803_v52 = vpop.f32.mrb[65].mxu1  ;;  %6379 = vmatmul.mubr.bf16.gmra.mrb[152].mxu0 %v10340_v34 }
 0x52a   : > { %16487 = vst [vmem:[#allocation85_spill] sm:$0xff] %v13803_v52  ;;  %v13805_v0 = vpop.f32.mrb[66].mxu1  ;;  %6388 = vmatprep.mubr.bf16.mxu0 %v10341_v24  ;;  %v10416_v24 = vld [vmem:[#allocation13 + $0x1c0] ss:$16 sps:$4 sm:$0xff]  }
 0x52b   : > { %16488 = vst [vmem:[#allocation84_spill] sm:$0xff] %v13805_v0  ;;  %v13807_v61 = vpop.f32.mrb[67].mxu1  ;;  %v10418_v0 = vld [vmem:[#allocation13 + $0x1c4] ss:$16 sps:$4 sm:$0xff]  }
 0x52c   : > { %16489 = vst [vmem:[#allocation87_spill] sm:$0xff] %v13807_v61  ;;  %v10350_v61 = vld [vmem:[%s11868_s29 + $0x12c] ss:$16 sps:$4 sm:$0xff]   ;;  %5255 = vmatprep.subr.bf16.mxu1 %v10418_v0 }
 0x52d   : > { %3459 = vmatmul.mubr.bf16.gmra.mrb[172].mxu1 %v13460_v8  ;;  %v10349_v8 = vld [vmem:[%s11868_s29 + $0x108] ss:$16 sps:$4 sm:$0xff]   ;;  %v10356_v0 = vld [vmem:[%s11868_s29 + $0x14c] ss:$16 sps:$4 sm:$0xff]  }
 0x52e   : > { %3468 = vmatprep.mubr.bf16.mxu1 %v16413_v21  ;;  %5256 = vmatpush1.bf16.msra.mxu1 %v10416_v24 }
 0x530   : > { %v13813_v58 = vpop.f32.mrb[68].mxu1 }
 0x531   : > { %16490 = vst [vmem:[#allocation86_spill] sm:$0xff] %v13813_v58  ;;  %v13815_v14 = vpop.f32.mrb[69].mxu1  ;;  %6389 = vmatmul.mubr.bf16.gmra.mrb[156].mxu0 %v10343_v33 }
 0x532   : > { %16491 = vst [vmem:[#allocation89_spill] sm:$0xff] %v13815_v14  ;;  %v13817_v52 = vpop.f32.mrb[70].mxu1  ;;  %6398 = vmatprep.mubr.bf16.mxu0 %v10347_v1  ;;  %v10422_v1 = vld [vmem:[#allocation16 + $0x80] sm:$0xff]   ;;  %v10423_v14 = vld [vmem:[#allocation16 + $0x88] sm:$0xff]  }
 0x533   : > { %16492 = vst [vmem:[#allocation88_spill] sm:$0xff] %v13817_v52  ;;  %v13819_v34 = vpop.f32.mrb[71].mxu1  ;;  %8088 = vmatpush1.bf16.msra.mxu0 %v10422_v1 }
 0x534   : > { %16493 = vst [vmem:[#allocation91_spill] sm:$0xff] %v13819_v34  ;;  %8089 = vmatprep.subr.bf16.mxu0 %v16413_v21 }
 0x535   : > { %3469 = vmatmul.mubr.bf16.gmra.mrb[176].mxu1 %v13468_v16  ;;  %v10352_v16 = vld [vmem:[%s11868_s29 + $0x128] ss:$16 sps:$4 sm:$0xff]  }
 0x536   : > { %3478 = vmatprep.mubr.bf16.mxu1 %v16413_v21 }
 0x537   : > { %8090 = vmatpush1.bf16.msra.mxu0 %v10423_v14  ;;  %v10358_v14 = vld [vmem:[%s11868_s29 + $0x148] ss:$16 sps:$4 sm:$0xff]  }
 0x538   : > { %v13825_v58 = vpop.f32.mrb[72].mxu1  ;;  %8091 = vmatprep.subr.bf16.mxu0 %v16413_v21 }
 0x539   : > { %16494 = vst [vmem:[#allocation90_spill] sm:$0xff] %v13825_v58  ;;  %v13827_v33 = vpop.f32.mrb[73].mxu1  ;;  %6399 = vmatmul.mubr.bf16.gmra.mrb[160].mxu0 %v10349_v8  ;;  %v10427_v8 = vld [vmem:[#allocation16 + $0x90] sm:$0xff]  }
 0x53a   : > { %16495 = vst [vmem:[#allocation93_spill] sm:$0xff] %v13827_v33  ;;  %v13829_v52 = vpop.f32.mrb[74].mxu1  ;;  %6408 = vmatprep.mubr.bf16.mxu0 %v10350_v61 }
 0x53b   : > { %16496 = vst [vmem:[#allocation92_spill] sm:$0xff] %v13829_v52  ;;  %v13831_v34 = vpop.f32.mrb[75].mxu1  ;;  %8092 = vmatpush1.bf16.msra.mxu0 %v10427_v8  ;;  %v10430_v52 = vld [vmem:[#allocation13 + $0x1e4] ss:$16 sps:$4 sm:$0xff]  }
 0x53c   : > { %16497 = vst [vmem:[#allocation95_spill] sm:$0xff] %v13831_v34  ;;  %v10428_v34 = vld [vmem:[#allocation13 + $0x1e0] ss:$16 sps:$4 sm:$0xff]   ;;  %8093 = vmatprep.subr.bf16.mxu0 %v16413_v21  ;;  %5257 = vmatprep.subr.bf16.mxu1 %v10430_v52  ;;  %v10435_v8 = vld [vmem:[#allocation16 + $0xa0] sm:$0xff]  }
 0x53d   : > { %3479 = vmatmul.mubr.bf16.gmra.mrb[180].mxu1 %v13476_v36  ;;  %v10361_v52 = vld [vmem:[%s11868_s29 + $0x168] ss:$16 sps:$4 sm:$0xff]  }
 0x53e   : > { %3488 = vmatprep.mubr.bf16.mxu1 %v16413_v21  ;;  %5258 = vmatpush1.bf16.msra.mxu1 %v10428_v34  ;;  %v10436_v34 = vld [vmem:[#allocation16 + $0xa8] sm:$0xff]  }
 0x540   : > { %v13838_v24 = vpop.f32.mrb[76].mxu1 }
 0x541   : > { %16498 = vst [vmem:[#allocation94_spill] sm:$0xff] %v13838_v24  ;;  %v13841_v61 = vpop.f32.mrb[77].mxu1  ;;  %6409 = vmatmul.mubr.bf16.gmra.mrb[164].mxu0 %v10352_v16  ;;  %v10431_v24 = vld [vmem:[#allocation16 + $0x98] sm:$0xff]  }
 0x542   : > { %16499 = vst [vmem:[#allocation97_spill] sm:$0xff] %v13841_v61  ;;  %v13843_v1 = vpop.f32.mrb[78].mxu1  ;;  %6418 = vmatprep.mubr.bf16.mxu0 %v10356_v0  ;;  %v10359_v61 = vld [vmem:[%s11868_s29 + $0x16c] ss:$16 sps:$4 sm:$0xff]   ;;  %8094 = vmatpush1.bf16.msra.mxu0 %v10431_v24 }
 0x543   : > { %16500 = vst [vmem:[#allocation96_spill] sm:$0xff] %v13843_v1  ;;  %v13845_v36 = vpop.f32.mrb[79].mxu1  ;;  %8095 = vmatprep.subr.bf16.mxu0 %v16413_v21  ;;  %v10365_v24 = vld [vmem:[%s11868_s29 + $0x18c] ss:$16 sps:$4 sm:$0xff]  }
 0x544   : > { %16501 = vst [vmem:[#allocation99_spill] sm:$0xff] %v13845_v36 }
 0x545   : > { %3489 = vmatmul.mubr.bf16.gmra.mrb[184].mxu1 %v13484_v38 }
 0x546   : > { %3498 = vmatprep.mubr.bf16.mxu1 %v16413_v21  ;;  %8096 = vmatpush1.bf16.msra.mxu0 %v10435_v8  ;;  %v10440_v8 = vld [vmem:[#allocation16 + $0xb0] sm:$0xff]  }
 0x547   : > { %8097 = vmatprep.subr.bf16.mxu0 %v16413_v21 }
 0x548   : > { %v13852_v16 = vpop.f32.mrb[80].mxu1 }
 0x549   : > { %16502 = vst [vmem:[#allocation98_spill] sm:$0xff] %v13852_v16  ;;  %v13855_v0 = vpop.f32.mrb[81].mxu1  ;;  %6419 = vmatmul.mubr.bf16.gmra.mrb[168].mxu0 %v10358_v14 }
 0x54a   : > { %16503 = vst [vmem:[#allocation101_spill] sm:$0xff] %v13855_v0  ;;  %v13857_v36 = vpop.f32.mrb[82].mxu1  ;;  %6428 = vmatprep.mubr.bf16.mxu0 %v10359_v61  ;;  %8098 = vmatpush1.bf16.msra.mxu0 %v10436_v34  ;;  %v10444_v34 = vld [vmem:[#allocation16 + $0xb8] sm:$0xff]   ;;  %v10443_v0 = vld [vmem:[#allocation13 + $0x204] ss:$16 sps:$4 sm:$0xff]  }
 0x54b   : > { %16504 = vst [vmem:[#allocation100_spill] sm:$0xff] %v13857_v36  ;;  %v13859_v38 = vpop.f32.mrb[83].mxu1  ;;  %8099 = vmatprep.subr.bf16.mxu0 %v16413_v21  ;;  %v10367_v36 = vld [vmem:[%s11868_s29 + $0x188] ss:$16 sps:$4 sm:$0xff]   ;;  %5580 = vmatprep.subr.bf16.mxu1 %v10443_v0 }
 0x54c   : > { %16505 = vst [vmem:[#allocation103_spill] sm:$0xff] %v13859_v38 }
 0x54d   : > { %3499 = vmatmul.mubr.bf16.gmra.mrb[188].mxu1 %v13492_v46 }
 0x54e   : > { %3508 = vmatprep.mubr.bf16.mxu1 %v16413_v21  ;;  %8100 = vmatpush1.bf16.msra.mxu0 %v10440_v8  ;;  %v10448_v8 = vld [vmem:[#allocation16 + $0xc0] sm:$0xff]  }
 0x54f   : > { %8101 = vmatprep.subr.bf16.mxu0 %v16413_v21 }
 0x550   : > { %v13866_v14 = vpop.f32.mrb[84].mxu1 }
 0x551   : > { %16506 = vst [vmem:[#allocation102_spill] sm:$0xff] %v13866_v14  ;;  %v13869_v61 = vpop.f32.mrb[85].mxu1  ;;  %6429 = vmatmul.mubr.bf16.gmra.mrb[172].mxu0 %v10361_v52  ;;  %v10368_v14 = vld [vmem:[%s11868_s29 + $0x1ac] ss:$16 sps:$4 sm:$0xff]  }
 0x552   : > { %16507 = vst [vmem:[#allocation105_spill] sm:$0xff] %v13869_v61  ;;  %v13871_v38 = vpop.f32.mrb[86].mxu1  ;;  %6438 = vmatprep.mubr.bf16.mxu0 %v10365_v24  ;;  %8102 = vmatpush1.bf16.msra.mxu0 %v10444_v34  ;;  %v10370_v34 = vld [vmem:[%s11868_s29 + $0x1a8] ss:$16 sps:$4 sm:$0xff]  }
 0x553   : > { %16508 = vst [vmem:[#allocation104_spill] sm:$0xff] %v13871_v38  ;;  %v13873_v46 = vpop.f32.mrb[87].mxu1  ;;  %8103 = vmatprep.subr.bf16.mxu0 %v16413_v21  ;;  %v10374_v38 = vld [vmem:[%s11868_s29 + $0x1cc] ss:$16 sps:$4 sm:$0xff]  }
 0x554   : > { %16509 = vst [vmem:[#allocation107_spill] sm:$0xff] %v13873_v46 }
 0x555   : > { %3509 = vmatmul.mubr.bf16.gmra.mrb[192].mxu1 %v13500_v41 }
 0x556   : > { %3518 = vmatprep.mubr.bf16.mxu1 %v16413_v21  ;;  %8104 = vmatpush1.bf16.msra.mxu0 %v10448_v8 }
 0x557   : > { %8105 = vmatprep.subr.bf16.mxu0 %v16413_v21 }
 0x558   : > { %v13880_v52 = vpop.f32.mrb[88].mxu1 }
 0x559   : > { %16510 = vst [vmem:[#allocation106_spill] sm:$0xff] %v13880_v52  ;;  %v13883_v24 = vpop.f32.mrb[89].mxu1  ;;  %6439 = vmatmul.mubr.bf16.gmra.mrb[176].mxu0 %v10367_v36  ;;  %v10449_v52 = vld [vmem:[#allocation16 + $0xc8] sm:$0xff]  }
 0x55a   : > { %16511 = vst [vmem:[#allocation109_spill] sm:$0xff] %v13883_v24  ;;  %v13885_v46 = vpop.f32.mrb[90].mxu1  ;;  %6448 = vmatprep.mubr.bf16.mxu0 %v10368_v14  ;;  %8106 = vmatpush1.bf16.msra.mxu0 %v10449_v52  ;;  %v10453_v14 = vld [vmem:[#allocation16 + $0xd0] sm:$0xff]   ;;  %v10457_v52 = vld [vmem:[#allocation16 + $0xd8] sm:$0xff]  }
 0x55b   : > { %16512 = vst [vmem:[#allocation108_spill] sm:$0xff] %v13885_v46  ;;  %v13887_v41 = vpop.f32.mrb[91].mxu1  ;;  %8107 = vmatprep.subr.bf16.mxu0 %v16413_v21  ;;  %v3925_v46 = vld [vmem:[#allocation14] sm:$0xf]  ;;  %v10437_v24 = vld [vmem:[%s11868_s29 + $0x36c] ss:$16 sps:$4 sm:$0xff]  }
 0x55c   : > { %16513 = vst [vmem:[#allocation111_spill] sm:$0xff] %v13887_v41  ;;  %v10376_v41 = vld [vmem:[%s11868_s29 + $0x1c8] ss:$16 sps:$4 sm:$0xff]  }
 0x55d   : > { %3519 = vmatmul.mubr.bf16.gmra.mrb[196].mxu1 %v13508_v60 }
 0x55e   : > { %3528 = vmatprep.mubr.bf16.mxu1 %v16413_v21  ;;  %8108 = vmatpush1.bf16.msra.mxu0 %v10453_v14  ;;  %v10461_v14 = vld [vmem:[#allocation16 + $0xe0] sm:$0xff]  }
 0x55f   : > { %8109 = vmatprep.subr.bf16.mxu0 %v16413_v21 }
 0x560   : > { %v13894_v36 = vpop.f32.mrb[92].mxu1 }
 0x561   : > { %16514 = vst [vmem:[#allocation110_spill] sm:$0xff] %v13894_v36  ;;  %v13897_v0 = vpop.f32.mrb[93].mxu1  ;;  %6449 = vmatmul.mubr.bf16.gmra.mrb[180].mxu0 %v10370_v34  ;;  %v10377_v36 = vld [vmem:[%s11868_s29 + $0x1ec] ss:$16 sps:$4 sm:$0xff]  }
 0x562   : > { %16515 = vst [vmem:[#allocation113_spill] sm:$0xff] %v13897_v0  ;;  %v13899_v8 = vpop.f32.mrb[94].mxu1  ;;  %6458 = vmatprep.mubr.bf16.mxu0 %v10374_v38  ;;  %8110 = vmatpush1.bf16.msra.mxu0 %v10457_v52  ;;  %v10462_v52 = vld [vmem:[#allocation16 + $0xe8] sm:$0xff]  }
 0x563   : > { %16516 = vst [vmem:[#allocation112_spill] sm:$0xff] %v13899_v8  ;;  %v13901_v60 = vpop.f32.mrb[95].mxu1  ;;  %8111 = vmatprep.subr.bf16.mxu0 %v16413_v21  ;;  %v10379_v8 = vld [vmem:[%s11868_s29 + $0x1e8] ss:$16 sps:$4 sm:$0xff]  }
 0x564   : > { %16517 = vst [vmem:[#allocation115_spill] sm:$0xff] %v13901_v60 }
 0x565   : > { %3529 = vmatmul.mubr.bf16.gmra.mrb[200].mxu1 %v13516_v28 }
 0x566   : > { %3538 = vmatprep.mubr.bf16.mxu1 %v16413_v21  ;;  %8112 = vmatpush1.bf16.msra.mxu0 %v10461_v14  ;;  %v10466_v14 = vld [vmem:[#allocation16 + $0xf0] sm:$0xff]  }
 0x567   : > { %8113 = vmatprep.subr.bf16.mxu0 %v16413_v21 }
 0x568   : > { %v13908_v34 = vpop.f32.mrb[96].mxu1 }
 0x569   : > { %16518 = vst [vmem:[#allocation114_spill] sm:$0xff] %v13908_v34  ;;  %v13911_v38 = vpop.f32.mrb[97].mxu1  ;;  %6459 = vmatmul.mubr.bf16.gmra.mrb[184].mxu0 %v10376_v41  ;;  %v10383_v34 = vld [vmem:[%s11868_s29 + $0x20c] ss:$16 sps:$4 sm:$0xff]  }
 0x56a   : > { %16519 = vst [vmem:[#allocation117_spill] sm:$0xff] %v13911_v38  ;;  %v13913_v60 = vpop.f32.mrb[98].mxu1  ;;  %6468 = vmatprep.mubr.bf16.mxu0 %v10377_v36  ;;  %8114 = vmatpush1.bf16.msra.mxu0 %v10462_v52  ;;  %v10385_v52 = vld [vmem:[%s11868_s29 + $0x208] ss:$16 sps:$4 sm:$0xff]  }
 0x56b   : > { %16520 = vst [vmem:[#allocation116_spill] sm:$0xff] %v13913_v60  ;;  %v13915_v28 = vpop.f32.mrb[99].mxu1  ;;  %8115 = vmatprep.subr.bf16.mxu0 %v16413_v21  ;;  %v10386_v60 = vld [vmem:[%s11868_s29 + $0x22c] ss:$16 sps:$4 sm:$0xff]  }
 0x56c   : > { %16521 = vst [vmem:[#allocation119_spill] sm:$0xff] %v13915_v28 }
 0x56d   : > { %3539 = vmatmul.mubr.bf16.gmra.mrb[204].mxu1 %v13524_v53 }
 0x56e   : > { %3548 = vmatprep.mubr.bf16.mxu1 %v16413_v21  ;;  %8116 = vmatpush1.bf16.msra.mxu0 %v10466_v14 }
 0x56f   : > { %8117 = vmatprep.subr.bf16.mxu0 %v16413_v21 }
 0x570   : > { %v13922_v41 = vpop.f32.mrb[100].mxu1 }
 0x571   : > { %16522 = vst [vmem:[#allocation118_spill] sm:$0xff] %v13922_v41  ;;  %v13925_v36 = vpop.f32.mrb[101].mxu1  ;;  %6469 = vmatmul.mubr.bf16.gmra.mrb[188].mxu0 %v10379_v8  ;;  %v10470_v41 = vld [vmem:[#allocation16 + $0xf8] sm:$0xff]  }
 0x572   : > { %16523 = vst [vmem:[#allocation121_spill] sm:$0xff] %v13925_v36  ;;  %v13927_v28 = vpop.f32.mrb[102].mxu1  ;;  %6478 = vmatprep.mubr.bf16.mxu0 %v10383_v34  ;;  %8118 = vmatpush1.bf16.msra.mxu0 %v10470_v41 }
 0x573   : > { %16524 = vst [vmem:[#allocation120_spill] sm:$0xff] %v13927_v28  ;;  %v13929_v53 = vpop.f32.mrb[103].mxu1 }
 0x574   : > { %16525 = vst [vmem:[#allocation123_spill] sm:$0xff] %v13929_v53  ;;  %v10392_v53 = vld [vmem:[%s11868_s29 + $0x24c] ss:$16 sps:$4 sm:$0xff]  }
 0x575   : > { %3549 = vmatmul.mubr.bf16.gmra.mrb[208].mxu1 %v13532_v25  ;;  %v10388_v25 = vld [vmem:[%s11868_s29 + $0x228] ss:$16 sps:$4 sm:$0xff]  }
 0x576   : > { %3558 = vmatprep.mubr.bf16.mxu1 %v16413_v21 }
 0x578   : > { %v13936_v8 = vpop.f32.mrb[104].mxu1 }
 0x579   : > { %16526 = vst [vmem:[#allocation122_spill] sm:$0xff] %v13936_v8  ;;  %v13938_v36 = vpop.f32.mrb[105].mxu1  ;;  %6479 = vmatmul.mubr.bf16.gmra.mrb[192].mxu0 %v10385_v52  ;;  %v2783_v8 = vlaneseq }
 0x57a   : > { %16527 = vst [vmem:[#allocation125_spill] sm:$0xff] %v13938_v36  ;;  %v13940_v34 = vpop.f32.mrb[106].mxu1  ;;  %6488 = vmatprep.mubr.bf16.mxu0 %v10386_v60  ;;  %v10394_v60 = vld [vmem:[%s11868_s29 + $0x248] ss:$16 sps:$4 sm:$0xff]  }
 0x57b   : > { %16528 = vst [vmem:[#allocation124_spill] sm:$0xff] %v13940_v34  ;;  %v13942_v14 = vpop.f32.mrb[107].mxu1 }
 0x57c   : > { %16529 = vst [vmem:[#allocation127_spill] sm:$0xff] %v13942_v14 }
 0x57d   : > { %3559 = vmatmul.mubr.bf16.gmra.mrb[212].mxu1 %v13541_v7  ;;  %v10395_v7 = vld [vmem:[%s11868_s29 + $0x26c] ss:$16 sps:$4 sm:$0xff]  }
 0x57e   : > { %3568 = vmatprep.mubr.bf16.mxu1 %v16413_v21 }
 0x580   : > { %v13948_v28 = vpop.f32.mrb[108].mxu1 }
 0x581   : > { %16530 = vst [vmem:[#allocation126_spill] sm:$0xff] %v13948_v28  ;;  %v13950_v41 = vpop.f32.mrb[109].mxu1  ;;  %6489 = vmatmul.mubr.bf16.gmra.mrb[196].mxu0 %v10388_v25 }
 0x582   : > { %16531 = vst [vmem:[#allocation129_spill] sm:$0xff] %v13950_v41  ;;  %v13952_v36 = vpop.f32.mrb[110].mxu1  ;;  %6498 = vmatprep.mubr.bf16.mxu0 %v10392_v53  ;;  %v10397_v53 = vld [vmem:[%s11868_s29 + $0x268] ss:$16 sps:$4 sm:$0xff]  }
 0x583   : > { %16532 = vst [vmem:[#allocation128_spill] sm:$0xff] %v13952_v36  ;;  %v13954_v52 = vpop.f32.mrb[111].mxu1 }
 0x584   : > { %16533 = vst [vmem:[#allocation131_spill] sm:$0xff] %v13954_v52 }
 0x585   : > { %3569 = vmatmul.mubr.bf16.gmra.mrb[216].mxu1 %v13549_v4  ;;  %v10401_v4 = vld [vmem:[%s11868_s29 + $0x28c] ss:$16 sps:$4 sm:$0xff]  }
 0x586   : > { %3578 = vmatprep.mubr.bf16.mxu1 %v16413_v21 }
 0x588   : > { %v13960_v14 = vpop.f32.mrb[112].mxu1 }
 0x589   : > { %16534 = vst [vmem:[#allocation130_spill] sm:$0xff] %v13960_v14  ;;  %v13962_v34 = vpop.f32.mrb[113].mxu1  ;;  %6499 = vmatmul.mubr.bf16.gmra.mrb[200].mxu0 %v10394_v60 }
 0x58a   : > { %16535 = vst [vmem:[#allocation133_spill] sm:$0xff] %v13962_v34  ;;  %v13964_v41 = vpop.f32.mrb[114].mxu1  ;;  %6508 = vmatprep.mubr.bf16.mxu0 %v10395_v7  ;;  %v10403_v7 = vld [vmem:[%s11868_s29 + $0x288] ss:$16 sps:$4 sm:$0xff]  }
 0x58b   : > { %16536 = vst [vmem:[#allocation132_spill] sm:$0xff] %v13964_v41  ;;  %v13966_v25 = vpop.f32.mrb[115].mxu1 }
 0x58c   : > { %16537 = vst [vmem:[#allocation135_spill] sm:$0xff] %v13966_v25 }
 0x58d   : > { %3579 = vmatmul.mubr.bf16.gmra.mrb[220].mxu1 %v13557_v37  ;;  %v10404_v37 = vld [vmem:[%s11868_s29 + $0x2ac] ss:$16 sps:$4 sm:$0xff]  }
 0x58e   : > { %3588 = vmatprep.mubr.bf16.mxu1 %v16413_v21 }
 0x590   : > { %v13972_v52 = vpop.f32.mrb[116].mxu1 }
 0x591   : > { %16538 = vst [vmem:[#allocation134_spill] sm:$0xff] %v13972_v52  ;;  %v13974_v36 = vpop.f32.mrb[117].mxu1  ;;  %6509 = vmatmul.mubr.bf16.gmra.mrb[204].mxu0 %v10397_v53 }
 0x592   : > { %16539 = vst [vmem:[#allocation136_spill] sm:$0xff] %v13974_v36  ;;  %v13976_v34 = vpop.f32.mrb[118].mxu1  ;;  %6518 = vmatprep.mubr.bf16.mxu0 %v10401_v4  ;;  %v10406_v4 = vld [vmem:[%s11868_s29 + $0x2a8] ss:$16 sps:$4 sm:$0xff]  }
 0x593   : > { %16540 = vst [vmem:[#allocation137_spill] sm:$0xff] %v13976_v34  ;;  %v13978_v60 = vpop.f32.mrb[119].mxu1 }
 0x594   : > { %16541 = vst [vmem:[#allocation138_spill] sm:$0xff] %v13978_v60 }
 0x595   : > { %3589 = vmatmul.mubr.bf16.gmra.mrb[224].mxu1 %v13565_v11  ;;  %v10410_v11 = vld [vmem:[%s11868_s29 + $0x2cc] ss:$16 sps:$4 sm:$0xff]  }
 0x596   : > { %3598 = vmatprep.mubr.bf16.mxu1 %v16413_v21 }
 0x598   : > { %v13984_v25 = vpop.f32.mrb[120].mxu1 }
 0x599   : > { %16542 = vst [vmem:[#allocation139_spill] sm:$0xff] %v13984_v25  ;;  %v13986_v41 = vpop.f32.mrb[121].mxu1  ;;  %6519 = vmatmul.mubr.bf16.gmra.mrb[208].mxu0 %v10403_v7 }
 0x59a   : > { %16543 = vst [vmem:[#allocation140_spill] sm:$0xff] %v13986_v41  ;;  %v13988_v36 = vpop.f32.mrb[122].mxu1  ;;  %6528 = vmatprep.mubr.bf16.mxu0 %v10404_v37  ;;  %v10412_v37 = vld [vmem:[%s11868_s29 + $0x2c8] ss:$16 sps:$4 sm:$0xff]  }
 0x59b   : > { %16544 = vst [vmem:[#allocation141_spill] sm:$0xff] %v13988_v36  ;;  %v13990_v53 = vpop.f32.mrb[123].mxu1 }
 0x59c   : > { %16545 = vst [vmem:[#allocation142_spill] sm:$0xff] %v13990_v53 }
 0x59d   : > { %3599 = vmatmul.mubr.bf16.gmra.mrb[228].mxu1 %v13573_v5  ;;  %v10413_v5 = vld [vmem:[%s11868_s29 + $0x2ec] ss:$16 sps:$4 sm:$0xff]  }
 0x59e   : > { %3608 = vmatprep.mubr.bf16.mxu1 %v16413_v21 }
 0x5a0   : > { %v13996_v60 = vpop.f32.mrb[124].mxu1 }
 0x5a1   : > { %16546 = vst [vmem:[#allocation143_spill] sm:$0xff] %v13996_v60  ;;  %v13998_v34 = vpop.f32.mrb[125].mxu1  ;;  %6529 = vmatmul.mubr.bf16.gmra.mrb[212].mxu0 %v10406_v4 }
 0x5a2   : > { %16547 = vst [vmem:[#allocation144_spill] sm:$0xff] %v13998_v34  ;;  %v14000_v41 = vpop.f32.mrb[126].mxu1  ;;  %6538 = vmatprep.mubr.bf16.mxu0 %v10410_v11  ;;  %v10415_v11 = vld [vmem:[%s11868_s29 + $0x2e8] ss:$16 sps:$4 sm:$0xff]  }
 0x5a3   : > { %16548 = vst [vmem:[#allocation145_spill] sm:$0xff] %v14000_v41  ;;  %v14002_v7 = vpop.f32.mrb[127].mxu1 }
 0x5a4   : > { %16549 = vst [vmem:[#allocation146_spill] sm:$0xff] %v14002_v7 }
 0x5a5   : > { %3609 = vmatmul.mubr.bf16.gmra.mrb[232].mxu1 %v13581_v32  ;;  %v10419_v32 = vld [vmem:[%s11868_s29 + $0x30c] ss:$16 sps:$4 sm:$0xff]  }
 0x5a6   : > { %3618 = vmatprep.mubr.bf16.mxu1 %v16413_v21 }
 0x5a8   : > { %v14008_v53 = vpop.f32.mrb[128].mxu1 }
 0x5a9   : > { %v14010_v36 = vpop.f32.mrb[129].mxu1  ;;  %6539 = vmatmul.mubr.bf16.gmra.mrb[216].mxu0 %v10412_v37 }
 0x5aa   : > { %v14012_v34 = vpop.f32.mrb[130].mxu1  ;;  %6548 = vmatprep.mubr.bf16.mxu0 %v10413_v5  ;;  %v10421_v5 = vld [vmem:[%s11868_s29 + $0x308] ss:$16 sps:$4 sm:$0xff]  }
 0x5ab   : > { %v14014_v4 = vpop.f32.mrb[131].mxu1 }
 0x5ad   : > { %3619 = vmatmul.mubr.bf16.gmra.mrb[236].mxu1 %v13597_v22  ;;  %v10424_v22 = vld [vmem:[%s11868_s29 + $0x32c] ss:$16 sps:$4 sm:$0xff]  }
 0x5ae   : > { %3628 = vmatprep.mubr.bf16.mxu1 %v16413_v21 }
 0x5b0   : > { %v14020_v7 = vpop.f32.mrb[132].mxu1 }
 0x5b1   : > { %v14022_v41 = vpop.f32.mrb[133].mxu1  ;;  %6549 = vmatmul.mubr.bf16.gmra.mrb[220].mxu0 %v10415_v11 }
 0x5b2   : > { %v14024_v60 = vpop.f32.mrb[134].mxu1  ;;  %6558 = vmatprep.mubr.bf16.mxu0 %v10419_v32  ;;  %v10426_v32 = vld [vmem:[%s11868_s29 + $0x328] ss:$16 sps:$4 sm:$0xff]  }
 0x5b3   : > { %v14026_v37 = vpop.f32.mrb[135].mxu1 }
 0x5b5   : > { %3629 = vmatmul.mubr.bf16.gmra.mrb[240].mxu1 %v13615_v44  ;;  %v10432_v44 = vld [vmem:[%s11868_s29 + $0x34c] ss:$16 sps:$4 sm:$0xff]  }
 0x5b6   : > { %3638 = vmatprep.mubr.bf16.mxu1 %v16413_v21 }
 0x5b8   : > { %v14032_v25 = vpop.f32.mrb[136].mxu1 }
 0x5b9   : > { %v14034_v52 = vpop.f32.mrb[137].mxu1  ;;  %6559 = vmatmul.mubr.bf16.gmra.mrb[224].mxu0 %v10421_v5 }
 0x5ba   : > { %v14036_v14 = vpop.f32.mrb[138].mxu1  ;;  %6568 = vmatprep.mubr.bf16.mxu0 %v10424_v22  ;;  %v14052_v22 = vshrl.u32 %v2783_v8, 7 }
 0x5bb   : > { %v14038_v11 = vpop.f32.mrb[139].mxu1 }
 0x5bc   : > { %v2793_v61 = vsub.s32 2, %v14052_v22  ;;  %v2797_v16 = vsub.s32 3, %v14052_v22 }
 0x5bd   : > { %3639 = vmatmul.mubr.bf16.gmra.mrb[244].mxu1 %v13631_v30  ;;  %v10434_v30 = vld [vmem:[%s11868_s29 + $0x348] ss:$16 sps:$4 sm:$0xff]  }
 0x5be   : > { %3648 = vmatprep.mubr.bf16.mxu1 %v16413_v21  ;;  %v14064_v8 = vrot.slane %v3925_v46, %v2793_v61  ;;  %v14068_v33 = vrot.slane %v3925_v46, %v2797_v16  ;;  %v10445_v46 = vld [vmem:[%s11868_s29 + $0x38c] ss:$16 sps:$4 sm:$0xff]  }
 0x5c0   : > { %v14044_v28 = vpop.f32.mrb[140].mxu1 }
 0x5c1   : > { %v14046_v38 = vpop.f32.mrb[141].mxu1  ;;  %6569 = vmatmul.mubr.bf16.gmra.mrb[228].mxu0 %v10426_v32 }
 0x5c2   : > { %v14048_v5 = vpop.f32.mrb[142].mxu1  ;;  %6578 = vmatprep.mubr.bf16.mxu0 %v10432_v44  ;;  %v2781_v44 = vld [vmem:[#allocation11] sm:$0xf] }
 0x5c3   : > { %v14050_v0 = vpop.f32.mrb[143].mxu1  ;;  %v14070_v58 = vrot.slane %v2781_v44, %v2793_v61  ;;  %v14074_v35 = vrot.slane %v2781_v44, %v2797_v16 }
 0x5c5   : > { %3649 = vmatmul.mubr.bf16.gmra.mrb[248].mxu1 %v13645_v57  ;;  %v3351_v61 = vadd.f32 %v14008_v53, %v14070_v58  ;;  %v10441_v53 = vld [vmem:[#allocation13 + $0x200] ss:$16 sps:$4 sm:$0xff]  }
 0x5c6   : > { %3658 = vmatprep.mubr.bf16.mxu1 %v16413_v21 }
 0x5c8   : > { %v14060_v32 = vpop.f32.mrb[144].mxu1 }
 0x5c9   : > { %v14062_v1 = vpop.f32.mrb[145].mxu1  ;;  %6579 = vmatmul.mubr.bf16.gmra.mrb[232].mxu0 %v10434_v30 }
 0x5ca   : > { %v14066_v57 = vpop.f32.mrb[146].mxu1  ;;  %6588 = vmatprep.mubr.bf16.mxu0 %v10437_v24 }
 0x5cb   : > { %v14072_v2 = vpop.f32.mrb[147].mxu1 }
 0x5cc   : > { %v6320_v20 = vpop.f32.mrb[128].mxu0 }
 0x5cd   : > { %v9245_v45 = vadd.f32 %v6320_v20, %v14064_v8  ;;  %3659 = vmatmul.mubr.bf16.gmra.mrb[252].mxu1 %v13661_v18  ;;  %v6322_v30 = vpop.f32.mrb[129].mxu0  ;;  %v3353_v20 = vadd.f32 %v14010_v36, %v14074_v35 }
 0x5ce   : > { %v9246_v59 = vadd.f32 %v6322_v30, %v14068_v33  ;;  %v6324_v62 = vpop.f32.mrb[130].mxu0  ;;  %5259 = vmatprep.mubr.bf16.mxu1 %v10911_v56  ;;  %v3355_v30 = vadd.f32 %v14012_v34, %v14070_v58  ;;  %v10456_v34 = vld [vmem:[#allocation13 + $0x224] ss:$16 sps:$4 sm:$0xff]  }
 0x5cf   : > { %v6641_v24 = vmax.f32 %v9245_v45, 0.0  ;;  %v9247_v16 = vadd.f32 %v6324_v62, %v14064_v8  ;;  %v6326_v44 = vpop.f32.mrb[131].mxu0  ;;  %v3357_v62 = vadd.f32 %v14014_v4, %v14074_v35  ;;  %v10912_v4 = vld [vmem:[%s11868_s29] ss:$16 sps:$4 sm:$0xff]  }
 0x5d0   : > { %v6642_v6 = vmax.f32 %v9246_v59, 0.0  ;;  %v9248_v18 = vadd.f32 %v6326_v44, %v14068_v33  ;;  %v14088_v26 = vpop.f32.mrb[148].mxu1 }
 0x5d1   : > { %v6897_v56 = vadd.f32 %v6641_v24, %v3351_v61  ;;  %v6645_v42 = vmax.f32 %v9247_v16, 0.0  ;;  %v14092_v15 = vpop.f32.mrb[149].mxu1  ;;  %6589 = vmatmul.mubr.bf16.gmra.mrb[236].mxu0 %v10439_v55  ;;  %v10447_v16 = vld [vmem:[%s11868_s29 + $0x388] ss:$16 sps:$4 sm:$0xff]  }
 0x5d2   : > { %v6898_v45 = vadd.f32 %v6642_v6, %v3353_v20  ;;  %v6646_v36 = vmax.f32 %v9248_v18, 0.0  ;;  %v14096_v59 = vpop.f32.mrb[150].mxu1  ;;  %6598 = vmatprep.mubr.bf16.mxu0 %v10445_v46  ;;  %v10450_v20 = vld [vmem:[%s11868_s29 + $0x3ac] ss:$16 sps:$4 sm:$0xff]  }
 0x5d3   : > { %v6901_v44 = vadd.f32 %v6645_v42, %v3355_v30  ;;  %v14098_v17 = vpop.f32.mrb[151].mxu1  ;;  %v7153_v55 = vmax.f32 %v6897_v56, 0.0  ;;  %v10913_v30 = vld [vmem:[%s11868_s29 + $0x24] ss:$16 sps:$4 sm:$0xff]  }
 0x5d4   : > { %v6902_v61 = vadd.f32 %v6646_v36, %v3357_v62  ;;  %v6330_v24 = vpop.f32.mrb[132].mxu0  ;;  %v7154_v18 = vmax.f32 %v6898_v45, 0.0  ;;  %v3361_v62 = vadd.f32 %v14020_v7, %v14070_v58  ;;  %v3363_v45 = vadd.f32 %v14022_v41, %v14074_v35 }
 0x5d5   : > { %v7157_v47 = vmax.f32 %v6901_v44, 0.0  ;;  %v9249_v48 = vadd.f32 %v6330_v24, %v14064_v8  ;;  %5260 = vmatmul.mubr.bf16.vlgmr.msra.gmra.mrb[0].mxu1 %v10912_v4  ;;  %v6332_v6 = vpop.f32.mrb[133].mxu0  ;;  %v10469_v4 = vld [vmem:[#allocation13 + $0x244] ss:$16 sps:$4 sm:$0xff]  }
 0x5d6   : > { %v7158_v39 = vmax.f32 %v6902_v61, 0.0  ;;  %5581 = vmatpush1.bf16.msra.mxu1 %v10441_v53  ;;  %v9250_v42 = vadd.f32 %v6332_v6, %v14068_v33  ;;  %v6334_v46 = vpop.f32.mrb[134].mxu0  ;;  %5269 = vmatprep.mubr.bf16.mxu1 %v10913_v30 }
 0x5d7   : > { %v14108_v56 = vpack.c.bf16 %v7157_v47, %v7153_v55  ;;  %v6649_v36 = vmax.f32 %v9249_v48, 0.0  ;;  %v9251_v44 = vadd.f32 %v6334_v46, %v14064_v8  ;;  %v6336_v24 = vpop.f32.mrb[135].mxu0  ;;  %5582 = vmatprep.subr.bf16.mxu1 %v10456_v34  ;;  %v3365_v47 = vadd.f32 %v14024_v60, %v14070_v58 }
 0x5d8   : > { %v6650_v53 = vmax.f32 %v9250_v42, 0.0  ;;  %v9252_v61 = vadd.f32 %v6336_v24, %v14068_v33  ;;  %v14114_v6 = vpop.f32.mrb[152].mxu1  ;;  %v14116_v30 = vpack.c.bf16 %v7158_v39, %v7154_v18  ;;  %v3367_v34 = vadd.f32 %v14026_v37, %v14074_v35  ;;  %v10467_v39 = vld [vmem:[#allocation13 + $0x240] ss:$16 sps:$4 sm:$0xff]  }
 0x5d9   : > { %v6905_v7 = vadd.f32 %v6649_v36, %v3361_v62  ;;  %v6653_v48 = vmax.f32 %v9251_v44, 0.0  ;;  %v14120_v55 = vpop.f32.mrb[153].mxu1  ;;  %6599 = vmatmul.mubr.bf16.gmra.mrb[240].mxu0 %v10447_v16  ;;  %v10473_v62 = vld [vmem:[#allocation13 + $0x264] ss:$16 sps:$4 sm:$0xff]  }
 0x5da   : > { %v6906_v41 = vadd.f32 %v6650_v53, %v3363_v45  ;;  %v6654_v42 = vmax.f32 %v9252_v61, 0.0  ;;  %v14124_v46 = vpop.f32.mrb[154].mxu1  ;;  %6608 = vmatprep.mubr.bf16.mxu0 %v10450_v20  ;;  %5583 = vmatpush1.bf16.msra.mxu1 %v10454_v40  ;;  %v10452_v44 = vld [vmem:[%s11868_s29 + $0x3a8] ss:$16 sps:$4 sm:$0xff]   ;;  %v10914_v53 = vld [vmem:[%s11868_s29 + $0x20] ss:$16 sps:$4 sm:$0xff]  }
 0x5db   : > { %v6909_v18 = vadd.f32 %v6653_v48, %v3365_v47  ;;  %v14126_v60 = vpop.f32.mrb[155].mxu1  ;;  %5584 = vmatprep.subr.bf16.mxu1 %v10469_v4  ;;  %v7161_v24 = vmax.f32 %v6905_v7, 0.0  ;;  %v10458_v20 = vld [vmem:[%s11868_s29 + $0x3cc] ss:$16 sps:$4 sm:$0xff]   ;;  %v10471_v4 = vld [vmem:[#allocation13 + $0x260] ss:$16 sps:$4 sm:$0xff]  }
 0x5dc   : > { %v6910_v36 = vadd.f32 %v6654_v42, %v3367_v34  ;;  %v6340_v16 = vpop.f32.mrb[136].mxu0  ;;  %v7162_v10 = vmax.f32 %v6906_v41, 0.0  ;;  %v3371_v34 = vadd.f32 %v14032_v25, %v14070_v58  ;;  %v3373_v41 = vadd.f32 %v14034_v52, %v14074_v35 }
 0x5dd   : > { %v7165_v37 = vmax.f32 %v6909_v18, 0.0  ;;  %v9253_v45 = vadd.f32 %v6340_v16, %v14064_v8  ;;  %5270 = vmatmul.mubr.bf16.gmra.mrb[4].mxu1 %v10914_v53  ;;  %v6342_v61 = vpop.f32.mrb[137].mxu0  ;;  %v10476_v53 = vld [vmem:[#allocation13 + $0x284] ss:$16 sps:$4 sm:$0xff]   ;;  %v3375_v25 = vadd.f32 %v14036_v14, %v14070_v58 }
 0x5de   : > { %v7166_v40 = vmax.f32 %v6910_v36, 0.0  ;;  %v9254_v47 = vadd.f32 %v6342_v61, %v14068_v33  ;;  %v6344_v48 = vpop.f32.mrb[138].mxu0  ;;  %5279 = vmatprep.mubr.bf16.mxu1 %v10915_v19  ;;  %5585 = vmatpush1.bf16.msra.mxu1 %v10467_v39 }
 0x5df   : > { %v14136_v7 = vpack.c.bf16 %v7165_v37, %v7161_v24  ;;  %v6657_v42 = vmax.f32 %v9253_v45, 0.0  ;;  %v9255_v18 = vadd.f32 %v6344_v48, %v14064_v8  ;;  %v6346_v16 = vpop.f32.mrb[139].mxu0  ;;  %5586 = vmatprep.subr.bf16.mxu1 %v10473_v62  ;;  %v3377_v62 = vadd.f32 %v14038_v11, %v14074_v35 }
 0x5e0   : > { %v6658_v36 = vmax.f32 %v9254_v47, 0.0  ;;  %v9256_v61 = vadd.f32 %v6346_v16, %v14068_v33  ;;  %v14142_v19 = vpop.f32.mrb[156].mxu1  ;;  %v14144_v39 = vpack.c.bf16 %v7166_v40, %v7162_v10  ;;  %v10474_v10 = vld [vmem:[#allocation13 + $0x280] ss:$16 sps:$4 sm:$0xff]  }
 0x5e1   : > { %v6913_v24 = vadd.f32 %v6657_v42, %v3371_v34  ;;  %v6661_v37 = vmax.f32 %v9255_v18, 0.0  ;;  %v14148_v45 = vpop.f32.mrb[157].mxu1  ;;  %6609 = vmatmul.mubr.bf16.gmra.mrb[244].mxu0 %v10452_v44  ;;  %v10479_v34 = vld [vmem:[#allocation13 + $0x2a4] ss:$16 sps:$4 sm:$0xff]  }
 0x5e2   : > { %v6914_v52 = vadd.f32 %v6658_v36, %v3373_v41  ;;  %v6662_v47 = vmax.f32 %v9256_v61, 0.0  ;;  %v14152_v48 = vpop.f32.mrb[158].mxu1  ;;  %6618 = vmatprep.mubr.bf16.mxu0 %v10458_v20  ;;  %5587 = vmatpush1.bf16.msra.mxu1 %v10471_v4  ;;  %v10460_v18 = vld [vmem:[%s11868_s29 + $0x3c8] ss:$16 sps:$4 sm:$0xff]   ;;  %v10916_v36 = vld [vmem:[%s11868_s29 + $0x40] ss:$16 sps:$4 sm:$0xff]  }
 0x5e3   : > { %v6917_v40 = vadd.f32 %v6661_v37, %v3375_v25  ;;  %v14154_v14 = vpop.f32.mrb[159].mxu1  ;;  %5588 = vmatprep.subr.bf16.mxu1 %v10476_v53  ;;  %v7169_v16 = vmax.f32 %v6913_v24, 0.0  ;;  %v10463_v20 = vld [vmem:[%s11868_s29 + $0x3ec] ss:$16 sps:$4 sm:$0xff]   ;;  %v10477_v53 = vld [vmem:[#allocation13 + $0x2a0] ss:$16 sps:$4 sm:$0xff]  }
 0x5e4   : > { %v6918_v42 = vadd.f32 %v6662_v47, %v3377_v62  ;;  %v6350_v44 = vpop.f32.mrb[140].mxu0  ;;  %v7170_v54 = vmax.f32 %v6914_v52, 0.0  ;;  %v3381_v62 = vadd.f32 %v14044_v28, %v14070_v58  ;;  %v3383_v52 = vadd.f32 %v14046_v38, %v14074_v35 }
 0x5e5   : > { %v7173_v11 = vmax.f32 %v6917_v40, 0.0  ;;  %v9257_v41 = vadd.f32 %v6350_v44, %v14064_v8  ;;  %5280 = vmatmul.mubr.bf16.gmra.mrb[8].mxu1 %v10916_v36  ;;  %v6352_v61 = vpop.f32.mrb[141].mxu0  ;;  %v10482_v36 = vld [vmem:[#allocation13 + $0x2c4] ss:$16 sps:$4 sm:$0xff]   ;;  %v3385_v28 = vadd.f32 %v14048_v5, %v14070_v58 }
 0x5e6   : > { %v7174_v4 = vmax.f32 %v6918_v42, 0.0  ;;  %v9258_v25 = vadd.f32 %v6352_v61, %v14068_v33  ;;  %v6354_v37 = vpop.f32.mrb[142].mxu0  ;;  %5289 = vmatprep.mubr.bf16.mxu1 %v10917_v3  ;;  %5589 = vmatpush1.bf16.msra.mxu1 %v10474_v10  ;;  %v10485_v5 = vld [vmem:[#allocation13 + $0x2e4] ss:$16 sps:$4 sm:$0xff]  }
 0x5e7   : > { %v14164_v24 = vpack.c.bf16 %v7173_v11, %v7169_v16  ;;  %v6665_v47 = vmax.f32 %v9257_v41, 0.0  ;;  %v9259_v40 = vadd.f32 %v6354_v37, %v14064_v8  ;;  %v6356_v44 = vpop.f32.mrb[143].mxu0  ;;  %5590 = vmatprep.subr.bf16.mxu1 %v10479_v34  ;;  %v3387_v34 = vadd.f32 %v14050_v0, %v14074_v35 }
 0x5e8   : > { %v6666_v42 = vmax.f32 %v9258_v25, 0.0  ;;  %v9260_v61 = vadd.f32 %v6356_v44, %v14068_v33  ;;  %v14170_v3 = vpop.f32.mrb[160].mxu1  ;;  %v14172_v10 = vpack.c.bf16 %v7174_v4, %v7170_v54  ;;  %v10480_v54 = vld [vmem:[#allocation13 + $0x2c0] ss:$16 sps:$4 sm:$0xff]  }
 0x5e9   : > { %v6921_v16 = vadd.f32 %v6665_v47, %v3381_v62  ;;  %v6669_v11 = vmax.f32 %v9259_v40, 0.0  ;;  %v14176_v41 = vpop.f32.mrb[161].mxu1  ;;  %6619 = vmatmul.mubr.bf16.gmra.mrb[248].mxu0 %v10460_v18 }
 0x5ea   : > { %v6922_v38 = vadd.f32 %v6666_v42, %v3383_v52  ;;  %v6670_v25 = vmax.f32 %v9260_v61, 0.0  ;;  %v14180_v37 = vpop.f32.mrb[162].mxu1  ;;  %6628 = vmatprep.mubr.bf16.mxu0 %v10463_v20  ;;  %5591 = vmatpush1.bf16.msra.mxu1 %v10477_v53  ;;  %v10918_v52 = vld [vmem:[%s11868_s29 + $0x60] ss:$16 sps:$4 sm:$0xff]   ;;  %v10465_v61 = vld [vmem:[%s11868_s29 + $0x3e8] ss:$16 sps:$4 sm:$0xff]  }
 0x5eb   : > { %v6925_v4 = vadd.f32 %v6669_v11, %v3385_v28  ;;  %v14182_v44 = vpop.f32.mrb[163].mxu1  ;;  %5592 = vmatprep.subr.bf16.mxu1 %v10482_v36  ;;  %v7177_v47 = vmax.f32 %v6921_v16, 0.0  ;;  %v10919_v11 = vld [vmem:[%s11868_s29 + $0x84] ss:$16 sps:$4 sm:$0xff]  }
 0x5ec   : > { %v6926_v62 = vadd.f32 %v6670_v25, %v3387_v34  ;;  %v6360_v18 = vpop.f32.mrb[144].mxu0  ;;  %v7178_v63 = vmax.f32 %v6922_v38, 0.0  ;;  %v10483_v36 = vld [vmem:[#allocation13 + $0x2e0] ss:$16 sps:$4 sm:$0xff]   ;;  %v3391_v34 = vadd.f32 %v14060_v32, %v14070_v58  ;;  %v3393_v38 = vadd.f32 %v14062_v1, %v14074_v35 }
 0x5ed   : > { %v7181_v40 = vmax.f32 %v6925_v4, 0.0  ;;  %v9261_v0 = vadd.f32 %v6360_v18, %v14064_v8  ;;  %5290 = vmatmul.mubr.bf16.gmra.mrb[12].mxu1 %v10918_v52  ;;  %v6362_v42 = vpop.f32.mrb[145].mxu0  ;;  %v10488_v52 = vld [vmem:[#allocation13 + $0x304] ss:$16 sps:$4 sm:$0xff]   ;;  %v3395_v32 = vadd.f32 %v14066_v57, %v14070_v58 }
 0x5ee   : > { %v7182_v20 = vmax.f32 %v6926_v62, 0.0  ;;  %v9262_v53 = vadd.f32 %v6362_v42, %v14068_v33  ;;  %v6364_v28 = vpop.f32.mrb[146].mxu0  ;;  %5299 = vmatprep.mubr.bf16.mxu1 %v10919_v11  ;;  %5593 = vmatpush1.bf16.msra.mxu1 %v10480_v54 }
 0x5ef   : > { %v14191_v16 = vpack.c.bf16 %v7181_v40, %v7177_v47  ;;  %v6673_v25 = vmax.f32 %v9261_v0, 0.0  ;;  %v9263_v4 = vadd.f32 %v6364_v28, %v14064_v8  ;;  %v6366_v18 = vpop.f32.mrb[147].mxu0  ;;  %5594 = vmatprep.subr.bf16.mxu1 %v10485_v5  ;;  %v3397_v5 = vadd.f32 %v14072_v2, %v14074_v35 }
 0x5f0   : > { %v6674_v62 = vmax.f32 %v9262_v53, 0.0  ;;  %v9264_v42 = vadd.f32 %v6366_v18, %v14068_v33  ;;  %v14197_v11 = vpop.f32.mrb[164].mxu1  ;;  %v14199_v54 = vpack.c.bf16 %v7182_v20, %v7178_v63  ;;  %v10486_v63 = vld [vmem:[#allocation13 + $0x300] ss:$16 sps:$4 sm:$0xff]  }
 0x5f1   : > { %v6929_v47 = vadd.f32 %v6673_v25, %v3391_v34  ;;  %v6677_v40 = vmax.f32 %v9263_v4, 0.0  ;;  %v14203_v0 = vpop.f32.mrb[165].mxu1  ;;  %6629 = vmatmul.mubr.bf16.gmra.mrb[252].mxu0 %v10465_v61  ;;  %v10491_v34 = vld [vmem:[#allocation13 + $0x324] ss:$16 sps:$4 sm:$0xff]  }
 0x5f2   : > { %v6930_v1 = vadd.f32 %v6674_v62, %v3393_v38  ;;  %v6678_v53 = vmax.f32 %v9264_v42, 0.0  ;;  %v14207_v28 = vpop.f32.mrb[166].mxu1  ;;  %8119 = vmatprep.mubr.bf16.mxu0 %v14116_v30  ;;  %5595 = vmatpush1.bf16.msra.mxu1 %v10483_v36  ;;  %v10920_v38 = vld [vmem:[%s11868_s29 + $0x80] ss:$16 sps:$4 sm:$0xff]  }
 0x5f3   : > { %v6933_v20 = vadd.f32 %v6677_v40, %v3395_v32  ;;  %v14210_v57 = vpop.f32.mrb[167].mxu1  ;;  %5596 = vmatprep.subr.bf16.mxu1 %v10488_v52  ;;  %v7185_v4 = vmax.f32 %v6929_v47, 0.0  ;;  %v10921_v32 = vld [vmem:[%s11868_s29 + $0xa4] ss:$16 sps:$4 sm:$0xff]   ;;  %v3401_v52 = vadd.f32 %v14088_v26, %v14070_v58  ;;  %v3405_v26 = vadd.f32 %v14096_v59, %v14070_v58 }
 0x5f4   : > { %v6934_v25 = vadd.f32 %v6678_v53, %v3397_v5  ;;  %v6370_v61 = vpop.f32.mrb[148].mxu0  ;;  %v7186_v42 = vmax.f32 %v6930_v1, 0.0  ;;  %v10489_v40 = vld [vmem:[#allocation13 + $0x320] ss:$16 sps:$4 sm:$0xff]   ;;  %v3403_v1 = vadd.f32 %v14092_v15, %v14074_v35  ;;  %v3407_v15 = vadd.f32 %v14098_v17, %v14074_v35  ;;  %v10922_v17 = vld [vmem:[%s11868_s29 + $0xa0] ss:$16 sps:$4 sm:$0xff]  }
 0x5f5   : > { %v7189_v18 = vmax.f32 %v6933_v20, 0.0  ;;  %v9265_v2 = vadd.f32 %v6370_v61, %v14064_v8  ;;  %5300 = vmatmul.mubr.bf16.gmra.mrb[16].mxu1 %v10920_v38  ;;  %v6372_v62 = vpop.f32.mrb[149].mxu0  ;;  %v10494_v61 = vld [vmem:[#allocation13 + $0x344] ss:$16 sps:$4 sm:$0xff]  }
 0x5f6   : > { %v7190_v27 = vmax.f32 %v6934_v25, 0.0  ;;  %v9266_v30 = vadd.f32 %v6372_v62, %v14068_v33  ;;  %v6374_v36 = vpop.f32.mrb[150].mxu0  ;;  %5309 = vmatprep.mubr.bf16.mxu1 %v10921_v32  ;;  %5597 = vmatpush1.bf16.msra.mxu1 %v10486_v63 }
 0x5f7   : > { %v14218_v5 = vpack.c.bf16 %v7189_v18, %v7185_v4  ;;  %v6681_v47 = vmax.f32 %v9265_v2, 0.0  ;;  %v9267_v53 = vadd.f32 %v6374_v36, %v14064_v8  ;;  %v6376_v20 = vpop.f32.mrb[151].mxu0  ;;  %5598 = vmatprep.subr.bf16.mxu1 %v10491_v34 }
 0x5f8   : > { %v6682_v25 = vmax.f32 %v9266_v30, 0.0  ;;  %v9268_v38 = vadd.f32 %v6376_v20, %v14068_v33  ;;  %v14224_v62 = vpop.f32.mrb[168].mxu1  ;;  %v14226_v63 = vpack.c.bf16 %v7190_v27, %v7186_v42  ;;  %v10492_v27 = vld [vmem:[#allocation13 + $0x340] ss:$16 sps:$4 sm:$0xff]  }
 0x5f9   : > { %v6937_v4 = vadd.f32 %v6681_v47, %v3401_v52  ;;  %v6685_v18 = vmax.f32 %v9267_v53, 0.0  ;;  %v14230_v2 = vpop.f32.mrb[169].mxu1  ;;  %8120 = vmatmul.mubr.bf16.vlgmr.msra.gmra.mrb[0].mxu0 %v14108_v56 }
 0x5fa   : > { %v6938_v34 = vadd.f32 %v6682_v25, %v3403_v1  ;;  %v6686_v30 = vmax.f32 %v9268_v38, 0.0  ;;  %v14235_v36 = vpop.f32.mrb[170].mxu1  ;;  %8127 = vmatprep.mubr.bf16.mxu0 %v14144_v39  ;;  %5599 = vmatpush1.bf16.msra.mxu1 %v10489_v40  ;;  %v10923_v38 = vld [vmem:[%s11868_s29 + $0xc4] ss:$16 sps:$4 sm:$0xff]  }
 0x5fb   : > { %v6941_v59 = vadd.f32 %v6685_v18, %v3405_v26  ;;  %v14238_v42 = vpop.f32.mrb[171].mxu1  ;;  %5600 = vmatprep.subr.bf16.mxu1 %v10494_v61  ;;  %v7193_v56 = vmax.f32 %v6937_v4, 0.0  ;;  %v3411_v61 = vadd.f32 %v14114_v6, %v14070_v58 }
 0x5fc   : > { %v6942_v32 = vadd.f32 %v6686_v30, %v3407_v15  ;;  %v6380_v52 = vpop.f32.mrb[152].mxu0  ;;  %v7194_v1 = vmax.f32 %v6938_v34, 0.0  ;;  %v3413_v30 = vadd.f32 %v14120_v55, %v14074_v35  ;;  %v3417_v55 = vadd.f32 %v14126_v60, %v14074_v35 }
 0x5fd   : > { %v7197_v47 = vmax.f32 %v6941_v59, 0.0  ;;  %v9269_v53 = vadd.f32 %v6380_v52, %v14064_v8  ;;  %5310 = vmatmul.mubr.bf16.gmra.mrb[20].mxu1 %v10922_v17  ;;  %v6382_v20 = vpop.f32.mrb[153].mxu0 }
 0x5fe   : > { %v7198_v25 = vmax.f32 %v6942_v32, 0.0  ;;  %v9270_v39 = vadd.f32 %v6382_v20, %v14068_v33  ;;  %v6384_v40 = vpop.f32.mrb[154].mxu0  ;;  %5319 = vmatprep.mubr.bf16.mxu1 %v10923_v38  ;;  %5601 = vmatpush1.bf16.msra.mxu1 %v10492_v27  ;;  %v3415_v27 = vadd.f32 %v14124_v46, %v14070_v58 }
 0x5ff   : > { %v14246_v26 = vpack.c.bf16 %v7197_v47, %v7193_v56  ;;  %v6689_v4 = vmax.f32 %v9269_v53, 0.0  ;;  %v9271_v18 = vadd.f32 %v6384_v40, %v14064_v8  ;;  %v6386_v15 = vpop.f32.mrb[155].mxu0 }
 0x600   : > { %v6690_v34 = vmax.f32 %v9270_v39, 0.0  ;;  %v9272_v59 = vadd.f32 %v6386_v15, %v14068_v33  ;;  %v14252_v32 = vpop.f32.mrb[172].mxu1  ;;  %v14254_v52 = vpack.c.bf16 %v7198_v25, %v7194_v1 }
 0x601   : > { %v6945_v6 = vadd.f32 %v6689_v4, %v3411_v61  ;;  %v6693_v56 = vmax.f32 %v9271_v18, 0.0  ;;  %v14258_v47 = vpop.f32.mrb[173].mxu1  ;;  %8128 = vmatmul.mubr.bf16.gmra.mrb[4].mxu0 %v14136_v7  ;;  %v10924_v7 = vld [vmem:[%s11868_s29 + $0xc0] ss:$16 sps:$4 sm:$0xff]  }
 0x602   : > { %v6946_v53 = vadd.f32 %v6690_v34, %v3413_v30  ;;  %v6694_v17 = vmax.f32 %v9272_v59, 0.0  ;;  %v14263_v20 = vpop.f32.mrb[174].mxu1  ;;  %8135 = vmatprep.mubr.bf16.mxu0 %v14172_v10  ;;  %v10925_v34 = vld [vmem:[%s11868_s29 + $0xe4] ss:$16 sps:$4 sm:$0xff]   ;;  %v3421_v10 = vadd.f32 %v14142_v19, %v14070_v58  ;;  %v3425_v19 = vadd.f32 %v14152_v48, %v14070_v58 }
 0x603   : > { %v6949_v1 = vadd.f32 %v6693_v56, %v3415_v27  ;;  %v14266_v25 = vpop.f32.mrb[175].mxu1  ;;  %v7201_v40 = vmax.f32 %v6945_v6, 0.0 }
 0x604   : > { %v6950_v46 = vadd.f32 %v6694_v17, %v3417_v55  ;;  %v6390_v39 = vpop.f32.mrb[156].mxu0  ;;  %v7202_v60 = vmax.f32 %v6946_v53, 0.0  ;;  %v10495_v55 = vld [vmem:[#allocation13 + $0x360] ss:$16 sps:$4 sm:$0xff]   ;;  %v10497_v17 = vld [vmem:[#allocation13 + $0x364] ss:$16 sps:$4 sm:$0xff]   ;;  %v3423_v53 = vadd.f32 %v14148_v45, %v14074_v35  ;;  %v3427_v45 = vadd.f32 %v14154_v14, %v14074_v35 }
 0x605   : > { %v7205_v38 = vmax.f32 %v6949_v1, 0.0  ;;  %v9273_v61 = vadd.f32 %v6390_v39, %v14064_v8  ;;  %5320 = vmatmul.mubr.bf16.gmra.mrb[24].mxu1 %v10924_v7  ;;  %v6392_v4 = vpop.f32.mrb[157].mxu0  ;;  %5602 = vmatprep.subr.bf16.mxu1 %v10497_v17 }
 0x606   : > { %v7206_v18 = vmax.f32 %v6950_v46, 0.0  ;;  %v9274_v15 = vadd.f32 %v6392_v4, %v14068_v33  ;;  %v6394_v30 = vpop.f32.mrb[158].mxu0  ;;  %5329 = vmatprep.mubr.bf16.mxu1 %v10925_v34  ;;  %5603 = vmatpush1.bf16.msra.mxu1 %v10495_v55  ;;  %v3431_v55 = vadd.f32 %v14170_v3, %v14070_v58 }
 0x607   : > { %v14274_v59 = vpack.c.bf16 %v7205_v38, %v7201_v40  ;;  %v6697_v27 = vmax.f32 %v9273_v61, 0.0  ;;  %v9275_v6 = vadd.f32 %v6394_v30, %v14064_v8  ;;  %v6396_v56 = vpop.f32.mrb[159].mxu0 }
 0x608   : > { %v6698_v1 = vmax.f32 %v9274_v15, 0.0  ;;  %v9276_v46 = vadd.f32 %v6396_v56, %v14068_v33  ;;  %v14280_v39 = vpop.f32.mrb[176].mxu1  ;;  %v14282_v7 = vpack.c.bf16 %v7206_v18, %v7202_v60 }
 0x609   : > { %v6953_v40 = vadd.f32 %v6697_v27, %v3421_v10  ;;  %v6701_v38 = vmax.f32 %v9275_v6, 0.0  ;;  %v14286_v61 = vpop.f32.mrb[177].mxu1  ;;  %8136 = vmatmul.mubr.bf16.gmra.mrb[8].mxu0 %v14164_v24  ;;  %v10926_v6 = vld [vmem:[%s11868_s29 + $0xe0] ss:$16 sps:$4 sm:$0xff]  }
 0x60a   : > { %v6954_v4 = vadd.f32 %v6698_v1, %v3423_v53  ;;  %v6702_v15 = vmax.f32 %v9276_v46, 0.0  ;;  %v14291_v30 = vpop.f32.mrb[178].mxu1  ;;  %8143 = vmatprep.mubr.bf16.mxu0 %v14199_v54  ;;  %v10927_v54 = vld [vmem:[%s11868_s29 + $0x104] ss:$16 sps:$4 sm:$0xff]  }
 0x60b   : > { %v6957_v48 = vadd.f32 %v6701_v38, %v3425_v19  ;;  %v14294_v60 = vpop.f32.mrb[179].mxu1  ;;  %v7209_v10 = vmax.f32 %v6953_v40, 0.0 }
 0x60c   : > { %v6958_v18 = vadd.f32 %v6702_v15, %v3427_v45  ;;  %v6400_v34 = vpop.f32.mrb[160].mxu0  ;;  %v7210_v56 = vmax.f32 %v6954_v4, 0.0  ;;  %v3433_v45 = vadd.f32 %v14176_v41, %v14074_v35  ;;  %v3437_v41 = vadd.f32 %v14182_v44, %v14074_v35 }
 0x60d   : > { %v7213_v27 = vmax.f32 %v6957_v48, 0.0  ;;  %v9277_v24 = vadd.f32 %v6400_v34, %v14064_v8  ;;  %5330 = vmatmul.mubr.bf16.gmra.mrb[28].mxu1 %v10926_v6  ;;  %v6402_v14 = vpop.f32.mrb[161].mxu0  ;;  %v3435_v34 = vadd.f32 %v14180_v37, %v14070_v58 }
 0x60e   : > { %v7214_v17 = vmax.f32 %v6958_v18, 0.0  ;;  %v9278_v53 = vadd.f32 %v6402_v14, %v14068_v33  ;;  %v6404_v1 = vpop.f32.mrb[162].mxu0  ;;  %5339 = vmatprep.mubr.bf16.mxu1 %v10927_v54 }
 0x60f   : > { %v14302_v46 = vpack.c.bf16 %v7213_v27, %v7209_v10  ;;  %v6705_v19 = vmax.f32 %v9277_v24, 0.0  ;;  %v9279_v40 = vadd.f32 %v6404_v1, %v14064_v8  ;;  %v6406_v38 = vpop.f32.mrb[163].mxu0 }
 0x610   : > { %v6706_v15 = vmax.f32 %v9278_v53, 0.0  ;;  %v9280_v4 = vadd.f32 %v6406_v38, %v14068_v33  ;;  %v14308_v48 = vpop.f32.mrb[180].mxu1  ;;  %v14310_v18 = vpack.c.bf16 %v7214_v17, %v7210_v56 }
 0x611   : > { %v6961_v3 = vadd.f32 %v6705_v19, %v3431_v55  ;;  %v6709_v10 = vmax.f32 %v9279_v40, 0.0  ;;  %v14314_v27 = vpop.f32.mrb[181].mxu1  ;;  %8144 = vmatmul.mubr.bf16.gmra.mrb[12].mxu0 %v14191_v16  ;;  %v10928_v16 = vld [vmem:[%s11868_s29 + $0x100] ss:$16 sps:$4 sm:$0xff]  }
 0x612   : > { %v6962_v24 = vadd.f32 %v6706_v15, %v3433_v45  ;;  %v6710_v6 = vmax.f32 %v9280_v4, 0.0  ;;  %v14319_v14 = vpop.f32.mrb[182].mxu1  ;;  %8151 = vmatprep.mubr.bf16.mxu0 %v14226_v63  ;;  %v10929_v15 = vld [vmem:[%s11868_s29 + $0x124] ss:$16 sps:$4 sm:$0xff]   ;;  %v3441_v63 = vadd.f32 %v14197_v11, %v14070_v58  ;;  %v3445_v11 = vadd.f32 %v14207_v28, %v14070_v58 }
 0x613   : > { %v6965_v56 = vadd.f32 %v6709_v10, %v3435_v34  ;;  %v14322_v17 = vpop.f32.mrb[183].mxu1  ;;  %v7217_v1 = vmax.f32 %v6961_v3, 0.0 }
 0x614   : > { %v6966_v37 = vadd.f32 %v6710_v6, %v3437_v41  ;;  %v6410_v53 = vpop.f32.mrb[164].mxu0  ;;  %v7218_v44 = vmax.f32 %v6962_v24, 0.0  ;;  %v10498_v41 = vld [vmem:[#allocation13 + $0x380] ss:$16 sps:$4 sm:$0xff]   ;;  %v10500_v6 = vld [vmem:[#allocation13 + $0x384] ss:$16 sps:$4 sm:$0xff]   ;;  %v3443_v24 = vadd.f32 %v14203_v0, %v14074_v35  ;;  %v3447_v0 = vadd.f32 %v14210_v57, %v14074_v35 }
 0x615   : > { %v7221_v54 = vmax.f32 %v6965_v56, 0.0  ;;  %v9281_v55 = vadd.f32 %v6410_v53, %v14064_v8  ;;  %5340 = vmatmul.mubr.bf16.gmra.mrb[32].mxu1 %v10928_v16  ;;  %v6412_v19 = vpop.f32.mrb[165].mxu0  ;;  %5604 = vmatprep.subr.bf16.mxu1 %v10500_v6 }
 0x616   : > { %v7222_v40 = vmax.f32 %v6966_v37, 0.0  ;;  %v9282_v38 = vadd.f32 %v6412_v19, %v14068_v33  ;;  %v6414_v45 = vpop.f32.mrb[166].mxu0  ;;  %5349 = vmatprep.mubr.bf16.mxu1 %v10929_v15  ;;  %5605 = vmatpush1.bf16.msra.mxu1 %v10498_v41  ;;  %v3451_v41 = vadd.f32 %v14224_v62, %v14070_v58 }
 0x617   : > { %v14330_v4 = vpack.c.bf16 %v7221_v54, %v7217_v1  ;;  %v6713_v34 = vmax.f32 %v9281_v55, 0.0  ;;  %v9283_v3 = vadd.f32 %v6414_v45, %v14064_v8  ;;  %v6416_v10 = vpop.f32.mrb[167].mxu0 }
 0x618   : > { %v6714_v56 = vmax.f32 %v9282_v38, 0.0  ;;  %v9284_v37 = vadd.f32 %v6416_v10, %v14068_v33  ;;  %v14336_v53 = vpop.f32.mrb[184].mxu1  ;;  %v14338_v16 = vpack.c.bf16 %v7222_v40, %v7218_v44 }
 0x619   : > { %v6969_v1 = vadd.f32 %v6713_v34, %v3441_v63  ;;  %v6717_v54 = vmax.f32 %v9283_v3, 0.0  ;;  %v14342_v55 = vpop.f32.mrb[185].mxu1  ;;  %8152 = vmatmul.mubr.bf16.gmra.mrb[16].mxu0 %v14218_v5  ;;  %v10930_v3 = vld [vmem:[%s11868_s29 + $0x120] ss:$16 sps:$4 sm:$0xff]  }
 0x61a   : > { %v6970_v19 = vadd.f32 %v6714_v56, %v3443_v24  ;;  %v6718_v38 = vmax.f32 %v9284_v37, 0.0  ;;  %v14347_v45 = vpop.f32.mrb[186].mxu1  ;;  %8159 = vmatprep.mubr.bf16.mxu0 %v14254_v52  ;;  %v10931_v52 = vld [vmem:[%s11868_s29 + $0x144] ss:$16 sps:$4 sm:$0xff]  }
 0x61b   : > { %v6973_v28 = vadd.f32 %v6717_v54, %v3445_v11  ;;  %v14350_v44 = vpop.f32.mrb[187].mxu1  ;;  %v7225_v63 = vmax.f32 %v6969_v1, 0.0 }
 0x61c   : > { %v6974_v40 = vadd.f32 %v6718_v38, %v3447_v0  ;;  %v6420_v15 = vpop.f32.mrb[168].mxu0  ;;  %v7226_v10 = vmax.f32 %v6970_v19, 0.0  ;;  %v3453_v0 = vadd.f32 %v14230_v2, %v14074_v35  ;;  %v3457_v2 = vadd.f32 %v14238_v42, %v14074_v35 }
 0x61d   : > { %v7229_v34 = vmax.f32 %v6973_v28, 0.0  ;;  %v9285_v5 = vadd.f32 %v6420_v15, %v14064_v8  ;;  %5350 = vmatmul.mubr.bf16.gmra.mrb[36].mxu1 %v10930_v3  ;;  %v6422_v57 = vpop.f32.mrb[169].mxu0  ;;  %v3455_v15 = vadd.f32 %v14235_v36, %v14070_v58 }
 0x61e   : > { %v7230_v6 = vmax.f32 %v6974_v40, 0.0  ;;  %v9286_v24 = vadd.f32 %v6422_v57, %v14068_v33  ;;  %v6424_v56 = vpop.f32.mrb[170].mxu0  ;;  %5359 = vmatprep.mubr.bf16.mxu1 %v10931_v52 }
 0x61f   : > { %v14358_v37 = vpack.c.bf16 %v7229_v34, %v7225_v63  ;;  %v6721_v11 = vmax.f32 %v9285_v5, 0.0  ;;  %v9287_v1 = vadd.f32 %v6424_v56, %v14064_v8  ;;  %v6426_v54 = vpop.f32.mrb[171].mxu0 }
 0x620   : > { %v6722_v38 = vmax.f32 %v9286_v24, 0.0  ;;  %v9288_v19 = vadd.f32 %v6426_v54, %v14068_v33  ;;  %v14364_v28 = vpop.f32.mrb[188].mxu1  ;;  %v14366_v40 = vpack.c.bf16 %v7230_v6, %v7226_v10 }
 0x621   : > { %v6977_v62 = vadd.f32 %v6721_v11, %v3451_v41  ;;  %v6725_v63 = vmax.f32 %v9287_v1, 0.0  ;;  %v14370_v34 = vpop.f32.mrb[189].mxu1  ;;  %8160 = vmatmul.mubr.bf16.gmra.mrb[20].mxu0 %v14246_v26  ;;  %v10932_v26 = vld [vmem:[%s11868_s29 + $0x140] ss:$16 sps:$4 sm:$0xff]  }
 0x622   : > { %v6978_v5 = vadd.f32 %v6722_v38, %v3453_v0  ;;  %v6726_v3 = vmax.f32 %v9288_v19, 0.0  ;;  %v14375_v57 = vpop.f32.mrb[190].mxu1  ;;  %8167 = vmatprep.mubr.bf16.mxu0 %v14282_v7  ;;  %v10933_v38 = vld [vmem:[%s11868_s29 + $0x164] ss:$16 sps:$4 sm:$0xff]   ;;  %v3461_v7 = vadd.f32 %v14252_v32, %v14070_v58  ;;  %v3465_v32 = vadd.f32 %v14263_v20, %v14070_v58 }
 0x623   : > { %v6981_v10 = vadd.f32 %v6725_v63, %v3455_v15  ;;  %v14378_v6 = vpop.f32.mrb[191].mxu1  ;;  %v7233_v56 = vmax.f32 %v6977_v62, 0.0 }
 0x624   : > { %v6982_v36 = vadd.f32 %v6726_v3, %v3457_v2  ;;  %v6430_v24 = vpop.f32.mrb[172].mxu0  ;;  %v7234_v42 = vmax.f32 %v6978_v5, 0.0  ;;  %v10501_v2 = vld [vmem:[#allocation13 + $0x3a0] ss:$16 sps:$4 sm:$0xff]   ;;  %v10503_v3 = vld [vmem:[#allocation13 + $0x3a4] ss:$16 sps:$4 sm:$0xff]   ;;  %v3463_v5 = vadd.f32 %v14258_v47, %v14074_v35  ;;  %v3467_v47 = vadd.f32 %v14266_v25, %v14074_v35 }
 0x625   : > { %v7237_v52 = vmax.f32 %v6981_v10, 0.0  ;;  %v9289_v41 = vadd.f32 %v6430_v24, %v14064_v8  ;;  %5360 = vmatmul.mubr.bf16.gmra.mrb[40].mxu1 %v10932_v26  ;;  %v6432_v11 = vpop.f32.mrb[173].mxu0  ;;  %5606 = vmatprep.subr.bf16.mxu1 %v10503_v3 }
 0x626   : > { %v7238_v1 = vmax.f32 %v6982_v36, 0.0  ;;  %v9290_v54 = vadd.f32 %v6432_v11, %v14068_v33  ;;  %v6434_v0 = vpop.f32.mrb[174].mxu0  ;;  %5369 = vmatprep.mubr.bf16.mxu1 %v10933_v38  ;;  %5607 = vmatpush1.bf16.msra.mxu1 %v10501_v2  ;;  %v3471_v2 = vadd.f32 %v14280_v39, %v14070_v58 }
 0x627   : > { %v14386_v19 = vpack.c.bf16 %v7237_v52, %v7233_v56  ;;  %v6729_v15 = vmax.f32 %v9289_v41, 0.0  ;;  %v9291_v62 = vadd.f32 %v6434_v0, %v14064_v8  ;;  %v6436_v63 = vpop.f32.mrb[175].mxu0 }
 0x628   : > { %v6730_v10 = vmax.f32 %v9290_v54, 0.0  ;;  %v9292_v36 = vadd.f32 %v6436_v63, %v14068_v33  ;;  %v14392_v24 = vpop.f32.mrb[192].mxu1  ;;  %v14394_v26 = vpack.c.bf16 %v7238_v1, %v7234_v42 }
 0x629   : > { %v6985_v56 = vadd.f32 %v6729_v15, %v3461_v7  ;;  %v6733_v52 = vmax.f32 %v9291_v62, 0.0  ;;  %v14398_v41 = vpop.f32.mrb[193].mxu1  ;;  %8168 = vmatmul.mubr.bf16.gmra.mrb[24].mxu0 %v14274_v59  ;;  %v10934_v62 = vld [vmem:[%s11868_s29 + $0x160] ss:$16 sps:$4 sm:$0xff]  }
 0x62a   : > { %v6986_v11 = vadd.f32 %v6730_v10, %v3463_v5  ;;  %v6734_v54 = vmax.f32 %v9292_v36, 0.0  ;;  %v14403_v0 = vpop.f32.mrb[194].mxu1  ;;  %8175 = vmatprep.mubr.bf16.mxu0 %v14310_v18  ;;  %v10935_v18 = vld [vmem:[%s11868_s29 + $0x184] ss:$16 sps:$4 sm:$0xff]  }
 0x62b   : > { %v6989_v20 = vadd.f32 %v6733_v52, %v3465_v32  ;;  %v14406_v42 = vpop.f32.mrb[195].mxu1  ;;  %v7241_v7 = vmax.f32 %v6985_v56, 0.0 }
 0x62c   : > { %v6990_v1 = vadd.f32 %v6734_v54, %v3467_v47  ;;  %v6440_v38 = vpop.f32.mrb[176].mxu0  ;;  %v7242_v63 = vmax.f32 %v6986_v11, 0.0  ;;  %v3473_v47 = vadd.f32 %v14286_v61, %v14074_v35  ;;  %v3477_v61 = vadd.f32 %v14294_v60, %v14074_v35 }
 0x62d   : > { %v7245_v15 = vmax.f32 %v6989_v20, 0.0  ;;  %v9293_v59 = vadd.f32 %v6440_v38, %v14064_v8  ;;  %5370 = vmatmul.mubr.bf16.gmra.mrb[44].mxu1 %v10934_v62  ;;  %v6442_v25 = vpop.f32.mrb[177].mxu0  ;;  %v3475_v38 = vadd.f32 %v14291_v30, %v14070_v58 }
 0x62e   : > { %v7246_v3 = vmax.f32 %v6990_v1, 0.0  ;;  %v9294_v5 = vadd.f32 %v6442_v25, %v14068_v33  ;;  %v6444_v10 = vpop.f32.mrb[178].mxu0  ;;  %5379 = vmatprep.mubr.bf16.mxu1 %v10935_v18 }
 0x62f   : > { %v14414_v36 = vpack.c.bf16 %v7245_v15, %v7241_v7  ;;  %v6737_v32 = vmax.f32 %v9293_v59, 0.0  ;;  %v9295_v56 = vadd.f32 %v6444_v10, %v14064_v8  ;;  %v6446_v52 = vpop.f32.mrb[179].mxu0 }
 0x630   : > { %v6738_v54 = vmax.f32 %v9294_v5, 0.0  ;;  %v9296_v11 = vadd.f32 %v6446_v52, %v14068_v33  ;;  %v14420_v20 = vpop.f32.mrb[196].mxu1  ;;  %v14422_v1 = vpack.c.bf16 %v7246_v3, %v7242_v63 }
 0x631   : > { %v6993_v39 = vadd.f32 %v6737_v32, %v3471_v2  ;;  %v6741_v7 = vmax.f32 %v9295_v56, 0.0  ;;  %v14426_v15 = vpop.f32.mrb[197].mxu1  ;;  %8176 = vmatmul.mubr.bf16.gmra.mrb[28].mxu0 %v14302_v46  ;;  %v10936_v46 = vld [vmem:[%s11868_s29 + $0x180] ss:$16 sps:$4 sm:$0xff]  }
 0x632   : > { %v6994_v59 = vadd.f32 %v6738_v54, %v3473_v47  ;;  %v6742_v62 = vmax.f32 %v9296_v11, 0.0  ;;  %v14431_v25 = vpop.f32.mrb[198].mxu1  ;;  %8183 = vmatprep.mubr.bf16.mxu0 %v14338_v16  ;;  %v10937_v54 = vld [vmem:[%s11868_s29 + $0x1a4] ss:$16 sps:$4 sm:$0xff]   ;;  %v3481_v16 = vadd.f32 %v14308_v48, %v14070_v58  ;;  %v3485_v48 = vadd.f32 %v14319_v14, %v14070_v58 }
 0x633   : > { %v6997_v63 = vadd.f32 %v6741_v7, %v3475_v38  ;;  %v14434_v3 = vpop.f32.mrb[199].mxu1  ;;  %v7249_v10 = vmax.f32 %v6993_v39, 0.0 }
 0x634   : > { %v6998_v30 = vadd.f32 %v6742_v62, %v3477_v61  ;;  %v6450_v5 = vpop.f32.mrb[180].mxu0  ;;  %v7250_v60 = vmax.f32 %v6994_v59, 0.0  ;;  %v10504_v61 = vld [vmem:[#allocation13 + $0x3c0] ss:$16 sps:$4 sm:$0xff]   ;;  %v10506_v62 = vld [vmem:[#allocation13 + $0x3c4] ss:$16 sps:$4 sm:$0xff]   ;;  %v3483_v59 = vadd.f32 %v14314_v27, %v14074_v35  ;;  %v3487_v27 = vadd.f32 %v14322_v17, %v14074_v35 }
 0x635   : > { %v7253_v18 = vmax.f32 %v6997_v63, 0.0  ;;  %v9297_v2 = vadd.f32 %v6450_v5, %v14064_v8  ;;  %5380 = vmatmul.mubr.bf16.gmra.mrb[48].mxu1 %v10936_v46  ;;  %v6452_v32 = vpop.f32.mrb[181].mxu0  ;;  %5608 = vmatprep.subr.bf16.mxu1 %v10506_v62 }
 0x636   : > { %v7254_v56 = vmax.f32 %v6998_v30, 0.0  ;;  %v9298_v52 = vadd.f32 %v6452_v32, %v14068_v33  ;;  %v6454_v47 = vpop.f32.mrb[182].mxu0  ;;  %5389 = vmatprep.mubr.bf16.mxu1 %v10937_v54  ;;  %5609 = vmatpush1.bf16.msra.mxu1 %v10504_v61  ;;  %v3491_v61 = vadd.f32 %v14336_v53, %v14070_v58 }
 0x637   : > { %v14442_v11 = vpack.c.bf16 %v7253_v18, %v7249_v10  ;;  %v6745_v38 = vmax.f32 %v9297_v2, 0.0  ;;  %v9299_v39 = vadd.f32 %v6454_v47, %v14064_v8  ;;  %v6456_v7 = vpop.f32.mrb[183].mxu0 }
 0x638   : > { %v6746_v63 = vmax.f32 %v9298_v52, 0.0  ;;  %v9300_v30 = vadd.f32 %v6456_v7, %v14068_v33  ;;  %v14448_v5 = vpop.f32.mrb[200].mxu1  ;;  %v14450_v46 = vpack.c.bf16 %v7254_v56, %v7250_v60 }
 0x639   : > { %v7001_v10 = vadd.f32 %v6745_v38, %v3481_v16  ;;  %v6749_v18 = vmax.f32 %v9299_v39, 0.0  ;;  %v14454_v2 = vpop.f32.mrb[201].mxu1  ;;  %8184 = vmatmul.mubr.bf16.gmra.mrb[32].mxu0 %v14330_v4  ;;  %v10938_v39 = vld [vmem:[%s11868_s29 + $0x1a0] ss:$16 sps:$4 sm:$0xff]  }
 0x63a   : > { %v7002_v32 = vadd.f32 %v6746_v63, %v3483_v59  ;;  %v6750_v52 = vmax.f32 %v9300_v30, 0.0  ;;  %v14459_v47 = vpop.f32.mrb[202].mxu1  ;;  %8191 = vmatprep.mubr.bf16.mxu0 %v14366_v40  ;;  %v10939_v40 = vld [vmem:[%s11868_s29 + $0x1c4] ss:$16 sps:$4 sm:$0xff]  }
 0x63b   : > { %v7005_v14 = vadd.f32 %v6749_v18, %v3485_v48  ;;  %v14462_v60 = vpop.f32.mrb[203].mxu1  ;;  %v7257_v16 = vmax.f32 %v7001_v10, 0.0 }
 0x63c   : > { %v7006_v56 = vadd.f32 %v6750_v52, %v3487_v27  ;;  %v6460_v54 = vpop.f32.mrb[184].mxu0  ;;  %v7258_v7 = vmax.f32 %v7002_v32, 0.0  ;;  %v3493_v27 = vadd.f32 %v14342_v55, %v14074_v35  ;;  %v3497_v55 = vadd.f32 %v14350_v44, %v14074_v35 }
 0x63d   : > { %v7261_v38 = vmax.f32 %v7005_v14, 0.0  ;;  %v9301_v4 = vadd.f32 %v6460_v54, %v14064_v8  ;;  %5390 = vmatmul.mubr.bf16.gmra.mrb[52].mxu1 %v10938_v39  ;;  %v6462_v17 = vpop.f32.mrb[185].mxu0  ;;  %v3495_v54 = vadd.f32 %v14347_v45, %v14070_v58 }
 0x63e   : > { %v7262_v62 = vmax.f32 %v7006_v56, 0.0  ;;  %v9302_v59 = vadd.f32 %v6462_v17, %v14068_v33  ;;  %v6464_v63 = vpop.f32.mrb[186].mxu0  ;;  %5399 = vmatprep.mubr.bf16.mxu1 %v10939_v40 }
 0x63f   : > { %v14470_v30 = vpack.c.bf16 %v7261_v38, %v7257_v16  ;;  %v6753_v48 = vmax.f32 %v9301_v4, 0.0  ;;  %v9303_v10 = vadd.f32 %v6464_v63, %v14064_v8  ;;  %v6466_v18 = vpop.f32.mrb[187].mxu0 }
 0x640   : > { %v6754_v52 = vmax.f32 %v9302_v59, 0.0  ;;  %v9304_v32 = vadd.f32 %v6466_v18, %v14068_v33  ;;  %v14476_v14 = vpop.f32.mrb[204].mxu1  ;;  %v14478_v56 = vpack.c.bf16 %v7262_v62, %v7258_v7 }
 0x641   : > { %v7009_v53 = vadd.f32 %v6753_v48, %v3491_v61  ;;  %v6757_v16 = vmax.f32 %v9303_v10, 0.0  ;;  %v14482_v38 = vpop.f32.mrb[205].mxu1  ;;  %8192 = vmatmul.mubr.bf16.gmra.mrb[36].mxu0 %v14358_v37  ;;  %v10940_v37 = vld [vmem:[%s11868_s29 + $0x1c0] ss:$16 sps:$4 sm:$0xff]  }
 0x642   : > { %v7010_v4 = vadd.f32 %v6754_v52, %v3493_v27  ;;  %v6758_v39 = vmax.f32 %v9304_v32, 0.0  ;;  %v14487_v17 = vpop.f32.mrb[206].mxu1  ;;  %8199 = vmatprep.mubr.bf16.mxu0 %v14394_v26  ;;  %v10941_v52 = vld [vmem:[%s11868_s29 + $0x1e4] ss:$16 sps:$4 sm:$0xff]   ;;  %v3501_v26 = vadd.f32 %v14364_v28, %v14070_v58  ;;  %v3505_v28 = vadd.f32 %v14375_v57, %v14070_v58 }
 0x643   : > { %v7013_v7 = vadd.f32 %v6757_v16, %v3495_v54  ;;  %v14490_v62 = vpop.f32.mrb[207].mxu1  ;;  %v7265_v63 = vmax.f32 %v7009_v53, 0.0 }
 0x644   : > { %v7014_v45 = vadd.f32 %v6758_v39, %v3497_v55  ;;  %v6470_v59 = vpop.f32.mrb[188].mxu0  ;;  %v7266_v44 = vmax.f32 %v7010_v4, 0.0  ;;  %v10507_v55 = vld [vmem:[#allocation13 + $0x3e0] ss:$16 sps:$4 sm:$0xff]   ;;  %v10509_v39 = vld [vmem:[#allocation13 + $0x3e4] ss:$16 sps:$4 sm:$0xff]   ;;  %v3503_v4 = vadd.f32 %v14370_v34, %v14074_v35  ;;  %v3507_v34 = vadd.f32 %v14378_v6, %v14074_v35 }
 0x645   : > { %v7269_v40 = vmax.f32 %v7013_v7, 0.0  ;;  %v9305_v61 = vadd.f32 %v6470_v59, %v14064_v8  ;;  %5400 = vmatmul.mubr.bf16.gmra.mrb[56].mxu1 %v10940_v37  ;;  %v6472_v48 = vpop.f32.mrb[189].mxu0  ;;  %5610 = vmatprep.subr.bf16.mxu1 %v10509_v39  ;;  %v10942_v6 = vld [vmem:[%s11868_s29 + $0x1e0] ss:$16 sps:$4 sm:$0xff]  }
 0x646   : > { %v7270_v10 = vmax.f32 %v7014_v45, 0.0  ;;  %v9306_v18 = vadd.f32 %v6472_v48, %v14068_v33  ;;  %v6474_v27 = vpop.f32.mrb[190].mxu0  ;;  %5409 = vmatprep.mubr.bf16.mxu1 %v10941_v52  ;;  %5611 = vmatpush1.bf16.msra.mxu1 %v10507_v55 }
 0x647   : > { %v14498_v32 = vpack.c.bf16 %v7269_v40, %v7265_v63  ;;  %v6761_v54 = vmax.f32 %v9305_v61, 0.0  ;;  %v9307_v53 = vadd.f32 %v6474_v27, %v14064_v8  ;;  %v6476_v16 = vpop.f32.mrb[191].mxu0  ;;  %7798 = vmatprep.subr.bf16.mxu1 %v16413_v21 }
 0x648   : > { %v6762_v7 = vmax.f32 %v9306_v18, 0.0  ;;  %v9308_v45 = vadd.f32 %v6476_v16, %v14068_v33  ;;  %v14504_v59 = vpop.f32.mrb[208].mxu1  ;;  %v14506_v37 = vpack.c.bf16 %v7270_v10, %v7266_v44 }
 0x649   : > { %v7017_v63 = vadd.f32 %v6761_v54, %v3501_v26  ;;  %v6765_v40 = vmax.f32 %v9307_v53, 0.0  ;;  %v14510_v61 = vpop.f32.mrb[209].mxu1  ;;  %8200 = vmatmul.mubr.bf16.gmra.mrb[40].mxu0 %v14386_v19 }
 0x64a   : > { %v7018_v48 = vadd.f32 %v6762_v7, %v3503_v4  ;;  %v6766_v18 = vmax.f32 %v9308_v45, 0.0  ;;  %v14515_v27 = vpop.f32.mrb[210].mxu1  ;;  %8207 = vmatprep.mubr.bf16.mxu0 %v14422_v1  ;;  %v10943_v4 = vld [vmem:[%s11868_s29 + $0x204] ss:$16 sps:$4 sm:$0xff]   ;;  %v3511_v7 = vadd.f32 %v14392_v24, %v14070_v58 }
 0x64b   : > { %v7021_v57 = vadd.f32 %v6765_v40, %v3505_v28  ;;  %v14518_v44 = vpop.f32.mrb[211].mxu1  ;;  %v7273_v52 = vmax.f32 %v7017_v63, 0.0 }
 0x64c   : > { %v7022_v10 = vadd.f32 %v6766_v18, %v3507_v34  ;;  %v6480_v19 = vpop.f32.mrb[192].mxu0  ;;  %v7274_v16 = vmax.f32 %v7018_v48, 0.0  ;;  %v3513_v34 = vadd.f32 %v14398_v41, %v14074_v35  ;;  %v3517_v41 = vadd.f32 %v14406_v42, %v14074_v35 }
 0x64d   : > { %v7277_v26 = vmax.f32 %v7021_v57, 0.0  ;;  %v9309_v54 = vadd.f32 %v6480_v19, %v14064_v8  ;;  %5410 = vmatmul.mubr.bf16.gmra.mrb[60].mxu1 %v10942_v6  ;;  %v6482_v53 = vpop.f32.mrb[193].mxu0  ;;  %v3515_v19 = vadd.f32 %v14403_v0, %v14070_v58 }
 0x64e   : > { %v7278_v39 = vmax.f32 %v7022_v10, 0.0  ;;  %v9310_v1 = vadd.f32 %v6482_v53, %v14068_v33  ;;  %v6484_v55 = vpop.f32.mrb[194].mxu0  ;;  %5419 = vmatprep.mubr.bf16.mxu1 %v10943_v4 }
 0x64f   : > { %v14527_v45 = vpack.c.bf16 %v7277_v26, %v7273_v52  ;;  %v6769_v28 = vmax.f32 %v9309_v54, 0.0  ;;  %v9311_v63 = vadd.f32 %v6484_v55, %v14064_v8  ;;  %v6486_v40 = vpop.f32.mrb[195].mxu0 }
 0x650   : > { %v6770_v18 = vmax.f32 %v9310_v1, 0.0  ;;  %v9312_v48 = vadd.f32 %v6486_v40, %v14068_v33  ;;  %v14533_v57 = vpop.f32.mrb[212].mxu1  ;;  %v14535_v10 = vpack.c.bf16 %v7278_v39, %v7274_v16 }
 0x651   : > { %v7025_v24 = vadd.f32 %v6769_v28, %v3511_v7  ;;  %v6773_v52 = vmax.f32 %v9311_v63, 0.0  ;;  %v14539_v26 = vpop.f32.mrb[213].mxu1  ;;  %8208 = vmatmul.mubr.bf16.gmra.mrb[44].mxu0 %v14414_v36  ;;  %v10944_v36 = vld [vmem:[%s11868_s29 + $0x200] ss:$16 sps:$4 sm:$0xff]  }
 0x652   : > { %v7026_v54 = vadd.f32 %v6770_v18, %v3513_v34  ;;  %v6774_v6 = vmax.f32 %v9312_v48, 0.0  ;;  %v14544_v53 = vpop.f32.mrb[214].mxu1  ;;  %8215 = vmatprep.mubr.bf16.mxu0 %v14450_v46  ;;  %v10945_v18 = vld [vmem:[%s11868_s29 + $0x224] ss:$16 sps:$4 sm:$0xff]   ;;  %v3521_v46 = vadd.f32 %v14420_v20, %v14070_v58 }
 0x653   : > { %v7029_v16 = vadd.f32 %v6773_v52, %v3515_v19  ;;  %v14547_v39 = vpop.f32.mrb[215].mxu1  ;;  %v7281_v55 = vmax.f32 %v7025_v24, 0.0 }
 0x654   : > { %v7030_v0 = vadd.f32 %v6774_v6, %v3517_v41  ;;  %v6490_v1 = vpop.f32.mrb[196].mxu0  ;;  %v7282_v42 = vmax.f32 %v7026_v54, 0.0  ;;  %v3523_v41 = vadd.f32 %v14426_v15, %v14074_v35  ;;  %v3527_v15 = vadd.f32 %v14434_v3, %v14074_v35 }
 0x655   : > { %v7285_v4 = vmax.f32 %v7029_v16, 0.0  ;;  %v9313_v7 = vadd.f32 %v6490_v1, %v14064_v8  ;;  %5420 = vmatmul.mubr.bf16.gmra.mrb[64].mxu1 %v10944_v36  ;;  %v6492_v28 = vpop.f32.mrb[197].mxu0  ;;  %v3525_v1 = vadd.f32 %v14431_v25, %v14070_v58 }
 0x656   : > { %v7286_v63 = vmax.f32 %v7030_v0, 0.0  ;;  %v9314_v40 = vadd.f32 %v6492_v28, %v14068_v33  ;;  %v6494_v34 = vpop.f32.mrb[198].mxu0  ;;  %5429 = vmatprep.mubr.bf16.mxu1 %v10945_v18 }
 0x657   : > { %v14555_v48 = vpack.c.bf16 %v7285_v4, %v7281_v55  ;;  %v6777_v19 = vmax.f32 %v9313_v7, 0.0  ;;  %v9315_v24 = vadd.f32 %v6494_v34, %v14064_v8  ;;  %v6496_v52 = vpop.f32.mrb[199].mxu0 }
 0x658   : > { %v6778_v6 = vmax.f32 %v9314_v40, 0.0  ;;  %v9316_v54 = vadd.f32 %v6496_v52, %v14068_v33  ;;  %v14561_v16 = vpop.f32.mrb[216].mxu1  ;;  %v14563_v0 = vpack.c.bf16 %v7286_v63, %v7282_v42 }
 0x659   : > { %v7033_v20 = vadd.f32 %v6777_v19, %v3521_v46  ;;  %v6781_v55 = vmax.f32 %v9315_v24, 0.0  ;;  %v14567_v4 = vpop.f32.mrb[217].mxu1  ;;  %8216 = vmatmul.mubr.bf16.gmra.mrb[48].mxu0 %v14442_v11  ;;  %v10946_v11 = vld [vmem:[%s11868_s29 + $0x220] ss:$16 sps:$4 sm:$0xff]  }
 0x65a   : > { %v7034_v7 = vadd.f32 %v6778_v6, %v3523_v41  ;;  %v6782_v36 = vmax.f32 %v9316_v54, 0.0  ;;  %v14572_v28 = vpop.f32.mrb[218].mxu1  ;;  %8223 = vmatprep.mubr.bf16.mxu0 %v14478_v56  ;;  %v10947_v6 = vld [vmem:[%s11868_s29 + $0x244] ss:$16 sps:$4 sm:$0xff]   ;;  %v3531_v56 = vadd.f32 %v14448_v5, %v14070_v58 }
 0x65b   : > { %v7037_v42 = vadd.f32 %v6781_v55, %v3525_v1  ;;  %v14575_v63 = vpop.f32.mrb[219].mxu1  ;;  %v7289_v34 = vmax.f32 %v7033_v20, 0.0 }
 0x65c   : > { %v7038_v25 = vadd.f32 %v6782_v36, %v3527_v15  ;;  %v6500_v40 = vpop.f32.mrb[200].mxu0  ;;  %v7290_v3 = vmax.f32 %v7034_v7, 0.0  ;;  %v3533_v15 = vadd.f32 %v14454_v2, %v14074_v35  ;;  %v3537_v2 = vadd.f32 %v14462_v60, %v14074_v35 }
 0x65d   : > { %v7293_v18 = vmax.f32 %v7037_v42, 0.0  ;;  %v9317_v46 = vadd.f32 %v6500_v40, %v14064_v8  ;;  %5430 = vmatmul.mubr.bf16.gmra.mrb[68].mxu1 %v10946_v11  ;;  %v6502_v19 = vpop.f32.mrb[201].mxu0  ;;  %v3535_v40 = vadd.f32 %v14459_v47, %v14070_v58 }
 0x65e   : > { %v7294_v24 = vmax.f32 %v7038_v25, 0.0  ;;  %v9318_v52 = vadd.f32 %v6502_v19, %v14068_v33  ;;  %v6504_v41 = vpop.f32.mrb[202].mxu0  ;;  %5439 = vmatprep.mubr.bf16.mxu1 %v10947_v6 }
 0x65f   : > { %v14583_v54 = vpack.c.bf16 %v7293_v18, %v7289_v34  ;;  %v6785_v1 = vmax.f32 %v9317_v46, 0.0  ;;  %v9319_v20 = vadd.f32 %v6504_v41, %v14064_v8  ;;  %v6506_v55 = vpop.f32.mrb[203].mxu0 }
 0x660   : > { %v6786_v36 = vmax.f32 %v9318_v52, 0.0  ;;  %v9320_v7 = vadd.f32 %v6506_v55, %v14068_v33  ;;  %v14589_v42 = vpop.f32.mrb[220].mxu1  ;;  %v14591_v25 = vpack.c.bf16 %v7294_v24, %v7290_v3 }
 0x661   : > { %v7041_v5 = vadd.f32 %v6785_v1, %v3531_v56  ;;  %v6789_v34 = vmax.f32 %v9319_v20, 0.0  ;;  %v14595_v18 = vpop.f32.mrb[221].mxu1  ;;  %8224 = vmatmul.mubr.bf16.gmra.mrb[52].mxu0 %v14470_v30  ;;  %v10948_v30 = vld [vmem:[%s11868_s29 + $0x240] ss:$16 sps:$4 sm:$0xff]  }
 0x662   : > { %v7042_v46 = vadd.f32 %v6786_v36, %v3533_v15  ;;  %v6790_v11 = vmax.f32 %v9320_v7, 0.0  ;;  %v14600_v19 = vpop.f32.mrb[222].mxu1  ;;  %8231 = vmatprep.mubr.bf16.mxu0 %v14506_v37  ;;  %v10949_v36 = vld [vmem:[%s11868_s29 + $0x264] ss:$16 sps:$4 sm:$0xff]   ;;  %v3541_v37 = vadd.f32 %v14476_v14, %v14070_v58 }
 0x663   : > { %v7045_v3 = vadd.f32 %v6789_v34, %v3535_v40  ;;  %v14603_v24 = vpop.f32.mrb[223].mxu1  ;;  %v7297_v41 = vmax.f32 %v7041_v5, 0.0 }
 0x664   : > { %v7046_v47 = vadd.f32 %v6790_v11, %v3537_v2  ;;  %v6510_v52 = vpop.f32.mrb[204].mxu0  ;;  %v7298_v60 = vmax.f32 %v7042_v46, 0.0  ;;  %v3543_v2 = vadd.f32 %v14482_v38, %v14074_v35  ;;  %v3547_v38 = vadd.f32 %v14490_v62, %v14074_v35 }
 0x665   : > { %v7301_v6 = vmax.f32 %v7045_v3, 0.0  ;;  %v9321_v56 = vadd.f32 %v6510_v52, %v14064_v8  ;;  %5440 = vmatmul.mubr.bf16.gmra.mrb[72].mxu1 %v10948_v30  ;;  %v6512_v1 = vpop.f32.mrb[205].mxu0  ;;  %v3545_v52 = vadd.f32 %v14487_v17, %v14070_v58 }
 0x666   : > { %v7302_v20 = vmax.f32 %v7046_v47, 0.0  ;;  %v9322_v55 = vadd.f32 %v6512_v1, %v14068_v33  ;;  %v6514_v15 = vpop.f32.mrb[206].mxu0  ;;  %5449 = vmatprep.mubr.bf16.mxu1 %v10949_v36 }
 0x667   : > { %v14611_v7 = vpack.c.bf16 %v7301_v6, %v7297_v41  ;;  %v6793_v40 = vmax.f32 %v9321_v56, 0.0  ;;  %v9323_v5 = vadd.f32 %v6514_v15, %v14064_v8  ;;  %v6516_v34 = vpop.f32.mrb[207].mxu0 }
 0x668   : > { %v6794_v11 = vmax.f32 %v9322_v55, 0.0  ;;  %v9324_v46 = vadd.f32 %v6516_v34, %v14068_v33  ;;  %v14617_v3 = vpop.f32.mrb[224].mxu1  ;;  %v14619_v47 = vpack.c.bf16 %v7302_v20, %v7298_v60 }
 0x669   : > { %v7049_v14 = vadd.f32 %v6793_v40, %v3541_v37  ;;  %v6797_v41 = vmax.f32 %v9323_v5, 0.0  ;;  %v14623_v6 = vpop.f32.mrb[225].mxu1  ;;  %8232 = vmatmul.mubr.bf16.gmra.mrb[56].mxu0 %v14498_v32  ;;  %v10950_v32 = vld [vmem:[%s11868_s29 + $0x260] ss:$16 sps:$4 sm:$0xff]  }
 0x66a   : > { %v7050_v56 = vadd.f32 %v6794_v11, %v3543_v2  ;;  %v6798_v30 = vmax.f32 %v9324_v46, 0.0  ;;  %v14628_v1 = vpop.f32.mrb[226].mxu1  ;;  %8239 = vmatprep.mubr.bf16.mxu0 %v14535_v10  ;;  %v10951_v11 = vld [vmem:[%s11868_s29 + $0x284] ss:$16 sps:$4 sm:$0xff]   ;;  %v3551_v10 = vadd.f32 %v14504_v59, %v14070_v58 }
 0x66b   : > { %v7053_v60 = vadd.f32 %v6797_v41, %v3545_v52  ;;  %v14631_v20 = vpop.f32.mrb[227].mxu1  ;;  %v7305_v15 = vmax.f32 %v7049_v14, 0.0 }
 0x66c   : > { %v7054_v17 = vadd.f32 %v6798_v30, %v3547_v38  ;;  %v6520_v55 = vpop.f32.mrb[208].mxu0  ;;  %v7306_v62 = vmax.f32 %v7050_v56, 0.0  ;;  %v3553_v38 = vadd.f32 %v14510_v61, %v14074_v35  ;;  %v3557_v61 = vadd.f32 %v14518_v44, %v14074_v35 }
 0x66d   : > { %v7309_v36 = vmax.f32 %v7053_v60, 0.0  ;;  %v9325_v37 = vadd.f32 %v6520_v55, %v14064_v8  ;;  %5450 = vmatmul.mubr.bf16.gmra.mrb[76].mxu1 %v10950_v32  ;;  %v6522_v40 = vpop.f32.mrb[209].mxu0  ;;  %v3555_v55 = vadd.f32 %v14515_v27, %v14070_v58 }
 0x66e   : > { %v7310_v5 = vmax.f32 %v7054_v17, 0.0  ;;  %v9326_v34 = vadd.f32 %v6522_v40, %v14068_v33  ;;  %v6524_v2 = vpop.f32.mrb[210].mxu0  ;;  %5459 = vmatprep.mubr.bf16.mxu1 %v10951_v11 }
 0x66f   : > { %v14639_v46 = vpack.c.bf16 %v7309_v36, %v7305_v15  ;;  %v6801_v52 = vmax.f32 %v9325_v37, 0.0  ;;  %v9327_v14 = vadd.f32 %v6524_v2, %v14064_v8  ;;  %v6526_v41 = vpop.f32.mrb[211].mxu0 }
 0x670   : > { %v6802_v30 = vmax.f32 %v9326_v34, 0.0  ;;  %v9328_v56 = vadd.f32 %v6526_v41, %v14068_v33  ;;  %v14645_v60 = vpop.f32.mrb[228].mxu1  ;;  %v14647_v17 = vpack.c.bf16 %v7310_v5, %v7306_v62 }
 0x671   : > { %v7057_v59 = vadd.f32 %v6801_v52, %v3551_v10  ;;  %v6805_v15 = vmax.f32 %v9327_v14, 0.0  ;;  %v14651_v36 = vpop.f32.mrb[229].mxu1  ;;  %8240 = vmatmul.mubr.bf16.gmra.mrb[60].mxu0 %v14527_v45  ;;  %v10952_v45 = vld [vmem:[%s11868_s29 + $0x280] ss:$16 sps:$4 sm:$0xff]  }
 0x672   : > { %v7058_v37 = vadd.f32 %v6802_v30, %v3553_v38  ;;  %v6806_v32 = vmax.f32 %v9328_v56, 0.0  ;;  %v14656_v40 = vpop.f32.mrb[230].mxu1  ;;  %8247 = vmatprep.mubr.bf16.mxu0 %v14563_v0  ;;  %v10953_v30 = vld [vmem:[%s11868_s29 + $0x2a4] ss:$16 sps:$4 sm:$0xff]   ;;  %v3561_v0 = vadd.f32 %v14533_v57, %v14070_v58 }
 0x673   : > { %v7061_v62 = vadd.f32 %v6805_v15, %v3555_v55  ;;  %v14659_v5 = vpop.f32.mrb[231].mxu1  ;;  %v7313_v2 = vmax.f32 %v7057_v59, 0.0 }
 0x674   : > { %v7062_v27 = vadd.f32 %v6806_v32, %v3557_v61  ;;  %v6530_v34 = vpop.f32.mrb[212].mxu0  ;;  %v7314_v44 = vmax.f32 %v7058_v37, 0.0  ;;  %v3563_v61 = vadd.f32 %v14539_v26, %v14074_v35  ;;  %v3567_v26 = vadd.f32 %v14547_v39, %v14074_v35 }
 0x675   : > { %v7317_v11 = vmax.f32 %v7061_v62, 0.0  ;;  %v9329_v10 = vadd.f32 %v6530_v34, %v14064_v8  ;;  %5460 = vmatmul.mubr.bf16.gmra.mrb[80].mxu1 %v10952_v45  ;;  %v6532_v52 = vpop.f32.mrb[213].mxu0  ;;  %v3565_v34 = vadd.f32 %v14544_v53, %v14070_v58 }
 0x676   : > { %v7318_v14 = vmax.f32 %v7062_v27, 0.0  ;;  %v9330_v41 = vadd.f32 %v6532_v52, %v14068_v33  ;;  %v6534_v38 = vpop.f32.mrb[214].mxu0  ;;  %5469 = vmatprep.mubr.bf16.mxu1 %v10953_v30 }
 0x677   : > { %v14667_v56 = vpack.c.bf16 %v7317_v11, %v7313_v2  ;;  %v6809_v55 = vmax.f32 %v9329_v10, 0.0  ;;  %v9331_v59 = vadd.f32 %v6534_v38, %v14064_v8  ;;  %v6536_v15 = vpop.f32.mrb[215].mxu0 }
 0x678   : > { %v6810_v32 = vmax.f32 %v9330_v41, 0.0  ;;  %v9332_v37 = vadd.f32 %v6536_v15, %v14068_v33  ;;  %v14673_v62 = vpop.f32.mrb[232].mxu1  ;;  %v14675_v27 = vpack.c.bf16 %v7318_v14, %v7314_v44 }
 0x679   : > { %v7065_v57 = vadd.f32 %v6809_v55, %v3561_v0  ;;  %v6813_v2 = vmax.f32 %v9331_v59, 0.0  ;;  %v14679_v11 = vpop.f32.mrb[233].mxu1  ;;  %8248 = vmatmul.mubr.bf16.gmra.mrb[64].mxu0 %v14555_v48  ;;  %v10954_v48 = vld [vmem:[%s11868_s29 + $0x2a0] ss:$16 sps:$4 sm:$0xff]  }
 0x67a   : > { %v7066_v10 = vadd.f32 %v6810_v32, %v3563_v61  ;;  %v6814_v45 = vmax.f32 %v9332_v37, 0.0  ;;  %v14684_v52 = vpop.f32.mrb[234].mxu1  ;;  %8255 = vmatprep.mubr.bf16.mxu0 %v14591_v25  ;;  %v10955_v32 = vld [vmem:[%s11868_s29 + $0x2c4] ss:$16 sps:$4 sm:$0xff]   ;;  %v3571_v25 = vadd.f32 %v14561_v16, %v14070_v58 }
 0x67b   : > { %v7069_v44 = vadd.f32 %v6813_v2, %v3565_v34  ;;  %v14687_v14 = vpop.f32.mrb[235].mxu1  ;;  %v7321_v38 = vmax.f32 %v7065_v57, 0.0 }
 0x67c   : > { %v7070_v53 = vadd.f32 %v6814_v45, %v3567_v26  ;;  %v6540_v41 = vpop.f32.mrb[216].mxu0  ;;  %v7322_v39 = vmax.f32 %v7066_v10, 0.0  ;;  %v3573_v26 = vadd.f32 %v14567_v4, %v14074_v35  ;;  %v3577_v4 = vadd.f32 %v14575_v63, %v14074_v35 }
 0x67d   : > { %v7325_v30 = vmax.f32 %v7069_v44, 0.0  ;;  %v9333_v0 = vadd.f32 %v6540_v41, %v14064_v8  ;;  %5470 = vmatmul.mubr.bf16.gmra.mrb[84].mxu1 %v10954_v48  ;;  %v6542_v55 = vpop.f32.mrb[217].mxu0  ;;  %v3575_v41 = vadd.f32 %v14572_v28, %v14070_v58 }
 0x67e   : > { %v7326_v59 = vmax.f32 %v7070_v53, 0.0  ;;  %v9334_v15 = vadd.f32 %v6542_v55, %v14068_v33  ;;  %v6544_v61 = vpop.f32.mrb[218].mxu0  ;;  %5479 = vmatprep.mubr.bf16.mxu1 %v10955_v32 }
 0x67f   : > { %v14695_v37 = vpack.c.bf16 %v7325_v30, %v7321_v38  ;;  %v6817_v34 = vmax.f32 %v9333_v0, 0.0  ;;  %v9335_v57 = vadd.f32 %v6544_v61, %v14064_v8  ;;  %v6546_v2 = vpop.f32.mrb[219].mxu0 }
 0x680   : > { %v6818_v45 = vmax.f32 %v9334_v15, 0.0  ;;  %v9336_v10 = vadd.f32 %v6546_v2, %v14068_v33  ;;  %v14701_v44 = vpop.f32.mrb[236].mxu1  ;;  %v14703_v53 = vpack.c.bf16 %v7326_v59, %v7322_v39 }
 0x681   : > { %v7073_v16 = vadd.f32 %v6817_v34, %v3571_v25  ;;  %v6821_v38 = vmax.f32 %v9335_v57, 0.0  ;;  %v14707_v30 = vpop.f32.mrb[237].mxu1  ;;  %8256 = vmatmul.mubr.bf16.gmra.mrb[68].mxu0 %v14583_v54  ;;  %v10956_v54 = vld [vmem:[%s11868_s29 + $0x2c0] ss:$16 sps:$4 sm:$0xff]  }
 0x682   : > { %v7074_v0 = vadd.f32 %v6818_v45, %v3573_v26  ;;  %v6822_v48 = vmax.f32 %v9336_v10, 0.0  ;;  %v14712_v55 = vpop.f32.mrb[238].mxu1  ;;  %8263 = vmatprep.mubr.bf16.mxu0 %v14619_v47  ;;  %v10957_v45 = vld [vmem:[%s11868_s29 + $0x2e4] ss:$16 sps:$4 sm:$0xff]   ;;  %v3581_v47 = vadd.f32 %v14589_v42, %v14070_v58 }
 0x683   : > { %v7077_v39 = vadd.f32 %v6821_v38, %v3575_v41  ;;  %v14715_v59 = vpop.f32.mrb[239].mxu1  ;;  %v7329_v61 = vmax.f32 %v7073_v16, 0.0 }
 0x684   : > { %v7078_v28 = vadd.f32 %v6822_v48, %v3577_v4  ;;  %v6550_v15 = vpop.f32.mrb[220].mxu0  ;;  %v7330_v63 = vmax.f32 %v7074_v0, 0.0  ;;  %v3583_v4 = vadd.f32 %v14595_v18, %v14074_v35  ;;  %v3587_v18 = vadd.f32 %v14603_v24, %v14074_v35 }
 0x685   : > { %v7333_v32 = vmax.f32 %v7077_v39, 0.0  ;;  %v9337_v25 = vadd.f32 %v6550_v15, %v14064_v8  ;;  %5480 = vmatmul.mubr.bf16.gmra.mrb[88].mxu1 %v10956_v54  ;;  %v6552_v34 = vpop.f32.mrb[221].mxu0  ;;  %v3585_v15 = vadd.f32 %v14600_v19, %v14070_v58 }
 0x686   : > { %v7334_v57 = vmax.f32 %v7078_v28, 0.0  ;;  %v9338_v2 = vadd.f32 %v6552_v34, %v14068_v33  ;;  %v6554_v26 = vpop.f32.mrb[222].mxu0  ;;  %5489 = vmatprep.mubr.bf16.mxu1 %v10957_v45 }
 0x687   : > { %v14723_v10 = vpack.c.bf16 %v7333_v32, %v7329_v61  ;;  %v6825_v41 = vmax.f32 %v9337_v25, 0.0  ;;  %v9339_v16 = vadd.f32 %v6554_v26, %v14064_v8  ;;  %v6556_v38 = vpop.f32.mrb[223].mxu0 }
 0x688   : > { %v6826_v48 = vmax.f32 %v9338_v2, 0.0  ;;  %v9340_v0 = vadd.f32 %v6556_v38, %v14068_v33  ;;  %v14729_v39 = vpop.f32.mrb[240].mxu1  ;;  %v14731_v28 = vpack.c.bf16 %v7334_v57, %v7330_v63 }
 0x689   : > { %v7081_v42 = vadd.f32 %v6825_v41, %v3581_v47  ;;  %v6829_v61 = vmax.f32 %v9339_v16, 0.0  ;;  %v14735_v32 = vpop.f32.mrb[241].mxu1  ;;  %8264 = vmatmul.mubr.bf16.gmra.mrb[72].mxu0 %v14611_v7  ;;  %v10958_v7 = vld [vmem:[%s11868_s29 + $0x2e0] ss:$16 sps:$4 sm:$0xff]  }
 0x68a   : > { %v7082_v25 = vadd.f32 %v6826_v48, %v3583_v4  ;;  %v6830_v54 = vmax.f32 %v9340_v0, 0.0  ;;  %v14740_v34 = vpop.f32.mrb[242].mxu1  ;;  %8271 = vmatprep.mubr.bf16.mxu0 %v14647_v17  ;;  %v10959_v48 = vld [vmem:[%s11868_s29 + $0x304] ss:$16 sps:$4 sm:$0xff]   ;;  %v3591_v17 = vadd.f32 %v14617_v3, %v14070_v58 }
 0x68b   : > { %v7085_v63 = vadd.f32 %v6829_v61, %v3585_v15  ;;  %v14743_v57 = vpop.f32.mrb[243].mxu1  ;;  %v7337_v26 = vmax.f32 %v7081_v42, 0.0 }
 0x68c   : > { %v7086_v19 = vadd.f32 %v6830_v54, %v3587_v18  ;;  %v6560_v2 = vpop.f32.mrb[224].mxu0  ;;  %v7338_v24 = vmax.f32 %v7082_v25, 0.0  ;;  %v3593_v18 = vadd.f32 %v14623_v6, %v14074_v35  ;;  %v3597_v6 = vadd.f32 %v14631_v20, %v14074_v35 }
 0x68d   : > { %v7341_v45 = vmax.f32 %v7085_v63, 0.0  ;;  %v9341_v47 = vadd.f32 %v6560_v2, %v14064_v8  ;;  %5490 = vmatmul.mubr.bf16.gmra.mrb[92].mxu1 %v10958_v7  ;;  %v6562_v41 = vpop.f32.mrb[225].mxu0  ;;  %v3595_v2 = vadd.f32 %v14628_v1, %v14070_v58 }
 0x68e   : > { %v7342_v16 = vmax.f32 %v7086_v19, 0.0  ;;  %v9342_v38 = vadd.f32 %v6562_v41, %v14068_v33  ;;  %v6564_v4 = vpop.f32.mrb[226].mxu0  ;;  %5499 = vmatprep.mubr.bf16.mxu1 %v10959_v48 }
 0x68f   : > { %v14751_v0 = vpack.c.bf16 %v7341_v45, %v7337_v26  ;;  %v6833_v15 = vmax.f32 %v9341_v47, 0.0  ;;  %v9343_v42 = vadd.f32 %v6564_v4, %v14064_v8  ;;  %v6566_v61 = vpop.f32.mrb[227].mxu0 }
 0x690   : > { %v6834_v54 = vmax.f32 %v9342_v38, 0.0  ;;  %v9344_v25 = vadd.f32 %v6566_v61, %v14068_v33  ;;  %v14757_v63 = vpop.f32.mrb[244].mxu1  ;;  %v14759_v19 = vpack.c.bf16 %v7342_v16, %v7338_v24 }
 0x691   : > { %v7089_v3 = vadd.f32 %v6833_v15, %v3591_v17  ;;  %v6837_v26 = vmax.f32 %v9343_v42, 0.0  ;;  %v14763_v45 = vpop.f32.mrb[245].mxu1  ;;  %8272 = vmatmul.mubr.bf16.gmra.mrb[76].mxu0 %v14639_v46  ;;  %v10960_v46 = vld [vmem:[%s11868_s29 + $0x300] ss:$16 sps:$4 sm:$0xff]  }
 0x692   : > { %v7090_v47 = vadd.f32 %v6834_v54, %v3593_v18  ;;  %v6838_v7 = vmax.f32 %v9344_v25, 0.0  ;;  %v14768_v41 = vpop.f32.mrb[246].mxu1  ;;  %8279 = vmatprep.mubr.bf16.mxu0 %v14675_v27  ;;  %v10961_v54 = vld [vmem:[%s11868_s29 + $0x324] ss:$16 sps:$4 sm:$0xff]   ;;  %v3601_v27 = vadd.f32 %v14645_v60, %v14070_v58 }
 0x693   : > { %v7093_v24 = vadd.f32 %v6837_v26, %v3595_v2  ;;  %v14771_v16 = vpop.f32.mrb[247].mxu1  ;;  %v7345_v4 = vmax.f32 %v7089_v3, 0.0 }
 0x694   : > { %v7094_v1 = vadd.f32 %v6838_v7, %v3597_v6  ;;  %v6570_v38 = vpop.f32.mrb[228].mxu0  ;;  %v7346_v20 = vmax.f32 %v7090_v47, 0.0  ;;  %v3603_v6 = vadd.f32 %v14651_v36, %v14074_v35  ;;  %v3607_v36 = vadd.f32 %v14659_v5, %v14074_v35 }
 0x695   : > { %v7349_v48 = vmax.f32 %v7093_v24, 0.0  ;;  %v9345_v17 = vadd.f32 %v6570_v38, %v14064_v8  ;;  %5500 = vmatmul.mubr.bf16.gmra.mrb[96].mxu1 %v10960_v46  ;;  %v6572_v15 = vpop.f32.mrb[229].mxu0  ;;  %v3605_v38 = vadd.f32 %v14656_v40, %v14070_v58 }
 0x696   : > { %v7350_v42 = vmax.f32 %v7094_v1, 0.0  ;;  %v9346_v61 = vadd.f32 %v6572_v15, %v14068_v33  ;;  %v6574_v18 = vpop.f32.mrb[230].mxu0  ;;  %5509 = vmatprep.mubr.bf16.mxu1 %v10961_v54 }
 0x697   : > { %v14779_v25 = vpack.c.bf16 %v7349_v48, %v7345_v4  ;;  %v6841_v2 = vmax.f32 %v9345_v17, 0.0  ;;  %v9347_v3 = vadd.f32 %v6574_v18, %v14064_v8  ;;  %v6576_v26 = vpop.f32.mrb[231].mxu0 }
 0x698   : > { %v6842_v7 = vmax.f32 %v9346_v61, 0.0  ;;  %v9348_v47 = vadd.f32 %v6576_v26, %v14068_v33  ;;  %v14785_v24 = vpop.f32.mrb[248].mxu1  ;;  %v14787_v1 = vpack.c.bf16 %v7350_v42, %v7346_v20 }
 0x699   : > { %v7097_v60 = vadd.f32 %v6841_v2, %v3601_v27  ;;  %v6845_v4 = vmax.f32 %v9347_v3, 0.0  ;;  %v14791_v48 = vpop.f32.mrb[249].mxu1  ;;  %8280 = vmatmul.mubr.bf16.gmra.mrb[80].mxu0 %v14667_v56  ;;  %v10962_v56 = vld [vmem:[%s11868_s29 + $0x320] ss:$16 sps:$4 sm:$0xff]  }
 0x69a   : > { %v7098_v17 = vadd.f32 %v6842_v7, %v3603_v6  ;;  %v6846_v46 = vmax.f32 %v9348_v47, 0.0  ;;  %v14796_v15 = vpop.f32.mrb[250].mxu1  ;;  %8287 = vmatprep.mubr.bf16.mxu0 %v14703_v53  ;;  %v10963_v7 = vld [vmem:[%s11868_s29 + $0x344] ss:$16 sps:$4 sm:$0xff]   ;;  %v3611_v53 = vadd.f32 %v14673_v62, %v14070_v58 }
 0x69b   : > { %v7101_v20 = vadd.f32 %v6845_v4, %v3605_v38  ;;  %v14799_v42 = vpop.f32.mrb[251].mxu1  ;;  %v7353_v18 = vmax.f32 %v7097_v60, 0.0 }
 0x69c   : > { %v7102_v40 = vadd.f32 %v6846_v46, %v3607_v36  ;;  %v6580_v61 = vpop.f32.mrb[232].mxu0  ;;  %v7354_v5 = vmax.f32 %v7098_v17, 0.0  ;;  %v3613_v36 = vadd.f32 %v14679_v11, %v14074_v35  ;;  %v3617_v11 = vadd.f32 %v14687_v14, %v14074_v35 }
 0x69d   : > { %v7357_v54 = vmax.f32 %v7101_v20, 0.0  ;;  %v9349_v27 = vadd.f32 %v6580_v61, %v14064_v8  ;;  %5510 = vmatmul.mubr.bf16.gmra.mrb[100].mxu1 %v10962_v56  ;;  %v6582_v2 = vpop.f32.mrb[233].mxu0  ;;  %v3615_v61 = vadd.f32 %v14684_v52, %v14070_v58 }
 0x69e   : > { %v7358_v3 = vmax.f32 %v7102_v40, 0.0  ;;  %v9350_v26 = vadd.f32 %v6582_v2, %v14068_v33  ;;  %v6584_v6 = vpop.f32.mrb[234].mxu0  ;;  %5519 = vmatprep.mubr.bf16.mxu1 %v10963_v7 }
 0x69f   : > { %v14807_v47 = vpack.c.bf16 %v7357_v54, %v7353_v18  ;;  %v6849_v38 = vmax.f32 %v9349_v27, 0.0  ;;  %v9351_v60 = vadd.f32 %v6584_v6, %v14064_v8  ;;  %v6586_v4 = vpop.f32.mrb[235].mxu0 }
 0x6a0   : > { %v6850_v46 = vmax.f32 %v9350_v26, 0.0  ;;  %v9352_v17 = vadd.f32 %v6586_v4, %v14068_v33  ;;  %v14813_v20 = vpop.f32.mrb[252].mxu1  ;;  %v14815_v40 = vpack.c.bf16 %v7358_v3, %v7354_v5 }
 0x6a1   : > { %v7105_v62 = vadd.f32 %v6849_v38, %v3611_v53  ;;  %v6853_v18 = vmax.f32 %v9351_v60, 0.0  ;;  %v14819_v54 = vpop.f32.mrb[253].mxu1  ;;  %8288 = vmatmul.mubr.bf16.gmra.mrb[84].mxu0 %v14695_v37  ;;  %v10964_v37 = vld [vmem:[%s11868_s29 + $0x340] ss:$16 sps:$4 sm:$0xff]  }
 0x6a2   : > { %v7106_v27 = vadd.f32 %v6850_v46, %v3613_v36  ;;  %v6854_v56 = vmax.f32 %v9352_v17, 0.0  ;;  %v14824_v2 = vpop.f32.mrb[254].mxu1  ;;  %8295 = vmatprep.mubr.bf16.mxu0 %v14731_v28  ;;  %v10965_v46 = vld [vmem:[%s11868_s29 + $0x364] ss:$16 sps:$4 sm:$0xff]   ;;  %v3621_v28 = vadd.f32 %v14701_v44, %v14070_v58 }
 0x6a3   : > { %v7109_v5 = vadd.f32 %v6853_v18, %v3615_v61  ;;  %v14827_v3 = vpop.f32.mrb[255].mxu1  ;;  %v7361_v6 = vmax.f32 %v7105_v62, 0.0 }
 0x6a4   : > { %v7110_v52 = vadd.f32 %v6854_v56, %v3617_v11  ;;  %v6590_v26 = vpop.f32.mrb[236].mxu0  ;;  %v7362_v14 = vmax.f32 %v7106_v27, 0.0  ;;  %v3623_v11 = vadd.f32 %v14707_v30, %v14074_v35 }
 0x6a5   : > { %v7365_v7 = vmax.f32 %v7109_v5, 0.0  ;;  %v9353_v53 = vadd.f32 %v6590_v26, %v14064_v8  ;;  %5520 = vmatmul.mubr.bf16.gmra.mrb[104].mxu1 %v10964_v37  ;;  %v6592_v38 = vpop.f32.mrb[237].mxu0 }
 0x6a6   : > { %v7366_v60 = vmax.f32 %v7110_v52, 0.0  ;;  %v9354_v4 = vadd.f32 %v6592_v38, %v14068_v33  ;;  %v6594_v36 = vpop.f32.mrb[238].mxu0  ;;  %5529 = vmatprep.mubr.bf16.mxu1 %v10965_v46  ;;  %v3625_v52 = vadd.f32 %v14712_v55, %v14070_v58  ;;  %v10966_v55 = vld [vmem:[%s11868_s29 + $0x360] ss:$16 sps:$4 sm:$0xff]  }
 0x6a7   : > { %v14835_v17 = vpack.c.bf16 %v7365_v7, %v7361_v6  ;;  %v6857_v61 = vmax.f32 %v9353_v53, 0.0  ;;  %v9355_v62 = vadd.f32 %v6594_v36, %v14064_v8  ;;  %v6596_v18 = vpop.f32.mrb[239].mxu0  ;;  %v3627_v6 = vadd.f32 %v14715_v59, %v14074_v35 }
 0x6a8   : > { %v6858_v56 = vmax.f32 %v9354_v4, 0.0  ;;  %v9356_v27 = vadd.f32 %v6596_v18, %v14068_v33  ;;  %v14841_v5 = vpack.c.bf16 %v7366_v60, %v7362_v14 }
 0x6a9   : > { %v7113_v26 = vadd.f32 %v6857_v61, %v3621_v28  ;;  %v6861_v44 = vmax.f32 %v9355_v62, 0.0  ;;  %8296 = vmatmul.mubr.bf16.gmra.mrb[88].mxu0 %v14723_v10  ;;  %v10967_v61 = vld [vmem:[%s11868_s29 + $0x384] ss:$16 sps:$4 sm:$0xff]  }
 0x6aa   : > { %v7114_v7 = vadd.f32 %v6858_v56, %v3623_v11  ;;  %v6862_v53 = vmax.f32 %v9356_v27, 0.0  ;;  %8303 = vmatprep.mubr.bf16.mxu0 %v14759_v19  ;;  %v3631_v19 = vadd.f32 %v14729_v39, %v14070_v58  ;;  %v3633_v27 = vadd.f32 %v14735_v32, %v14074_v35 }
 0x6ab   : > { %v7117_v30 = vadd.f32 %v6861_v44, %v3625_v52  ;;  %v7369_v14 = vmax.f32 %v7113_v26, 0.0 }
 0x6ac   : > { %v7118_v37 = vadd.f32 %v6862_v53, %v3627_v6  ;;  %v6600_v38 = vpop.f32.mrb[240].mxu0  ;;  %v7370_v46 = vmax.f32 %v7114_v7, 0.0  ;;  %v3635_v6 = vadd.f32 %v14740_v34, %v14070_v58  ;;  %v3637_v53 = vadd.f32 %v14743_v57, %v14074_v35  ;;  %v10968_v34 = vld [vmem:[%s11868_s29 + $0x380] ss:$16 sps:$4 sm:$0xff]  }
 0x6ad   : > { %v7373_v60 = vmax.f32 %v7117_v30, 0.0  ;;  %v9357_v4 = vadd.f32 %v6600_v38, %v14064_v8  ;;  %5530 = vmatmul.mubr.bf16.gmra.mrb[108].mxu1 %v10966_v55  ;;  %v6602_v36 = vpop.f32.mrb[241].mxu0 }
 0x6ae   : > { %v7374_v10 = vmax.f32 %v7118_v37, 0.0  ;;  %v9358_v28 = vadd.f32 %v6602_v36, %v14068_v33  ;;  %v6604_v59 = vpop.f32.mrb[242].mxu0  ;;  %5539 = vmatprep.mubr.bf16.mxu1 %v10967_v61 }
 0x6af   : > { %v14855_v62 = vpack.c.bf16 %v7373_v60, %v7369_v14  ;;  %v6865_v18 = vmax.f32 %v9357_v4, 0.0  ;;  %v9359_v11 = vadd.f32 %v6604_v59, %v14064_v8  ;;  %v6606_v56 = vpop.f32.mrb[243].mxu0 }
 0x6b0   : > { %v6866_v52 = vmax.f32 %v9358_v28, 0.0  ;;  %v9360_v26 = vadd.f32 %v6606_v56, %v14068_v33  ;;  %v14861_v44 = vpack.c.bf16 %v7374_v10, %v7370_v46  ;;  %v10969_v28 = vld [vmem:[%s11868_s29 + $0x3a4] ss:$16 sps:$4 sm:$0xff]  }
 0x6b1   : > { %v7121_v7 = vadd.f32 %v6865_v18, %v3631_v19  ;;  %v6869_v39 = vmax.f32 %v9359_v11, 0.0  ;;  %8304 = vmatmul.mubr.bf16.gmra.mrb[92].mxu0 %v14751_v0  ;;  %v3643_v11 = vadd.f32 %v14763_v45, %v14074_v35 }
 0x6b2   : > { %v7122_v30 = vadd.f32 %v6866_v52, %v3633_v27  ;;  %v6870_v37 = vmax.f32 %v9360_v26, 0.0  ;;  %8311 = vmatprep.mubr.bf16.mxu0 %v14787_v1  ;;  %v3641_v1 = vadd.f32 %v14757_v63, %v14070_v58  ;;  %v3645_v26 = vadd.f32 %v14768_v41, %v14070_v58  ;;  %v10970_v41 = vld [vmem:[%s11868_s29 + $0x3a0] ss:$16 sps:$4 sm:$0xff]  }
 0x6b3   : > { %v7125_v32 = vadd.f32 %v6869_v39, %v3635_v6  ;;  %v7377_v60 = vmax.f32 %v7121_v7, 0.0  ;;  %v3647_v7 = vadd.f32 %v14771_v16, %v14074_v35 }
 0x6b4   : > { %v7126_v38 = vadd.f32 %v6870_v37, %v3637_v53  ;;  %v6610_v14 = vpop.f32.mrb[244].mxu0  ;;  %v7378_v46 = vmax.f32 %v7122_v30, 0.0 }
 0x6b5   : > { %v7381_v4 = vmax.f32 %v7125_v32, 0.0  ;;  %v9361_v55 = vadd.f32 %v6610_v14, %v14064_v8  ;;  %5540 = vmatmul.mubr.bf16.gmra.mrb[112].mxu1 %v10968_v34  ;;  %v6612_v36 = vpop.f32.mrb[245].mxu0  ;;  %v10971_v34 = vld [vmem:[%s11868_s29 + $0x3c4] ss:$16 sps:$4 sm:$0xff]  }
 0x6b6   : > { %v7382_v0 = vmax.f32 %v7126_v38, 0.0  ;;  %v9362_v10 = vadd.f32 %v6612_v36, %v14068_v33  ;;  %v6614_v57 = vpop.f32.mrb[246].mxu0  ;;  %5549 = vmatprep.mubr.bf16.mxu1 %v10969_v28 }
 0x6b7   : > { %v14875_v59 = vpack.c.bf16 %v7381_v4, %v7377_v60  ;;  %v6873_v61 = vmax.f32 %v9361_v55, 0.0  ;;  %v9363_v19 = vadd.f32 %v6614_v57, %v14064_v8  ;;  %v6616_v18 = vpop.f32.mrb[247].mxu0  ;;  %v3653_v57 = vadd.f32 %v14791_v48, %v14074_v35 }
 0x6b8   : > { %v6874_v56 = vmax.f32 %v9362_v10, 0.0  ;;  %v9364_v27 = vadd.f32 %v6616_v18, %v14068_v33  ;;  %v14881_v52 = vpack.c.bf16 %v7382_v0, %v7378_v46  ;;  %v3655_v18 = vadd.f32 %v14796_v15, %v14070_v58 }
 0x6b9   : > { %v7129_v6 = vadd.f32 %v6873_v61, %v3641_v1  ;;  %v6877_v63 = vmax.f32 %v9363_v19, 0.0  ;;  %8312 = vmatmul.mubr.bf16.gmra.mrb[96].mxu0 %v14779_v25 }
 0x6ba   : > { %v7130_v39 = vadd.f32 %v6874_v56, %v3643_v11  ;;  %v6878_v53 = vmax.f32 %v9364_v27, 0.0  ;;  %8319 = vmatprep.mubr.bf16.mxu0 %v14815_v40  ;;  %v3651_v40 = vadd.f32 %v14785_v24, %v14070_v58  ;;  %v3657_v56 = vadd.f32 %v14799_v42, %v14074_v35  ;;  %v10973_v42 = vld [vmem:[%s11868_s29 + $0x3e4] ss:$16 sps:$4 sm:$0xff]  }
 0x6bb   : > { %v7133_v45 = vadd.f32 %v6877_v63, %v3645_v26  ;;  %v7385_v32 = vmax.f32 %v7129_v6, 0.0 }
 0x6bc   : > { %v7134_v30 = vadd.f32 %v6878_v53, %v3647_v7  ;;  %v6620_v37 = vpop.f32.mrb[248].mxu0  ;;  %v7386_v4 = vmax.f32 %v7130_v39, 0.0  ;;  %v10972_v53 = vld [vmem:[%s11868_s29 + $0x3c0] ss:$16 sps:$4 sm:$0xff]  }
 0x6bd   : > { %v7389_v38 = vmax.f32 %v7133_v45, 0.0  ;;  %v9365_v14 = vadd.f32 %v6620_v37, %v14064_v8  ;;  %5550 = vmatmul.mubr.bf16.gmra.mrb[116].mxu1 %v10970_v41  ;;  %v6622_v60 = vpop.f32.mrb[249].mxu0 }
 0x6be   : > { %v7390_v25 = vmax.f32 %v7134_v30, 0.0  ;;  %v9366_v55 = vadd.f32 %v6622_v60, %v14068_v33  ;;  %v6624_v16 = vpop.f32.mrb[250].mxu0  ;;  %5559 = vmatprep.mubr.bf16.mxu1 %v10971_v34  ;;  %v3663_v60 = vadd.f32 %v14819_v54, %v14074_v35  ;;  %v3665_v34 = vadd.f32 %v14824_v2, %v14070_v58 }
 0x6bf   : > { %v14893_v36 = vpack.c.bf16 %v7389_v38, %v7385_v32  ;;  %v6881_v46 = vmax.f32 %v9365_v14, 0.0  ;;  %v9367_v0 = vadd.f32 %v6624_v16, %v14064_v8  ;;  %v6626_v10 = vpop.f32.mrb[251].mxu0 }
 0x6c0   : > { %v6882_v28 = vmax.f32 %v9366_v55, 0.0  ;;  %v9368_v1 = vadd.f32 %v6626_v10, %v14068_v33  ;;  %v14901_v61 = vpack.c.bf16 %v7390_v25, %v7386_v4 }
 0x6c1   : > { %v7137_v19 = vadd.f32 %v6881_v46, %v3651_v40  ;;  %v6885_v11 = vmax.f32 %v9367_v0, 0.0  ;;  %8320 = vmatmul.mubr.bf16.gmra.mrb[100].mxu0 %v14807_v47 }
 0x6c2   : > { %v7138_v24 = vadd.f32 %v6882_v28, %v3653_v57  ;;  %v6886_v27 = vmax.f32 %v9368_v1, 0.0  ;;  %8327 = vmatprep.mubr.bf16.mxu0 %v14841_v5  ;;  %v3661_v5 = vadd.f32 %v14813_v20, %v14070_v58  ;;  %v10974_v28 = vld [vmem:[%s11868_s29 + $0x3e0] ss:$16 sps:$4 sm:$0xff]  }
 0x6c3   : > { %v7141_v48 = vadd.f32 %v6885_v11, %v3655_v18  ;;  %v7393_v63 = vmax.f32 %v7137_v19, 0.0  ;;  %v10975_v19 = vld [vmem:[%s11868_s29 + $0xc] ss:$16 sps:$4 sm:$0xff]  }
 0x6c4   : > { %v7142_v26 = vadd.f32 %v6886_v27, %v3657_v56  ;;  %v6630_v6 = vpop.f32.mrb[252].mxu0  ;;  %v7394_v45 = vmax.f32 %v7138_v24, 0.0  ;;  %v10510_v18 = vld [vmem:[#allocation16] sm:$0xff]  }
 0x6c5   : > { %v7397_v7 = vmax.f32 %v7141_v48, 0.0  ;;  %v9369_v39 = vadd.f32 %v6630_v6, %v14064_v8  ;;  %5560 = vmatmul.mubr.bf16.gmra.mrb[120].mxu1 %v10972_v53  ;;  %v6632_v15 = vpop.f32.mrb[253].mxu0  ;;  %v10976_v24 = vld [vmem:[%s11868_s29 + $0x8] ss:$16 sps:$4 sm:$0xff]   ;;  %v10977_v48 = vld [vmem:[%s11868_s29 + $0x2c] ss:$16 sps:$4 sm:$0xff]  }
 0x6c6   : > { %v7398_v47 = vmax.f32 %v7142_v26, 0.0  ;;  %v9370_v30 = vadd.f32 %v6632_v15, %v14068_v33  ;;  %v6634_v37 = vpop.f32.mrb[254].mxu0  ;;  %5569 = vmatprep.mubr.bf16.mxu1 %v10973_v42  ;;  %v10511_v26 = vld [vmem:[#allocation16 + $0x8] sm:$0xff]   ;;  %v10979_v53 = vld [vmem:[%s11868_s29 + $0x4c] ss:$16 sps:$4 sm:$0xff]   ;;  %v10513_v15 = vld [vmem:[#allocation16 + $0x18] sm:$0xff]  }
 0x6c7   : > { %v14913_v32 = vpack.c.bf16 %v7397_v7, %v7393_v63  ;;  %v6889_v38 = vmax.f32 %v9369_v39, 0.0  ;;  %v9371_v14 = vadd.f32 %v6634_v37, %v14064_v8  ;;  %v6636_v41 = vpop.f32.mrb[255].mxu0  ;;  %v3667_v8 = vadd.f32 %v14827_v3, %v14074_v35  ;;  %v10978_v63 = vld [vmem:[%s11868_s29 + $0x28] ss:$16 sps:$4 sm:$0xff]   ;;  %v10981_v42 = vld [vmem:[%s11868_s29 + $0x6c] ss:$16 sps:$4 sm:$0xff]  }
 0x6c8   : > { %v6890_v4 = vmax.f32 %v9370_v30, 0.0  ;;  %v9372_v25 = vadd.f32 %v6636_v41, %v14068_v33  ;;  %v14921_v55 = vpack.c.bf16 %v7398_v47, %v7394_v45  ;;  %v10980_v47 = vld [vmem:[%s11868_s29 + $0x48] ss:$16 sps:$4 sm:$0xff]  }
 0x6c9   : > { %v7145_v16 = vadd.f32 %v6889_v38, %v3661_v5  ;;  %v6893_v40 = vmax.f32 %v9371_v14, 0.0  ;;  %8328 = vmatmul.mubr.bf16.gmra.mrb[104].mxu0 %v14835_v17  ;;  %v10515_v5 = vld [vmem:[#allocation16 + $0x28] sm:$0xff]  }
 0x6ca   : > { %v7146_v20 = vadd.f32 %v6890_v4, %v3663_v60  ;;  %v6894_v46 = vmax.f32 %v9372_v25, 0.0  ;;  %8335 = vmatprep.mubr.bf16.mxu0 %v14861_v44  ;;  %v10982_v41 = vld [vmem:[%s11868_s29 + $0x68] ss:$16 sps:$4 sm:$0xff]   ;;  %v10983_v25 = vld [vmem:[%s11868_s29 + $0x8c] ss:$16 sps:$4 sm:$0xff]  }
 0x6cb   : > { %v7149_v54 = vadd.f32 %v6893_v40, %v3665_v34  ;;  %v7401_v10 = vmax.f32 %v7145_v16, 0.0  ;;  %v10517_v16 = vld [vmem:[#allocation16 + $0x38] sm:$0xff]   ;;  %v10518_v40 = vld [vmem:[#allocation16 + $0x40] sm:$0xff]  }
 0x6cc   : > { %v7150_v0 = vadd.f32 %v6894_v46, %v3667_v8  ;;  %v14929_v33 = vpop.f32.mrb[0].mxu0  ;;  %v7402_v2 = vmax.f32 %v7146_v20, 0.0  ;;  %v10984_v8 = vld [vmem:[%s11868_s29 + $0x88] ss:$16 sps:$4 sm:$0xff]  }
 0x6cd   : > { %v7405_v57 = vmax.f32 %v7149_v54, 0.0  ;;  %5570 = vmatmul.mubr.bf16.gmra.mrb[124].mxu1 %v10974_v28  ;;  %v8123_v58 = vpop.f32.mrb[1].mxu0  ;;  %v10520_v28 = vld [vmem:[#allocation16 + $0x50] sm:$0xff]  }
 0x6ce   : > { %v7406_v17 = vmax.f32 %v7150_v0, 0.0  ;;  %v14932_v1 = vpop.f32.mrb[2].mxu0  ;;  %5612 = vmatprep.mubr.bf16.mxu1 %v10975_v19  ;;  %v10985_v0 = vld [vmem:[%s11868_s29 + $0xac] ss:$16 sps:$4 sm:$0xff]  }
 0x6cf   : > { %v14935_v35 = vpack.c.bf16 %v7405_v57, %v7401_v10  ;;  %v8126_v3 = vpop.f32.mrb[3].mxu0  ;;  %v10519_v10 = vld [vmem:[#allocation16 + $0x48] sm:$0xff]  }
 0x6d0   : > { %v14937_v44 = vpack.c.bf16 %v7406_v17, %v7402_v2  ;;  %v10986_v2 = vld [vmem:[%s11868_s29 + $0xa8] ss:$16 sps:$4 sm:$0xff]   ;;  %v10987_v3 = vld [vmem:[%s11868_s29 + $0xcc] ss:$16 sps:$4 sm:$0xff]  }
 0x6d1   : > { %8336 = vmatmul.mubr.bf16.gmra.mrb[108].mxu0 %v14855_v62  ;;  %v10512_v62 = vld [vmem:[#allocation16 + $0x10] sm:$0xff]  }
 0x6d2   : > { %8343 = vmatprep.mubr.bf16.mxu0 %v14881_v52 }
 0x6d4   : > { %v14941_v11 = vpop.f32.mrb[4].mxu0 }
 0x6d5   : > { %5613 = vmatmul.mubr.bf16.vlgmr.msra.gmra.mrb[0].mxu1 %v10976_v24  ;;  %v8131_v56 = vpop.f32.mrb[5].mxu0 }
 0x6d6   : > { %7799 = vmatpush1.bf16.msra.mxu1 %v10510_v18  ;;  %v14944_v27 = vpop.f32.mrb[6].mxu0  ;;  %5622 = vmatprep.mubr.bf16.mxu1 %v10977_v48  ;;  %v10988_v56 = vld [vmem:[%s11868_s29 + $0xc8] ss:$16 sps:$4 sm:$0xff]  }
 0x6d7   : > { %v8134_v6 = vpop.f32.mrb[7].mxu0  ;;  %7800 = vmatprep.subr.bf16.mxu1 %v16413_v21 }
 0x6d9   : > { %8344 = vmatmul.mubr.bf16.gmra.mrb[112].mxu0 %v14875_v59 }
 0x6da   : > { %8351 = vmatprep.mubr.bf16.mxu0 %v14901_v61  ;;  %7801 = vmatpush1.bf16.msra.mxu1 %v10511_v26  ;;  %v10514_v61 = vld [vmem:[#allocation16 + $0x20] sm:$0xff]   ;;  %v10521_v26 = vld [vmem:[#allocation16 + $0x58] sm:$0xff]  }
 0x6db   : > { %7802 = vmatprep.subr.bf16.mxu1 %v16413_v21 }
 0x6dc   : > { %v14951_v52 = vpop.f32.mrb[8].mxu0 }
 0x6dd   : > { %5623 = vmatmul.mubr.bf16.gmra.mrb[4].mxu1 %v10978_v63  ;;  %v8139_v7 = vpop.f32.mrb[9].mxu0 }
 0x6de   : > { %v14954_v39 = vpop.f32.mrb[10].mxu0  ;;  %5632 = vmatprep.mubr.bf16.mxu1 %v10979_v53  ;;  %7803 = vmatpush1.bf16.msra.mxu1 %v10512_v62  ;;  %v10989_v62 = vld [vmem:[%s11868_s29 + $0xec] ss:$16 sps:$4 sm:$0xff]   ;;  %v10990_v53 = vld [vmem:[%s11868_s29 + $0xe8] ss:$16 sps:$4 sm:$0xff]  }
 0x6df   : > { %v8142_v59 = vpop.f32.mrb[11].mxu0  ;;  %7804 = vmatprep.subr.bf16.mxu1 %v16413_v21 }
 0x6e1   : > { %8352 = vmatmul.mubr.bf16.gmra.mrb[116].mxu0 %v14893_v36  ;;  %v10516_v36 = vld [vmem:[#allocation16 + $0x30] sm:$0xff]  }
 0x6e2   : > { %7805 = vmatpush1.bf16.msra.mxu1 %v10513_v15 }
 0x6e3   : > { %7806 = vmatprep.subr.bf16.mxu1 %v16413_v21 }
 0x6e4   : > { %v14960_v45 = vpop.f32.mrb[12].mxu0 }
 0x6e5   : > { %5633 = vmatmul.mubr.bf16.gmra.mrb[8].mxu1 %v10980_v47  ;;  %v8147_v30 = vpop.f32.mrb[13].mxu0 }
 0x6e6   : > { %v14963_v37 = vpop.f32.mrb[14].mxu0  ;;  %5642 = vmatprep.mubr.bf16.mxu1 %v10981_v42  ;;  %7807 = vmatpush1.bf16.msra.mxu1 %v10514_v61  ;;  %v10991_v61 = vld [vmem:[%s11868_s29 + $0x10c] ss:$16 sps:$4 sm:$0xff]   ;;  %v10992_v42 = vld [vmem:[%s11868_s29 + $0x108] ss:$16 sps:$4 sm:$0xff]  }
 0x6e7   : > { %v8150_v38 = vpop.f32.mrb[15].mxu0  ;;  %7808 = vmatprep.subr.bf16.mxu1 %v16413_v21 }
 0x6e8   : > { %v10522_v38 = vld [vmem:[#allocation16 + $0x60] sm:$0xff]  }
 0x6ea   : > { %7809 = vmatpush1.bf16.msra.mxu1 %v10515_v5 }
 0x6eb   : > { %7810 = vmatprep.subr.bf16.mxu1 %v16413_v21 }
 0x6ec   : > { %v14968_v14 = vpop.f32.mrb[16].mxu0 }
 0x6ed   : > { %5643 = vmatmul.mubr.bf16.gmra.mrb[12].mxu1 %v10982_v41  ;;  %v8155_v60 = vpop.f32.mrb[17].mxu0  ;;  %v10993_v41 = vld [vmem:[%s11868_s29 + $0x12c] ss:$16 sps:$4 sm:$0xff]  }
 0x6ee   : > { %v14971_v4 = vpop.f32.mrb[18].mxu0  ;;  %5652 = vmatprep.mubr.bf16.mxu1 %v10983_v25  ;;  %7811 = vmatpush1.bf16.msra.mxu1 %v10516_v36 }
 0x6ef   : > { %v8158_v34 = vpop.f32.mrb[19].mxu0  ;;  %7812 = vmatprep.subr.bf16.mxu1 %v16413_v21 }
 0x6f2   : > { %7813 = vmatpush1.bf16.msra.mxu1 %v10517_v16  ;;  %v10994_v16 = vld [vmem:[%s11868_s29 + $0x128] ss:$16 sps:$4 sm:$0xff]  }
 0x6f3   : > { %7814 = vmatprep.subr.bf16.mxu1 %v16413_v21 }
 0x6f4   : > { %v14976_v20 = vpop.f32.mrb[20].mxu0 }
 0x6f5   : > { %5653 = vmatmul.mubr.bf16.gmra.mrb[16].mxu1 %v10984_v8  ;;  %v8163_v46 = vpop.f32.mrb[21].mxu0  ;;  %v10995_v8 = vld [vmem:[%s11868_s29 + $0x14c] ss:$16 sps:$4 sm:$0xff]  }
 0x6f6   : > { %v14979_v54 = vpop.f32.mrb[22].mxu0  ;;  %5662 = vmatprep.mubr.bf16.mxu1 %v10985_v0  ;;  %7815 = vmatpush1.bf16.msra.mxu1 %v10518_v40 }
 0x6f7   : > { %v8166_v57 = vpop.f32.mrb[23].mxu0  ;;  %7816 = vmatprep.subr.bf16.mxu1 %v16413_v21 }
 0x6fa   : > { %7817 = vmatpush1.bf16.msra.mxu1 %v10519_v10  ;;  %v10996_v10 = vld [vmem:[%s11868_s29 + $0x148] ss:$16 sps:$4 sm:$0xff]  }
 0x6fb   : > { %7818 = vmatprep.subr.bf16.mxu1 %v16413_v21 }
 0x6fc   : > { %v14984_v58 = vpop.f32.mrb[24].mxu0 }
 0x6fd   : > { %5663 = vmatmul.mubr.bf16.gmra.mrb[20].mxu1 %v10986_v2  ;;  %v8171_v17 = vpop.f32.mrb[25].mxu0 }
 0x6fe   : > { %v14987_v19 = vpop.f32.mrb[26].mxu0  ;;  %5672 = vmatprep.mubr.bf16.mxu1 %v10987_v3  ;;  %7819 = vmatpush1.bf16.msra.mxu1 %v10520_v28  ;;  %v10523_v28 = vld [vmem:[#allocation16 + $0x68] sm:$0xff]   ;;  %v10997_v17 = vld [vmem:[%s11868_s29 + $0x16c] ss:$16 sps:$4 sm:$0xff]  }
 0x6ff   : > { %v8174_v18 = vpop.f32.mrb[27].mxu0  ;;  %7820 = vmatprep.subr.bf16.mxu1 %v16413_v21 }
 0x702   : > { %7821 = vmatpush1.bf16.msra.mxu1 %v10521_v26 }
 0x703   : > { %7822 = vmatprep.subr.bf16.mxu1 %v16413_v21 }
 0x704   : > { %v14991_v24 = vpop.f32.mrb[28].mxu0 }
 0x705   : > { %5673 = vmatmul.mubr.bf16.gmra.mrb[24].mxu1 %v10988_v56  ;;  %v8179_v48 = vpop.f32.mrb[29].mxu0  ;;  %v10998_v56 = vld [vmem:[%s11868_s29 + $0x168] ss:$16 sps:$4 sm:$0xff]  }
 0x706   : > { %v14994_v6 = vpop.f32.mrb[30].mxu0  ;;  %5682 = vmatprep.mubr.bf16.mxu1 %v10989_v62  ;;  %7823 = vmatpush1.bf16.msra.mxu1 %v10522_v38  ;;  %v10999_v62 = vld [vmem:[%s11868_s29 + $0x18c] ss:$16 sps:$4 sm:$0xff]  }
 0x707   : > { %v8182_v63 = vpop.f32.mrb[31].mxu0  ;;  %7824 = vmatprep.subr.bf16.mxu1 %v16413_v21  ;;  %v10524_v38 = vld [vmem:[#allocation16 + $0x70] sm:$0xff]  }
 0x70a   : > { %7825 = vmatpush1.bf16.msra.mxu1 %v10523_v28 }
 0x70b   : > { %7826 = vmatprep.subr.bf16.mxu1 %v16413_v21 }
 0x70c   : > { %v14998_v7 = vpop.f32.mrb[32].mxu0 }
 0x70d   : > { %5683 = vmatmul.mubr.bf16.gmra.mrb[28].mxu1 %v10990_v53  ;;  %v8187_v15 = vpop.f32.mrb[33].mxu0 }
 0x70e   : > { %v15001_v59 = vpop.f32.mrb[34].mxu0  ;;  %5692 = vmatprep.mubr.bf16.mxu1 %v10991_v61  ;;  %v11000_v15 = vld [vmem:[%s11868_s29 + $0x188] ss:$16 sps:$4 sm:$0xff]   ;;  %7827 = vmatpush1.bf16.msra.mxu1 %v10524_v38 }
 0x70f   : > { %v8190_v47 = vpop.f32.mrb[35].mxu0  ;;  %7828 = vmatprep.subr.bf16.mxu1 %v16413_v21 }
 0x714   : > { %v15004_v30 = vpop.f32.mrb[36].mxu0 }
 0x715   : > { %5693 = vmatmul.mubr.bf16.gmra.mrb[32].mxu1 %v10992_v42  ;;  %v8195_v5 = vpop.f32.mrb[37].mxu0  ;;  %v11001_v42 = vld [vmem:[%s11868_s29 + $0x1ac] ss:$16 sps:$4 sm:$0xff]  }
 0x716   : > { %v15007_v36 = vpop.f32.mrb[38].mxu0  ;;  %5702 = vmatprep.mubr.bf16.mxu1 %v10993_v41 }
 0x717   : > { %v8198_v60 = vpop.f32.mrb[39].mxu0 }
 0x718   : > { %v11002_v60 = vld [vmem:[%s11868_s29 + $0x1a8] ss:$16 sps:$4 sm:$0xff]  }
 0x71c   : > { %v15011_v25 = vpop.f32.mrb[40].mxu0 }
 0x71d   : > { %5703 = vmatmul.mubr.bf16.gmra.mrb[36].mxu1 %v10994_v16  ;;  %v8203_v34 = vpop.f32.mrb[41].mxu0 }
 0x71e   : > { %v15014_v40 = vpop.f32.mrb[42].mxu0  ;;  %5712 = vmatprep.mubr.bf16.mxu1 %v10995_v8  ;;  %v11003_v8 = vld [vmem:[%s11868_s29 + $0x1cc] ss:$16 sps:$4 sm:$0xff]  }
 0x71f   : > { %v8206_v46 = vpop.f32.mrb[43].mxu0 }
 0x724   : > { %v15017_v0 = vpop.f32.mrb[44].mxu0 }
 0x725   : > { %5713 = vmatmul.mubr.bf16.gmra.mrb[40].mxu1 %v10996_v10  ;;  %v8211_v57 = vpop.f32.mrb[45].mxu0 }
 0x726   : > { %v15020_v2 = vpop.f32.mrb[46].mxu0  ;;  %5722 = vmatprep.mubr.bf16.mxu1 %v10997_v17  ;;  %v11004_v57 = vld [vmem:[%s11868_s29 + $0x1c8] ss:$16 sps:$4 sm:$0xff]  }
 0x727   : > { %v8214_v3 = vpop.f32.mrb[47].mxu0 }
 0x728   : > { %v11005_v3 = vld [vmem:[%s11868_s29 + $0x1ec] ss:$16 sps:$4 sm:$0xff]  }
 0x72c   : > { %v15024_v18 = vpop.f32.mrb[48].mxu0 }
 0x72d   : > { %5723 = vmatmul.mubr.bf16.gmra.mrb[44].mxu1 %v10998_v56  ;;  %v8219_v48 = vpop.f32.mrb[49].mxu0 }
 0x72e   : > { %v15027_v26 = vpop.f32.mrb[50].mxu0  ;;  %5732 = vmatprep.mubr.bf16.mxu1 %v10999_v62  ;;  %v10525_v48 = vld [vmem:[#allocation16 + $0x78] sm:$0xff]  }
 0x72f   : > { %v8222_v63 = vpop.f32.mrb[51].mxu0  ;;  %7829 = vmatpush1.bf16.msra.mxu1 %v10525_v48 }
 0x730   : > { %v11006_v63 = vld [vmem:[%s11868_s29 + $0x1e8] ss:$16 sps:$4 sm:$0xff]   ;;  %9021 = vmatprep.subr.bf16.mxu1 %v16413_v21 }
 0x734   : > { %v15030_v53 = vpop.f32.mrb[52].mxu0 }
 0x735   : > { %16550 = vst [vmem:[#allocation147_spill] sm:$0xff] %v15030_v53  ;;  %5733 = vmatmul.mubr.bf16.gmra.mrb[48].mxu1 %v11000_v15  ;;  %v8227_v61 = vpop.f32.mrb[53].mxu0 }
 0x736   : > { %v15033_v47 = vpop.f32.mrb[54].mxu0  ;;  %5742 = vmatprep.mubr.bf16.mxu1 %v11001_v42  ;;  %v11007_v42 = vld [vmem:[%s11868_s29 + $0x20c] ss:$16 sps:$4 sm:$0xff]  }
 0x737   : > { %16551 = vst [vmem:[#allocation148_spill] sm:$0xff] %v15033_v47  ;;  %v8230_v5 = vpop.f32.mrb[55].mxu0 }
 0x73c   : > { %v15036_v41 = vpop.f32.mrb[56].mxu0 }
 0x73d   : > { %16552 = vst [vmem:[#allocation149_spill] sm:$0xff] %v15036_v41  ;;  %5743 = vmatmul.mubr.bf16.gmra.mrb[52].mxu1 %v11002_v60  ;;  %v8235_v16 = vpop.f32.mrb[57].mxu0  ;;  %v11008_v60 = vld [vmem:[%s11868_s29 + $0x208] ss:$16 sps:$4 sm:$0xff]  }
 0x73e   : > { %v15039_v34 = vpop.f32.mrb[58].mxu0  ;;  %5752 = vmatprep.mubr.bf16.mxu1 %v11003_v8 }
 0x73f   : > { %16553 = vst [vmem:[#allocation150_spill] sm:$0xff] %v15039_v34  ;;  %v8238_v46 = vpop.f32.mrb[59].mxu0 }
 0x740   : > { %v11009_v46 = vld [vmem:[%s11868_s29 + $0x22c] ss:$16 sps:$4 sm:$0xff]  }
 0x744   : > { %v15043_v10 = vpop.f32.mrb[60].mxu0 }
 0x745   : > { %16554 = vst [vmem:[#allocation151_spill] sm:$0xff] %v15043_v10  ;;  %5753 = vmatmul.mubr.bf16.gmra.mrb[56].mxu1 %v11004_v57  ;;  %v8243_v28 = vpop.f32.mrb[61].mxu0  ;;  %v11032_v10 = vld [vmem:[%s11868_s29 + $0x368] ss:$16 sps:$4 sm:$0xff]  }
 0x746   : > { %v15046_v17 = vpop.f32.mrb[62].mxu0  ;;  %5762 = vmatprep.mubr.bf16.mxu1 %v11005_v3  ;;  %v11010_v3 = vld [vmem:[%s11868_s29 + $0x228] ss:$16 sps:$4 sm:$0xff]  }
 0x747   : > { %16555 = vst [vmem:[#allocation152_spill] sm:$0xff] %v15046_v17  ;;  %v8246_v56 = vpop.f32.mrb[63].mxu0 }
 0x74c   : > { %v15049_v62 = vpop.f32.mrb[64].mxu0 }
 0x74d   : > { %16556 = vst [vmem:[#allocation153_spill] sm:$0xff] %v15049_v62  ;;  %5763 = vmatmul.mubr.bf16.gmra.mrb[60].mxu1 %v11006_v63  ;;  %v8251_v15 = vpop.f32.mrb[65].mxu0  ;;  %v11011_v63 = vld [vmem:[%s11868_s29 + $0x24c] ss:$16 sps:$4 sm:$0xff]  }
 0x74e   : > { %v15052_v61 = vpop.f32.mrb[66].mxu0  ;;  %5772 = vmatprep.mubr.bf16.mxu1 %v11007_v42 }
 0x74f   : > { %16557 = vst [vmem:[#allocation154_spill] sm:$0xff] %v15052_v61  ;;  %v8254_v5 = vpop.f32.mrb[67].mxu0 }
 0x750   : > { %v11012_v5 = vld [vmem:[%s11868_s29 + $0x248] ss:$16 sps:$4 sm:$0xff]  }
 0x754   : > { %v15056_v38 = vpop.f32.mrb[68].mxu0 }
 0x755   : > { %16558 = vst [vmem:[#allocation155_spill] sm:$0xff] %v15056_v38  ;;  %5773 = vmatmul.mubr.bf16.gmra.mrb[64].mxu1 %v11008_v60  ;;  %v8259_v16 = vpop.f32.mrb[69].mxu0 }
 0x756   : > { %v15059_v8 = vpop.f32.mrb[70].mxu0  ;;  %5782 = vmatprep.mubr.bf16.mxu1 %v11009_v46  ;;  %v11013_v46 = vld [vmem:[%s11868_s29 + $0x26c] ss:$16 sps:$4 sm:$0xff]  }
 0x757   : > { %16559 = vst [vmem:[#allocation156_spill] sm:$0xff] %v15059_v8  ;;  %v8262_v57 = vpop.f32.mrb[71].mxu0 }
 0x75c   : > { %v15062_v28 = vpop.f32.mrb[72].mxu0 }
 0x75d   : > { %16560 = vst [vmem:[#allocation157_spill] sm:$0xff] %v15062_v28  ;;  %5783 = vmatmul.mubr.bf16.gmra.mrb[68].mxu1 %v11010_v3  ;;  %v8267_v56 = vpop.f32.mrb[73].mxu0 }
 0x75e   : > { %v15065_v48 = vpop.f32.mrb[74].mxu0  ;;  %5792 = vmatprep.mubr.bf16.mxu1 %v11011_v63  ;;  %v11014_v56 = vld [vmem:[%s11868_s29 + $0x268] ss:$16 sps:$4 sm:$0xff]  }
 0x75f   : > { %16561 = vst [vmem:[#allocation158_spill] sm:$0xff] %v15065_v48  ;;  %v8270_v15 = vpop.f32.mrb[75].mxu0 }
 0x760   : > { %v11015_v15 = vld [vmem:[%s11868_s29 + $0x28c] ss:$16 sps:$4 sm:$0xff]  }
 0x764   : > { %v15068_v42 = vpop.f32.mrb[76].mxu0 }
 0x765   : > { %16562 = vst [vmem:[#allocation159_spill] sm:$0xff] %v15068_v42  ;;  %5793 = vmatmul.mubr.bf16.gmra.mrb[72].mxu1 %v11012_v5  ;;  %v8275_v60 = vpop.f32.mrb[77].mxu0 }
 0x766   : > { %v15071_v16 = vpop.f32.mrb[78].mxu0  ;;  %5802 = vmatprep.mubr.bf16.mxu1 %v11013_v46  ;;  %v11016_v60 = vld [vmem:[%s11868_s29 + $0x288] ss:$16 sps:$4 sm:$0xff]  }
 0x767   : > { %16563 = vst [vmem:[#allocation160_spill] sm:$0xff] %v15071_v16  ;;  %v8278_v57 = vpop.f32.mrb[79].mxu0 }
 0x768   : > { %v11017_v57 = vld [vmem:[%s11868_s29 + $0x2ac] ss:$16 sps:$4 sm:$0xff]  }
 0x76c   : > { %v15074_v3 = vpop.f32.mrb[80].mxu0 }
 0x76d   : > { %16564 = vst [vmem:[#allocation161_spill] sm:$0xff] %v15074_v3  ;;  %5803 = vmatmul.mubr.bf16.gmra.mrb[76].mxu1 %v11014_v56  ;;  %v8283_v48 = vpop.f32.mrb[81].mxu0 }
 0x76e   : > { %v15077_v63 = vpop.f32.mrb[82].mxu0  ;;  %5812 = vmatprep.mubr.bf16.mxu1 %v11015_v15  ;;  %v11018_v48 = vld [vmem:[%s11868_s29 + $0x2a8] ss:$16 sps:$4 sm:$0xff]  }
 0x76f   : > { %16565 = vst [vmem:[#allocation162_spill] sm:$0xff] %v15077_v63  ;;  %v8286_v42 = vpop.f32.mrb[83].mxu0 }
 0x770   : > { %v11019_v42 = vld [vmem:[%s11868_s29 + $0x2cc] ss:$16 sps:$4 sm:$0xff]  }
 0x774   : > { %v15080_v5 = vpop.f32.mrb[84].mxu0 }
 0x775   : > { %16566 = vst [vmem:[#allocation163_spill] sm:$0xff] %v15080_v5  ;;  %5813 = vmatmul.mubr.bf16.gmra.mrb[80].mxu1 %v11016_v60  ;;  %v8291_v16 = vpop.f32.mrb[85].mxu0 }
 0x776   : > { %v15083_v46 = vpop.f32.mrb[86].mxu0  ;;  %5822 = vmatprep.mubr.bf16.mxu1 %v11017_v57  ;;  %v11020_v16 = vld [vmem:[%s11868_s29 + $0x2c8] ss:$16 sps:$4 sm:$0xff]  }
 0x777   : > { %16567 = vst [vmem:[#allocation164_spill] sm:$0xff] %v15083_v46  ;;  %v8294_v3 = vpop.f32.mrb[87].mxu0 }
 0x778   : > { %v11021_v3 = vld [vmem:[%s11868_s29 + $0x2ec] ss:$16 sps:$4 sm:$0xff]  }
 0x77c   : > { %v15086_v56 = vpop.f32.mrb[88].mxu0 }
 0x77d   : > { %16568 = vst [vmem:[#allocation165_spill] sm:$0xff] %v15086_v56  ;;  %5823 = vmatmul.mubr.bf16.gmra.mrb[84].mxu1 %v11018_v48  ;;  %v8299_v63 = vpop.f32.mrb[89].mxu0 }
 0x77e   : > { %v15089_v15 = vpop.f32.mrb[90].mxu0  ;;  %5832 = vmatprep.mubr.bf16.mxu1 %v11019_v42  ;;  %v11022_v63 = vld [vmem:[%s11868_s29 + $0x2e8] ss:$16 sps:$4 sm:$0xff]  }
 0x77f   : > { %16569 = vst [vmem:[#allocation166_spill] sm:$0xff] %v15089_v15  ;;  %v8302_v5 = vpop.f32.mrb[91].mxu0 }
 0x780   : > { %v11023_v5 = vld [vmem:[%s11868_s29 + $0x30c] ss:$16 sps:$4 sm:$0xff]  }
 0x784   : > { %v15092_v60 = vpop.f32.mrb[92].mxu0 }
 0x785   : > { %16570 = vst [vmem:[#allocation167_spill] sm:$0xff] %v15092_v60  ;;  %5833 = vmatmul.mubr.bf16.gmra.mrb[88].mxu1 %v11020_v16  ;;  %v8307_v46 = vpop.f32.mrb[93].mxu0 }
 0x786   : > { %v15095_v57 = vpop.f32.mrb[94].mxu0  ;;  %5842 = vmatprep.mubr.bf16.mxu1 %v11021_v3  ;;  %v11024_v46 = vld [vmem:[%s11868_s29 + $0x308] ss:$16 sps:$4 sm:$0xff]  }
 0x787   : > { %16571 = vst [vmem:[#allocation168_spill] sm:$0xff] %v15095_v57  ;;  %v8310_v56 = vpop.f32.mrb[95].mxu0 }
 0x788   : > { %v11025_v56 = vld [vmem:[%s11868_s29 + $0x32c] ss:$16 sps:$4 sm:$0xff]  }
 0x78c   : > { %v15098_v48 = vpop.f32.mrb[96].mxu0 }
 0x78d   : > { %16572 = vst [vmem:[#allocation169_spill] sm:$0xff] %v15098_v48  ;;  %5843 = vmatmul.mubr.bf16.gmra.mrb[92].mxu1 %v11022_v63  ;;  %v8315_v15 = vpop.f32.mrb[97].mxu0 }
 0x78e   : > { %v15101_v42 = vpop.f32.mrb[98].mxu0  ;;  %5852 = vmatprep.mubr.bf16.mxu1 %v11023_v5  ;;  %v11026_v15 = vld [vmem:[%s11868_s29 + $0x328] ss:$16 sps:$4 sm:$0xff]  }
 0x78f   : > { %16573 = vst [vmem:[#allocation170_spill] sm:$0xff] %v15101_v42  ;;  %v8318_v60 = vpop.f32.mrb[99].mxu0 }
 0x790   : > { %v11027_v60 = vld [vmem:[%s11868_s29 + $0x34c] ss:$16 sps:$4 sm:$0xff]  }
 0x794   : > { %v15104_v16 = vpop.f32.mrb[100].mxu0 }
 0x795   : > { %16574 = vst [vmem:[#allocation171_spill] sm:$0xff] %v15104_v16  ;;  %5853 = vmatmul.mubr.bf16.gmra.mrb[96].mxu1 %v11024_v46  ;;  %v8323_v57 = vpop.f32.mrb[101].mxu0  ;;  %v2785_v46 = vsub.s32 0, %v14052_v22  ;;  %v11028_v16 = vld [vmem:[%s11868_s29 + $0x348] ss:$16 sps:$4 sm:$0xff]  }
 0x796   : > { %v15107_v3 = vpop.f32.mrb[102].mxu0  ;;  %5862 = vmatprep.mubr.bf16.mxu1 %v11025_v56  ;;  %v11029_v56 = vld [vmem:[#allocation14] sm:$0xf] }
 0x797   : > { %16575 = vst [vmem:[#allocation172_spill] sm:$0xff] %v15107_v3  ;;  %v8326_v48 = vpop.f32.mrb[103].mxu0  ;;  %v2789_v3 = vsub.s32 1, %v14052_v22 }
 0x79c   : > { %v15110_v28 = vpop.f32.mrb[104].mxu0 }
 0x79d   : > { %16576 = vst [vmem:[#allocation173_spill] sm:$0xff] %v15110_v28  ;;  %5863 = vmatmul.mubr.bf16.gmra.mrb[100].mxu1 %v11026_v15  ;;  %v8331_v63 = vpop.f32.mrb[105].mxu0  ;;  %v15121_v28 = vrot.slane %v11029_v56, %v2785_v46 }
 0x79e   : > { %v15113_v42 = vpop.f32.mrb[106].mxu0  ;;  %5872 = vmatprep.mubr.bf16.mxu1 %v11027_v60  ;;  %v15125_v63 = vrot.slane %v11029_v56, %v2789_v3 }
 0x79f   : > { %16577 = vst [vmem:[#allocation174_spill] sm:$0xff] %v15113_v42  ;;  %v8334_v5 = vpop.f32.mrb[107].mxu0  ;;  %v11030_v42 = vld [vmem:[%s11868_s29 + $0x36c] ss:$16 sps:$4 sm:$0xff]  }
 0x7a0   : > { %v11031_v5 = vld [vmem:[#allocation11] sm:$0xf] }
 0x7a1   : > { %v15128_v8 = vrot.slane %v11031_v5, %v2785_v46 }
 0x7a3   : > { %v2998_v56 = vadd.f32 %v13589_v13, %v15128_v8 }
 0x7a4   : > { %v15117_v57 = vpop.f32.mrb[108].mxu0 }
 0x7a5   : > { %16578 = vst [vmem:[#allocation175_spill] sm:$0xff] %v15117_v57  ;;  %5873 = vmatmul.mubr.bf16.gmra.mrb[104].mxu1 %v11028_v16  ;;  %v8339_v48 = vpop.f32.mrb[109].mxu0  ;;  %v15130_v57 = vrot.slane %v11031_v5, %v2789_v3 }
 0x7a6   : > { %v15123_v15 = vpop.f32.mrb[110].mxu0  ;;  %5882 = vmatprep.mubr.bf16.mxu1 %v11030_v42 }
 0x7a7   : > { %16579 = vst [vmem:[#allocation176_spill] sm:$0xff] %v15123_v15  ;;  %v8342_v60 = vpop.f32.mrb[111].mxu0  ;;  %v3000_v46 = vadd.f32 %v13591_v12, %v15130_v57  ;;  %v11033_v12 = vld [vmem:[%s11868_s29 + $0x38c] ss:$16 sps:$4 sm:$0xff]  }
 0x7a8   : > { %v5614_v38 = vpop.f32.mrb[0].mxu1 }
 0x7a9   : > { %v9117_v22 = vadd.f32 %v5614_v38, %v15121_v28  ;;  %v5616_v16 = vpop.f32.mrb[1].mxu1 }
 0x7aa   : > { %v9118_v48 = vadd.f32 %v5616_v16, %v15125_v63  ;;  %v5618_v61 = vpop.f32.mrb[2].mxu1  ;;  %v3002_v16 = vadd.f32 %v13593_v9, %v15128_v8 }
 0x7ab   : > { %v6639_v15 = vmax.f32 %v9117_v22, 0.0  ;;  %v9119_v42 = vadd.f32 %v5618_v61, %v15121_v28  ;;  %v5620_v60 = vpop.f32.mrb[3].mxu1  ;;  %v3004_v61 = vadd.f32 %v13595_v43, %v15130_v57 }
 0x7ac   : > { %v6640_v3 = vmax.f32 %v9118_v48, 0.0  ;;  %v9120_v5 = vadd.f32 %v5620_v60, %v15125_v63  ;;  %v15140_v62 = vpop.f32.mrb[112].mxu0 }
 0x7ad   : > { %16580 = vst [vmem:[#allocation177_spill] sm:$0xff] %v15140_v62  ;;  %v6895_v38 = vadd.f32 %v6639_v15, %v2998_v56  ;;  %v6643_v17 = vmax.f32 %v9119_v42, 0.0  ;;  %5883 = vmatmul.mubr.bf16.gmra.mrb[108].mxu1 %v11032_v10  ;;  %v8347_v13 = vpop.f32.mrb[113].mxu0 }
 0x7ae   : > { %v6896_v22 = vadd.f32 %v6640_v3, %v3000_v46  ;;  %v6644_v34 = vmax.f32 %v9120_v5, 0.0  ;;  %v15147_v41 = vpop.f32.mrb[114].mxu0  ;;  %5892 = vmatprep.mubr.bf16.mxu1 %v11033_v12  ;;  %v3008_v5 = vadd.f32 %v13607_v50, %v15128_v8 }
 0x7af   : > { %16581 = vst [vmem:[#allocation178_spill] sm:$0xff] %v15147_v41  ;;  %v6899_v48 = vadd.f32 %v6643_v17, %v3002_v16  ;;  %v8350_v60 = vpop.f32.mrb[115].mxu0  ;;  %v7151_v56 = vmax.f32 %v6895_v38, 0.0  ;;  %v3010_v38 = vadd.f32 %v13609_v29, %v15130_v57 }
 0x7b0   : > { %v6900_v62 = vadd.f32 %v6644_v34, %v3004_v61  ;;  %v5624_v15 = vpop.f32.mrb[4].mxu1  ;;  %v7152_v10 = vmax.f32 %v6896_v22, 0.0  ;;  %v11034_v60 = vld [vmem:[%s11868_s29 + $0x388] ss:$16 sps:$4 sm:$0xff]  }
 0x7b1   : > { %v7155_v47 = vmax.f32 %v6899_v48, 0.0  ;;  %v9121_v9 = vadd.f32 %v5624_v15, %v15121_v28  ;;  %v5626_v42 = vpop.f32.mrb[5].mxu1  ;;  %v3012_v48 = vadd.f32 %v13611_v31, %v15128_v8 }
 0x7b2   : > { %v7156_v13 = vmax.f32 %v6900_v62, 0.0  ;;  %v9122_v46 = vadd.f32 %v5626_v42, %v15125_v63  ;;  %v5628_v43 = vpop.f32.mrb[6].mxu1 }
 0x7b3   : > { %v15152_v3 = vpack.c.bf16 %v7155_v47, %v7151_v56  ;;  %v6647_v17 = vmax.f32 %v9121_v9, 0.0  ;;  %v9123_v34 = vadd.f32 %v5628_v43, %v15121_v28  ;;  %v5630_v16 = vpop.f32.mrb[7].mxu1  ;;  %v3014_v9 = vadd.f32 %v13613_v23, %v15130_v57 }
 0x7b4   : > { %v6648_v61 = vmax.f32 %v9122_v46, 0.0  ;;  %v9124_v62 = vadd.f32 %v5630_v16, %v15125_v63  ;;  %v15160_v22 = vpop.f32.mrb[116].mxu0  ;;  %v15162_v12 = vpack.c.bf16 %v7156_v13, %v7152_v10  ;;  %v11035_v46 = vld [vmem:[%s11868_s29 + $0x3ac] ss:$16 sps:$4 sm:$0xff]  }
 0x7b5   : > { %16582 = vst [vmem:[#allocation179_spill] sm:$0xff] %v15160_v22  ;;  %v6903_v47 = vadd.f32 %v6647_v17, %v3008_v5  ;;  %v6651_v50 = vmax.f32 %v9123_v34, 0.0  ;;  %5893 = vmatmul.mubr.bf16.gmra.mrb[112].mxu1 %v11034_v60  ;;  %v8355_v15 = vpop.f32.mrb[117].mxu0  ;;  %v11039_v22 = vld [vmem:[%s11868_s29 + $0x3ec] ss:$16 sps:$4 sm:$0xff]  }
 0x7b6   : > { %v6904_v56 = vadd.f32 %v6648_v61, %v3010_v38  ;;  %v6652_v29 = vmax.f32 %v9124_v62, 0.0  ;;  %v15169_v42 = vpop.f32.mrb[118].mxu0  ;;  %5902 = vmatprep.mubr.bf16.mxu1 %v11035_v46  ;;  %v3018_v15 = vadd.f32 %v13623_v51, %v15128_v8 }
 0x7b7   : > { %16583 = vst [vmem:[#allocation180_spill] sm:$0xff] %v15169_v42  ;;  %v6907_v43 = vadd.f32 %v6651_v50, %v3012_v48  ;;  %v8358_v10 = vpop.f32.mrb[119].mxu0  ;;  %v7159_v17 = vmax.f32 %v6903_v47, 0.0 }
 0x7b8   : > { %v6908_v13 = vadd.f32 %v6652_v29, %v3014_v9  ;;  %v5634_v5 = vpop.f32.mrb[8].mxu1  ;;  %v7160_v60 = vmax.f32 %v6904_v56, 0.0  ;;  %v3020_v9 = vadd.f32 %v13625_v49, %v15130_v57  ;;  %v16584_v10 = vld [vmem:[#allocation29_spill] sm:$0xff] }
 0x7b9   : > { %v7163_v16 = vmax.f32 %v6907_v43, 0.0  ;;  %v9125_v31 = vadd.f32 %v5634_v5, %v15121_v28  ;;  %v5636_v34 = vpop.f32.mrb[9].mxu1 }
 0x7ba   : > { %v7164_v38 = vmax.f32 %v6908_v13, 0.0  ;;  %v9126_v61 = vadd.f32 %v5636_v34, %v15125_v63  ;;  %v5638_v23 = vpop.f32.mrb[10].mxu1  ;;  %v3022_v13 = vadd.f32 %v16584_v10, %v15128_v8 }
 0x7bb   : > { %v15174_v62 = vpack.c.bf16 %v7163_v16, %v7159_v17  ;;  %v6655_v48 = vmax.f32 %v9125_v31, 0.0  ;;  %v9127_v50 = vadd.f32 %v5638_v23, %v15121_v28  ;;  %v5640_v47 = vpop.f32.mrb[11].mxu1  ;;  %v11036_v17 = vld [vmem:[%s11868_s29 + $0x3a8] ss:$16 sps:$4 sm:$0xff]   ;;  %v16585_v16 = vld [vmem:[#allocation31_spill] sm:$0xff] }
 0x7bc   : > { %v6656_v29 = vmax.f32 %v9126_v61, 0.0  ;;  %v9128_v56 = vadd.f32 %v5640_v47, %v15125_v63  ;;  %v15182_v46 = vpack.c.bf16 %v7164_v38, %v7160_v60  ;;  %v3024_v31 = vadd.f32 %v16585_v16, %v15130_v57  ;;  %v11037_v23 = vld [vmem:[%s11868_s29 + $0x3cc] ss:$16 sps:$4 sm:$0xff]  }
 0x7bd   : > { %v6911_v43 = vadd.f32 %v6655_v48, %v3018_v15  ;;  %v6659_v5 = vmax.f32 %v9127_v50, 0.0  ;;  %5903 = vmatmul.mubr.bf16.gmra.mrb[116].mxu1 %v11036_v17  ;;  %v16587_v16 = vld [vmem:[#allocation33_spill] sm:$0xff] }
 0x7be   : > { %v6912_v51 = vadd.f32 %v6656_v29, %v3020_v9  ;;  %v6660_v34 = vmax.f32 %v9128_v56, 0.0  ;;  %5912 = vmatprep.mubr.bf16.mxu1 %v11037_v23  ;;  %v16586_v56 = vld [vmem:[#allocation30_spill] sm:$0xff] }
 0x7bf   : > { %v6915_v49 = vadd.f32 %v6659_v5, %v3022_v13  ;;  %v7167_v47 = vmax.f32 %v6911_v43, 0.0  ;;  %v3028_v17 = vadd.f32 %v16586_v56, %v15128_v8 }
 0x7c0   : > { %v6916_v61 = vadd.f32 %v6660_v34, %v3024_v31  ;;  %v5644_v42 = vpop.f32.mrb[12].mxu1  ;;  %v7168_v48 = vmax.f32 %v6912_v51, 0.0 }
 0x7c1   : > { %v7171_v60 = vmax.f32 %v6915_v49, 0.0  ;;  %v9129_v38 = vadd.f32 %v5644_v42, %v15121_v28  ;;  %v5646_v15 = vpop.f32.mrb[13].mxu1  ;;  %v3030_v42 = vadd.f32 %v16587_v16, %v15130_v57  ;;  %v16588_v49 = vld [vmem:[#allocation32_spill] sm:$0xff] }
 0x7c2   : > { %v7172_v50 = vmax.f32 %v6916_v61, 0.0  ;;  %v9130_v10 = vadd.f32 %v5646_v15, %v15125_v63  ;;  %v5648_v9 = vpop.f32.mrb[14].mxu1  ;;  %v3032_v61 = vadd.f32 %v16588_v49, %v15128_v8 }
 0x7c3   : > { %v15192_v29 = vpack.c.bf16 %v7171_v60, %v7167_v47  ;;  %v6663_v13 = vmax.f32 %v9129_v38, 0.0  ;;  %v9131_v5 = vadd.f32 %v5648_v9, %v15121_v28  ;;  %v5650_v43 = vpop.f32.mrb[15].mxu1  ;;  %v11038_v60 = vld [vmem:[%s11868_s29 + $0x3c8] ss:$16 sps:$4 sm:$0xff]   ;;  %v16589_v38 = vld [vmem:[#allocation35_spill] sm:$0xff] }
 0x7c4   : > { %v6664_v31 = vmax.f32 %v9130_v10, 0.0  ;;  %v9132_v51 = vadd.f32 %v5650_v43, %v15125_v63  ;;  %v15200_v34 = vpack.c.bf16 %v7172_v50, %v7168_v48  ;;  %v3034_v9 = vadd.f32 %v16589_v38, %v15130_v57 }
 0x7c5   : > { %v6919_v23 = vadd.f32 %v6663_v13, %v3028_v17  ;;  %v6667_v47 = vmax.f32 %v9131_v5, 0.0  ;;  %5913 = vmatmul.mubr.bf16.gmra.mrb[120].mxu1 %v11038_v60 }
 0x7c6   : > { %v6920_v15 = vadd.f32 %v6664_v31, %v3030_v42  ;;  %v6668_v56 = vmax.f32 %v9132_v51, 0.0  ;;  %5922 = vmatprep.mubr.bf16.mxu1 %v11039_v22  ;;  %v16590_v51 = vld [vmem:[#allocation34_spill] sm:$0xff] }
 0x7c7   : > { %v6923_v16 = vadd.f32 %v6667_v47, %v3032_v61  ;;  %v7175_v43 = vmax.f32 %v6919_v23, 0.0  ;;  %v3038_v60 = vadd.f32 %v16590_v51, %v15128_v8  ;;  %v16591_v23 = vld [vmem:[#allocation37_spill] sm:$0xff] }
 0x7c8   : > { %v6924_v10 = vadd.f32 %v6668_v56, %v3034_v9  ;;  %v5654_v41 = vpop.f32.mrb[16].mxu1  ;;  %v7176_v13 = vmax.f32 %v6920_v15, 0.0  ;;  %v3040_v38 = vadd.f32 %v16591_v23, %v15130_v57 }
 0x7c9   : > { %v7179_v48 = vmax.f32 %v6923_v16, 0.0  ;;  %v9133_v50 = vadd.f32 %v5654_v41, %v15121_v28  ;;  %v5656_v17 = vpop.f32.mrb[17].mxu1  ;;  %v16592_v16 = vld [vmem:[#allocation36_spill] sm:$0xff] }
 0x7ca   : > { %v7180_v5 = vmax.f32 %v6924_v10, 0.0  ;;  %v9134_v49 = vadd.f32 %v5656_v17, %v15125_v63  ;;  %v5658_v42 = vpop.f32.mrb[18].mxu1  ;;  %v3042_v10 = vadd.f32 %v16592_v16, %v15128_v8 }
 0x7cb   : > { %v15210_v31 = vpack.c.bf16 %v7179_v48, %v7175_v43  ;;  %v6671_v22 = vmax.f32 %v9133_v50, 0.0  ;;  %v9135_v61 = vadd.f32 %v5658_v42, %v15121_v28  ;;  %v5660_v47 = vpop.f32.mrb[19].mxu1  ;;  %v11040_v48 = vld [vmem:[%s11868_s29 + $0x3e8] ss:$16 sps:$4 sm:$0xff]   ;;  %v16593_v50 = vld [vmem:[#allocation39_spill] sm:$0xff] }
 0x7cc   : > { %v6672_v41 = vmax.f32 %v9134_v49, 0.0  ;;  %v9136_v15 = vadd.f32 %v5660_v47, %v15125_v63  ;;  %v15218_v9 = vpack.c.bf16 %v7180_v5, %v7176_v13  ;;  %v3044_v42 = vadd.f32 %v16593_v50, %v15130_v57 }
 0x7cd   : > { %v6927_v56 = vadd.f32 %v6671_v22, %v3038_v60  ;;  %v6675_v43 = vmax.f32 %v9135_v61, 0.0  ;;  %5923 = vmatmul.mubr.bf16.gmra.mrb[124].mxu1 %v11040_v48 }
 0x7ce   : > { %v6928_v17 = vadd.f32 %v6672_v41, %v3040_v38  ;;  %v6676_v51 = vmax.f32 %v9136_v15, 0.0  ;;  %7830 = vmatprep.mubr.bf16.mxu1 %v15162_v12  ;;  %v16594_v41 = vld [vmem:[#allocation38_spill] sm:$0xff] }
 0x7cf   : > { %v6931_v23 = vadd.f32 %v6675_v43, %v3042_v10  ;;  %v7183_v47 = vmax.f32 %v6927_v56, 0.0  ;;  %v3048_v15 = vadd.f32 %v16594_v41, %v15128_v8  ;;  %v16595_v56 = vld [vmem:[#allocation41_spill] sm:$0xff] }
 0x7d0   : > { %v6932_v49 = vadd.f32 %v6676_v51, %v3044_v42  ;;  %v5664_v53 = vpop.f32.mrb[20].mxu1  ;;  %v7184_v22 = vmax.f32 %v6928_v17, 0.0  ;;  %v3050_v43 = vadd.f32 %v16595_v56, %v15130_v57  ;;  %v11041_v41 = vld [vmem:[#allocation16 + $0x80] sm:$0xff]  }
 0x7d1   : > { %v7187_v13 = vmax.f32 %v6931_v23, 0.0  ;;  %v9137_v5 = vadd.f32 %v5664_v53, %v15121_v28  ;;  %v5666_v60 = vpop.f32.mrb[21].mxu1  ;;  %v16596_v23 = vld [vmem:[#allocation40_spill] sm:$0xff] }
 0x7d2   : > { %v7188_v16 = vmax.f32 %v6932_v49, 0.0  ;;  %v9138_v61 = vadd.f32 %v5666_v60, %v15125_v63  ;;  %v5668_v48 = vpop.f32.mrb[22].mxu1  ;;  %v3052_v49 = vadd.f32 %v16596_v23, %v15128_v8 }
 0x7d3   : > { %v15228_v38 = vpack.c.bf16 %v7187_v13, %v7183_v47  ;;  %v6679_v50 = vmax.f32 %v9137_v5, 0.0  ;;  %v9139_v12 = vadd.f32 %v5668_v48, %v15121_v28  ;;  %v5670_v10 = vpop.f32.mrb[23].mxu1  ;;  %v16597_v5 = vld [vmem:[#allocation43_spill] sm:$0xff] }
 0x7d4   : > { %v6680_v42 = vmax.f32 %v9138_v61, 0.0  ;;  %v9140_v53 = vadd.f32 %v5670_v10, %v15125_v63  ;;  %v15236_v17 = vpack.c.bf16 %v7188_v16, %v7184_v22  ;;  %v3054_v60 = vadd.f32 %v16597_v5, %v15130_v57 }
 0x7d5   : > { %v6935_v51 = vadd.f32 %v6679_v50, %v3048_v15  ;;  %v6683_v47 = vmax.f32 %v9139_v12, 0.0  ;;  %7831 = vmatmul.mubr.bf16.vlgmr.msra.gmra.mrb[128].mxu1 %v15152_v3 }
 0x7d6   : > { %v6936_v13 = vadd.f32 %v6680_v42, %v3050_v43  ;;  %v6684_v48 = vmax.f32 %v9140_v53, 0.0  ;;  %9037 = vmatpush1.bf16.msra.mxu1 %v11041_v41  ;;  %7838 = vmatprep.mubr.bf16.mxu1 %v15182_v46  ;;  %v11042_v53 = vld [vmem:[#allocation16 + $0x88] sm:$0xff]  }
 0x7d7   : > { %v6939_v61 = vadd.f32 %v6683_v47, %v3052_v49  ;;  %9022 = vmatprep.subr.bf16.mxu1 %v16413_v21  ;;  %v7191_v15 = vmax.f32 %v6935_v51, 0.0  ;;  %v16598_v46 = vld [vmem:[#allocation42_spill] sm:$0xff] }
 0x7d8   : > { %v6940_v22 = vadd.f32 %v6684_v48, %v3054_v60  ;;  %v5674_v16 = vpop.f32.mrb[24].mxu1  ;;  %v7192_v3 = vmax.f32 %v6936_v13, 0.0  ;;  %v3058_v49 = vadd.f32 %v16598_v46, %v15128_v8  ;;  %v16599_v60 = vld [vmem:[#allocation45_spill] sm:$0xff]  ;;  %v11043_v46 = vld [vmem:[#allocation16 + $0x90] sm:$0xff]  }
 0x7d9   : > { %v7195_v50 = vmax.f32 %v6939_v61, 0.0  ;;  %v9141_v12 = vadd.f32 %v5674_v16, %v15121_v28  ;;  %v5676_v10 = vpop.f32.mrb[25].mxu1  ;;  %v3060_v13 = vadd.f32 %v16599_v60, %v15130_v57  ;;  %v16600_v16 = vld [vmem:[#allocation44_spill] sm:$0xff] }
 0x7da   : > { %v7196_v56 = vmax.f32 %v6940_v22, 0.0  ;;  %v9142_v43 = vadd.f32 %v5676_v10, %v15125_v63  ;;  %v5678_v42 = vpop.f32.mrb[26].mxu1  ;;  %9038 = vmatpush1.bf16.msra.mxu1 %v11042_v53  ;;  %v16601_v10 = vld [vmem:[#allocation47_spill] sm:$0xff] }
 0x7db   : > { %v15247_v23 = vpack.c.bf16 %v7195_v50, %v7191_v15  ;;  %v6687_v47 = vmax.f32 %v9141_v12, 0.0  ;;  %v9143_v5 = vadd.f32 %v5678_v42, %v15121_v28  ;;  %v5680_v51 = vpop.f32.mrb[27].mxu1  ;;  %9023 = vmatprep.subr.bf16.mxu1 %v16413_v21  ;;  %v3062_v15 = vadd.f32 %v16600_v16, %v15128_v8  ;;  %v16602_v16 = vld [vmem:[#allocation46_spill] sm:$0xff] }
 0x7dc   : > { %v6688_v48 = vmax.f32 %v9142_v43, 0.0  ;;  %v9144_v41 = vadd.f32 %v5680_v51, %v15125_v63  ;;  %v15256_v61 = vpack.c.bf16 %v7196_v56, %v7192_v3  ;;  %v3064_v42 = vadd.f32 %v16601_v10, %v15130_v57 }
 0x7dd   : > { %v6943_v22 = vadd.f32 %v6687_v47, %v3058_v49  ;;  %v6691_v50 = vmax.f32 %v9143_v5, 0.0  ;;  %7839 = vmatmul.mubr.bf16.gmra.mrb[132].mxu1 %v15174_v62 }
 0x7de   : > { %v6944_v12 = vadd.f32 %v6688_v48, %v3060_v13  ;;  %v6692_v53 = vmax.f32 %v9144_v41, 0.0  ;;  %7846 = vmatprep.mubr.bf16.mxu1 %v15200_v34  ;;  %9039 = vmatpush1.bf16.msra.mxu1 %v11043_v46  ;;  %v11044_v41 = vld [vmem:[#allocation16 + $0x98] sm:$0xff]  }
 0x7df   : > { %v6947_v43 = vadd.f32 %v6691_v50, %v3062_v15  ;;  %9024 = vmatprep.subr.bf16.mxu1 %v16413_v21  ;;  %v7199_v49 = vmax.f32 %v6943_v22, 0.0  ;;  %v3068_v15 = vadd.f32 %v16602_v16, %v15128_v8  ;;  %v11045_v16 = vld [vmem:[#allocation16 + $0xa0] sm:$0xff]  }
 0x7e0   : > { %v6948_v3 = vadd.f32 %v6692_v53, %v3064_v42  ;;  %v5684_v56 = vpop.f32.mrb[28].mxu1  ;;  %v7200_v62 = vmax.f32 %v6944_v12, 0.0  ;;  %v16603_v42 = vld [vmem:[#allocation49_spill] sm:$0xff] }
 0x7e1   : > { %v7203_v47 = vmax.f32 %v6947_v43, 0.0  ;;  %v9145_v5 = vadd.f32 %v5684_v56, %v15121_v28  ;;  %v5686_v51 = vpop.f32.mrb[29].mxu1  ;;  %v3070_v12 = vadd.f32 %v16603_v42, %v15130_v57  ;;  %v16604_v56 = vld [vmem:[#allocation48_spill] sm:$0xff] }
 0x7e2   : > { %v7204_v60 = vmax.f32 %v6948_v3, 0.0  ;;  %v9146_v13 = vadd.f32 %v5686_v51, %v15125_v63  ;;  %v5688_v48 = vpop.f32.mrb[30].mxu1  ;;  %9040 = vmatpush1.bf16.msra.mxu1 %v11044_v41  ;;  %v16605_v51 = vld [vmem:[#allocation51_spill] sm:$0xff] }
 0x7e3   : > { %v15267_v34 = vpack.c.bf16 %v7203_v47, %v7199_v49  ;;  %v6695_v50 = vmax.f32 %v9145_v5, 0.0  ;;  %v9147_v10 = vadd.f32 %v5688_v48, %v15121_v28  ;;  %v5690_v22 = vpop.f32.mrb[31].mxu1  ;;  %9025 = vmatprep.subr.bf16.mxu1 %v16413_v21  ;;  %v3072_v49 = vadd.f32 %v16604_v56, %v15128_v8  ;;  %v16606_v56 = vld [vmem:[#allocation50_spill] sm:$0xff] }
 0x7e4   : > { %v6696_v53 = vmax.f32 %v9146_v13, 0.0  ;;  %v9148_v46 = vadd.f32 %v5690_v22, %v15125_v63  ;;  %v15276_v43 = vpack.c.bf16 %v7204_v60, %v7200_v62  ;;  %v3074_v48 = vadd.f32 %v16605_v51, %v15130_v57 }
 0x7e5   : > { %v6951_v3 = vadd.f32 %v6695_v50, %v3068_v15  ;;  %v6699_v47 = vmax.f32 %v9147_v10, 0.0  ;;  %7847 = vmatmul.mubr.bf16.gmra.mrb[136].mxu1 %v15192_v29 }
 0x7e6   : > { %v6952_v5 = vadd.f32 %v6696_v53, %v3070_v12  ;;  %v6700_v41 = vmax.f32 %v9148_v46, 0.0  ;;  %7854 = vmatprep.mubr.bf16.mxu1 %v15218_v9  ;;  %9041 = vmatpush1.bf16.msra.mxu1 %v11045_v16  ;;  %v11046_v46 = vld [vmem:[#allocation16 + $0xa8] sm:$0xff]  }
 0x7e7   : > { %v6955_v13 = vadd.f32 %v6699_v47, %v3072_v49  ;;  %9026 = vmatprep.subr.bf16.mxu1 %v16413_v21  ;;  %v7207_v15 = vmax.f32 %v6951_v3, 0.0  ;;  %v3078_v49 = vadd.f32 %v16606_v56, %v15128_v8  ;;  %v11047_v56 = vld [vmem:[#allocation16 + $0xb0] sm:$0xff]  }
 0x7e8   : > { %v6956_v62 = vadd.f32 %v6700_v41, %v3074_v48  ;;  %v5694_v60 = vpop.f32.mrb[32].mxu1  ;;  %v7208_v29 = vmax.f32 %v6952_v5, 0.0  ;;  %v16607_v48 = vld [vmem:[#allocation53_spill] sm:$0xff] }
 0x7e9   : > { %v7211_v50 = vmax.f32 %v6955_v13, 0.0  ;;  %v9149_v10 = vadd.f32 %v5694_v60, %v15121_v28  ;;  %v5696_v22 = vpop.f32.mrb[33].mxu1  ;;  %v3080_v5 = vadd.f32 %v16607_v48, %v15130_v57  ;;  %v16608_v60 = vld [vmem:[#allocation52_spill] sm:$0xff] }
 0x7ea   : > { %v7212_v42 = vmax.f32 %v6956_v62, 0.0  ;;  %v9150_v12 = vadd.f32 %v5696_v22, %v15125_v63  ;;  %v5698_v53 = vpop.f32.mrb[34].mxu1  ;;  %9042 = vmatpush1.bf16.msra.mxu1 %v11046_v46  ;;  %v16609_v22 = vld [vmem:[#allocation55_spill] sm:$0xff] }
 0x7eb   : > { %v15287_v9 = vpack.c.bf16 %v7211_v50, %v7207_v15  ;;  %v6703_v47 = vmax.f32 %v9149_v10, 0.0  ;;  %v9151_v51 = vadd.f32 %v5698_v53, %v15121_v28  ;;  %v5700_v3 = vpop.f32.mrb[35].mxu1  ;;  %9027 = vmatprep.subr.bf16.mxu1 %v16413_v21  ;;  %v3082_v15 = vadd.f32 %v16608_v60, %v15128_v8  ;;  %v16610_v60 = vld [vmem:[#allocation54_spill] sm:$0xff] }
 0x7ec   : > { %v6704_v41 = vmax.f32 %v9150_v12, 0.0  ;;  %v9152_v16 = vadd.f32 %v5700_v3, %v15125_v63  ;;  %v15296_v13 = vpack.c.bf16 %v7212_v42, %v7208_v29  ;;  %v3084_v53 = vadd.f32 %v16609_v22, %v15130_v57 }
 0x7ed   : > { %v6959_v62 = vadd.f32 %v6703_v47, %v3078_v49  ;;  %v6707_v50 = vmax.f32 %v9151_v51, 0.0  ;;  %7855 = vmatmul.mubr.bf16.gmra.mrb[140].mxu1 %v15210_v31 }
 0x7ee   : > { %v6960_v10 = vadd.f32 %v6704_v41, %v3080_v5  ;;  %v6708_v46 = vmax.f32 %v9152_v16, 0.0  ;;  %7862 = vmatprep.mubr.bf16.mxu1 %v15236_v17  ;;  %9043 = vmatpush1.bf16.msra.mxu1 %v11047_v56  ;;  %v11048_v16 = vld [vmem:[#allocation16 + $0xb8] sm:$0xff]  }
 0x7ef   : > { %v6963_v12 = vadd.f32 %v6707_v50, %v3082_v15  ;;  %9028 = vmatprep.subr.bf16.mxu1 %v16413_v21  ;;  %v7215_v49 = vmax.f32 %v6959_v62, 0.0  ;;  %v3088_v15 = vadd.f32 %v16610_v60, %v15128_v8  ;;  %v11049_v60 = vld [vmem:[#allocation16 + $0xc0] sm:$0xff]  }
 0x7f0   : > { %v6964_v29 = vadd.f32 %v6708_v46, %v3084_v53  ;;  %v5704_v42 = vpop.f32.mrb[36].mxu1  ;;  %v7216_v31 = vmax.f32 %v6960_v10, 0.0  ;;  %v16611_v53 = vld [vmem:[#allocation57_spill] sm:$0xff] }
 0x7f1   : > { %v7219_v47 = vmax.f32 %v6963_v12, 0.0  ;;  %v9153_v51 = vadd.f32 %v5704_v42, %v15121_v28  ;;  %v5706_v3 = vpop.f32.mrb[37].mxu1  ;;  %v3090_v10 = vadd.f32 %v16611_v53, %v15130_v57  ;;  %v16612_v42 = vld [vmem:[#allocation56_spill] sm:$0xff] }
 0x7f2   : > { %v7220_v48 = vmax.f32 %v6964_v29, 0.0  ;;  %v9154_v5 = vadd.f32 %v5706_v3, %v15125_v63  ;;  %v5708_v41 = vpop.f32.mrb[38].mxu1  ;;  %9044 = vmatpush1.bf16.msra.mxu1 %v11048_v16  ;;  %v16613_v3 = vld [vmem:[#allocation59_spill] sm:$0xff] }
 0x7f3   : > { %v15307_v17 = vpack.c.bf16 %v7219_v47, %v7215_v49  ;;  %v6711_v50 = vmax.f32 %v9153_v51, 0.0  ;;  %v9155_v22 = vadd.f32 %v5708_v41, %v15121_v28  ;;  %v5710_v62 = vpop.f32.mrb[39].mxu1  ;;  %9029 = vmatprep.subr.bf16.mxu1 %v16413_v21  ;;  %v3092_v49 = vadd.f32 %v16612_v42, %v15128_v8  ;;  %v16614_v42 = vld [vmem:[#allocation58_spill] sm:$0xff] }
 0x7f4   : > { %v6712_v46 = vmax.f32 %v9154_v5, 0.0  ;;  %v9156_v56 = vadd.f32 %v5710_v62, %v15125_v63  ;;  %v15316_v12 = vpack.c.bf16 %v7220_v48, %v7216_v31  ;;  %v3094_v41 = vadd.f32 %v16613_v3, %v15130_v57 }
 0x7f5   : > { %v6967_v29 = vadd.f32 %v6711_v50, %v3088_v15  ;;  %v6715_v47 = vmax.f32 %v9155_v22, 0.0  ;;  %7863 = vmatmul.mubr.bf16.gmra.mrb[144].mxu1 %v15228_v38 }
 0x7f6   : > { %v6968_v51 = vadd.f32 %v6712_v46, %v3090_v10  ;;  %v6716_v16 = vmax.f32 %v9156_v56, 0.0  ;;  %7870 = vmatprep.mubr.bf16.mxu1 %v15256_v61  ;;  %9045 = vmatpush1.bf16.msra.mxu1 %v11049_v60  ;;  %v11050_v56 = vld [vmem:[#allocation16 + $0xc8] sm:$0xff]  }
 0x7f7   : > { %v6971_v5 = vadd.f32 %v6715_v47, %v3092_v49  ;;  %9030 = vmatprep.subr.bf16.mxu1 %v16413_v21  ;;  %v7223_v15 = vmax.f32 %v6967_v29, 0.0  ;;  %v3098_v49 = vadd.f32 %v16614_v42, %v15128_v8  ;;  %v11051_v42 = vld [vmem:[#allocation16 + $0xd0] sm:$0xff]  }
 0x7f8   : > { %v6972_v31 = vadd.f32 %v6716_v16, %v3094_v41  ;;  %v5714_v48 = vpop.f32.mrb[40].mxu1  ;;  %v7224_v38 = vmax.f32 %v6968_v51, 0.0  ;;  %v16615_v41 = vld [vmem:[#allocation61_spill] sm:$0xff] }
 0x7f9   : > { %v7227_v50 = vmax.f32 %v6971_v5, 0.0  ;;  %v9157_v22 = vadd.f32 %v5714_v48, %v15121_v28  ;;  %v5716_v62 = vpop.f32.mrb[41].mxu1  ;;  %v3100_v51 = vadd.f32 %v16615_v41, %v15130_v57  ;;  %v16616_v48 = vld [vmem:[#allocation60_spill] sm:$0xff] }
 0x7fa   : > { %v7228_v53 = vmax.f32 %v6972_v31, 0.0  ;;  %v9158_v10 = vadd.f32 %v5716_v62, %v15125_v63  ;;  %v5718_v46 = vpop.f32.mrb[42].mxu1  ;;  %9046 = vmatpush1.bf16.msra.mxu1 %v11050_v56  ;;  %v16617_v62 = vld [vmem:[#allocation63_spill] sm:$0xff] }
 0x7fb   : > { %v15327_v61 = vpack.c.bf16 %v7227_v50, %v7223_v15  ;;  %v6719_v47 = vmax.f32 %v9157_v22, 0.0  ;;  %v9159_v3 = vadd.f32 %v5718_v46, %v15121_v28  ;;  %v5720_v29 = vpop.f32.mrb[43].mxu1  ;;  %9031 = vmatprep.subr.bf16.mxu1 %v16413_v21  ;;  %v3102_v15 = vadd.f32 %v16616_v48, %v15128_v8  ;;  %v16618_v48 = vld [vmem:[#allocation62_spill] sm:$0xff] }
 0x7fc   : > { %v6720_v16 = vmax.f32 %v9158_v10, 0.0  ;;  %v9160_v60 = vadd.f32 %v5720_v29, %v15125_v63  ;;  %v15336_v5 = vpack.c.bf16 %v7228_v53, %v7224_v38  ;;  %v3104_v46 = vadd.f32 %v16617_v62, %v15130_v57 }
 0x7fd   : > { %v6975_v31 = vadd.f32 %v6719_v47, %v3098_v49  ;;  %v6723_v50 = vmax.f32 %v9159_v3, 0.0  ;;  %7871 = vmatmul.mubr.bf16.gmra.mrb[148].mxu1 %v15247_v23 }
 0x7fe   : > { %v6976_v22 = vadd.f32 %v6720_v16, %v3100_v51  ;;  %v6724_v56 = vmax.f32 %v9160_v60, 0.0  ;;  %7878 = vmatprep.mubr.bf16.mxu1 %v15276_v43  ;;  %9047 = vmatpush1.bf16.msra.mxu1 %v11051_v42  ;;  %v11052_v60 = vld [vmem:[#allocation16 + $0xd8] sm:$0xff]  }
 0x7ff   : > { %v6979_v10 = vadd.f32 %v6723_v50, %v3102_v15  ;;  %9032 = vmatprep.subr.bf16.mxu1 %v16413_v21  ;;  %v7231_v49 = vmax.f32 %v6975_v31, 0.0  ;;  %v3108_v15 = vadd.f32 %v16618_v48, %v15128_v8  ;;  %v11053_v48 = vld [vmem:[#allocation16 + $0xe0] sm:$0xff]  }
 0x800   : > { %v6980_v38 = vadd.f32 %v6724_v56, %v3104_v46  ;;  %v5724_v53 = vpop.f32.mrb[44].mxu1  ;;  %v7232_v23 = vmax.f32 %v6976_v22, 0.0  ;;  %v16619_v46 = vld [vmem:[#allocation65_spill] sm:$0xff] }
 0x801   : > { %v7235_v47 = vmax.f32 %v6979_v10, 0.0  ;;  %v9161_v3 = vadd.f32 %v5724_v53, %v15121_v28  ;;  %v5726_v29 = vpop.f32.mrb[45].mxu1  ;;  %v3110_v22 = vadd.f32 %v16619_v46, %v15130_v57  ;;  %v16620_v53 = vld [vmem:[#allocation64_spill] sm:$0xff] }
 0x802   : > { %v7236_v41 = vmax.f32 %v6980_v38, 0.0  ;;  %v9162_v51 = vadd.f32 %v5726_v29, %v15125_v63  ;;  %v5728_v16 = vpop.f32.mrb[46].mxu1  ;;  %9048 = vmatpush1.bf16.msra.mxu1 %v11052_v60  ;;  %v16621_v29 = vld [vmem:[#allocation67_spill] sm:$0xff] }
 0x803   : > { %v15347_v43 = vpack.c.bf16 %v7235_v47, %v7231_v49  ;;  %v6727_v50 = vmax.f32 %v9161_v3, 0.0  ;;  %v9163_v62 = vadd.f32 %v5728_v16, %v15121_v28  ;;  %v5730_v31 = vpop.f32.mrb[47].mxu1  ;;  %9033 = vmatprep.subr.bf16.mxu1 %v16413_v21  ;;  %v3112_v49 = vadd.f32 %v16620_v53, %v15128_v8  ;;  %v16622_v53 = vld [vmem:[#allocation66_spill] sm:$0xff] }
 0x804   : > { %v6728_v56 = vmax.f32 %v9162_v51, 0.0  ;;  %v9164_v42 = vadd.f32 %v5730_v31, %v15125_v63  ;;  %v15356_v10 = vpack.c.bf16 %v7236_v41, %v7232_v23  ;;  %v3114_v16 = vadd.f32 %v16621_v29, %v15130_v57 }
 0x805   : > { %v6983_v38 = vadd.f32 %v6727_v50, %v3108_v15  ;;  %v6731_v47 = vmax.f32 %v9163_v62, 0.0  ;;  %7879 = vmatmul.mubr.bf16.gmra.mrb[152].mxu1 %v15267_v34 }
 0x806   : > { %v6984_v3 = vadd.f32 %v6728_v56, %v3110_v22  ;;  %v6732_v60 = vmax.f32 %v9164_v42, 0.0  ;;  %7886 = vmatprep.mubr.bf16.mxu1 %v15296_v13  ;;  %9049 = vmatpush1.bf16.msra.mxu1 %v11053_v48  ;;  %v11054_v42 = vld [vmem:[#allocation16 + $0xe8] sm:$0xff]  }
 0x807   : > { %v6987_v51 = vadd.f32 %v6731_v47, %v3112_v49  ;;  %9034 = vmatprep.subr.bf16.mxu1 %v16413_v21  ;;  %v7239_v15 = vmax.f32 %v6983_v38, 0.0  ;;  %v3118_v49 = vadd.f32 %v16622_v53, %v15128_v8  ;;  %v11055_v53 = vld [vmem:[#allocation16 + $0xf0] sm:$0xff]  }
 0x808   : > { %v6988_v23 = vadd.f32 %v6732_v60, %v3114_v16  ;;  %v5734_v41 = vpop.f32.mrb[48].mxu1  ;;  %v7240_v34 = vmax.f32 %v6984_v3, 0.0  ;;  %v16623_v16 = vld [vmem:[#allocation69_spill] sm:$0xff] }
 0x809   : > { %v7243_v50 = vmax.f32 %v6987_v51, 0.0  ;;  %v9165_v62 = vadd.f32 %v5734_v41, %v15121_v28  ;;  %v5736_v31 = vpop.f32.mrb[49].mxu1  ;;  %v3120_v3 = vadd.f32 %v16623_v16, %v15130_v57  ;;  %v16624_v41 = vld [vmem:[#allocation68_spill] sm:$0xff] }
 0x80a   : > { %v7244_v46 = vmax.f32 %v6988_v23, 0.0  ;;  %v9166_v22 = vadd.f32 %v5736_v31, %v15125_v63  ;;  %v5738_v56 = vpop.f32.mrb[50].mxu1  ;;  %9050 = vmatpush1.bf16.msra.mxu1 %v11054_v42  ;;  %v16625_v31 = vld [vmem:[#allocation71_spill] sm:$0xff] }
 0x80b   : > { %v15367_v13 = vpack.c.bf16 %v7243_v50, %v7239_v15  ;;  %v6735_v47 = vmax.f32 %v9165_v62, 0.0  ;;  %v9167_v29 = vadd.f32 %v5738_v56, %v15121_v28  ;;  %v5740_v38 = vpop.f32.mrb[51].mxu1  ;;  %9035 = vmatprep.subr.bf16.mxu1 %v16413_v21  ;;  %v3122_v15 = vadd.f32 %v16624_v41, %v15128_v8  ;;  %v16626_v41 = vld [vmem:[#allocation70_spill] sm:$0xff] }
 0x80c   : > { %v6736_v60 = vmax.f32 %v9166_v22, 0.0  ;;  %v9168_v48 = vadd.f32 %v5740_v38, %v15125_v63  ;;  %v15376_v51 = vpack.c.bf16 %v7244_v46, %v7240_v34  ;;  %v3124_v56 = vadd.f32 %v16625_v31, %v15130_v57  ;;  %v16627_v31 = vld [vmem:[#allocation73_spill] sm:$0xff] }
 0x80d   : > { %v6991_v23 = vadd.f32 %v6735_v47, %v3118_v49  ;;  %v6739_v50 = vmax.f32 %v9167_v29, 0.0  ;;  %7887 = vmatmul.mubr.bf16.gmra.mrb[156].mxu1 %v15287_v9 }
 0x80e   : > { %v6992_v62 = vadd.f32 %v6736_v60, %v3120_v3  ;;  %v6740_v42 = vmax.f32 %v9168_v48, 0.0  ;;  %7894 = vmatprep.mubr.bf16.mxu1 %v15316_v12  ;;  %9051 = vmatpush1.bf16.msra.mxu1 %v11055_v53  ;;  %v11056_v48 = vld [vmem:[#allocation16 + $0xf8] sm:$0xff]  }
 0x80f   : > { %v6995_v22 = vadd.f32 %v6739_v50, %v3122_v15  ;;  %9036 = vmatprep.subr.bf16.mxu1 %v16413_v21  ;;  %v7247_v49 = vmax.f32 %v6991_v23, 0.0  ;;  %v3128_v15 = vadd.f32 %v16626_v41, %v15128_v8 }
 0x810   : > { %v6996_v34 = vadd.f32 %v6740_v42, %v3124_v56  ;;  %v5744_v46 = vpop.f32.mrb[52].mxu1  ;;  %v7248_v9 = vmax.f32 %v6992_v62, 0.0  ;;  %v3130_v56 = vadd.f32 %v16627_v31, %v15130_v57 }
 0x811   : > { %v7251_v47 = vmax.f32 %v6995_v22, 0.0  ;;  %v9169_v29 = vadd.f32 %v5744_v46, %v15121_v28  ;;  %v5746_v38 = vpop.f32.mrb[53].mxu1 }
 0x812   : > { %v7252_v16 = vmax.f32 %v6996_v34, 0.0  ;;  %v9170_v3 = vadd.f32 %v5746_v38, %v15125_v63  ;;  %v5748_v60 = vpop.f32.mrb[54].mxu1  ;;  %9052 = vmatpush1.bf16.msra.mxu1 %v11056_v48  ;;  %v16628_v34 = vld [vmem:[#allocation72_spill] sm:$0xff] }
 0x813   : > { %v15387_v12 = vpack.c.bf16 %v7251_v47, %v7247_v49  ;;  %v6743_v21 = vmax.f32 %v9169_v29, 0.0  ;;  %v9171_v50 = vadd.f32 %v5748_v60, %v15121_v28  ;;  %v5750_v23 = vpop.f32.mrb[55].mxu1  ;;  %v3132_v46 = vadd.f32 %v16628_v34, %v15128_v8  ;;  %v16629_v29 = vld [vmem:[#allocation75_spill] sm:$0xff] }
 0x814   : > { %v6744_v42 = vmax.f32 %v9170_v3, 0.0  ;;  %v9172_v62 = vadd.f32 %v5750_v23, %v15125_v63  ;;  %v15395_v53 = vpack.c.bf16 %v7252_v16, %v7248_v9  ;;  %v3134_v38 = vadd.f32 %v16629_v29, %v15130_v57 }
 0x815   : > { %v6999_v22 = vadd.f32 %v6743_v21, %v3128_v15  ;;  %v6747_v49 = vmax.f32 %v9171_v50, 0.0  ;;  %7895 = vmatmul.mubr.bf16.gmra.mrb[160].mxu1 %v15307_v17 }
 0x816   : > { %v7000_v47 = vadd.f32 %v6744_v42, %v3130_v56  ;;  %v6748_v60 = vmax.f32 %v9172_v62, 0.0  ;;  %7902 = vmatprep.mubr.bf16.mxu1 %v15336_v5  ;;  %v16630_v42 = vld [vmem:[#allocation74_spill] sm:$0xff] }
 0x817   : > { %v7003_v48 = vadd.f32 %v6747_v49, %v3132_v46  ;;  %v7255_v23 = vmax.f32 %v6999_v22, 0.0  ;;  %v3138_v62 = vadd.f32 %v16630_v42, %v15128_v8  ;;  %v16631_v22 = vld [vmem:[#allocation77_spill] sm:$0xff] }
 0x818   : > { %v7004_v3 = vadd.f32 %v6748_v60, %v3134_v38  ;;  %v5754_v41 = vpop.f32.mrb[56].mxu1  ;;  %v7256_v21 = vmax.f32 %v7000_v47, 0.0  ;;  %v3140_v49 = vadd.f32 %v16631_v22, %v15130_v57 }
 0x819   : > { %v7259_v9 = vmax.f32 %v7003_v48, 0.0  ;;  %v9173_v16 = vadd.f32 %v5754_v41, %v15121_v28  ;;  %v5756_v15 = vpop.f32.mrb[57].mxu1  ;;  %v16632_v48 = vld [vmem:[#allocation76_spill] sm:$0xff] }
 0x81a   : > { %v7260_v31 = vmax.f32 %v7004_v3, 0.0  ;;  %v9174_v50 = vadd.f32 %v5756_v15, %v15125_v63  ;;  %v5758_v17 = vpop.f32.mrb[58].mxu1  ;;  %v3142_v3 = vadd.f32 %v16632_v48, %v15128_v8 }
 0x81b   : > { %v15405_v56 = vpack.c.bf16 %v7259_v9, %v7255_v23  ;;  %v6751_v34 = vmax.f32 %v9173_v16, 0.0  ;;  %v9175_v5 = vadd.f32 %v5758_v17, %v15121_v28  ;;  %v5760_v46 = vpop.f32.mrb[59].mxu1  ;;  %v16633_v9 = vld [vmem:[#allocation79_spill] sm:$0xff] }
 0x81c   : > { %v6752_v29 = vmax.f32 %v9174_v50, 0.0  ;;  %v9176_v38 = vadd.f32 %v5760_v46, %v15125_v63  ;;  %v15413_v47 = vpack.c.bf16 %v7260_v31, %v7256_v21  ;;  %v3144_v16 = vadd.f32 %v16633_v9, %v15130_v57 }
 0x81d   : > { %v7007_v60 = vadd.f32 %v6751_v34, %v3138_v62  ;;  %v6755_v41 = vmax.f32 %v9175_v5, 0.0  ;;  %7903 = vmatmul.mubr.bf16.gmra.mrb[164].mxu1 %v15327_v61 }
 0x81e   : > { %v7008_v23 = vadd.f32 %v6752_v29, %v3140_v49  ;;  %v6756_v15 = vmax.f32 %v9176_v38, 0.0  ;;  %7910 = vmatprep.mubr.bf16.mxu1 %v15356_v10  ;;  %v16634_v29 = vld [vmem:[#allocation78_spill] sm:$0xff] }
 0x81f   : > { %v7011_v17 = vadd.f32 %v6755_v41, %v3142_v3  ;;  %v7263_v46 = vmax.f32 %v7007_v60, 0.0  ;;  %v3148_v38 = vadd.f32 %v16634_v29, %v15128_v8  ;;  %v16635_v60 = vld [vmem:[#allocation81_spill] sm:$0xff] }
 0x820   : > { %v7012_v50 = vadd.f32 %v6756_v15, %v3144_v16  ;;  %v5764_v42 = vpop.f32.mrb[60].mxu1  ;;  %v7264_v34 = vmax.f32 %v7008_v23, 0.0  ;;  %v3150_v41 = vadd.f32 %v16635_v60, %v15130_v57 }
 0x821   : > { %v7267_v21 = vmax.f32 %v7011_v17, 0.0  ;;  %v9177_v31 = vadd.f32 %v5764_v42, %v15121_v28  ;;  %v5766_v62 = vpop.f32.mrb[61].mxu1  ;;  %v16636_v17 = vld [vmem:[#allocation80_spill] sm:$0xff] }
 0x822   : > { %v7268_v22 = vmax.f32 %v7012_v50, 0.0  ;;  %v9178_v5 = vadd.f32 %v5766_v62, %v15125_v63  ;;  %v5768_v61 = vpop.f32.mrb[62].mxu1  ;;  %v3152_v50 = vadd.f32 %v16636_v17, %v15128_v8 }
 0x823   : > { %v15423_v49 = vpack.c.bf16 %v7267_v21, %v7263_v46  ;;  %v6759_v48 = vmax.f32 %v9177_v31, 0.0  ;;  %v9179_v10 = vadd.f32 %v5768_v61, %v15121_v28  ;;  %v5770_v3 = vpop.f32.mrb[63].mxu1  ;;  %v16637_v21 = vld [vmem:[#allocation83_spill] sm:$0xff] }
 0x824   : > { %v6760_v9 = vmax.f32 %v9178_v5, 0.0  ;;  %v9180_v16 = vadd.f32 %v5770_v3, %v15125_v63  ;;  %v15431_v23 = vpack.c.bf16 %v7268_v22, %v7264_v34  ;;  %v3154_v31 = vadd.f32 %v16637_v21, %v15130_v57 }
 0x825   : > { %v7015_v15 = vadd.f32 %v6759_v48, %v3148_v38  ;;  %v6763_v42 = vmax.f32 %v9179_v10, 0.0  ;;  %7911 = vmatmul.mubr.bf16.gmra.mrb[168].mxu1 %v15347_v43 }
 0x826   : > { %v7016_v46 = vadd.f32 %v6760_v9, %v3150_v41  ;;  %v6764_v62 = vmax.f32 %v9180_v16, 0.0  ;;  %7918 = vmatprep.mubr.bf16.mxu1 %v15376_v51  ;;  %v16638_v9 = vld [vmem:[#allocation82_spill] sm:$0xff] }
 0x827   : > { %v7019_v61 = vadd.f32 %v6763_v42, %v3152_v50  ;;  %v7271_v3 = vmax.f32 %v7015_v15, 0.0  ;;  %v3158_v16 = vadd.f32 %v16638_v9, %v15128_v8  ;;  %v16639_v15 = vld [vmem:[#allocation85_spill] sm:$0xff] }
 0x828   : > { %v7020_v5 = vadd.f32 %v6764_v62, %v3154_v31  ;;  %v5774_v29 = vpop.f32.mrb[64].mxu1  ;;  %v7272_v48 = vmax.f32 %v7016_v46, 0.0  ;;  %v3160_v42 = vadd.f32 %v16639_v15, %v15130_v57 }
 0x829   : > { %v7275_v34 = vmax.f32 %v7019_v61, 0.0  ;;  %v9181_v22 = vadd.f32 %v5774_v29, %v15121_v28  ;;  %v5776_v38 = vpop.f32.mrb[65].mxu1  ;;  %v16640_v61 = vld [vmem:[#allocation84_spill] sm:$0xff] }
 0x82a   : > { %v7276_v60 = vmax.f32 %v7020_v5, 0.0  ;;  %v9182_v10 = vadd.f32 %v5776_v38, %v15125_v63  ;;  %v5778_v43 = vpop.f32.mrb[66].mxu1  ;;  %v3162_v5 = vadd.f32 %v16640_v61, %v15128_v8 }
 0x82b   : > { %v15441_v41 = vpack.c.bf16 %v7275_v34, %v7271_v3  ;;  %v6767_v17 = vmax.f32 %v9181_v22, 0.0  ;;  %v9183_v51 = vadd.f32 %v5778_v43, %v15121_v28  ;;  %v5780_v50 = vpop.f32.mrb[67].mxu1  ;;  %v16641_v34 = vld [vmem:[#allocation87_spill] sm:$0xff] }
 0x82c   : > { %v6768_v21 = vmax.f32 %v9182_v10, 0.0  ;;  %v9184_v31 = vadd.f32 %v5780_v50, %v15125_v63  ;;  %v15449_v46 = vpack.c.bf16 %v7276_v60, %v7272_v48  ;;  %v3164_v22 = vadd.f32 %v16641_v34, %v15130_v57 }
 0x82d   : > { %v7023_v62 = vadd.f32 %v6767_v17, %v3158_v16  ;;  %v6771_v29 = vmax.f32 %v9183_v51, 0.0  ;;  %7919 = vmatmul.mubr.bf16.gmra.mrb[172].mxu1 %v15367_v13 }
 0x82e   : > { %v7024_v3 = vadd.f32 %v6768_v21, %v3160_v42  ;;  %v6772_v38 = vmax.f32 %v9184_v31, 0.0  ;;  %7926 = vmatprep.mubr.bf16.mxu1 %v15395_v53  ;;  %v16642_v21 = vld [vmem:[#allocation86_spill] sm:$0xff] }
 0x82f   : > { %v7027_v43 = vadd.f32 %v6771_v29, %v3162_v5  ;;  %v7279_v50 = vmax.f32 %v7023_v62, 0.0  ;;  %v3168_v31 = vadd.f32 %v16642_v21, %v15128_v8  ;;  %v16643_v62 = vld [vmem:[#allocation89_spill] sm:$0xff] }
 0x830   : > { %v7028_v10 = vadd.f32 %v6772_v38, %v3164_v22  ;;  %v5784_v9 = vpop.f32.mrb[68].mxu1  ;;  %v7280_v17 = vmax.f32 %v7024_v3, 0.0  ;;  %v3170_v29 = vadd.f32 %v16643_v62, %v15130_v57 }
 0x831   : > { %v7283_v48 = vmax.f32 %v7027_v43, 0.0  ;;  %v9185_v60 = vadd.f32 %v5784_v9, %v15121_v28  ;;  %v5786_v16 = vpop.f32.mrb[69].mxu1  ;;  %v16644_v43 = vld [vmem:[#allocation88_spill] sm:$0xff] }
 0x832   : > { %v7284_v15 = vmax.f32 %v7028_v10, 0.0  ;;  %v9186_v51 = vadd.f32 %v5786_v16, %v15125_v63  ;;  %v5788_v13 = vpop.f32.mrb[70].mxu1  ;;  %v3172_v10 = vadd.f32 %v16644_v43, %v15128_v8 }
 0x833   : > { %v15459_v42 = vpack.c.bf16 %v7283_v48, %v7279_v50  ;;  %v6775_v61 = vmax.f32 %v9185_v60, 0.0  ;;  %v9187_v53 = vadd.f32 %v5788_v13, %v15121_v28  ;;  %v5790_v5 = vpop.f32.mrb[71].mxu1  ;;  %v16645_v48 = vld [vmem:[#allocation91_spill] sm:$0xff] }
 0x834   : > { %v6776_v34 = vmax.f32 %v9186_v51, 0.0  ;;  %v9188_v22 = vadd.f32 %v5790_v5, %v15125_v63  ;;  %v15467_v3 = vpack.c.bf16 %v7284_v15, %v7280_v17  ;;  %v3174_v60 = vadd.f32 %v16645_v48, %v15130_v57 }
 0x835   : > { %v7031_v38 = vadd.f32 %v6775_v61, %v3168_v31  ;;  %v6779_v9 = vmax.f32 %v9187_v53, 0.0  ;;  %7927 = vmatmul.mubr.bf16.gmra.mrb[176].mxu1 %v15387_v12 }
 0x836   : > { %v7032_v50 = vadd.f32 %v6776_v34, %v3170_v29  ;;  %v6780_v16 = vmax.f32 %v9188_v22, 0.0  ;;  %7934 = vmatprep.mubr.bf16.mxu1 %v15413_v47  ;;  %v16646_v34 = vld [vmem:[#allocation90_spill] sm:$0xff] }
 0x837   : > { %v7035_v13 = vadd.f32 %v6779_v9, %v3172_v10  ;;  %v7287_v5 = vmax.f32 %v7031_v38, 0.0  ;;  %v3178_v22 = vadd.f32 %v16646_v34, %v15128_v8  ;;  %v16647_v38 = vld [vmem:[#allocation93_spill] sm:$0xff] }
 0x838   : > { %v7036_v51 = vadd.f32 %v6780_v16, %v3174_v60  ;;  %v5794_v21 = vpop.f32.mrb[72].mxu1  ;;  %v7288_v61 = vmax.f32 %v7032_v50, 0.0  ;;  %v3180_v9 = vadd.f32 %v16647_v38, %v15130_v57 }
 0x839   : > { %v7291_v17 = vmax.f32 %v7035_v13, 0.0  ;;  %v9189_v15 = vadd.f32 %v5794_v21, %v15121_v28  ;;  %v5796_v31 = vpop.f32.mrb[73].mxu1  ;;  %v16648_v13 = vld [vmem:[#allocation92_spill] sm:$0xff] }
 0x83a   : > { %v7292_v62 = vmax.f32 %v7036_v51, 0.0  ;;  %v9190_v53 = vadd.f32 %v5796_v31, %v15125_v63  ;;  %v5798_v12 = vpop.f32.mrb[74].mxu1  ;;  %v3182_v51 = vadd.f32 %v16648_v13, %v15128_v8 }
 0x83b   : > { %v15477_v29 = vpack.c.bf16 %v7291_v17, %v7287_v5  ;;  %v6783_v43 = vmax.f32 %v9189_v15, 0.0  ;;  %v9191_v47 = vadd.f32 %v5798_v12, %v15121_v28  ;;  %v5800_v10 = vpop.f32.mrb[75].mxu1  ;;  %v16649_v17 = vld [vmem:[#allocation95_spill] sm:$0xff] }
 0x83c   : > { %v6784_v48 = vmax.f32 %v9190_v53, 0.0  ;;  %v9192_v60 = vadd.f32 %v5800_v10, %v15125_v63  ;;  %v15485_v50 = vpack.c.bf16 %v7292_v62, %v7288_v61  ;;  %v3184_v15 = vadd.f32 %v16649_v17, %v15130_v57 }
 0x83d   : > { %v7039_v16 = vadd.f32 %v6783_v43, %v3178_v22  ;;  %v6787_v21 = vmax.f32 %v9191_v47, 0.0  ;;  %7935 = vmatmul.mubr.bf16.gmra.mrb[180].mxu1 %v15405_v56 }
 0x83e   : > { %v7040_v5 = vadd.f32 %v6784_v48, %v3180_v9  ;;  %v6788_v31 = vmax.f32 %v9192_v60, 0.0  ;;  %7942 = vmatprep.mubr.bf16.mxu1 %v15431_v23  ;;  %v16650_v48 = vld [vmem:[#allocation94_spill] sm:$0xff] }
 0x83f   : > { %v7043_v12 = vadd.f32 %v6787_v21, %v3182_v51  ;;  %v7295_v10 = vmax.f32 %v7039_v16, 0.0  ;;  %v3188_v60 = vadd.f32 %v16650_v48, %v15128_v8  ;;  %v16651_v16 = vld [vmem:[#allocation97_spill] sm:$0xff] }
 0x840   : > { %v7044_v53 = vadd.f32 %v6788_v31, %v3184_v15  ;;  %v5804_v34 = vpop.f32.mrb[76].mxu1  ;;  %v7296_v43 = vmax.f32 %v7040_v5, 0.0  ;;  %v3190_v21 = vadd.f32 %v16651_v16, %v15130_v57 }
 0x841   : > { %v7299_v61 = vmax.f32 %v7043_v12, 0.0  ;;  %v9193_v62 = vadd.f32 %v5804_v34, %v15121_v28  ;;  %v5806_v22 = vpop.f32.mrb[77].mxu1  ;;  %v16652_v12 = vld [vmem:[#allocation96_spill] sm:$0xff] }
 0x842   : > { %v7300_v38 = vmax.f32 %v7044_v53, 0.0  ;;  %v9194_v47 = vadd.f32 %v5806_v22, %v15125_v63  ;;  %v5808_v56 = vpop.f32.mrb[78].mxu1  ;;  %v3192_v53 = vadd.f32 %v16652_v12, %v15128_v8 }
 0x843   : > { %v15495_v9 = vpack.c.bf16 %v7299_v61, %v7295_v10  ;;  %v6791_v13 = vmax.f32 %v9193_v62, 0.0  ;;  %v9195_v23 = vadd.f32 %v5808_v56, %v15121_v28  ;;  %v5810_v51 = vpop.f32.mrb[79].mxu1  ;;  %v16653_v61 = vld [vmem:[#allocation99_spill] sm:$0xff] }
 0x844   : > { %v6792_v17 = vmax.f32 %v9194_v47, 0.0  ;;  %v9196_v15 = vadd.f32 %v5810_v51, %v15125_v63  ;;  %v15503_v5 = vpack.c.bf16 %v7300_v38, %v7296_v43  ;;  %v3194_v62 = vadd.f32 %v16653_v61, %v15130_v57 }
 0x845   : > { %v7047_v31 = vadd.f32 %v6791_v13, %v3188_v60  ;;  %v6795_v34 = vmax.f32 %v9195_v23, 0.0  ;;  %7943 = vmatmul.mubr.bf16.gmra.mrb[184].mxu1 %v15423_v49 }
 0x846   : > { %v7048_v10 = vadd.f32 %v6792_v17, %v3190_v21  ;;  %v6796_v22 = vmax.f32 %v9196_v15, 0.0  ;;  %7950 = vmatprep.mubr.bf16.mxu1 %v15449_v46  ;;  %v16654_v17 = vld [vmem:[#allocation98_spill] sm:$0xff] }
 0x847   : > { %v7051_v56 = vadd.f32 %v6795_v34, %v3192_v53  ;;  %v7303_v51 = vmax.f32 %v7047_v31, 0.0  ;;  %v3198_v15 = vadd.f32 %v16654_v17, %v15128_v8  ;;  %v16655_v31 = vld [vmem:[#allocation101_spill] sm:$0xff] }
 0x848   : > { %v7052_v47 = vadd.f32 %v6796_v22, %v3194_v62  ;;  %v5814_v48 = vpop.f32.mrb[80].mxu1  ;;  %v7304_v13 = vmax.f32 %v7048_v10, 0.0  ;;  %v3200_v34 = vadd.f32 %v16655_v31, %v15130_v57 }
 0x849   : > { %v7307_v43 = vmax.f32 %v7051_v56, 0.0  ;;  %v9197_v38 = vadd.f32 %v5814_v48, %v15121_v28  ;;  %v5816_v60 = vpop.f32.mrb[81].mxu1  ;;  %v16656_v56 = vld [vmem:[#allocation100_spill] sm:$0xff] }
 0x84a   : > { %v7308_v16 = vmax.f32 %v7052_v47, 0.0  ;;  %v9198_v23 = vadd.f32 %v5816_v60, %v15125_v63  ;;  %v5818_v49 = vpop.f32.mrb[82].mxu1  ;;  %v3202_v47 = vadd.f32 %v16656_v56, %v15128_v8 }
 0x84b   : > { %v15513_v21 = vpack.c.bf16 %v7307_v43, %v7303_v51  ;;  %v6799_v12 = vmax.f32 %v9197_v38, 0.0  ;;  %v9199_v46 = vadd.f32 %v5818_v49, %v15121_v28  ;;  %v5820_v53 = vpop.f32.mrb[83].mxu1  ;;  %v16657_v43 = vld [vmem:[#allocation103_spill] sm:$0xff] }
 0x84c   : > { %v6800_v61 = vmax.f32 %v9198_v23, 0.0  ;;  %v9200_v62 = vadd.f32 %v5820_v53, %v15125_v63  ;;  %v15521_v10 = vpack.c.bf16 %v7308_v16, %v7304_v13  ;;  %v3204_v38 = vadd.f32 %v16657_v43, %v15130_v57 }
 0x84d   : > { %v7055_v22 = vadd.f32 %v6799_v12, %v3198_v15  ;;  %v6803_v48 = vmax.f32 %v9199_v46, 0.0  ;;  %7951 = vmatmul.mubr.bf16.gmra.mrb[188].mxu1 %v15441_v41 }
 0x84e   : > { %v7056_v51 = vadd.f32 %v6800_v61, %v3200_v34  ;;  %v6804_v60 = vmax.f32 %v9200_v62, 0.0  ;;  %7958 = vmatprep.mubr.bf16.mxu1 %v15467_v3  ;;  %v16658_v61 = vld [vmem:[#allocation102_spill] sm:$0xff] }
 0x84f   : > { %v7059_v49 = vadd.f32 %v6803_v48, %v3202_v47  ;;  %v7311_v53 = vmax.f32 %v7055_v22, 0.0  ;;  %v3208_v62 = vadd.f32 %v16658_v61, %v15128_v8  ;;  %v16659_v22 = vld [vmem:[#allocation105_spill] sm:$0xff] }
 0x850   : > { %v7060_v23 = vadd.f32 %v6804_v60, %v3204_v38  ;;  %v5824_v17 = vpop.f32.mrb[84].mxu1  ;;  %v7312_v12 = vmax.f32 %v7056_v51, 0.0  ;;  %v3210_v48 = vadd.f32 %v16659_v22, %v15130_v57 }
 0x851   : > { %v7315_v13 = vmax.f32 %v7059_v49, 0.0  ;;  %v9201_v16 = vadd.f32 %v5824_v17, %v15121_v28  ;;  %v5826_v15 = vpop.f32.mrb[85].mxu1  ;;  %v16660_v49 = vld [vmem:[#allocation104_spill] sm:$0xff] }
 0x852   : > { %v7316_v31 = vmax.f32 %v7060_v23, 0.0  ;;  %v9202_v46 = vadd.f32 %v5826_v15, %v15125_v63  ;;  %v5828_v41 = vpop.f32.mrb[86].mxu1  ;;  %v3212_v23 = vadd.f32 %v16660_v49, %v15128_v8 }
 0x853   : > { %v15531_v34 = vpack.c.bf16 %v7315_v13, %v7311_v53  ;;  %v6807_v56 = vmax.f32 %v9201_v16, 0.0  ;;  %v9203_v3 = vadd.f32 %v5828_v41, %v15121_v28  ;;  %v5830_v47 = vpop.f32.mrb[87].mxu1  ;;  %v16661_v13 = vld [vmem:[#allocation107_spill] sm:$0xff] }
 0x854   : > { %v6808_v43 = vmax.f32 %v9202_v46, 0.0  ;;  %v9204_v38 = vadd.f32 %v5830_v47, %v15125_v63  ;;  %v15539_v51 = vpack.c.bf16 %v7316_v31, %v7312_v12  ;;  %v3214_v16 = vadd.f32 %v16661_v13, %v15130_v57 }
 0x855   : > { %v7063_v60 = vadd.f32 %v6807_v56, %v3208_v62  ;;  %v6811_v17 = vmax.f32 %v9203_v3, 0.0  ;;  %7959 = vmatmul.mubr.bf16.gmra.mrb[192].mxu1 %v15459_v42 }
 0x856   : > { %v7064_v53 = vadd.f32 %v6808_v43, %v3210_v48  ;;  %v6812_v15 = vmax.f32 %v9204_v38, 0.0  ;;  %7966 = vmatprep.mubr.bf16.mxu1 %v15485_v50  ;;  %v16662_v43 = vld [vmem:[#allocation106_spill] sm:$0xff] }
 0x857   : > { %v7067_v41 = vadd.f32 %v6811_v17, %v3212_v23  ;;  %v7319_v47 = vmax.f32 %v7063_v60, 0.0  ;;  %v3218_v38 = vadd.f32 %v16662_v43, %v15128_v8  ;;  %v16663_v60 = vld [vmem:[#allocation109_spill] sm:$0xff] }
 0x858   : > { %v7068_v46 = vadd.f32 %v6812_v15, %v3214_v16  ;;  %v5834_v61 = vpop.f32.mrb[88].mxu1  ;;  %v7320_v56 = vmax.f32 %v7064_v53, 0.0  ;;  %v3220_v17 = vadd.f32 %v16663_v60, %v15130_v57 }
 0x859   : > { %v7323_v12 = vmax.f32 %v7067_v41, 0.0  ;;  %v9205_v31 = vadd.f32 %v5834_v61, %v15121_v28  ;;  %v5836_v62 = vpop.f32.mrb[89].mxu1  ;;  %v16664_v41 = vld [vmem:[#allocation108_spill] sm:$0xff] }
 0x85a   : > { %v7324_v22 = vmax.f32 %v7068_v46, 0.0  ;;  %v9206_v3 = vadd.f32 %v5836_v62, %v15125_v63  ;;  %v5838_v42 = vpop.f32.mrb[90].mxu1  ;;  %v3222_v46 = vadd.f32 %v16664_v41, %v15128_v8 }
 0x85b   : > { %v15549_v48 = vpack.c.bf16 %v7323_v12, %v7319_v47  ;;  %v6815_v49 = vmax.f32 %v9205_v31, 0.0  ;;  %v9207_v50 = vadd.f32 %v5838_v42, %v15121_v28  ;;  %v5840_v23 = vpop.f32.mrb[91].mxu1  ;;  %v16665_v12 = vld [vmem:[#allocation111_spill] sm:$0xff] }
 0x85c   : > { %v6816_v13 = vmax.f32 %v9206_v3, 0.0  ;;  %v9208_v16 = vadd.f32 %v5840_v23, %v15125_v63  ;;  %v15557_v53 = vpack.c.bf16 %v7324_v22, %v7320_v56  ;;  %v3224_v31 = vadd.f32 %v16665_v12, %v15130_v57 }
 0x85d   : > { %v7071_v15 = vadd.f32 %v6815_v49, %v3218_v38  ;;  %v6819_v61 = vmax.f32 %v9207_v50, 0.0  ;;  %7967 = vmatmul.mubr.bf16.gmra.mrb[196].mxu1 %v15477_v29 }
 0x85e   : > { %v7072_v47 = vadd.f32 %v6816_v13, %v3220_v17  ;;  %v6820_v62 = vmax.f32 %v9208_v16, 0.0  ;;  %7974 = vmatprep.mubr.bf16.mxu1 %v15503_v5  ;;  %v16666_v13 = vld [vmem:[#allocation110_spill] sm:$0xff] }
 0x85f   : > { %v7075_v42 = vadd.f32 %v6819_v61, %v3222_v46  ;;  %v7327_v23 = vmax.f32 %v7071_v15, 0.0  ;;  %v3228_v16 = vadd.f32 %v16666_v13, %v15128_v8  ;;  %v16667_v15 = vld [vmem:[#allocation113_spill] sm:$0xff] }
 0x860   : > { %v7076_v3 = vadd.f32 %v6820_v62, %v3224_v31  ;;  %v5844_v43 = vpop.f32.mrb[92].mxu1  ;;  %v7328_v49 = vmax.f32 %v7072_v47, 0.0  ;;  %v3230_v61 = vadd.f32 %v16667_v15, %v15130_v57 }
 0x861   : > { %v7331_v56 = vmax.f32 %v7075_v42, 0.0  ;;  %v9209_v22 = vadd.f32 %v5844_v43, %v15121_v28  ;;  %v5846_v38 = vpop.f32.mrb[93].mxu1  ;;  %v16668_v42 = vld [vmem:[#allocation112_spill] sm:$0xff] }
 0x862   : > { %v7332_v60 = vmax.f32 %v7076_v3, 0.0  ;;  %v9210_v50 = vadd.f32 %v5846_v38, %v15125_v63  ;;  %v5848_v29 = vpop.f32.mrb[94].mxu1  ;;  %v3232_v3 = vadd.f32 %v16668_v42, %v15128_v8 }
 0x863   : > { %v15567_v17 = vpack.c.bf16 %v7331_v56, %v7327_v23  ;;  %v6823_v41 = vmax.f32 %v9209_v22, 0.0  ;;  %v9211_v5 = vadd.f32 %v5848_v29, %v15121_v28  ;;  %v5850_v46 = vpop.f32.mrb[95].mxu1  ;;  %v16669_v56 = vld [vmem:[#allocation115_spill] sm:$0xff] }
 0x864   : > { %v6824_v12 = vmax.f32 %v9210_v50, 0.0  ;;  %v9212_v31 = vadd.f32 %v5850_v46, %v15125_v63  ;;  %v15575_v47 = vpack.c.bf16 %v7332_v60, %v7328_v49  ;;  %v3234_v22 = vadd.f32 %v16669_v56, %v15130_v57 }
 0x865   : > { %v7079_v62 = vadd.f32 %v6823_v41, %v3228_v16  ;;  %v6827_v43 = vmax.f32 %v9211_v5, 0.0  ;;  %7975 = vmatmul.mubr.bf16.gmra.mrb[200].mxu1 %v15495_v9 }
 0x866   : > { %v7080_v23 = vadd.f32 %v6824_v12, %v3230_v61  ;;  %v6828_v38 = vmax.f32 %v9212_v31, 0.0  ;;  %7982 = vmatprep.mubr.bf16.mxu1 %v15521_v10  ;;  %v16670_v12 = vld [vmem:[#allocation114_spill] sm:$0xff] }
 0x867   : > { %v7083_v29 = vadd.f32 %v6827_v43, %v3232_v3  ;;  %v7335_v46 = vmax.f32 %v7079_v62, 0.0  ;;  %v3238_v31 = vadd.f32 %v16670_v12, %v15128_v8  ;;  %v16671_v62 = vld [vmem:[#allocation117_spill] sm:$0xff] }
 0x868   : > { %v7084_v50 = vadd.f32 %v6828_v38, %v3234_v22  ;;  %v5854_v13 = vpop.f32.mrb[96].mxu1  ;;  %v7336_v41 = vmax.f32 %v7080_v23, 0.0  ;;  %v3240_v43 = vadd.f32 %v16671_v62, %v15130_v57 }
 0x869   : > { %v7339_v49 = vmax.f32 %v7083_v29, 0.0  ;;  %v9213_v60 = vadd.f32 %v5854_v13, %v15121_v28  ;;  %v5856_v16 = vpop.f32.mrb[97].mxu1  ;;  %v16672_v29 = vld [vmem:[#allocation116_spill] sm:$0xff] }
 0x86a   : > { %v7340_v15 = vmax.f32 %v7084_v50, 0.0  ;;  %v9214_v5 = vadd.f32 %v5856_v16, %v15125_v63  ;;  %v5858_v9 = vpop.f32.mrb[98].mxu1  ;;  %v3242_v50 = vadd.f32 %v16672_v29, %v15128_v8 }
 0x86b   : > { %v15585_v61 = vpack.c.bf16 %v7339_v49, %v7335_v46  ;;  %v6831_v42 = vmax.f32 %v9213_v60, 0.0  ;;  %v9215_v10 = vadd.f32 %v5858_v9, %v15121_v28  ;;  %v5860_v3 = vpop.f32.mrb[99].mxu1  ;;  %v16673_v49 = vld [vmem:[#allocation119_spill] sm:$0xff] }
 0x86c   : > { %v6832_v56 = vmax.f32 %v9214_v5, 0.0  ;;  %v9216_v22 = vadd.f32 %v5860_v3, %v15125_v63  ;;  %v15593_v23 = vpack.c.bf16 %v7340_v15, %v7336_v41  ;;  %v3244_v60 = vadd.f32 %v16673_v49, %v15130_v57 }
 0x86d   : > { %v7087_v38 = vadd.f32 %v6831_v42, %v3238_v31  ;;  %v6835_v13 = vmax.f32 %v9215_v10, 0.0  ;;  %7983 = vmatmul.mubr.bf16.gmra.mrb[204].mxu1 %v15513_v21 }
 0x86e   : > { %v7088_v46 = vadd.f32 %v6832_v56, %v3240_v43  ;;  %v6836_v16 = vmax.f32 %v9216_v22, 0.0  ;;  %7990 = vmatprep.mubr.bf16.mxu1 %v15539_v51  ;;  %v16674_v56 = vld [vmem:[#allocation118_spill] sm:$0xff] }
 0x86f   : > { %v7091_v9 = vadd.f32 %v6835_v13, %v3242_v50  ;;  %v7343_v3 = vmax.f32 %v7087_v38, 0.0  ;;  %v3248_v22 = vadd.f32 %v16674_v56, %v15128_v8  ;;  %v16675_v38 = vld [vmem:[#allocation121_spill] sm:$0xff] }
 0x870   : > { %v7092_v5 = vadd.f32 %v6836_v16, %v3244_v60  ;;  %v5864_v12 = vpop.f32.mrb[100].mxu1  ;;  %v7344_v42 = vmax.f32 %v7088_v46, 0.0  ;;  %v3250_v13 = vadd.f32 %v16675_v38, %v15130_v57 }
 0x871   : > { %v7347_v41 = vmax.f32 %v7091_v9, 0.0  ;;  %v9217_v15 = vadd.f32 %v5864_v12, %v15121_v28  ;;  %v5866_v31 = vpop.f32.mrb[101].mxu1  ;;  %v16676_v9 = vld [vmem:[#allocation120_spill] sm:$0xff] }
 0x872   : > { %v7348_v62 = vmax.f32 %v7092_v5, 0.0  ;;  %v9218_v10 = vadd.f32 %v5866_v31, %v15125_v63  ;;  %v5868_v21 = vpop.f32.mrb[102].mxu1  ;;  %v3252_v5 = vadd.f32 %v16676_v9, %v15128_v8 }
 0x873   : > { %v15603_v43 = vpack.c.bf16 %v7347_v41, %v7343_v3  ;;  %v6839_v29 = vmax.f32 %v9217_v15, 0.0  ;;  %v9219_v51 = vadd.f32 %v5868_v21, %v15121_v28  ;;  %v5870_v50 = vpop.f32.mrb[103].mxu1  ;;  %v16677_v41 = vld [vmem:[#allocation123_spill] sm:$0xff] }
 0x874   : > { %v6840_v49 = vmax.f32 %v9218_v10, 0.0  ;;  %v9220_v60 = vadd.f32 %v5870_v50, %v15125_v63  ;;  %v15611_v46 = vpack.c.bf16 %v7348_v62, %v7344_v42  ;;  %v3254_v15 = vadd.f32 %v16677_v41, %v15130_v57 }
 0x875   : > { %v7095_v16 = vadd.f32 %v6839_v29, %v3248_v22  ;;  %v6843_v12 = vmax.f32 %v9219_v51, 0.0  ;;  %7991 = vmatmul.mubr.bf16.gmra.mrb[208].mxu1 %v15531_v34 }
 0x876   : > { %v7096_v3 = vadd.f32 %v6840_v49, %v3250_v13  ;;  %v6844_v31 = vmax.f32 %v9220_v60, 0.0  ;;  %7998 = vmatprep.mubr.bf16.mxu1 %v15557_v53  ;;  %v16678_v49 = vld [vmem:[#allocation122_spill] sm:$0xff] }
 0x877   : > { %v7099_v21 = vadd.f32 %v6843_v12, %v3252_v5  ;;  %v7351_v50 = vmax.f32 %v7095_v16, 0.0  ;;  %v3258_v60 = vadd.f32 %v16678_v49, %v15128_v8  ;;  %v16679_v16 = vld [vmem:[#allocation125_spill] sm:$0xff] }
 0x878   : > { %v7100_v10 = vadd.f32 %v6844_v31, %v3254_v15  ;;  %v5874_v56 = vpop.f32.mrb[104].mxu1  ;;  %v7352_v29 = vmax.f32 %v7096_v3, 0.0  ;;  %v3260_v12 = vadd.f32 %v16679_v16, %v15130_v57 }
 0x879   : > { %v7355_v42 = vmax.f32 %v7099_v21, 0.0  ;;  %v9221_v62 = vadd.f32 %v5874_v56, %v15121_v28  ;;  %v5876_v22 = vpop.f32.mrb[105].mxu1  ;;  %v16680_v21 = vld [vmem:[#allocation124_spill] sm:$0xff] }
 0x87a   : > { %v7356_v38 = vmax.f32 %v7100_v10, 0.0  ;;  %v9222_v51 = vadd.f32 %v5876_v22, %v15125_v63  ;;  %v5878_v34 = vpop.f32.mrb[106].mxu1  ;;  %v3262_v10 = vadd.f32 %v16680_v21, %v15128_v8 }
 0x87b   : > { %v15621_v13 = vpack.c.bf16 %v7355_v42, %v7351_v50  ;;  %v6847_v9 = vmax.f32 %v9221_v62, 0.0  ;;  %v9223_v53 = vadd.f32 %v5878_v34, %v15121_v28  ;;  %v5880_v5 = vpop.f32.mrb[107].mxu1  ;;  %v16681_v42 = vld [vmem:[#allocation127_spill] sm:$0xff] }
 0x87c   : > { %v6848_v41 = vmax.f32 %v9222_v51, 0.0  ;;  %v9224_v15 = vadd.f32 %v5880_v5, %v15125_v63  ;;  %v15629_v3 = vpack.c.bf16 %v7356_v38, %v7352_v29  ;;  %v3264_v62 = vadd.f32 %v16681_v42, %v15130_v57 }
 0x87d   : > { %v7103_v31 = vadd.f32 %v6847_v9, %v3258_v60  ;;  %v6851_v56 = vmax.f32 %v9223_v53, 0.0  ;;  %7999 = vmatmul.mubr.bf16.gmra.mrb[212].mxu1 %v15549_v48 }
 0x87e   : > { %v7104_v50 = vadd.f32 %v6848_v41, %v3260_v12  ;;  %v6852_v22 = vmax.f32 %v9224_v15, 0.0  ;;  %8006 = vmatprep.mubr.bf16.mxu1 %v15575_v47  ;;  %v16682_v41 = vld [vmem:[#allocation126_spill] sm:$0xff] }
 0x87f   : > { %v7107_v34 = vadd.f32 %v6851_v56, %v3262_v10  ;;  %v7359_v5 = vmax.f32 %v7103_v31, 0.0  ;;  %v3268_v15 = vadd.f32 %v16682_v41, %v15128_v8  ;;  %v16683_v31 = vld [vmem:[#allocation129_spill] sm:$0xff] }
 0x880   : > { %v7108_v51 = vadd.f32 %v6852_v22, %v3264_v62  ;;  %v5884_v49 = vpop.f32.mrb[108].mxu1  ;;  %v7360_v9 = vmax.f32 %v7104_v50, 0.0  ;;  %v3270_v56 = vadd.f32 %v16683_v31, %v15130_v57 }
 0x881   : > { %v7363_v29 = vmax.f32 %v7107_v34, 0.0  ;;  %v9225_v38 = vadd.f32 %v5884_v49, %v15121_v28  ;;  %v5886_v60 = vpop.f32.mrb[109].mxu1  ;;  %v16684_v34 = vld [vmem:[#allocation128_spill] sm:$0xff] }
 0x882   : > { %v7364_v16 = vmax.f32 %v7108_v51, 0.0  ;;  %v9226_v53 = vadd.f32 %v5886_v60, %v15125_v63  ;;  %v5888_v48 = vpop.f32.mrb[110].mxu1  ;;  %v3272_v51 = vadd.f32 %v16684_v34, %v15128_v8 }
 0x883   : > { %v15639_v12 = vpack.c.bf16 %v7363_v29, %v7359_v5  ;;  %v6855_v21 = vmax.f32 %v9225_v38, 0.0  ;;  %v9227_v47 = vadd.f32 %v5888_v48, %v15121_v28  ;;  %v5890_v10 = vpop.f32.mrb[111].mxu1  ;;  %v16685_v29 = vld [vmem:[#allocation131_spill] sm:$0xff] }
 0x884   : > { %v6856_v42 = vmax.f32 %v9226_v53, 0.0  ;;  %v9228_v62 = vadd.f32 %v5890_v10, %v15125_v63  ;;  %v15647_v50 = vpack.c.bf16 %v7364_v16, %v7360_v9  ;;  %v3274_v38 = vadd.f32 %v16685_v29, %v15130_v57 }
 0x885   : > { %v7111_v22 = vadd.f32 %v6855_v21, %v3268_v15  ;;  %v6859_v49 = vmax.f32 %v9227_v47, 0.0  ;;  %8007 = vmatmul.mubr.bf16.gmra.mrb[216].mxu1 %v15567_v17 }
 0x886   : > { %v7112_v5 = vadd.f32 %v6856_v42, %v3270_v56  ;;  %v6860_v60 = vmax.f32 %v9228_v62, 0.0  ;;  %8014 = vmatprep.mubr.bf16.mxu1 %v15593_v23  ;;  %v16686_v42 = vld [vmem:[#allocation130_spill] sm:$0xff] }
 0x887   : > { %v7115_v48 = vadd.f32 %v6859_v49, %v3272_v51  ;;  %v7367_v10 = vmax.f32 %v7111_v22, 0.0  ;;  %v3278_v62 = vadd.f32 %v16686_v42, %v15128_v8  ;;  %v16687_v22 = vld [vmem:[#allocation133_spill] sm:$0xff] }
 0x888   : > { %v7116_v53 = vadd.f32 %v6860_v60, %v3274_v38  ;;  %v5894_v41 = vpop.f32.mrb[112].mxu1  ;;  %v7368_v21 = vmax.f32 %v7112_v5, 0.0  ;;  %v3280_v49 = vadd.f32 %v16687_v22, %v15130_v57 }
 0x889   : > { %v7371_v9 = vmax.f32 %v7115_v48, 0.0  ;;  %v9229_v16 = vadd.f32 %v5894_v41, %v15121_v28  ;;  %v5896_v15 = vpop.f32.mrb[113].mxu1  ;;  %v16688_v48 = vld [vmem:[#allocation132_spill] sm:$0xff] }
 0x88a   : > { %v7372_v31 = vmax.f32 %v7116_v53, 0.0  ;;  %v9230_v47 = vadd.f32 %v5896_v15, %v15125_v63  ;;  %v5898_v17 = vpop.f32.mrb[114].mxu1  ;;  %v3282_v53 = vadd.f32 %v16688_v48, %v15128_v8 }
 0x88b   : > { %v15657_v56 = vpack.c.bf16 %v7371_v9, %v7367_v10  ;;  %v6863_v34 = vmax.f32 %v9229_v16, 0.0  ;;  %v9231_v23 = vadd.f32 %v5898_v17, %v15121_v28  ;;  %v5900_v51 = vpop.f32.mrb[115].mxu1  ;;  %v16689_v9 = vld [vmem:[#allocation135_spill] sm:$0xff] }
 0x88c   : > { %v6864_v29 = vmax.f32 %v9230_v47, 0.0  ;;  %v9232_v38 = vadd.f32 %v5900_v51, %v15125_v63  ;;  %v15665_v5 = vpack.c.bf16 %v7372_v31, %v7368_v21  ;;  %v3284_v16 = vadd.f32 %v16689_v9, %v15130_v57 }
 0x88d   : > { %v7119_v60 = vadd.f32 %v6863_v34, %v3278_v62  ;;  %v6867_v41 = vmax.f32 %v9231_v23, 0.0  ;;  %8015 = vmatmul.mubr.bf16.gmra.mrb[220].mxu1 %v15585_v61 }
 0x88e   : > { %v7120_v10 = vadd.f32 %v6864_v29, %v3280_v49  ;;  %v6868_v15 = vmax.f32 %v9232_v38, 0.0  ;;  %8022 = vmatprep.mubr.bf16.mxu1 %v15611_v46  ;;  %v16690_v29 = vld [vmem:[#allocation134_spill] sm:$0xff] }
 0x88f   : > { %v7123_v17 = vadd.f32 %v6867_v41, %v3282_v53  ;;  %v7375_v51 = vmax.f32 %v7119_v60, 0.0  ;;  %v3288_v38 = vadd.f32 %v16690_v29, %v15128_v8  ;;  %v16691_v60 = vld [vmem:[#allocation136_spill] sm:$0xff] }
 0x890   : > { %v7124_v47 = vadd.f32 %v6868_v15, %v3284_v16  ;;  %v5904_v42 = vpop.f32.mrb[116].mxu1  ;;  %v7376_v34 = vmax.f32 %v7120_v10, 0.0  ;;  %v3290_v41 = vadd.f32 %v16691_v60, %v15130_v57 }
 0x891   : > { %v7379_v21 = vmax.f32 %v7123_v17, 0.0  ;;  %v9233_v31 = vadd.f32 %v5904_v42, %v15121_v28  ;;  %v5906_v62 = vpop.f32.mrb[117].mxu1  ;;  %v16692_v17 = vld [vmem:[#allocation137_spill] sm:$0xff] }
 0x892   : > { %v7380_v22 = vmax.f32 %v7124_v47, 0.0  ;;  %v9234_v23 = vadd.f32 %v5906_v62, %v15125_v63  ;;  %v5908_v61 = vpop.f32.mrb[118].mxu1  ;;  %v3292_v47 = vadd.f32 %v16692_v17, %v15128_v8 }
 0x893   : > { %v15675_v49 = vpack.c.bf16 %v7379_v21, %v7375_v51  ;;  %v6871_v48 = vmax.f32 %v9233_v31, 0.0  ;;  %v9235_v46 = vadd.f32 %v5908_v61, %v15121_v28  ;;  %v5910_v53 = vpop.f32.mrb[119].mxu1  ;;  %v16693_v21 = vld [vmem:[#allocation138_spill] sm:$0xff] }
 0x894   : > { %v6872_v9 = vmax.f32 %v9234_v23, 0.0  ;;  %v9236_v16 = vadd.f32 %v5910_v53, %v15125_v63  ;;  %v15683_v10 = vpack.c.bf16 %v7380_v22, %v7376_v34  ;;  %v3294_v31 = vadd.f32 %v16693_v21, %v15130_v57 }
 0x895   : > { %v7127_v15 = vadd.f32 %v6871_v48, %v3288_v38  ;;  %v6875_v42 = vmax.f32 %v9235_v46, 0.0  ;;  %8023 = vmatmul.mubr.bf16.gmra.mrb[224].mxu1 %v15603_v43 }
 0x896   : > { %v7128_v51 = vadd.f32 %v6872_v9, %v3290_v41  ;;  %v6876_v62 = vmax.f32 %v9236_v16, 0.0  ;;  %8030 = vmatprep.mubr.bf16.mxu1 %v15629_v3  ;;  %v16694_v9 = vld [vmem:[#allocation139_spill] sm:$0xff] }
 0x897   : > { %v7131_v61 = vadd.f32 %v6875_v42, %v3292_v47  ;;  %v7383_v53 = vmax.f32 %v7127_v15, 0.0  ;;  %v3298_v16 = vadd.f32 %v16694_v9, %v15128_v8  ;;  %v16695_v15 = vld [vmem:[#allocation140_spill] sm:$0xff] }
 0x898   : > { %v7132_v23 = vadd.f32 %v6876_v62, %v3294_v31  ;;  %v5914_v29 = vpop.f32.mrb[120].mxu1  ;;  %v7384_v48 = vmax.f32 %v7128_v51, 0.0  ;;  %v3300_v42 = vadd.f32 %v16695_v15, %v15130_v57 }
 0x899   : > { %v7387_v34 = vmax.f32 %v7131_v61, 0.0  ;;  %v9237_v22 = vadd.f32 %v5914_v29, %v15121_v28  ;;  %v5916_v38 = vpop.f32.mrb[121].mxu1  ;;  %v16696_v61 = vld [vmem:[#allocation141_spill] sm:$0xff] }
 0x89a   : > { %v7388_v60 = vmax.f32 %v7132_v23, 0.0  ;;  %v9238_v46 = vadd.f32 %v5916_v38, %v15125_v63  ;;  %v5918_v43 = vpop.f32.mrb[122].mxu1  ;;  %v3302_v23 = vadd.f32 %v16696_v61, %v15128_v8 }
 0x89b   : > { %v15693_v41 = vpack.c.bf16 %v7387_v34, %v7383_v53  ;;  %v6879_v17 = vmax.f32 %v9237_v22, 0.0  ;;  %v9239_v3 = vadd.f32 %v5918_v43, %v15121_v28  ;;  %v5920_v47 = vpop.f32.mrb[123].mxu1  ;;  %v16697_v34 = vld [vmem:[#allocation142_spill] sm:$0xff] }
 0x89c   : > { %v6880_v21 = vmax.f32 %v9238_v46, 0.0  ;;  %v9240_v31 = vadd.f32 %v5920_v47, %v15125_v63  ;;  %v15701_v51 = vpack.c.bf16 %v7388_v60, %v7384_v48  ;;  %v3304_v22 = vadd.f32 %v16697_v34, %v15130_v57 }
 0x89d   : > { %v7135_v62 = vadd.f32 %v6879_v17, %v3298_v16  ;;  %v6883_v29 = vmax.f32 %v9239_v3, 0.0  ;;  %8031 = vmatmul.mubr.bf16.gmra.mrb[228].mxu1 %v15621_v13 }
 0x89e   : > { %v7136_v53 = vadd.f32 %v6880_v21, %v3300_v42  ;;  %v6884_v38 = vmax.f32 %v9240_v31, 0.0  ;;  %8038 = vmatprep.mubr.bf16.mxu1 %v15647_v50  ;;  %v16698_v21 = vld [vmem:[#allocation143_spill] sm:$0xff] }
 0x89f   : > { %v7139_v43 = vadd.f32 %v6883_v29, %v3302_v23  ;;  %v7391_v47 = vmax.f32 %v7135_v62, 0.0  ;;  %v3308_v31 = vadd.f32 %v16698_v21, %v15128_v8  ;;  %v16699_v62 = vld [vmem:[#allocation144_spill] sm:$0xff] }
 0x8a0   : > { %v7140_v46 = vadd.f32 %v6884_v38, %v3304_v22  ;;  %v5924_v9 = vpop.f32.mrb[124].mxu1  ;;  %v7392_v17 = vmax.f32 %v7136_v53, 0.0  ;;  %v3310_v29 = vadd.f32 %v16699_v62, %v15130_v57 }
 0x8a1   : > { %v7395_v48 = vmax.f32 %v7139_v43, 0.0  ;;  %v9241_v60 = vadd.f32 %v5924_v9, %v15121_v28  ;;  %v5926_v16 = vpop.f32.mrb[125].mxu1  ;;  %v16700_v43 = vld [vmem:[#allocation145_spill] sm:$0xff] }
 0x8a2   : > { %v7396_v15 = vmax.f32 %v7140_v46, 0.0  ;;  %v9242_v3 = vadd.f32 %v5926_v16, %v15125_v63  ;;  %v5928_v13 = vpop.f32.mrb[126].mxu1  ;;  %v3312_v46 = vadd.f32 %v16700_v43, %v15128_v8  ;;  %v15725_v16 = vld [vmem:[#allocation17] ss:$0 sm:$0xff] }
 0x8a3   : > { %v15711_v42 = vpack.c.bf16 %v7395_v48, %v7391_v47  ;;  %v6887_v61 = vmax.f32 %v9241_v60, 0.0  ;;  %v9243_v50 = vadd.f32 %v5928_v13, %v15121_v28  ;;  %v5930_v23 = vpop.f32.mrb[127].mxu1  ;;  %v16701_v48 = vld [vmem:[#allocation146_spill] sm:$0xff] }
 0x8a4   : > { %v6888_v34 = vmax.f32 %v9242_v3, 0.0  ;;  %v9244_v53 = vadd.f32 %v5930_v23, %v15125_v63  ;;  %v7528_v22 = vpack.c.bf16 %v7396_v15, %v7392_v17  ;;  %v3314_v28 = vadd.f32 %v16701_v48, %v15130_v57 }
 0x8a5   : > { %v7143_v38 = vadd.f32 %v6887_v61, %v3308_v31  ;;  %v6891_v9 = vmax.f32 %v9243_v50, 0.0  ;;  %8039 = vmatmul.mubr.bf16.gmra.mrb[232].mxu1 %v15639_v12 }
 0x8a6   : > { %v7144_v47 = vadd.f32 %v6888_v34, %v3310_v29  ;;  %v6892_v60 = vmax.f32 %v9244_v53, 0.0  ;;  %8046 = vmatprep.mubr.bf16.mxu1 %v15665_v5 }
 0x8a7   : > { %v7147_v3 = vadd.f32 %v6891_v9, %v3312_v46  ;;  %v7399_v15 = vmax.f32 %v7143_v38, 0.0 }
 0x8a8   : > { %v7148_v63 = vadd.f32 %v6892_v60, %v3314_v28  ;;  %v7832_v17 = vpop.f32.mrb[128].mxu1  ;;  %v7400_v31 = vmax.f32 %v7144_v47, 0.0 }
 0x8a9   : > { %v7403_v13 = vmax.f32 %v7147_v3, 0.0  ;;  %v7833_v8 = vadd.f32 %v15725_v16, %v7832_v17  ;;  %v7834_v21 = vpop.f32.mrb[129].mxu1 }
 0x8aa   : > { %v7404_v12 = vmax.f32 %v7148_v63, 0.0  ;;  %v7835_v61 = vpop.f32.mrb[130].mxu1 }
 0x8ab   : > { %v7531_v50 = vpack.c.bf16 %v7403_v13, %v7399_v15  ;;  %v8122_v57 = vadd.f32 %v14929_v33, %v7833_v8  ;;  %v7836_v23 = vadd.f32 %v15725_v16, %v7835_v61  ;;  %v7837_v5 = vpop.f32.mrb[131].mxu1 }
 0x8ac   : > { %v7532_v62 = vpack.c.bf16 %v7404_v12, %v7400_v31 }
 0x8ad   : > { %8376 = vst [vmem:[%s15731_s11] sm:$0xff] %v8122_v57  ;;  %v8125_v29 = vadd.f32 %v14932_v1, %v7836_v23  ;;  %8047 = vmatmul.mubr.bf16.gmra.mrb[236].mxu1 %v15657_v56 }
 0x8ae   : > { %8054 = vmatprep.mubr.bf16.mxu1 %v15683_v10 }
 0x8af   : > { %8377 = vst [vmem:[%s15731_s11 + $0x8] sm:$0xff] %v8125_v29 }
 0x8b0   : > { %v7840_v34 = vpop.f32.mrb[132].mxu1 }
 0x8b1   : > { %v7841_v33 = vadd.f32 %v15725_v16, %v7840_v34  ;;  %v7842_v53 = vpop.f32.mrb[133].mxu1 }
 0x8b2   : > { %v7843_v38 = vpop.f32.mrb[134].mxu1 }
 0x8b3   : > { %v8130_v43 = vadd.f32 %v14941_v11, %v7841_v33  ;;  %v7844_v46 = vadd.f32 %v15725_v16, %v7843_v38  ;;  %v7845_v9 = vpop.f32.mrb[135].mxu1 }
 0x8b5   : > { %8378 = vst [vmem:[%s15731_s11 + $0x10] sm:$0xff] %v8130_v43  ;;  %v8133_v1 = vadd.f32 %v14944_v27, %v7844_v46  ;;  %8055 = vmatmul.mubr.bf16.gmra.mrb[240].mxu1 %v15675_v49 }
 0x8b6   : > { %8062 = vmatprep.mubr.bf16.mxu1 %v15701_v51 }
 0x8b7   : > { %8379 = vst [vmem:[%s15731_s11 + $0x18] sm:$0xff] %v8133_v1 }
 0x8b8   : > { %v7848_v56 = vpop.f32.mrb[136].mxu1 }
 0x8b9   : > { %v7849_v10 = vadd.f32 %v15725_v16, %v7848_v56  ;;  %v7850_v47 = vpop.f32.mrb[137].mxu1 }
 0x8ba   : > { %v7851_v48 = vpop.f32.mrb[138].mxu1 }
 0x8bb   : > { %v8138_v11 = vadd.f32 %v14951_v52, %v7849_v10  ;;  %v7852_v28 = vadd.f32 %v15725_v16, %v7851_v48  ;;  %v7853_v60 = vpop.f32.mrb[139].mxu1 }
 0x8bd   : > { %8380 = vst [vmem:[%s15731_s11 + $0x20] sm:$0xff] %v8138_v11  ;;  %v8141_v27 = vadd.f32 %v14954_v39, %v7852_v28  ;;  %8063 = vmatmul.mubr.bf16.gmra.mrb[244].mxu1 %v15693_v41 }
 0x8be   : > { %8070 = vmatprep.mubr.bf16.mxu1 %v7528_v22 }
 0x8bf   : > { %8381 = vst [vmem:[%s15731_s11 + $0x28] sm:$0xff] %v8141_v27 }
 0x8c0   : > { %v7856_v49 = vpop.f32.mrb[140].mxu1 }
 0x8c1   : > { %v7857_v51 = vadd.f32 %v15725_v16, %v7856_v49  ;;  %v7858_v3 = vpop.f32.mrb[141].mxu1 }
 0x8c2   : > { %v7859_v63 = vpop.f32.mrb[142].mxu1 }
 0x8c3   : > { %v8146_v17 = vadd.f32 %v14960_v45, %v7857_v51  ;;  %v7860_v52 = vadd.f32 %v15725_v16, %v7859_v63  ;;  %v7861_v15 = vpop.f32.mrb[143].mxu1 }
 0x8c5   : > { %8382 = vst [vmem:[%s15731_s11 + $0x30] sm:$0xff] %v8146_v17  ;;  %v8149_v13 = vadd.f32 %v14963_v37, %v7860_v52  ;;  %8071 = vmatmul.mubr.bf16.gmra.mrb[248].mxu1 %v15711_v42 }
 0x8c6   : > { %8078 = vmatprep.mubr.bf16.mxu1 %v7532_v62 }
 0x8c7   : > { %8383 = vst [vmem:[%s15731_s11 + $0x38] sm:$0xff] %v8149_v13 }
 0x8c8   : > { %v7864_v39 = vpop.f32.mrb[144].mxu1 }
 0x8c9   : > { %v7865_v41 = vadd.f32 %v15725_v16, %v7864_v39  ;;  %v7866_v22 = vpop.f32.mrb[145].mxu1 }
 0x8ca   : > { %v7867_v8 = vpop.f32.mrb[146].mxu1 }
 0x8cb   : > { %v8154_v21 = vadd.f32 %v14968_v14, %v7865_v41  ;;  %v7868_v45 = vadd.f32 %v15725_v16, %v7867_v8  ;;  %v7869_v31 = vpop.f32.mrb[147].mxu1 }
 0x8cd   : > { %8384 = vst [vmem:[%s15731_s11 + $0x40] sm:$0xff] %v8154_v21  ;;  %v8157_v12 = vadd.f32 %v14971_v4, %v7868_v45  ;;  %8079 = vmatmul.mubr.bf16.gmra.mrb[252].mxu1 %v7531_v50 }
 0x8ce   : > { %8359 = vmatprep.mubr.bf16.mxu1 %v14921_v55 }
 0x8cf   : > { %8385 = vst [vmem:[%s15731_s11 + $0x48] sm:$0xff] %v8157_v12 }
 0x8d0   : > { %v7872_v37 = vpop.f32.mrb[148].mxu1 }
 0x8d1   : > { %v7873_v42 = vadd.f32 %v15725_v16, %v7872_v37  ;;  %v7874_v61 = vpop.f32.mrb[149].mxu1 }
 0x8d2   : > { %v7875_v57 = vpop.f32.mrb[150].mxu1 }
 0x8d3   : > { %v8162_v23 = vadd.f32 %v14976_v20, %v7873_v42  ;;  %v7876_v14 = vadd.f32 %v15725_v16, %v7875_v57  ;;  %v7877_v5 = vpop.f32.mrb[151].mxu1 }
 0x8d5   : > { %8386 = vst [vmem:[%s15731_s11 + $0x50] sm:$0xff] %v8162_v23  ;;  %v8165_v62 = vadd.f32 %v14979_v54, %v7876_v14  ;;  %8360 = vmatmul.mubr.bf16.vlgmr.msra.gmra.mrb[248].mxu1 %v14913_v32 }
 0x8d6   : > { %8367 = vmatprep.mubr.bf16.mxu1 %v14937_v44 }
 0x8d7   : > { %8387 = vst [vmem:[%s15731_s11 + $0x58] sm:$0xff] %v8165_v62  ;;  %v16702_v62 = vld [vmem:[#allocation147_spill] sm:$0xff] }
 0x8d8   : > { %v7880_v55 = vpop.f32.mrb[152].mxu1 }
 0x8d9   : > { %v7881_v4 = vadd.f32 %v15725_v16, %v7880_v55  ;;  %v7882_v50 = vpop.f32.mrb[153].mxu1 }
 0x8da   : > { %v7883_v29 = vpop.f32.mrb[154].mxu1 }
 0x8db   : > { %v8170_v20 = vadd.f32 %v14984_v58, %v7881_v4  ;;  %v7884_v34 = vadd.f32 %v15725_v16, %v7883_v29  ;;  %v7885_v33 = vpop.f32.mrb[155].mxu1 }
 0x8dd   : > { %8388 = vst [vmem:[%s15731_s11 + $0x60] sm:$0xff] %v8170_v20  ;;  %v8173_v54 = vadd.f32 %v14987_v19, %v7884_v34  ;;  %8368 = vmatmul.mubr.bf16.gmra.mrb[252].mxu1 %v14935_v35 }
 0x8df   : > { %8389 = vst [vmem:[%s15731_s11 + $0x68] sm:$0xff] %v8173_v54  ;;  %v16704_v54 = vld [vmem:[#allocation149_spill] sm:$0xff] }
 0x8e0   : > { %v7888_v32 = vpop.f32.mrb[156].mxu1 }
 0x8e1   : > { %v7889_v44 = vadd.f32 %v15725_v16, %v7888_v32  ;;  %v7890_v53 = vpop.f32.mrb[157].mxu1 }
 0x8e2   : > { %v7891_v38 = vpop.f32.mrb[158].mxu1 }
 0x8e3   : > { %v8178_v43 = vadd.f32 %v14991_v24, %v7889_v44  ;;  %v7892_v58 = vadd.f32 %v15725_v16, %v7891_v38  ;;  %v7893_v46 = vpop.f32.mrb[159].mxu1  ;;  %v16705_v38 = vld [vmem:[#allocation150_spill] sm:$0xff] }
 0x8e5   : > { %8390 = vst [vmem:[%s15731_s11 + $0x70] sm:$0xff] %v8178_v43  ;;  %v8181_v9 = vadd.f32 %v14994_v6, %v7892_v58 }
 0x8e7   : > { %8391 = vst [vmem:[%s15731_s11 + $0x78] sm:$0xff] %v8181_v9 }
 0x8e8   : > { %v7896_v19 = vpop.f32.mrb[160].mxu1 }
 0x8e9   : > { %v7897_v35 = vadd.f32 %v15725_v16, %v7896_v19  ;;  %v7898_v1 = vpop.f32.mrb[161].mxu1 }
 0x8ea   : > { %v7899_v56 = vpop.f32.mrb[162].mxu1 }
 0x8eb   : > { %v8186_v10 = vadd.f32 %v14998_v7, %v7897_v35  ;;  %v7900_v47 = vadd.f32 %v15725_v16, %v7899_v56  ;;  %v7901_v48 = vpop.f32.mrb[163].mxu1  ;;  %v16706_v35 = vld [vmem:[#allocation151_spill] sm:$0xff] }
 0x8ed   : > { %8392 = vst [vmem:[%s15731_s11 + $0x80] sm:$0xff] %v8186_v10  ;;  %v8189_v24 = vadd.f32 %v15001_v59, %v7900_v47  ;;  %v16707_v47 = vld [vmem:[#allocation152_spill] sm:$0xff] }
 0x8ef   : > { %8393 = vst [vmem:[%s15731_s11 + $0x88] sm:$0xff] %v8189_v24 }
 0x8f0   : > { %v7904_v11 = vpop.f32.mrb[164].mxu1 }
 0x8f1   : > { %v7905_v6 = vadd.f32 %v15725_v16, %v7904_v11  ;;  %v7906_v28 = vpop.f32.mrb[165].mxu1 }
 0x8f2   : > { %v7907_v60 = vpop.f32.mrb[166].mxu1 }
 0x8f3   : > { %v8194_v27 = vadd.f32 %v15004_v30, %v7905_v6  ;;  %v7908_v49 = vadd.f32 %v15725_v16, %v7907_v60  ;;  %v7909_v51 = vpop.f32.mrb[167].mxu1  ;;  %v16708_v60 = vld [vmem:[#allocation153_spill] sm:$0xff] }
 0x8f5   : > { %8394 = vst [vmem:[%s15731_s11 + $0x90] sm:$0xff] %v8194_v27  ;;  %v8197_v7 = vadd.f32 %v15007_v36, %v7908_v49 }
 0x8f7   : > { %8395 = vst [vmem:[%s15731_s11 + $0x98] sm:$0xff] %v8197_v7  ;;  %v16709_v7 = vld [vmem:[#allocation154_spill] sm:$0xff] }
 0x8f8   : > { %v7912_v3 = vpop.f32.mrb[168].mxu1 }
 0x8f9   : > { %v7913_v59 = vadd.f32 %v15725_v16, %v7912_v3  ;;  %v7914_v63 = vpop.f32.mrb[169].mxu1 }
 0x8fa   : > { %v7915_v17 = vpop.f32.mrb[170].mxu1 }
 0x8fb   : > { %v8202_v52 = vadd.f32 %v15011_v25, %v7913_v59  ;;  %v7916_v15 = vadd.f32 %v15725_v16, %v7915_v17  ;;  %v7917_v13 = vpop.f32.mrb[171].mxu1 }
 0x8fd   : > { %8396 = vst [vmem:[%s15731_s11 + $0xa0] sm:$0xff] %v8202_v52  ;;  %v8205_v30 = vadd.f32 %v15014_v40, %v7916_v15  ;;  %v16710_v15 = vld [vmem:[#allocation155_spill] sm:$0xff] }
 0x8ff   : > { %8397 = vst [vmem:[%s15731_s11 + $0xa8] sm:$0xff] %v8205_v30 }
 0x900   : > { %v7920_v39 = vpop.f32.mrb[172].mxu1 }
 0x901   : > { %v7921_v36 = vadd.f32 %v15725_v16, %v7920_v39  ;;  %v7922_v41 = vpop.f32.mrb[173].mxu1 }
 0x902   : > { %v7923_v22 = vpop.f32.mrb[174].mxu1 }
 0x903   : > { %v8210_v8 = vadd.f32 %v15017_v0, %v7921_v36  ;;  %v7924_v21 = vadd.f32 %v15725_v16, %v7923_v22  ;;  %v7925_v45 = vpop.f32.mrb[175].mxu1  ;;  %v16711_v36 = vld [vmem:[#allocation156_spill] sm:$0xff] }
 0x905   : > { %8398 = vst [vmem:[%s15731_s11 + $0xb0] sm:$0xff] %v8210_v8  ;;  %v8213_v25 = vadd.f32 %v15020_v2, %v7924_v21 }
 0x907   : > { %8399 = vst [vmem:[%s15731_s11 + $0xb8] sm:$0xff] %v8213_v25  ;;  %v16712_v25 = vld [vmem:[#allocation157_spill] sm:$0xff] }
 0x908   : > { %v7928_v31 = vpop.f32.mrb[176].mxu1 }
 0x909   : > { %v7929_v40 = vadd.f32 %v15725_v16, %v7928_v31  ;;  %v7930_v12 = vpop.f32.mrb[177].mxu1 }
 0x90a   : > { %v7931_v37 = vpop.f32.mrb[178].mxu1 }
 0x90b   : > { %v8218_v42 = vadd.f32 %v15024_v18, %v7929_v40  ;;  %v7932_v61 = vadd.f32 %v15725_v16, %v7931_v37  ;;  %v7933_v57 = vpop.f32.mrb[179].mxu1  ;;  %v16703_v18 = vld [vmem:[#allocation148_spill] sm:$0xff]  ;;  %v16713_v37 = vld [vmem:[#allocation158_spill] sm:$0xff] }
 0x90d   : > { %8400 = vst [vmem:[%s15731_s11 + $0xc0] sm:$0xff] %v8218_v42  ;;  %v8221_v0 = vadd.f32 %v15027_v26, %v7932_v61 }
 0x90f   : > { %8401 = vst [vmem:[%s15731_s11 + $0xc8] sm:$0xff] %v8221_v0 }
 0x910   : > { %v7936_v23 = vpop.f32.mrb[180].mxu1 }
 0x911   : > { %v7937_v2 = vadd.f32 %v15725_v16, %v7936_v23  ;;  %v7938_v14 = vpop.f32.mrb[181].mxu1 }
 0x912   : > { %v7939_v5 = vpop.f32.mrb[182].mxu1 }
 0x913   : > { %v8226_v55 = vadd.f32 %v16702_v62, %v7937_v2  ;;  %v7940_v4 = vadd.f32 %v15725_v16, %v7939_v5  ;;  %v7941_v50 = vpop.f32.mrb[183].mxu1  ;;  %v16714_v2 = vld [vmem:[#allocation159_spill] sm:$0xff] }
 0x915   : > { %8402 = vst [vmem:[%s15731_s11 + $0xd0] sm:$0xff] %v8226_v55  ;;  %v8229_v29 = vadd.f32 %v16703_v18, %v7940_v4  ;;  %v16715_v55 = vld [vmem:[#allocation160_spill] sm:$0xff] }
 0x917   : > { %8403 = vst [vmem:[%s15731_s11 + $0xd8] sm:$0xff] %v8229_v29 }
 0x918   : > { %v7944_v20 = vpop.f32.mrb[184].mxu1 }
 0x919   : > { %v7945_v26 = vadd.f32 %v15725_v16, %v7944_v20  ;;  %v7946_v34 = vpop.f32.mrb[185].mxu1 }
 0x91a   : > { %v7947_v33 = vpop.f32.mrb[186].mxu1 }
 0x91b   : > { %v8234_v32 = vadd.f32 %v16704_v54, %v7945_v26  ;;  %v7948_v44 = vadd.f32 %v15725_v16, %v7947_v33  ;;  %v7949_v53 = vpop.f32.mrb[187].mxu1  ;;  %v16716_v26 = vld [vmem:[#allocation161_spill] sm:$0xff] }
 0x91d   : > { %8404 = vst [vmem:[%s15731_s11 + $0xe0] sm:$0xff] %v8234_v32  ;;  %v8237_v43 = vadd.f32 %v16705_v38, %v7948_v44  ;;  %v16717_v32 = vld [vmem:[#allocation162_spill] sm:$0xff] }
 0x91f   : > { %8405 = vst [vmem:[%s15731_s11 + $0xe8] sm:$0xff] %v8237_v43 }
 0x920   : > { %v7952_v58 = vpop.f32.mrb[188].mxu1 }
 0x921   : > { %v7953_v46 = vadd.f32 %v15725_v16, %v7952_v58  ;;  %v7954_v9 = vpop.f32.mrb[189].mxu1 }
 0x922   : > { %v7955_v19 = vpop.f32.mrb[190].mxu1 }
 0x923   : > { %v8242_v1 = vadd.f32 %v16706_v35, %v7953_v46  ;;  %v7956_v56 = vadd.f32 %v15725_v16, %v7955_v19  ;;  %v7957_v10 = vpop.f32.mrb[191].mxu1  ;;  %v16718_v46 = vld [vmem:[#allocation163_spill] sm:$0xff] }
 0x925   : > { %8406 = vst [vmem:[%s15731_s11 + $0xf0] sm:$0xff] %v8242_v1  ;;  %v8245_v48 = vadd.f32 %v16707_v47, %v7956_v56  ;;  %v16719_v1 = vld [vmem:[#allocation164_spill] sm:$0xff] }
 0x927   : > { %8407 = vst [vmem:[%s15731_s11 + $0xf8] sm:$0xff] %v8245_v48 }
 0x928   : > { %v7960_v24 = vpop.f32.mrb[192].mxu1 }
 0x929   : > { %v7961_v11 = vadd.f32 %v15725_v16, %v7960_v24  ;;  %v7962_v6 = vpop.f32.mrb[193].mxu1 }
 0x92a   : > { %v7963_v28 = vpop.f32.mrb[194].mxu1 }
 0x92b   : > { %v8250_v27 = vadd.f32 %v16708_v60, %v7961_v11  ;;  %v7964_v49 = vadd.f32 %v15725_v16, %v7963_v28  ;;  %v7965_v51 = vpop.f32.mrb[195].mxu1  ;;  %v16720_v11 = vld [vmem:[#allocation165_spill] sm:$0xff] }
 0x92d   : > { %8408 = vst [vmem:[%s15731_s11 + $0x100] sm:$0xff] %v8250_v27  ;;  %v8253_v3 = vadd.f32 %v16709_v7, %v7964_v49  ;;  %v16721_v27 = vld [vmem:[#allocation166_spill] sm:$0xff] }
 0x92f   : > { %8409 = vst [vmem:[%s15731_s11 + $0x108] sm:$0xff] %v8253_v3 }
 0x930   : > { %v7968_v59 = vpop.f32.mrb[196].mxu1 }
 0x931   : > { %v7969_v63 = vadd.f32 %v15725_v16, %v7968_v59  ;;  %v7970_v17 = vpop.f32.mrb[197].mxu1 }
 0x932   : > { %v7971_v52 = vpop.f32.mrb[198].mxu1 }
 0x933   : > { %v8258_v13 = vadd.f32 %v16710_v15, %v7969_v63  ;;  %v7972_v30 = vadd.f32 %v15725_v16, %v7971_v52  ;;  %v7973_v39 = vpop.f32.mrb[199].mxu1  ;;  %v16722_v63 = vld [vmem:[#allocation167_spill] sm:$0xff] }
 0x935   : > { %8410 = vst [vmem:[%s15731_s11 + $0x110] sm:$0xff] %v8258_v13  ;;  %v8261_v41 = vadd.f32 %v16711_v36, %v7972_v30  ;;  %v16723_v13 = vld [vmem:[#allocation168_spill] sm:$0xff] }
 0x937   : > { %8411 = vst [vmem:[%s15731_s11 + $0x118] sm:$0xff] %v8261_v41 }
 0x938   : > { %v7976_v22 = vpop.f32.mrb[200].mxu1 }
 0x939   : > { %v7977_v8 = vadd.f32 %v15725_v16, %v7976_v22  ;;  %v7978_v21 = vpop.f32.mrb[201].mxu1 }
 0x93a   : > { %v7979_v45 = vpop.f32.mrb[202].mxu1 }
 0x93b   : > { %v8266_v31 = vadd.f32 %v16712_v25, %v7977_v8  ;;  %v7980_v40 = vadd.f32 %v15725_v16, %v7979_v45  ;;  %v7981_v12 = vpop.f32.mrb[203].mxu1  ;;  %v16724_v8 = vld [vmem:[#allocation169_spill] sm:$0xff] }
 0x93d   : > { %8412 = vst [vmem:[%s15731_s11 + $0x120] sm:$0xff] %v8266_v31  ;;  %v8269_v42 = vadd.f32 %v16713_v37, %v7980_v40  ;;  %v16725_v31 = vld [vmem:[#allocation170_spill] sm:$0xff] }
 0x93f   : > { %8413 = vst [vmem:[%s15731_s11 + $0x128] sm:$0xff] %v8269_v42 }
 0x940   : > { %v7984_v61 = vpop.f32.mrb[204].mxu1 }
 0x941   : > { %v7985_v57 = vadd.f32 %v15725_v16, %v7984_v61  ;;  %v7986_v0 = vpop.f32.mrb[205].mxu1 }
 0x942   : > { %v7987_v23 = vpop.f32.mrb[206].mxu1 }
 0x943   : > { %v8274_v14 = vadd.f32 %v16714_v2, %v7985_v57  ;;  %v7988_v5 = vadd.f32 %v15725_v16, %v7987_v23  ;;  %v7989_v62 = vpop.f32.mrb[207].mxu1  ;;  %v16726_v57 = vld [vmem:[#allocation171_spill] sm:$0xff] }
 0x945   : > { %8414 = vst [vmem:[%s15731_s11 + $0x130] sm:$0xff] %v8274_v14  ;;  %v8277_v4 = vadd.f32 %v16715_v55, %v7988_v5  ;;  %v16727_v14 = vld [vmem:[#allocation172_spill] sm:$0xff] }
 0x947   : > { %8415 = vst [vmem:[%s15731_s11 + $0x138] sm:$0xff] %v8277_v4 }
 0x948   : > { %v7992_v50 = vpop.f32.mrb[208].mxu1 }
 0x949   : > { %v7993_v18 = vadd.f32 %v15725_v16, %v7992_v50  ;;  %v7994_v29 = vpop.f32.mrb[209].mxu1 }
 0x94a   : > { %v7995_v20 = vpop.f32.mrb[210].mxu1 }
 0x94b   : > { %v8282_v34 = vadd.f32 %v16716_v26, %v7993_v18  ;;  %v7996_v33 = vadd.f32 %v15725_v16, %v7995_v20  ;;  %v7997_v54 = vpop.f32.mrb[211].mxu1  ;;  %v16728_v18 = vld [vmem:[#allocation173_spill] sm:$0xff] }
 0x94d   : > { %8416 = vst [vmem:[%s15731_s11 + $0x140] sm:$0xff] %v8282_v34  ;;  %v8285_v44 = vadd.f32 %v16717_v32, %v7996_v33  ;;  %v16729_v34 = vld [vmem:[#allocation174_spill] sm:$0xff] }
 0x94f   : > { %8417 = vst [vmem:[%s15731_s11 + $0x148] sm:$0xff] %v8285_v44 }
 0x950   : > { %v8000_v53 = vpop.f32.mrb[212].mxu1 }
 0x951   : > { %v8001_v38 = vadd.f32 %v15725_v16, %v8000_v53  ;;  %v8002_v43 = vpop.f32.mrb[213].mxu1 }
 0x952   : > { %v8003_v58 = vpop.f32.mrb[214].mxu1 }
 0x953   : > { %v8290_v9 = vadd.f32 %v16718_v46, %v8001_v38  ;;  %v8004_v19 = vadd.f32 %v15725_v16, %v8003_v58  ;;  %v8005_v35 = vpop.f32.mrb[215].mxu1  ;;  %v16730_v38 = vld [vmem:[#allocation175_spill] sm:$0xff] }
 0x955   : > { %8418 = vst [vmem:[%s15731_s11 + $0x150] sm:$0xff] %v8290_v9  ;;  %v8293_v56 = vadd.f32 %v16719_v1, %v8004_v19  ;;  %v16731_v9 = vld [vmem:[#allocation176_spill] sm:$0xff] }
 0x957   : > { %8419 = vst [vmem:[%s15731_s11 + $0x158] sm:$0xff] %v8293_v56 }
 0x958   : > { %v8008_v10 = vpop.f32.mrb[216].mxu1 }
 0x959   : > { %v8009_v47 = vadd.f32 %v15725_v16, %v8008_v10  ;;  %v8010_v48 = vpop.f32.mrb[217].mxu1 }
 0x95a   : > { %v8011_v24 = vpop.f32.mrb[218].mxu1 }
 0x95b   : > { %v8298_v6 = vadd.f32 %v16720_v11, %v8009_v47  ;;  %v8012_v28 = vadd.f32 %v15725_v16, %v8011_v24  ;;  %v8013_v60 = vpop.f32.mrb[219].mxu1  ;;  %v16732_v47 = vld [vmem:[#allocation177_spill] sm:$0xff] }
 0x95d   : > { %8420 = vst [vmem:[%s15731_s11 + $0x160] sm:$0xff] %v8298_v6  ;;  %v8301_v49 = vadd.f32 %v16721_v27, %v8012_v28  ;;  %v16733_v6 = vld [vmem:[#allocation178_spill] sm:$0xff] }
 0x95f   : > { %8421 = vst [vmem:[%s15731_s11 + $0x168] sm:$0xff] %v8301_v49 }
 0x960   : > { %v8016_v51 = vpop.f32.mrb[220].mxu1 }
 0x961   : > { %v8017_v7 = vadd.f32 %v15725_v16, %v8016_v51  ;;  %v8018_v3 = vpop.f32.mrb[221].mxu1 }
 0x962   : > { %v8019_v59 = vpop.f32.mrb[222].mxu1 }
 0x963   : > { %v8306_v17 = vadd.f32 %v16722_v63, %v8017_v7  ;;  %v8020_v52 = vadd.f32 %v15725_v16, %v8019_v59  ;;  %v8021_v15 = vpop.f32.mrb[223].mxu1  ;;  %v16734_v7 = vld [vmem:[#allocation179_spill] sm:$0xff] }
 0x965   : > { %8422 = vst [vmem:[%s15731_s11 + $0x170] sm:$0xff] %v8306_v17  ;;  %v8309_v30 = vadd.f32 %v16723_v13, %v8020_v52  ;;  %v16735_v17 = vld [vmem:[#allocation180_spill] sm:$0xff] }
 0x967   : > { %8423 = vst [vmem:[%s15731_s11 + $0x178] sm:$0xff] %v8309_v30 }
 0x968   : > { %v8024_v39 = vpop.f32.mrb[224].mxu1 }
 0x969   : > { %v8025_v36 = vadd.f32 %v15725_v16, %v8024_v39  ;;  %v8026_v41 = vpop.f32.mrb[225].mxu1 }
 0x96a   : > { %v8027_v22 = vpop.f32.mrb[226].mxu1 }
 0x96b   : > { %v8314_v21 = vadd.f32 %v16724_v8, %v8025_v36  ;;  %v8028_v45 = vadd.f32 %v15725_v16, %v8027_v22  ;;  %v8029_v25 = vpop.f32.mrb[227].mxu1 }
 0x96d   : > { %8424 = vst [vmem:[%s15731_s11 + $0x180] sm:$0xff] %v8314_v21  ;;  %v8317_v40 = vadd.f32 %v16725_v31, %v8028_v45 }
 0x96f   : > { %8425 = vst [vmem:[%s15731_s11 + $0x188] sm:$0xff] %v8317_v40 }
 0x970   : > { %v8032_v12 = vpop.f32.mrb[228].mxu1 }
 0x971   : > { %v8033_v37 = vadd.f32 %v15725_v16, %v8032_v12  ;;  %v8034_v42 = vpop.f32.mrb[229].mxu1 }
 0x972   : > { %v8035_v61 = vpop.f32.mrb[230].mxu1 }
 0x973   : > { %v8322_v0 = vadd.f32 %v16726_v57, %v8033_v37  ;;  %v8036_v23 = vadd.f32 %v15725_v16, %v8035_v61  ;;  %v8037_v2 = vpop.f32.mrb[231].mxu1 }
 0x975   : > { %8426 = vst [vmem:[%s15731_s11 + $0x190] sm:$0xff] %v8322_v0  ;;  %v8325_v5 = vadd.f32 %v16727_v14, %v8036_v23 }
 0x977   : > { %8427 = vst [vmem:[%s15731_s11 + $0x198] sm:$0xff] %v8325_v5 }
 0x978   : > { %v8040_v62 = vpop.f32.mrb[232].mxu1 }
 0x979   : > { %v8041_v55 = vadd.f32 %v15725_v16, %v8040_v62  ;;  %v8042_v4 = vpop.f32.mrb[233].mxu1 }
 0x97a   : > { %v8043_v50 = vpop.f32.mrb[234].mxu1 }
 0x97b   : > { %v8330_v29 = vadd.f32 %v16728_v18, %v8041_v55  ;;  %v8044_v20 = vadd.f32 %v15725_v16, %v8043_v50  ;;  %v8045_v26 = vpop.f32.mrb[235].mxu1 }
 0x97d   : > { %8428 = vst [vmem:[%s15731_s11 + $0x1a0] sm:$0xff] %v8330_v29  ;;  %v8333_v33 = vadd.f32 %v16729_v34, %v8044_v20 }
 0x97f   : > { %8429 = vst [vmem:[%s15731_s11 + $0x1a8] sm:$0xff] %v8333_v33 }
 0x980   : > { %v8048_v54 = vpop.f32.mrb[236].mxu1 }
 0x981   : > { %v8049_v32 = vadd.f32 %v15725_v16, %v8048_v54  ;;  %v8050_v44 = vpop.f32.mrb[237].mxu1 }
 0x982   : > { %v8051_v53 = vpop.f32.mrb[238].mxu1 }
 0x983   : > { %v8338_v43 = vadd.f32 %v16730_v38, %v8049_v32  ;;  %v8052_v58 = vadd.f32 %v15725_v16, %v8051_v53  ;;  %v8053_v46 = vpop.f32.mrb[239].mxu1 }
 0x985   : > { %8430 = vst [vmem:[%s15731_s11 + $0x1b0] sm:$0xff] %v8338_v43  ;;  %v8341_v19 = vadd.f32 %v16731_v9, %v8052_v58 }
 0x987   : > { %8431 = vst [vmem:[%s15731_s11 + $0x1b8] sm:$0xff] %v8341_v19 }
 0x988   : > { %v8056_v35 = vpop.f32.mrb[240].mxu1 }
 0x989   : > { %v8057_v1 = vadd.f32 %v15725_v16, %v8056_v35  ;;  %v8058_v56 = vpop.f32.mrb[241].mxu1 }
 0x98a   : > { %v8059_v10 = vpop.f32.mrb[242].mxu1 }
 0x98b   : > { %v8346_v48 = vadd.f32 %v16732_v47, %v8057_v1  ;;  %v8060_v24 = vadd.f32 %v15725_v16, %v8059_v10  ;;  %v8061_v11 = vpop.f32.mrb[243].mxu1 }
 0x98d   : > { %8432 = vst [vmem:[%s15731_s11 + $0x1c0] sm:$0xff] %v8346_v48  ;;  %v8349_v28 = vadd.f32 %v16733_v6, %v8060_v24 }
 0x98f   : > { %8433 = vst [vmem:[%s15731_s11 + $0x1c8] sm:$0xff] %v8349_v28 }
 0x990   : > { %v8064_v60 = vpop.f32.mrb[244].mxu1 }
 0x991   : > { %v8065_v27 = vadd.f32 %v15725_v16, %v8064_v60  ;;  %v8066_v49 = vpop.f32.mrb[245].mxu1 }
 0x992   : > { %v8067_v51 = vpop.f32.mrb[246].mxu1 }
 0x993   : > { %v8354_v3 = vadd.f32 %v16734_v7, %v8065_v27  ;;  %v8068_v59 = vadd.f32 %v15725_v16, %v8067_v51  ;;  %v8069_v63 = vpop.f32.mrb[247].mxu1 }
 0x995   : > { %8434 = vst [vmem:[%s15731_s11 + $0x1d0] sm:$0xff] %v8354_v3  ;;  %v8357_v52 = vadd.f32 %v16735_v17, %v8068_v59 }
 0x997   : > { %8435 = vst [vmem:[%s15731_s11 + $0x1d8] sm:$0xff] %v8357_v52 }
 0x9a8   : > { %v8361_v15 = vpop.f32.mrb[248].mxu1 }
 0x9a9   : > { %v9493_v13 = vadd.f32 %v15725_v16, %v8361_v15  ;;  %v8363_v30 = vpop.f32.mrb[249].mxu1 }
 0x9aa   : > { %v8364_v39 = vpop.f32.mrb[250].mxu1 }
 0x9ab   : > { %8436 = vst [vmem:[%s15731_s11 + $0x1e0] sm:$0xff] %v9493_v13  ;;  %v9494_v36 = vadd.f32 %v15725_v16, %v8364_v39  ;;  %v8366_v41 = vpop.f32.mrb[251].mxu1 }
 0x9ad   : > { %8437 = vst [vmem:[%s15731_s11 + $0x1e8] sm:$0xff] %v9494_v36 }
 0x9b0   : > { %v8369_v22 = vpop.f32.mrb[252].mxu1 }
 0x9b1   : > { %v9495_v8 = vadd.f32 %v15725_v16, %v8369_v22  ;;  %v8371_v21 = vpop.f32.mrb[253].mxu1 }
 0x9b2   : > { %v8372_v45 = vpop.f32.mrb[254].mxu1 }
 0x9b3   : > { %8438 = vst [vmem:[%s15731_s11 + $0x1f0] sm:$0xff] %v9495_v8  ;;  %v9496_v25 = vadd.f32 %v15725_v16, %v8372_v45  ;;  %v8374_v31 = vpop.f32.mrb[255].mxu1 }
 0x9b5   : > { %8439 = vst [vmem:[%s15731_s11 + $0x1f8] sm:$0xff] %v9496_v25 }
 0x9b6   : > { %11354 = shalt.err (!%p11351_p13)
}
 0x9b7   : > { %s11355_s27 = scalar_lea.hbm %s15930_s6, 8192  ;;  %s11359_s2 = scalar_lea.hbm %s16736_s30, 16384 }
 0x9b8   : > { %p11356_p1 = scmp.ne.s32.totalorder %s15930_s6, %s11355_s27  ;;  %p11360_p2 = scmp.lt.u32.totalorder %s15930_s6, %s16736_s30 }
 0x9b9   : > { %p11361_p4 = scmp.lt.u32.totalorder %s11359_s2, %s11355_s27  ;;  %p11363_p5 = scmp.lt.u32.totalorder %s11355_s27, %s15930_s6 }
 0x9ba   : > { %p11357_p3 = pnand %p11356_p1, %p16737_p7 }
 0x9bb   : > { %p11362_p10 = por %p11361_p4, %p11360_p2 }
 0x9bc   : > { %p11358_p6 = pneg %p11357_p3 }
 0x9bd   : > { %p11364_p9 = por %p11363_p5, %p11362_p10 }
 0x9bf   : > { %p11365_p8 = pnand %p11364_p9, %p11358_p6 }
 0x9c1   : > { %11368 = shalt.err (!%p11365_p8)
}
 0x9c2   : > { %s11451_s11 = smov 128   ;;  %s11452_s17 = smov 8  }
 0x9c3   : > { %9925 = dma.vmem_to_hbm [thread:$0]  (%p16737_p7), %s15932_s4, 8192, %s15930_s6, %s8441_s19, %s11451_s11, %s11451_s11, %s11452_s17  }
 0x9c4 PF: > { %s8469_s3 = sand.u32 1, %s11419_s13   ;;  %p16738_p11 = scmp.ne.s32.totalorder %s16132_s21, 0 }
 0x9c5   : > { %p16739_p0 = scmp.ge.s32.totalorder %s11431_s16, 2  ;;  %s8470_s20 = scalar_lea.sflag [#allocation4], %s8469_s3 }
 0x9c7   : > { %p9960_p12 = pnand %p16739_p0, %p16738_p11 }
 0x9c9   : > { %11414 = dma.done.wait (!%p9960_p12), %s8470_s20, 8192  }
 0x9ca   : > { %11416 = vsyncadd (!%p9960_p12), %s8470_s20, 4294959104  ;;  %p30_p13 = scmp.ge.s32.totalorder %s11733_s23, 4   ;;  %s16740_s13 = smov %s11423_s14 }
 0x9cb   : > { %s16741_s14 = smov %s11427_s15  ;;  %s16742_s15 = smov %s11744_s10 }
 0x9cc   : > { %s16743_s16 = smov %s11733_s23  ;;  %32 = sbr.rel (!%p30_p13) target bundleno = 19 (0x13), region = 150 }
 0x9d3   :  { %8475 = vsyncpa [#allocation3], 1 }
 0x9d4   :  { %8477 = vsyncpa [#allocation3 + $0x1], 1 }
 0x9d5   :  { %8478 = vsyncpa [#allocation6], 1 }
 0x9d6   :  { %8480 = vsyncpa [#allocation6 + $0x1], 1 }
 0x9d7   :  { %8481 = vsyncpa [#allocation9], 1 }
 0x9d8   :  { %8482 = vsyncpa [#allocation12], 1 }
 0x9d9   :  { %8483 = vsyncpa [#allocation15], 1 }
 0x9da   :  { %8484 = vsyncpa [#allocation18], 1 }
 0x9db   :  { %8485 = vsyncpa [#allocation4], 1 }
 0x9dc   :  { %8487 = vsyncpa [#allocation4 + $0x1], 1 }

</bundles_post_ra>
